<compile_context>
chip_gen: v6e
topology: v6e:2x2x1
jax: 0.10.0
libtpu: 0.0.40
codegen_flags: <defaults>
</compile_context>

<pallas_src>
import jax
import jax.numpy as jnp
from jax.experimental import pallas as pl
from jax.experimental.pallas import tpu as pltpu

# ---- model dims (match the module / its hardcoded forward) ----
NTOKEN = 10
NINP = 512
NHID = 256
NLAYERS = 2          # forward() supplies a 2-layer hidden state
SEQ = 3
BATCH = 10
BP = 16              # batch padded to a sublane-friendly size (8|16)
DEC_PAD = 128        # lane-dense padded decoder width (sliced back to NTOKEN outside)


# ----------------------------- fused Pallas kernel -----------------------------

def fused_lstm_kernel(emb_ref, h0_ref, c0_ref,
                      wih0_ref, whh0_ref, b0_ref,
                      wih1_ref, whh1_ref, b1_ref,
                      decw_ref, decb_ref,
                      dec_ref, hn_ref, cn_ref,
                      x1_scr, y_scr):
    """Whole forward pass in one kernel.

    emb:   (SEQ*BP, NINP) bf16        h0,c0: (NLAYERS, BP, NHID) f32
    wihL:  (F_in, 4H) bf16   whhL: (H, 4H) bf16   bL: (1, 4H) f32 (b_ih + b_hh)
    decw:  (H, DEC_PAD) bf16 (cols >= NTOKEN zero)   decb: (1, DEC_PAD) f32
    Outputs: dec (SEQ*BP, DEC_PAD) f32, hn/cn (NLAYERS, BP, NHID) f32.
    Scratch: x1_scr/y_scr (SEQ*BP, NHID) bf16 layer-output slabs.
    PyTorch gate order: i, f, g, o.
    """
    H = NHID

    def run_layer(x_slab_bf16, wih_ref, whh_ref, b_ref, h, c, out_ref):
        # One whole-layer input projection (M = SEQ*BP = 48) + bias added once.
        wih = wih_ref[...]
        whh = whh_ref[...]
        xproj = jnp.dot(x_slab_bf16, wih, preferred_element_type=jnp.float32)
        xproj = xproj + b_ref[...]                              # (SEQ*BP, 4H) f32

        for t in range(SEQ):                                    # SEQ=3, fully unrolled
            gates = xproj[t * BP:(t + 1) * BP, :] + jnp.dot(
                h.astype(jnp.bfloat16), whh,
                preferred_element_type=jnp.float32)             # (BP, 4H) f32

            i_g = jax.nn.sigmoid(gates[:, 0:H])
            f_g = jax.nn.sigmoid(gates[:, H:2 * H])
            g_g = jnp.tanh(gates[:, 2 * H:3 * H])
            o_g = jax.nn.sigmoid(gates[:, 3 * H:4 * H])

            c = f_g * c + i_g * g_g
            h = o_g * jnp.tanh(c)
            out_ref[t * BP:(t + 1) * BP, :] = h.astype(jnp.bfloat16)
        return h, c                                             # (BP, H) f32 each

    # Layer 0
    h_l0, c_l0 = run_layer(emb_ref[...], wih0_ref, whh0_ref, b0_ref,
                           h0_ref[0], c0_ref[0], x1_scr)
    # Inter-layer dropout: identity (eval semantics).

    # Layer 1
    h_l1, c_l1 = run_layer(x1_scr[...], wih1_ref, whh1_ref, b1_ref,
                           h0_ref[1], c0_ref[1], y_scr)
    # self.drop(output): identity (eval semantics).

    # Final hidden state
    hn_ref[0] = h_l0
    hn_ref[1] = h_l1
    cn_ref[0] = c_l0
    cn_ref[1] = c_l1

    # Decoder: (SEQ*BP, H) @ (H, DEC_PAD) + (1, DEC_PAD), lane-dense output.
    dec_ref[...] = (jnp.dot(y_scr[...], decw_ref[...],
                            preferred_element_type=jnp.float32) + decb_ref[...])


# ----------------------------- wrapper -----------------------------

def _vmem_spec():
    return pl.BlockSpec(memory_space=pltpu.MemorySpace.VMEM)


def lstm_model_forward(params, _unused_input, h0, c0):
    # forward() hardcodes the token ids (all ones)
    input_ids = jnp.ones((SEQ, BATCH), dtype=jnp.int32)

    # encoder (embedding gather with constant indices) — glue in plain JAX
    emb = params["encoder"][input_ids]                          # (SEQ, BATCH, NINP) f32
    emb_pad = jnp.zeros((SEQ, BP, NINP), jnp.float32).at[:, :BATCH].set(emb)
    emb_slab = emb_pad.reshape(SEQ * BP, NINP).astype(jnp.bfloat16)

    # pad h0/c0 along batch to BP (padded rows produce garbage that is sliced off)
    h0_pad = jnp.zeros((NLAYERS, BP, NHID), jnp.float32).at[:, :BATCH].set(h0)
    c0_pad = jnp.zeros((NLAYERS, BP, NHID), jnp.float32).at[:, :BATCH].set(c0)

    (wih0, whh0, b0), (wih1, whh1, b1) = params["lstm"]

    dec_pad, h_n, c_n = pl.pallas_call(
        fused_lstm_kernel,
        in_specs=[_vmem_spec()] * 11,
        out_specs=(_vmem_spec(), _vmem_spec(), _vmem_spec()),
        out_shape=(jax.ShapeDtypeStruct((SEQ * BP, DEC_PAD), jnp.float32),
                   jax.ShapeDtypeStruct((NLAYERS, BP, NHID), jnp.float32),
                   jax.ShapeDtypeStruct((NLAYERS, BP, NHID), jnp.float32)),
        scratch_shapes=[pltpu.VMEM((SEQ * BP, NHID), jnp.bfloat16),
                        pltpu.VMEM((SEQ * BP, NHID), jnp.bfloat16)],
        compiler_params=pltpu.CompilerParams(vmem_limit_bytes=32 * 1024 * 1024),
    )(emb_slab, h0_pad, c0_pad,
      wih0, whh0, b0,
      wih1, whh1, b1,
      params["dec_w_t_pad"], params["dec_b_pad"])

    decoded = dec_pad.reshape(SEQ, BP, DEC_PAD)[:, :BATCH, :NTOKEN]
    return decoded, (h_n[:, :BATCH], c_n[:, :BATCH])


# ----------------------------- parameters -----------------------------

def init_params(key):
    ks = jax.random.split(key, 2 + 4 * NLAYERS)
    initrange = 0.1
    params = {}

    # encoder.weight ~ U(-0.1, 0.1), shape (ntoken, ninp)
    params["encoder"] = jax.random.uniform(
        ks[0], (NTOKEN, NINP), jnp.float32, -initrange, initrange)

    # decoder: weight (ntoken, nhid) ~ U(-0.1, 0.1), bias zeros — padded to 128 lanes
    dec_w = jax.random.uniform(
        ks[1], (NTOKEN, NHID), jnp.float32, -initrange, initrange)
    dec_w_t = dec_w.T                                            # (NHID, NTOKEN)
    dec_w_t_pad = jnp.zeros((NHID, DEC_PAD), jnp.float32).at[:, :NTOKEN].set(dec_w_t)
    params["dec_w_t_pad"] = dec_w_t_pad.astype(jnp.bfloat16)
    params["dec_b_pad"] = jnp.zeros((1, DEC_PAD), jnp.float32)

    # LSTM layers: PyTorch default init U(-1/sqrt(H), 1/sqrt(H)); bf16 weights, f32 bias
    stdv = 1.0 / (NHID ** 0.5)
    lstm = []
    for l in range(NLAYERS):
        f_in = NINP if l == 0 else NHID
        kw = ks[2 + 4 * l: 2 + 4 * (l + 1)]
        w_ih = jax.random.uniform(kw[0], (4 * NHID, f_in), jnp.float32, -stdv, stdv)
        w_hh = jax.random.uniform(kw[1], (4 * NHID, NHID), jnp.float32, -stdv, stdv)
        b_ih = jax.random.uniform(kw[2], (4 * NHID,), jnp.float32, -stdv, stdv)
        b_hh = jax.random.uniform(kw[3], (4 * NHID,), jnp.float32, -stdv, stdv)
        lstm.append((w_ih.T.astype(jnp.bfloat16),                # (F_in, 4H)
                     w_hh.T.astype(jnp.bfloat16),                # (H, 4H)
                     (b_ih + b_hh).reshape(1, 4 * NHID)))        # (1, 4H) f32
    params["lstm"] = lstm
    return params


# ----------------------------- main -----------------------------

if __name__ == "__main__":
    key = jax.random.PRNGKey(0)
    k_param, k_h0, k_c0, k_in = jax.random.split(key, 4)

    params = init_params(k_param)

    # forward() hardcodes these (made deterministic here)
    h0 = jax.random.normal(k_h0, (NLAYERS, BATCH, NHID), jnp.float32)
    c0 = jax.random.normal(k_c0, (NLAYERS, BATCH, NHID), jnp.float32)

    # the module's forward ignores its input; provide one anyway
    dummy_input = jax.random.randint(k_in, (SEQ, BATCH), 0, NTOKEN, jnp.int32)

    fwd = jax.jit(lstm_model_forward)
    decoded, (h_n, c_n) = fwd(params, dummy_input, h0, c0)
    jax.block_until_ready((decoded, h_n, c_n))

    assert decoded.shape == (SEQ, BATCH, NTOKEN)
    assert h_n.shape == (NLAYERS, BATCH, NHID)
    assert c_n.shape == (NLAYERS, BATCH, NHID)
    assert bool(jnp.all(jnp.isfinite(decoded)))
    assert bool(jnp.all(jnp.isfinite(h_n))) and bool(jnp.all(jnp.isfinite(c_n)))
    print("KERNEL_OK")
</pallas_src>

<mosaic_0001>
module attributes {stable_mosaic.version = 11 : i64} {
  func.func @fused_lstm_kernel(%arg0: memref<48x512xbf16, #tpu.memory_space<vmem>>, %arg1: memref<2x16x256xf32, #tpu.memory_space<vmem>>, %arg2: memref<2x16x256xf32, #tpu.memory_space<vmem>>, %arg3: memref<512x1024xbf16, #tpu.memory_space<vmem>>, %arg4: memref<256x1024xbf16, #tpu.memory_space<vmem>>, %arg5: memref<1x1024xf32, #tpu.memory_space<vmem>>, %arg6: memref<256x1024xbf16, #tpu.memory_space<vmem>>, %arg7: memref<256x1024xbf16, #tpu.memory_space<vmem>>, %arg8: memref<1x1024xf32, #tpu.memory_space<vmem>>, %arg9: memref<256x128xbf16, #tpu.memory_space<vmem>>, %arg10: memref<1x128xf32, #tpu.memory_space<vmem>>, %arg11: memref<48x128xf32, #tpu.memory_space<vmem>>, %arg12: memref<2x16x256xf32, #tpu.memory_space<vmem>>, %arg13: memref<2x16x256xf32, #tpu.memory_space<vmem>>, %arg14: memref<48x256xbf16, #tpu.memory_space<vmem>>, %arg15: memref<48x256xbf16, #tpu.memory_space<vmem>>) attributes {dimension_semantics = [], scalar_prefetch = 0 : i64, scratch_operands = 2 : i64, tpu.core_type = #tpu.core_type<tc>} {
    %c0 = arith.constant 0 : index
    %c0_0 = arith.constant 0 : index
    %0 = vector.load %arg0[%c0, %c0_0] : memref<48x512xbf16, #tpu.memory_space<vmem>>, vector<48x512xbf16>
    %c0_1 = arith.constant 0 : index
    %c0_2 = arith.constant 0 : index
    %c0_3 = arith.constant 0 : index
    %1 = vector.load %arg1[%c0_1, %c0_2, %c0_3] : memref<2x16x256xf32, #tpu.memory_space<vmem>>, vector<1x16x256xf32>
    %2 = vector.shape_cast %1 : vector<1x16x256xf32> to vector<16x256xf32>
    %c0_4 = arith.constant 0 : index
    %c0_5 = arith.constant 0 : index
    %c0_6 = arith.constant 0 : index
    %3 = vector.load %arg2[%c0_4, %c0_5, %c0_6] : memref<2x16x256xf32, #tpu.memory_space<vmem>>, vector<1x16x256xf32>
    %4 = vector.shape_cast %3 : vector<1x16x256xf32> to vector<16x256xf32>
    %c0_7 = arith.constant 0 : index
    %c0_8 = arith.constant 0 : index
    %5 = vector.load %arg3[%c0_7, %c0_8] : memref<512x1024xbf16, #tpu.memory_space<vmem>>, vector<512x1024xbf16>
    %c0_9 = arith.constant 0 : index
    %c0_10 = arith.constant 0 : index
    %6 = vector.load %arg4[%c0_9, %c0_10] : memref<256x1024xbf16, #tpu.memory_space<vmem>>, vector<256x1024xbf16>
    %cst = arith.constant dense<0.000000e+00> : vector<48x1024xf32>
    %7 = tpu.matmul %0, %5, %cst {dimension_numbers = #tpu.dot_dimension_numbers<[1], [0], [0], [1], [0, 0, 1, 1], [], []>} : vector<48x512xbf16>, vector<512x1024xbf16>, vector<48x1024xf32> -> vector<48x1024xf32>
    %c0_11 = arith.constant 0 : index
    %c0_12 = arith.constant 0 : index
    %8 = vector.load %arg5[%c0_11, %c0_12] : memref<1x1024xf32, #tpu.memory_space<vmem>>, vector<1x1024xf32>
    %9 = vector.broadcast %8 : vector<1x1024xf32> to vector<48x1024xf32>
    %10 = arith.addf %7, %9 : vector<48x1024xf32>
    %11 = vector.extract_strided_slice %10 {offsets = [0, 0], sizes = [16, 1024], strides = [1, 1]} : vector<48x1024xf32> to vector<16x1024xf32>
    %12 = arith.truncf %2 : vector<16x256xf32> to vector<16x256xbf16>
    %cst_13 = arith.constant dense<0.000000e+00> : vector<16x1024xf32>
    %13 = tpu.matmul %12, %6, %cst_13 {dimension_numbers = #tpu.dot_dimension_numbers<[1], [0], [0], [1], [0, 0, 1, 1], [], []>} : vector<16x256xbf16>, vector<256x1024xbf16>, vector<16x1024xf32> -> vector<16x1024xf32>
    %14 = arith.addf %11, %13 : vector<16x1024xf32>
    %15 = vector.extract_strided_slice %14 {offsets = [0, 0], sizes = [16, 256], strides = [1, 1]} : vector<16x1024xf32> to vector<16x256xf32>
    %16 = arith.negf %15 : vector<16x256xf32>
    %17 = math.exp %16 : vector<16x256xf32>
    %cst_14 = arith.constant 1.000000e+00 : f32
    %18 = vector.broadcast %cst_14 : f32 to vector<16x256xf32>
    %19 = arith.addf %18, %17 : vector<16x256xf32>
    %20 = arith.divf %18, %19 : vector<16x256xf32>
    %21 = vector.extract_strided_slice %14 {offsets = [0, 256], sizes = [16, 256], strides = [1, 1]} : vector<16x1024xf32> to vector<16x256xf32>
    %22 = arith.negf %21 : vector<16x256xf32>
    %23 = math.exp %22 : vector<16x256xf32>
    %cst_15 = arith.constant 1.000000e+00 : f32
    %24 = vector.broadcast %cst_15 : f32 to vector<16x256xf32>
    %25 = arith.addf %24, %23 : vector<16x256xf32>
    %26 = arith.divf %24, %25 : vector<16x256xf32>
    %27 = vector.extract_strided_slice %14 {offsets = [0, 512], sizes = [16, 256], strides = [1, 1]} : vector<16x1024xf32> to vector<16x256xf32>
    %28 = math.tanh %27 : vector<16x256xf32>
    %29 = vector.extract_strided_slice %14 {offsets = [0, 768], sizes = [16, 256], strides = [1, 1]} : vector<16x1024xf32> to vector<16x256xf32>
    %30 = arith.negf %29 : vector<16x256xf32>
    %31 = math.exp %30 : vector<16x256xf32>
    %cst_16 = arith.constant 1.000000e+00 : f32
    %32 = vector.broadcast %cst_16 : f32 to vector<16x256xf32>
    %33 = arith.addf %32, %31 : vector<16x256xf32>
    %34 = arith.divf %32, %33 : vector<16x256xf32>
    %35 = arith.mulf %26, %4 : vector<16x256xf32>
    %36 = arith.mulf %20, %28 : vector<16x256xf32>
    %37 = arith.addf %35, %36 : vector<16x256xf32>
    %38 = math.tanh %37 : vector<16x256xf32>
    %39 = arith.mulf %34, %38 : vector<16x256xf32>
    %40 = arith.truncf %39 : vector<16x256xf32> to vector<16x256xbf16>
    %c0_17 = arith.constant 0 : index
    %c0_18 = arith.constant 0 : index
    %41 = vector.load %arg14[%c0_17, %c0_18] : memref<48x256xbf16, #tpu.memory_space<vmem>>, vector<16x256xbf16>
    tpu.vector_store %arg14[%c0_17, %c0_18], %40 {strides = array<i32>} : memref<48x256xbf16, #tpu.memory_space<vmem>>, vector<16x256xbf16>,
    %42 = vector.extract_strided_slice %10 {offsets = [16, 0], sizes = [16, 1024], strides = [1, 1]} : vector<48x1024xf32> to vector<16x1024xf32>
    %43 = arith.truncf %39 : vector<16x256xf32> to vector<16x256xbf16>
    %cst_19 = arith.constant dense<0.000000e+00> : vector<16x1024xf32>
    %44 = tpu.matmul %43, %6, %cst_19 {dimension_numbers = #tpu.dot_dimension_numbers<[1], [0], [0], [1], [0, 0, 1, 1], [], []>} : vector<16x256xbf16>, vector<256x1024xbf16>, vector<16x1024xf32> -> vector<16x1024xf32>
    %45 = arith.addf %42, %44 : vector<16x1024xf32>
    %46 = vector.extract_strided_slice %45 {offsets = [0, 0], sizes = [16, 256], strides = [1, 1]} : vector<16x1024xf32> to vector<16x256xf32>
    %47 = arith.negf %46 : vector<16x256xf32>
    %48 = math.exp %47 : vector<16x256xf32>
    %cst_20 = arith.constant 1.000000e+00 : f32
    %49 = vector.broadcast %cst_20 : f32 to vector<16x256xf32>
    %50 = arith.addf %49, %48 : vector<16x256xf32>
    %51 = arith.divf %49, %50 : vector<16x256xf32>
    %52 = vector.extract_strided_slice %45 {offsets = [0, 256], sizes = [16, 256], strides = [1, 1]} : vector<16x1024xf32> to vector<16x256xf32>
    %53 = arith.negf %52 : vector<16x256xf32>
    %54 = math.exp %53 : vector<16x256xf32>
    %cst_21 = arith.constant 1.000000e+00 : f32
    %55 = vector.broadcast %cst_21 : f32 to vector<16x256xf32>
    %56 = arith.addf %55, %54 : vector<16x256xf32>
    %57 = arith.divf %55, %56 : vector<16x256xf32>
    %58 = vector.extract_strided_slice %45 {offsets = [0, 512], sizes = [16, 256], strides = [1, 1]} : vector<16x1024xf32> to vector<16x256xf32>
    %59 = math.tanh %58 : vector<16x256xf32>
    %60 = vector.extract_strided_slice %45 {offsets = [0, 768], sizes = [16, 256], strides = [1, 1]} : vector<16x1024xf32> to vector<16x256xf32>
    %61 = arith.negf %60 : vector<16x256xf32>
    %62 = math.exp %61 : vector<16x256xf32>
    %cst_22 = arith.constant 1.000000e+00 : f32
    %63 = vector.broadcast %cst_22 : f32 to vector<16x256xf32>
    %64 = arith.addf %63, %62 : vector<16x256xf32>
    %65 = arith.divf %63, %64 : vector<16x256xf32>
    %66 = arith.mulf %57, %37 : vector<16x256xf32>
    %67 = arith.mulf %51, %59 : vector<16x256xf32>
    %68 = arith.addf %66, %67 : vector<16x256xf32>
    %69 = math.tanh %68 : vector<16x256xf32>
    %70 = arith.mulf %65, %69 : vector<16x256xf32>
    %71 = arith.truncf %70 : vector<16x256xf32> to vector<16x256xbf16>
    %c16 = arith.constant 16 : index
    %c0_23 = arith.constant 0 : index
    %72 = vector.load %arg14[%c16, %c0_23] : memref<48x256xbf16, #tpu.memory_space<vmem>>, vector<16x256xbf16>
    tpu.vector_store %arg14[%c16, %c0_23], %71 {strides = array<i32>} : memref<48x256xbf16, #tpu.memory_space<vmem>>, vector<16x256xbf16>,
    %73 = vector.extract_strided_slice %10 {offsets = [32, 0], sizes = [16, 1024], strides = [1, 1]} : vector<48x1024xf32> to vector<16x1024xf32>
    %74 = arith.truncf %70 : vector<16x256xf32> to vector<16x256xbf16>
    %cst_24 = arith.constant dense<0.000000e+00> : vector<16x1024xf32>
    %75 = tpu.matmul %74, %6, %cst_24 {dimension_numbers = #tpu.dot_dimension_numbers<[1], [0], [0], [1], [0, 0, 1, 1], [], []>} : vector<16x256xbf16>, vector<256x1024xbf16>, vector<16x1024xf32> -> vector<16x1024xf32>
    %76 = arith.addf %73, %75 : vector<16x1024xf32>
    %77 = vector.extract_strided_slice %76 {offsets = [0, 0], sizes = [16, 256], strides = [1, 1]} : vector<16x1024xf32> to vector<16x256xf32>
    %78 = arith.negf %77 : vector<16x256xf32>
    %79 = math.exp %78 : vector<16x256xf32>
    %cst_25 = arith.constant 1.000000e+00 : f32
    %80 = vector.broadcast %cst_25 : f32 to vector<16x256xf32>
    %81 = arith.addf %80, %79 : vector<16x256xf32>
    %82 = arith.divf %80, %81 : vector<16x256xf32>
    %83 = vector.extract_strided_slice %76 {offsets = [0, 256], sizes = [16, 256], strides = [1, 1]} : vector<16x1024xf32> to vector<16x256xf32>
    %84 = arith.negf %83 : vector<16x256xf32>
    %85 = math.exp %84 : vector<16x256xf32>
    %cst_26 = arith.constant 1.000000e+00 : f32
    %86 = vector.broadcast %cst_26 : f32 to vector<16x256xf32>
    %87 = arith.addf %86, %85 : vector<16x256xf32>
    %88 = arith.divf %86, %87 : vector<16x256xf32>
    %89 = vector.extract_strided_slice %76 {offsets = [0, 512], sizes = [16, 256], strides = [1, 1]} : vector<16x1024xf32> to vector<16x256xf32>
    %90 = math.tanh %89 : vector<16x256xf32>
    %91 = vector.extract_strided_slice %76 {offsets = [0, 768], sizes = [16, 256], strides = [1, 1]} : vector<16x1024xf32> to vector<16x256xf32>
    %92 = arith.negf %91 : vector<16x256xf32>
    %93 = math.exp %92 : vector<16x256xf32>
    %cst_27 = arith.constant 1.000000e+00 : f32
    %94 = vector.broadcast %cst_27 : f32 to vector<16x256xf32>
    %95 = arith.addf %94, %93 : vector<16x256xf32>
    %96 = arith.divf %94, %95 : vector<16x256xf32>
    %97 = arith.mulf %88, %68 : vector<16x256xf32>
    %98 = arith.mulf %82, %90 : vector<16x256xf32>
    %99 = arith.addf %97, %98 : vector<16x256xf32>
    %100 = math.tanh %99 : vector<16x256xf32>
    %101 = arith.mulf %96, %100 : vector<16x256xf32>
    %102 = arith.truncf %101 : vector<16x256xf32> to vector<16x256xbf16>
    %c32 = arith.constant 32 : index
    %c0_28 = arith.constant 0 : index
    %103 = vector.load %arg14[%c32, %c0_28] : memref<48x256xbf16, #tpu.memory_space<vmem>>, vector<16x256xbf16>
    tpu.vector_store %arg14[%c32, %c0_28], %102 {strides = array<i32>} : memref<48x256xbf16, #tpu.memory_space<vmem>>, vector<16x256xbf16>,
    %c0_29 = arith.constant 0 : index
    %c0_30 = arith.constant 0 : index
    %104 = vector.load %arg14[%c0_29, %c0_30] : memref<48x256xbf16, #tpu.memory_space<vmem>>, vector<48x256xbf16>
    %c1 = arith.constant 1 : index
    %c0_31 = arith.constant 0 : index
    %c0_32 = arith.constant 0 : index
    %105 = vector.load %arg1[%c1, %c0_31, %c0_32] : memref<2x16x256xf32, #tpu.memory_space<vmem>>, vector<1x16x256xf32>
    %106 = vector.shape_cast %105 : vector<1x16x256xf32> to vector<16x256xf32>
    %c1_33 = arith.constant 1 : index
    %c0_34 = arith.constant 0 : index
    %c0_35 = arith.constant 0 : index
    %107 = vector.load %arg2[%c1_33, %c0_34, %c0_35] : memref<2x16x256xf32, #tpu.memory_space<vmem>>, vector<1x16x256xf32>
    %108 = vector.shape_cast %107 : vector<1x16x256xf32> to vector<16x256xf32>
    %c0_36 = arith.constant 0 : index
    %c0_37 = arith.constant 0 : index
    %109 = vector.load %arg6[%c0_36, %c0_37] : memref<256x1024xbf16, #tpu.memory_space<vmem>>, vector<256x1024xbf16>
    %c0_38 = arith.constant 0 : index
    %c0_39 = arith.constant 0 : index
    %110 = vector.load %arg7[%c0_38, %c0_39] : memref<256x1024xbf16, #tpu.memory_space<vmem>>, vector<256x1024xbf16>
    %cst_40 = arith.constant dense<0.000000e+00> : vector<48x1024xf32>
    %111 = tpu.matmul %104, %109, %cst_40 {dimension_numbers = #tpu.dot_dimension_numbers<[1], [0], [0], [1], [0, 0, 1, 1], [], []>} : vector<48x256xbf16>, vector<256x1024xbf16>, vector<48x1024xf32> -> vector<48x1024xf32>
    %c0_41 = arith.constant 0 : index
    %c0_42 = arith.constant 0 : index
    %112 = vector.load %arg8[%c0_41, %c0_42] : memref<1x1024xf32, #tpu.memory_space<vmem>>, vector<1x1024xf32>
    %113 = vector.broadcast %112 : vector<1x1024xf32> to vector<48x1024xf32>
    %114 = arith.addf %111, %113 : vector<48x1024xf32>
    %115 = vector.extract_strided_slice %114 {offsets = [0, 0], sizes = [16, 1024], strides = [1, 1]} : vector<48x1024xf32> to vector<16x1024xf32>
    %116 = arith.truncf %106 : vector<16x256xf32> to vector<16x256xbf16>
    %cst_43 = arith.constant dense<0.000000e+00> : vector<16x1024xf32>
    %117 = tpu.matmul %116, %110, %cst_43 {dimension_numbers = #tpu.dot_dimension_numbers<[1], [0], [0], [1], [0, 0, 1, 1], [], []>} : vector<16x256xbf16>, vector<256x1024xbf16>, vector<16x1024xf32> -> vector<16x1024xf32>
    %118 = arith.addf %115, %117 : vector<16x1024xf32>
    %119 = vector.extract_strided_slice %118 {offsets = [0, 0], sizes = [16, 256], strides = [1, 1]} : vector<16x1024xf32> to vector<16x256xf32>
    %120 = arith.negf %119 : vector<16x256xf32>
    %121 = math.exp %120 : vector<16x256xf32>
    %cst_44 = arith.constant 1.000000e+00 : f32
    %122 = vector.broadcast %cst_44 : f32 to vector<16x256xf32>
    %123 = arith.addf %122, %121 : vector<16x256xf32>
    %124 = arith.divf %122, %123 : vector<16x256xf32>
    %125 = vector.extract_strided_slice %118 {offsets = [0, 256], sizes = [16, 256], strides = [1, 1]} : vector<16x1024xf32> to vector<16x256xf32>
    %126 = arith.negf %125 : vector<16x256xf32>
    %127 = math.exp %126 : vector<16x256xf32>
    %cst_45 = arith.constant 1.000000e+00 : f32
    %128 = vector.broadcast %cst_45 : f32 to vector<16x256xf32>
    %129 = arith.addf %128, %127 : vector<16x256xf32>
    %130 = arith.divf %128, %129 : vector<16x256xf32>
    %131 = vector.extract_strided_slice %118 {offsets = [0, 512], sizes = [16, 256], strides = [1, 1]} : vector<16x1024xf32> to vector<16x256xf32>
    %132 = math.tanh %131 : vector<16x256xf32>
    %133 = vector.extract_strided_slice %118 {offsets = [0, 768], sizes = [16, 256], strides = [1, 1]} : vector<16x1024xf32> to vector<16x256xf32>
    %134 = arith.negf %133 : vector<16x256xf32>
    %135 = math.exp %134 : vector<16x256xf32>
    %cst_46 = arith.constant 1.000000e+00 : f32
    %136 = vector.broadcast %cst_46 : f32 to vector<16x256xf32>
    %137 = arith.addf %136, %135 : vector<16x256xf32>
    %138 = arith.divf %136, %137 : vector<16x256xf32>
    %139 = arith.mulf %130, %108 : vector<16x256xf32>
    %140 = arith.mulf %124, %132 : vector<16x256xf32>
    %141 = arith.addf %139, %140 : vector<16x256xf32>
    %142 = math.tanh %141 : vector<16x256xf32>
    %143 = arith.mulf %138, %142 : vector<16x256xf32>
    %144 = arith.truncf %143 : vector<16x256xf32> to vector<16x256xbf16>
    %c0_47 = arith.constant 0 : index
    %c0_48 = arith.constant 0 : index
    %145 = vector.load %arg15[%c0_47, %c0_48] : memref<48x256xbf16, #tpu.memory_space<vmem>>, vector<16x256xbf16>
    tpu.vector_store %arg15[%c0_47, %c0_48], %144 {strides = array<i32>} : memref<48x256xbf16, #tpu.memory_space<vmem>>, vector<16x256xbf16>,
    %146 = vector.extract_strided_slice %114 {offsets = [16, 0], sizes = [16, 1024], strides = [1, 1]} : vector<48x1024xf32> to vector<16x1024xf32>
    %147 = arith.truncf %143 : vector<16x256xf32> to vector<16x256xbf16>
    %cst_49 = arith.constant dense<0.000000e+00> : vector<16x1024xf32>
    %148 = tpu.matmul %147, %110, %cst_49 {dimension_numbers = #tpu.dot_dimension_numbers<[1], [0], [0], [1], [0, 0, 1, 1], [], []>} : vector<16x256xbf16>, vector<256x1024xbf16>, vector<16x1024xf32> -> vector<16x1024xf32>
    %149 = arith.addf %146, %148 : vector<16x1024xf32>
    %150 = vector.extract_strided_slice %149 {offsets = [0, 0], sizes = [16, 256], strides = [1, 1]} : vector<16x1024xf32> to vector<16x256xf32>
    %151 = arith.negf %150 : vector<16x256xf32>
    %152 = math.exp %151 : vector<16x256xf32>
    %cst_50 = arith.constant 1.000000e+00 : f32
    %153 = vector.broadcast %cst_50 : f32 to vector<16x256xf32>
    %154 = arith.addf %153, %152 : vector<16x256xf32>
    %155 = arith.divf %153, %154 : vector<16x256xf32>
    %156 = vector.extract_strided_slice %149 {offsets = [0, 256], sizes = [16, 256], strides = [1, 1]} : vector<16x1024xf32> to vector<16x256xf32>
    %157 = arith.negf %156 : vector<16x256xf32>
    %158 = math.exp %157 : vector<16x256xf32>
    %cst_51 = arith.constant 1.000000e+00 : f32
    %159 = vector.broadcast %cst_51 : f32 to vector<16x256xf32>
    %160 = arith.addf %159, %158 : vector<16x256xf32>
    %161 = arith.divf %159, %160 : vector<16x256xf32>
    %162 = vector.extract_strided_slice %149 {offsets = [0, 512], sizes = [16, 256], strides = [1, 1]} : vector<16x1024xf32> to vector<16x256xf32>
    %163 = math.tanh %162 : vector<16x256xf32>
    %164 = vector.extract_strided_slice %149 {offsets = [0, 768], sizes = [16, 256], strides = [1, 1]} : vector<16x1024xf32> to vector<16x256xf32>
    %165 = arith.negf %164 : vector<16x256xf32>
    %166 = math.exp %165 : vector<16x256xf32>
    %cst_52 = arith.constant 1.000000e+00 : f32
    %167 = vector.broadcast %cst_52 : f32 to vector<16x256xf32>
    %168 = arith.addf %167, %166 : vector<16x256xf32>
    %169 = arith.divf %167, %168 : vector<16x256xf32>
    %170 = arith.mulf %161, %141 : vector<16x256xf32>
    %171 = arith.mulf %155, %163 : vector<16x256xf32>
    %172 = arith.addf %170, %171 : vector<16x256xf32>
    %173 = math.tanh %172 : vector<16x256xf32>
    %174 = arith.mulf %169, %173 : vector<16x256xf32>
    %175 = arith.truncf %174 : vector<16x256xf32> to vector<16x256xbf16>
    %c16_53 = arith.constant 16 : index
    %c0_54 = arith.constant 0 : index
    %176 = vector.load %arg15[%c16_53, %c0_54] : memref<48x256xbf16, #tpu.memory_space<vmem>>, vector<16x256xbf16>
    tpu.vector_store %arg15[%c16_53, %c0_54], %175 {strides = array<i32>} : memref<48x256xbf16, #tpu.memory_space<vmem>>, vector<16x256xbf16>,
    %177 = vector.extract_strided_slice %114 {offsets = [32, 0], sizes = [16, 1024], strides = [1, 1]} : vector<48x1024xf32> to vector<16x1024xf32>
    %178 = arith.truncf %174 : vector<16x256xf32> to vector<16x256xbf16>
    %cst_55 = arith.constant dense<0.000000e+00> : vector<16x1024xf32>
    %179 = tpu.matmul %178, %110, %cst_55 {dimension_numbers = #tpu.dot_dimension_numbers<[1], [0], [0], [1], [0, 0, 1, 1], [], []>} : vector<16x256xbf16>, vector<256x1024xbf16>, vector<16x1024xf32> -> vector<16x1024xf32>
    %180 = arith.addf %177, %179 : vector<16x1024xf32>
    %181 = vector.extract_strided_slice %180 {offsets = [0, 0], sizes = [16, 256], strides = [1, 1]} : vector<16x1024xf32> to vector<16x256xf32>
    %182 = arith.negf %181 : vector<16x256xf32>
    %183 = math.exp %182 : vector<16x256xf32>
    %cst_56 = arith.constant 1.000000e+00 : f32
    %184 = vector.broadcast %cst_56 : f32 to vector<16x256xf32>
    %185 = arith.addf %184, %183 : vector<16x256xf32>
    %186 = arith.divf %184, %185 : vector<16x256xf32>
    %187 = vector.extract_strided_slice %180 {offsets = [0, 256], sizes = [16, 256], strides = [1, 1]} : vector<16x1024xf32> to vector<16x256xf32>
    %188 = arith.negf %187 : vector<16x256xf32>
    %189 = math.exp %188 : vector<16x256xf32>
    %cst_57 = arith.constant 1.000000e+00 : f32
    %190 = vector.broadcast %cst_57 : f32 to vector<16x256xf32>
    %191 = arith.addf %190, %189 : vector<16x256xf32>
    %192 = arith.divf %190, %191 : vector<16x256xf32>
    %193 = vector.extract_strided_slice %180 {offsets = [0, 512], sizes = [16, 256], strides = [1, 1]} : vector<16x1024xf32> to vector<16x256xf32>
    %194 = math.tanh %193 : vector<16x256xf32>
    %195 = vector.extract_strided_slice %180 {offsets = [0, 768], sizes = [16, 256], strides = [1, 1]} : vector<16x1024xf32> to vector<16x256xf32>
    %196 = arith.negf %195 : vector<16x256xf32>
    %197 = math.exp %196 : vector<16x256xf32>
    %cst_58 = arith.constant 1.000000e+00 : f32
    %198 = vector.broadcast %cst_58 : f32 to vector<16x256xf32>
    %199 = arith.addf %198, %197 : vector<16x256xf32>
    %200 = arith.divf %198, %199 : vector<16x256xf32>
    %201 = arith.mulf %192, %172 : vector<16x256xf32>
    %202 = arith.mulf %186, %194 : vector<16x256xf32>
    %203 = arith.addf %201, %202 : vector<16x256xf32>
    %204 = math.tanh %203 : vector<16x256xf32>
    %205 = arith.mulf %200, %204 : vector<16x256xf32>
    %206 = arith.truncf %205 : vector<16x256xf32> to vector<16x256xbf16>
    %c32_59 = arith.constant 32 : index
    %c0_60 = arith.constant 0 : index
    %207 = vector.load %arg15[%c32_59, %c0_60] : memref<48x256xbf16, #tpu.memory_space<vmem>>, vector<16x256xbf16>
    tpu.vector_store %arg15[%c32_59, %c0_60], %206 {strides = array<i32>} : memref<48x256xbf16, #tpu.memory_space<vmem>>, vector<16x256xbf16>,
    %c0_61 = arith.constant 0 : index
    %c0_62 = arith.constant 0 : index
    %c0_63 = arith.constant 0 : index
    %208 = vector.load %arg12[%c0_61, %c0_62, %c0_63] : memref<2x16x256xf32, #tpu.memory_space<vmem>>, vector<1x16x256xf32>
    %209 = vector.shape_cast %208 : vector<1x16x256xf32> to vector<16x256xf32>
    %210 = vector.shape_cast %101 : vector<16x256xf32> to vector<1x16x256xf32>
    tpu.vector_store %arg12[%c0_61, %c0_62, %c0_63], %210 {strides = array<i32>} : memref<2x16x256xf32, #tpu.memory_space<vmem>>, vector<1x16x256xf32>,
    %c1_64 = arith.constant 1 : index
    %c0_65 = arith.constant 0 : index
    %c0_66 = arith.constant 0 : index
    %211 = vector.load %arg12[%c1_64, %c0_65, %c0_66] : memref<2x16x256xf32, #tpu.memory_space<vmem>>, vector<1x16x256xf32>
    %212 = vector.shape_cast %211 : vector<1x16x256xf32> to vector<16x256xf32>
    %213 = vector.shape_cast %205 : vector<16x256xf32> to vector<1x16x256xf32>
    tpu.vector_store %arg12[%c1_64, %c0_65, %c0_66], %213 {strides = array<i32>} : memref<2x16x256xf32, #tpu.memory_space<vmem>>, vector<1x16x256xf32>,
    %c0_67 = arith.constant 0 : index
    %c0_68 = arith.constant 0 : index
    %c0_69 = arith.constant 0 : index
    %214 = vector.load %arg13[%c0_67, %c0_68, %c0_69] : memref<2x16x256xf32, #tpu.memory_space<vmem>>, vector<1x16x256xf32>
    %215 = vector.shape_cast %214 : vector<1x16x256xf32> to vector<16x256xf32>
    %216 = vector.shape_cast %99 : vector<16x256xf32> to vector<1x16x256xf32>
    tpu.vector_store %arg13[%c0_67, %c0_68, %c0_69], %216 {strides = array<i32>} : memref<2x16x256xf32, #tpu.memory_space<vmem>>, vector<1x16x256xf32>,
    %c1_70 = arith.constant 1 : index
    %c0_71 = arith.constant 0 : index
    %c0_72 = arith.constant 0 : index
    %217 = vector.load %arg13[%c1_70, %c0_71, %c0_72] : memref<2x16x256xf32, #tpu.memory_space<vmem>>, vector<1x16x256xf32>
    %218 = vector.shape_cast %217 : vector<1x16x256xf32> to vector<16x256xf32>
    %219 = vector.shape_cast %203 : vector<16x256xf32> to vector<1x16x256xf32>
    tpu.vector_store %arg13[%c1_70, %c0_71, %c0_72], %219 {strides = array<i32>} : memref<2x16x256xf32, #tpu.memory_space<vmem>>, vector<1x16x256xf32>,
    %c0_73 = arith.constant 0 : index
    %c0_74 = arith.constant 0 : index
    %220 = vector.load %arg15[%c0_73, %c0_74] : memref<48x256xbf16, #tpu.memory_space<vmem>>, vector<48x256xbf16>
    %c0_75 = arith.constant 0 : index
    %c0_76 = arith.constant 0 : index
    %221 = vector.load %arg9[%c0_75, %c0_76] : memref<256x128xbf16, #tpu.memory_space<vmem>>, vector<256x128xbf16>
    %cst_77 = arith.constant dense<0.000000e+00> : vector<48x128xf32>
    %222 = tpu.matmul %220, %221, %cst_77 {dimension_numbers = #tpu.dot_dimension_numbers<[1], [0], [0], [1], [0, 0, 1, 1], [], []>} : vector<48x256xbf16>, vector<256x128xbf16>, vector<48x128xf32> -> vector<48x128xf32>
    %c0_78 = arith.constant 0 : index
    %c0_79 = arith.constant 0 : index
    %223 = vector.load %arg10[%c0_78, %c0_79] : memref<1x128xf32, #tpu.memory_space<vmem>>, vector<1x128xf32>
    %224 = vector.broadcast %223 : vector<1x128xf32> to vector<48x128xf32>
    %225 = arith.addf %222, %224 : vector<48x128xf32>
    %c0_80 = arith.constant 0 : index
    %c0_81 = arith.constant 0 : index
    %226 = vector.load %arg11[%c0_80, %c0_81] : memref<48x128xf32, #tpu.memory_space<vmem>>, vector<48x128xf32>
    tpu.vector_store %arg11[%c0_80, %c0_81], %225 {strides = array<i32>} : memref<48x128xf32, #tpu.memory_space<vmem>>, vector<48x128xf32>,
    return
  }
}

</mosaic_0001>

<bundles_post_ra>
// kernel: lstm_model_forward.1
= control target key start
LH: loop header
LB: loop body
LE: loop exit
PB: predicated region body
PF: predicated region fallthrough
CT: control target
= control target key end

     0   :  { %19 = vsyncpa [#allocation5], 0  ;;  %s11011_s0 = inlined_call_operand.vmem [shape: bf16[48,512], index: 0, kind: input, shape index: {}]   ;;  %s11012_s1 = inlined_call_operand.vmem [shape: f32[2,16,256], index: 1, kind: input, shape index: {}]   ;;  %s11013_s2 = inlined_call_operand.vmem [shape: f32[2,16,256], index: 2, kind: input, shape index: {}]   ;;  %s11014_s3 = inlined_call_operand.hbm [shape: bf16[512,1024], index: 3, kind: input, shape index: {}]   ;;  %s11015_s4 = inlined_call_operand.vmem [shape: bf16[256,1024], index: 4, kind: input, shape index: {}]   ;;  %s11016_s5 = inlined_call_operand.vmem [shape: f32[1,1024], index: 5, kind: input, shape index: {}]   ;;  %s11017_s6 = inlined_call_operand.hbm [shape: bf16[256,1024], index: 6, kind: input, shape index: {}]   ;;  %s11018_s7 = inlined_call_operand.hbm [shape: bf16[256,1024], index: 7, kind: input, shape index: {}]   ;;  %s11019_s8 = inlined_call_operand.vmem [shape: f32[1,1024], index: 8, kind: input, shape index: {}]   ;;  %s11020_s9 = inlined_call_operand.vmem [shape: bf16[256,128], index: 9, kind: input, shape index: {}]   ;;  %s11021_s10 = inlined_call_operand.vmem [shape: f32[1,128], index: 10, kind: input, shape index: {}]   ;;  %s11022_s11 = inlined_call_operand.vmem [shape: f32[48,128], index: 11, kind: output, shape index: {0}]   ;;  %s11023_s12 = inlined_call_operand.vmem [shape: f32[2,16,256], index: 12, kind: output, shape index: {1}]   ;;  %s11024_s13 = inlined_call_operand.vmem [shape: f32[2,16,256], index: 13, kind: output, shape index: {2}]  }
   0x1   :  { %20 = vsyncpa [#allocation7], 0  ;;  %s8302_s25 = smov [#allocation6]   ;;  %s8303_s27 = smov [#allocation4]  }
   0x2   :  { %s48_s26 = sshll.u32 %s8302_s25, 4  ;;  %s32_s28 = sshll.u32 %s8303_s27, 4  ;;  %s49_s26 = int_to_ptr.vmem [resolvable:$true] %s48_s26  ;;  %s33_s28 = int_to_ptr.vmem [resolvable:$true] %s32_s28 }
   0x3   :  { %s8246_s29 = scalar_lea.vmem %s49_s26, 16384  ;;  %p8251_p1 = scmp.lt.s32.totalorder %s49_s26, %s49_s26 }
   0x4   :  { %p8247_p0 = scmp.ne.s32.totalorder %s49_s26, %s8246_s29  ;;  %p8252_p2 = scmp.lt.s32.totalorder %s8246_s29, %s8246_s29 }
   0x6   :  { %p8253_p3 = por %p8252_p2, %p8251_p1 }
   0x8   :  { %p8254_p4 = pnand %p8253_p3, %p8247_p0 }
   0xa   :  { %8257 = shalt.err (!%p8254_p4)
}
   0xb   :  { %s8304_s30 = smov 512   ;;  %s8305_s14 = smov 32  }
   0xc   :  { %54 = dma.hbm_to_vmem [thread:$0]  %s11017_s6, 16384, %s49_s26, [#allocation7], %s8304_s30, %s8304_s30, %s8305_s14  }
   0xd   :  { %s8266_s17 = scalar_lea.vmem %s33_s28, 32768  ;;  %p8271_p6 = scmp.lt.s32.totalorder %s33_s28, %s33_s28 }
   0xe   :  { %p8267_p5 = scmp.ne.s32.totalorder %s33_s28, %s8266_s17  ;;  %p8272_p7 = scmp.lt.s32.totalorder %s8266_s17, %s8266_s17 }
  0x10   :  { %p8273_p8 = por %p8272_p7, %p8271_p6 }
  0x12   :  { %p8274_p9 = pnand %p8273_p8, %p8267_p5 }
  0x14   :  { %8277 = shalt.err (!%p8274_p9)
}
  0x15   :  { %38 = dma.hbm_to_vmem [thread:$0]  %s11014_s3, 32768, %s33_s28, [#allocation5], %s8304_s30, %s8304_s30, %s8305_s14  }
  0x16   :  { %s8306_s20 = smov [#allocation8]  }
  0x17   :  { %s60_s21 = sshll.u32 %s8306_s20, 4  ;;  %s61_s21 = int_to_ptr.vmem [resolvable:$true] %s60_s21 }
  0x18   :  { %s8286_s22 = scalar_lea.vmem %s61_s21, 16384  ;;  %p8291_p11 = scmp.lt.s32.totalorder %s61_s21, %s61_s21 }
  0x19   :  { %p8287_p10 = scmp.ne.s32.totalorder %s61_s21, %s8286_s22  ;;  %p8292_p12 = scmp.lt.s32.totalorder %s8286_s22, %s8286_s22 }
  0x1b   :  { %p8293_p13 = por %p8292_p12, %p8291_p11 }
  0x1d   :  { %p8294_p0 = pnand %p8293_p13, %p8287_p10 }
  0x1f   :  { %8297 = shalt.err (!%p8294_p0)
}
  0x20   :  { %66 = dma.hbm_to_vmem [thread:$0]  %s11018_s7, 16384, %s61_s21, [#allocation7], %s8304_s30, %s8304_s30, %s8305_s14  }
  0x21   :  { %8298 = dma.done.wait [#allocation5], 32768  }
  0x22   :  { %8299 = vsyncadd [#allocation5], 4294934528 }
  0x23   :  { %8300 = dma.done.wait [#allocation7], 32768  }
  0x24   :  { %8301 = vsyncadd [#allocation7], 4294934528  ;;  %v159_v0 = vld [vmem:[#allocation4 + $0x1c0] sm:$0xff]  ;;  %v8394_v59 = vld [vmem:[%s11011_s0 + $0xc] ss:$16 sps:$4 sm:$0xff]  }
  0x25   :  { %v163_v1 = vld [vmem:[#allocation4 + $0x1e0] sm:$0xff]  ;;  %1964 = vmatprep.mubr.bf16.mxu1 %v8394_v59 }
  0x26   :  { %v287_v2 = vld [vmem:[#allocation4 + $0x5c0] sm:$0xff]  ;;  %v7016_v3 = vcombine.high %v159_v0, %v163_v1  ;;  %v7015_v5 = vcombine.low %v159_v0, %v163_v1 }
  0x27   :  { %v291_v4 = vld [vmem:[#allocation4 + $0x5e0] sm:$0xff] }
  0x28   :  { %v151_v6 = vld [vmem:[#allocation4 + $0x180] sm:$0xff]  ;;  %v7144_v8 = vcombine.high %v287_v2, %v291_v4  ;;  %v7143_v9 = vcombine.low %v287_v2, %v291_v4  ;;  %1869 = vmatprep.subr.bf16.mxu0 %v7016_v3 }
  0x29   :  { %v155_v7 = vld [vmem:[#allocation4 + $0x1a0] sm:$0xff]  ;;  %1870 = vmatpush1.bf16.msra.mxu0 %v7015_v5 }
  0x2a   :  { %v7008_v10 = vcombine.high %v151_v6, %v155_v7  ;;  %v279_v11 = vld [vmem:[#allocation4 + $0x580] sm:$0xff]  ;;  %1932 = vmatprep.subr.bf16.mxu1 %v7144_v8  ;;  %v7007_v18 = vcombine.low %v151_v6, %v155_v7 }
  0x2b   :  { %v283_v12 = vld [vmem:[#allocation4 + $0x5a0] sm:$0xff]  ;;  %1933 = vmatpush1.bf16.msra.mxu1 %v7143_v9 }
  0x2c   :  { %v143_v13 = vld [vmem:[#allocation4 + $0x140] sm:$0xff]  ;;  %v7136_v14 = vcombine.high %v279_v11, %v283_v12  ;;  %1871 = vmatprep.subr.bf16.mxu0 %v7008_v10  ;;  %v7135_v19 = vcombine.low %v279_v11, %v283_v12 }
  0x2d   :  { %v147_v15 = vld [vmem:[#allocation4 + $0x160] sm:$0xff]  ;;  %1872 = vmatpush1.bf16.msra.mxu0 %v7007_v18 }
  0x2e   :  { %v271_v16 = vld [vmem:[#allocation4 + $0x540] sm:$0xff]  ;;  %v7000_v20 = vcombine.high %v143_v13, %v147_v15  ;;  %1934 = vmatprep.subr.bf16.mxu1 %v7136_v14  ;;  %v6999_v26 = vcombine.low %v143_v13, %v147_v15 }
  0x2f   :  { %v275_v17 = vld [vmem:[#allocation4 + $0x560] sm:$0xff]  ;;  %1935 = vmatpush1.bf16.msra.mxu1 %v7135_v19 }
  0x30   :  { %v7128_v21 = vcombine.high %v271_v16, %v275_v17  ;;  %v135_v22 = vld [vmem:[#allocation4 + $0x100] sm:$0xff]  ;;  %1873 = vmatprep.subr.bf16.mxu0 %v7000_v20  ;;  %v7127_v27 = vcombine.low %v271_v16, %v275_v17 }
  0x31   :  { %v139_v23 = vld [vmem:[#allocation4 + $0x120] sm:$0xff]  ;;  %1874 = vmatpush1.bf16.msra.mxu0 %v6999_v26 }
  0x32   :  { %v263_v24 = vld [vmem:[#allocation4 + $0x500] sm:$0xff]  ;;  %v6992_v28 = vcombine.high %v135_v22, %v139_v23  ;;  %1936 = vmatprep.subr.bf16.mxu1 %v7128_v21  ;;  %v6991_v34 = vcombine.low %v135_v22, %v139_v23 }
  0x33   :  { %v267_v25 = vld [vmem:[#allocation4 + $0x520] sm:$0xff]  ;;  %1937 = vmatpush1.bf16.msra.mxu1 %v7127_v27 }
  0x34   :  { %v7120_v29 = vcombine.high %v263_v24, %v267_v25  ;;  %v127_v30 = vld [vmem:[#allocation4 + $0xc0] sm:$0xff]  ;;  %1875 = vmatprep.subr.bf16.mxu0 %v6992_v28  ;;  %v7119_v35 = vcombine.low %v263_v24, %v267_v25 }
  0x35   :  { %v131_v31 = vld [vmem:[#allocation4 + $0xe0] sm:$0xff]  ;;  %1876 = vmatpush1.bf16.msra.mxu0 %v6991_v34 }
  0x36   :  { %v255_v32 = vld [vmem:[#allocation4 + $0x4c0] sm:$0xff]  ;;  %v6984_v36 = vcombine.high %v127_v30, %v131_v31  ;;  %1938 = vmatprep.subr.bf16.mxu1 %v7120_v29  ;;  %v6983_v42 = vcombine.low %v127_v30, %v131_v31 }
  0x37   :  { %v259_v33 = vld [vmem:[#allocation4 + $0x4e0] sm:$0xff]  ;;  %1939 = vmatpush1.bf16.msra.mxu1 %v7119_v35 }
  0x38   :  { %v7112_v37 = vcombine.high %v255_v32, %v259_v33  ;;  %v119_v38 = vld [vmem:[#allocation4 + $0x80] sm:$0xff]  ;;  %1877 = vmatprep.subr.bf16.mxu0 %v6984_v36  ;;  %v7111_v43 = vcombine.low %v255_v32, %v259_v33 }
  0x39   :  { %v123_v39 = vld [vmem:[#allocation4 + $0xa0] sm:$0xff]  ;;  %1878 = vmatpush1.bf16.msra.mxu0 %v6983_v42 }
  0x3a   :  { %v247_v40 = vld [vmem:[#allocation4 + $0x480] sm:$0xff]  ;;  %v6976_v44 = vcombine.high %v119_v38, %v123_v39  ;;  %1940 = vmatprep.subr.bf16.mxu1 %v7112_v37  ;;  %v6975_v50 = vcombine.low %v119_v38, %v123_v39 }
  0x3b   :  { %v251_v41 = vld [vmem:[#allocation4 + $0x4a0] sm:$0xff]  ;;  %1941 = vmatpush1.bf16.msra.mxu1 %v7111_v43 }
  0x3c   :  { %v7104_v45 = vcombine.high %v247_v40, %v251_v41  ;;  %v111_v46 = vld [vmem:[#allocation4 + $0x40] sm:$0xff]  ;;  %1879 = vmatprep.subr.bf16.mxu0 %v6976_v44  ;;  %v7103_v52 = vcombine.low %v247_v40, %v251_v41 }
  0x3d   :  { %v115_v47 = vld [vmem:[#allocation4 + $0x60] sm:$0xff]  ;;  %1880 = vmatpush1.bf16.msra.mxu0 %v6975_v50 }
  0x3e   :  { %v239_v48 = vld [vmem:[#allocation4 + $0x440] sm:$0xff]  ;;  %v6968_v53 = vcombine.high %v111_v46, %v115_v47  ;;  %1942 = vmatprep.subr.bf16.mxu1 %v7104_v45  ;;  %v6967_v60 = vcombine.low %v111_v46, %v115_v47 }
  0x3f   :  { %v243_v49 = vld [vmem:[#allocation4 + $0x460] sm:$0xff]  ;;  %1943 = vmatpush1.bf16.msra.mxu1 %v7103_v52 }
  0x40   :  { %v103_v51 = vld [vmem:[#allocation4] sm:$0xff]  ;;  %v7096_v55 = vcombine.high %v239_v48, %v243_v49  ;;  %1881 = vmatprep.subr.bf16.mxu0 %v6968_v53  ;;  %v7095_v61 = vcombine.low %v239_v48, %v243_v49 }
  0x41   :  { %v107_v54 = vld [vmem:[#allocation4 + $0x20] sm:$0xff]  ;;  %1882 = vmatpush1.bf16.msra.mxu0 %v6967_v60 }
  0x42   :  { %v8389_v56 = vld [vmem:[%s11011_s0 + $0x4] ss:$16 sps:$4 sm:$0xff]   ;;  %v6960_v62 = vcombine.high %v103_v51, %v107_v54  ;;  %1944 = vmatprep.subr.bf16.mxu1 %v7096_v55  ;;  %v6959_v4 = vcombine.low %v103_v51, %v107_v54 }
  0x43   :  { %v231_v57 = vld [vmem:[#allocation4 + $0x400] sm:$0xff]  ;;  %1901 = vmatprep.mubr.bf16.mxu0 %v8389_v56  ;;  %1945 = vmatpush1.bf16.msra.mxu1 %v7095_v61 }
  0x44   :  { %v235_v58 = vld [vmem:[#allocation4 + $0x420] sm:$0xff]  ;;  %1883 = vmatprep.subr.bf16.mxu0 %v6960_v62 }
  0x45   :  { %v7088_v63 = vcombine.high %v231_v57, %v235_v58  ;;  %v223_v0 = vld [vmem:[#allocation4 + $0x3c0] sm:$0xff]  ;;  %v7087_v5 = vcombine.low %v231_v57, %v235_v58  ;;  %1884 = vmatpush1.bf16.msra.mxu0 %v6959_v4  ;;  %v288_v4 = vld [vmem:[#allocation4 + $0x5c8] sm:$0xff] }
  0x46   :  { %v227_v1 = vld [vmem:[#allocation4 + $0x3e0] sm:$0xff] }
  0x47   :  { %v351_v2 = vld [vmem:[#allocation4 + $0x7c0] sm:$0xff]  ;;  %v7080_v6 = vcombine.high %v223_v0, %v227_v1  ;;  %1946 = vmatprep.subr.bf16.mxu1 %v7088_v63  ;;  %v7079_v12 = vcombine.low %v223_v0, %v227_v1 }
  0x48   :  { %v355_v3 = vld [vmem:[#allocation4 + $0x7e0] sm:$0xff]  ;;  %1947 = vmatpush1.bf16.msra.mxu1 %v7087_v5  ;;  %v292_v5 = vld [vmem:[#allocation4 + $0x5e8] sm:$0xff] }
  0x49   :  { %v7208_v7 = vcombine.high %v351_v2, %v355_v3  ;;  %v215_v8 = vld [vmem:[#allocation4 + $0x380] sm:$0xff]  ;;  %1885 = vmatprep.subr.bf16.mxu0 %v7080_v6  ;;  %v7207_v13 = vcombine.low %v351_v2, %v355_v3  ;;  %v160_v2 = vld [vmem:[#allocation4 + $0x1c8] sm:$0xff] }
  0x4a   :  { %v219_v9 = vld [vmem:[#allocation4 + $0x3a0] sm:$0xff]  ;;  %1886 = vmatpush2.bf16.msra.mxu0 %v7079_v12  ;;  %v164_v3 = vld [vmem:[#allocation4 + $0x1e8] sm:$0xff] }
  0x4b   :  { %v343_v10 = vld [vmem:[#allocation4 + $0x780] sm:$0xff]  ;;  %v7072_v14 = vcombine.high %v215_v8, %v219_v9  ;;  %1948 = vmatprep.subr.bf16.mxu1 %v7208_v7  ;;  %v7071_v20 = vcombine.low %v215_v8, %v219_v9  ;;  %v7018_v8 = vcombine.high %v160_v2, %v164_v3  ;;  %v7146_v9 = vcombine.high %v288_v4, %v292_v5 }
  0x4c   :  { %v347_v11 = vld [vmem:[#allocation4 + $0x7a0] sm:$0xff]  ;;  %1949 = vmatpush2.bf16.msra.mxu1 %v7207_v13  ;;  %v280_v13 = vld [vmem:[#allocation4 + $0x588] sm:$0xff] }
  0x4d   :  { %v7200_v15 = vcombine.high %v343_v10, %v347_v11  ;;  %v207_v16 = vld [vmem:[#allocation4 + $0x340] sm:$0xff]  ;;  %1887 = vmatprep.subr.bf16.mxu0 %v7072_v14  ;;  %v7199_v21 = vcombine.low %v343_v10, %v347_v11  ;;  %v152_v10 = vld [vmem:[#allocation4 + $0x188] sm:$0xff] }
  0x4e   :  { %v211_v17 = vld [vmem:[#allocation4 + $0x360] sm:$0xff]  ;;  %1888 = vmatpush2.bf16.msra.mxu0 %v7071_v20  ;;  %v156_v11 = vld [vmem:[#allocation4 + $0x1a8] sm:$0xff] }
  0x4f   :  { %v335_v18 = vld [vmem:[#allocation4 + $0x740] sm:$0xff]  ;;  %v7064_v22 = vcombine.high %v207_v16, %v211_v17  ;;  %1950 = vmatprep.subr.bf16.mxu1 %v7200_v15  ;;  %v7063_v28 = vcombine.low %v207_v16, %v211_v17  ;;  %v284_v14 = vld [vmem:[#allocation4 + $0x5a8] sm:$0xff]  ;;  %v7017_v16 = vcombine.low %v160_v2, %v164_v3  ;;  %v7145_v17 = vcombine.low %v288_v4, %v292_v5 }
  0x50   :  { %v339_v19 = vld [vmem:[#allocation4 + $0x760] sm:$0xff]  ;;  %1951 = vmatpush2.bf16.msra.mxu1 %v7199_v21  ;;  %v8406_v15 = vld [vmem:[%s11011_s0 + $0x8] ss:$16 sps:$4 sm:$0xff]  }
  0x51   :  { %v7192_v23 = vcombine.high %v335_v18, %v339_v19  ;;  %v199_v24 = vld [vmem:[#allocation4 + $0x300] sm:$0xff]  ;;  %1889 = vmatprep.subr.bf16.mxu0 %v7064_v22  ;;  %v7191_v29 = vcombine.low %v335_v18, %v339_v19  ;;  %v7010_v18 = vcombine.high %v152_v10, %v156_v11  ;;  %v7138_v19 = vcombine.high %v280_v13, %v284_v14  ;;  %v144_v20 = vld [vmem:[#allocation4 + $0x148] sm:$0xff] }
  0x52   :  { %v203_v25 = vld [vmem:[#allocation4 + $0x320] sm:$0xff]  ;;  %1890 = vmatpush2.bf16.msra.mxu0 %v7063_v28  ;;  %v148_v21 = vld [vmem:[#allocation4 + $0x168] sm:$0xff] }
  0x53   :  { %v327_v26 = vld [vmem:[#allocation4 + $0x700] sm:$0xff]  ;;  %v7056_v30 = vcombine.high %v199_v24, %v203_v25  ;;  %1952 = vmatprep.subr.bf16.mxu1 %v7192_v23  ;;  %v7055_v36 = vcombine.low %v199_v24, %v203_v25  ;;  %v272_v23 = vld [vmem:[#allocation4 + $0x548] sm:$0xff]  ;;  %v7002_v28 = vcombine.high %v144_v20, %v148_v21 }
  0x54   :  { %v331_v27 = vld [vmem:[#allocation4 + $0x720] sm:$0xff]  ;;  %1953 = vmatpush2.bf16.msra.mxu1 %v7191_v29  ;;  %v276_v24 = vld [vmem:[#allocation4 + $0x568] sm:$0xff] }
  0x55   :  { %v7184_v31 = vcombine.high %v327_v26, %v331_v27  ;;  %v191_v32 = vld [vmem:[#allocation4 + $0x2c0] sm:$0xff]  ;;  %1891 = vmatprep.subr.bf16.mxu0 %v7056_v30  ;;  %v7183_v37 = vcombine.low %v327_v26, %v331_v27  ;;  %v8417_v25 = vld [vmem:[%s11011_s0 + $0x2c] ss:$16 sps:$4 sm:$0xff]   ;;  %v7009_v26 = vcombine.low %v152_v10, %v156_v11  ;;  %v7137_v27 = vcombine.low %v280_v13, %v284_v14 }
  0x56   :  { %v195_v33 = vld [vmem:[#allocation4 + $0x2e0] sm:$0xff]  ;;  %1892 = vmatpush2.bf16.msra.mxu0 %v7055_v36  ;;  %v7130_v29 = vcombine.high %v272_v23, %v276_v24  ;;  %v136_v30 = vld [vmem:[#allocation4 + $0x108] sm:$0xff] }
  0x57   :  { %v319_v34 = vld [vmem:[#allocation4 + $0x6c0] sm:$0xff]  ;;  %v7048_v38 = vcombine.high %v191_v32, %v195_v33  ;;  %1954 = vmatprep.subr.bf16.mxu1 %v7184_v31  ;;  %v7047_v44 = vcombine.low %v191_v32, %v195_v33  ;;  %v140_v31 = vld [vmem:[#allocation4 + $0x128] sm:$0xff] }
  0x58   :  { %v323_v35 = vld [vmem:[#allocation4 + $0x6e0] sm:$0xff]  ;;  %1955 = vmatpush2.bf16.msra.mxu1 %v7183_v37  ;;  %v264_v32 = vld [vmem:[#allocation4 + $0x508] sm:$0xff]  ;;  %v7129_v37 = vcombine.low %v272_v23, %v276_v24 }
  0x59   :  { %v7176_v39 = vcombine.high %v319_v34, %v323_v35  ;;  %v183_v40 = vld [vmem:[#allocation4 + $0x280] sm:$0xff]  ;;  %1893 = vmatprep.subr.bf16.mxu0 %v7048_v38  ;;  %v7175_v45 = vcombine.low %v319_v34, %v323_v35  ;;  %v268_v33 = vld [vmem:[#allocation4 + $0x528] sm:$0xff]  ;;  %v7001_v35 = vcombine.low %v144_v20, %v148_v21  ;;  %v6994_v38 = vcombine.high %v136_v30, %v140_v31 }
  0x5a   :  { %v187_v41 = vld [vmem:[#allocation4 + $0x2a0] sm:$0xff]  ;;  %1894 = vmatpush2.bf16.msra.mxu0 %v7047_v44  ;;  %v8430_v36 = vld [vmem:[%s11011_s0 + $0x28] ss:$16 sps:$4 sm:$0xff]  }
  0x5b   :  { %v311_v42 = vld [vmem:[#allocation4 + $0x680] sm:$0xff]  ;;  %v7040_v46 = vcombine.high %v183_v40, %v187_v41  ;;  %1956 = vmatprep.subr.bf16.mxu1 %v7176_v39  ;;  %v7039_v52 = vcombine.low %v183_v40, %v187_v41  ;;  %v7122_v39 = vcombine.high %v264_v32, %v268_v33  ;;  %v128_v40 = vld [vmem:[#allocation4 + $0xc8] sm:$0xff] }
  0x5c   :  { %v315_v43 = vld [vmem:[#allocation4 + $0x6a0] sm:$0xff]  ;;  %1957 = vmatpush2.bf16.msra.mxu1 %v7175_v45  ;;  %v132_v41 = vld [vmem:[#allocation4 + $0xe8] sm:$0xff] }
  0x5d   :  { %v7168_v47 = vcombine.high %v311_v42, %v315_v43  ;;  %v175_v48 = vld [vmem:[#allocation4 + $0x240] sm:$0xff]  ;;  %1895 = vmatprep.subr.bf16.mxu0 %v7040_v46  ;;  %v7167_v53 = vcombine.low %v311_v42, %v315_v43  ;;  %v256_v43 = vld [vmem:[#allocation4 + $0x4c8] sm:$0xff]  ;;  %v6993_v46 = vcombine.low %v136_v30, %v140_v31 }
  0x5e   :  { %v179_v49 = vld [vmem:[#allocation4 + $0x260] sm:$0xff]  ;;  %1896 = vmatpush2.bf16.msra.mxu0 %v7039_v52  ;;  %v260_v44 = vld [vmem:[#allocation4 + $0x4e8] sm:$0xff] }
  0x5f   :  { %v303_v50 = vld [vmem:[#allocation4 + $0x640] sm:$0xff]  ;;  %v7032_v54 = vcombine.high %v175_v48, %v179_v49  ;;  %1958 = vmatprep.subr.bf16.mxu1 %v7168_v47  ;;  %v7031_v62 = vcombine.low %v175_v48, %v179_v49  ;;  %v8441_v45 = vld [vmem:[%s11011_s0 + $0x4c] ss:$16 sps:$4 sm:$0xff]   ;;  %v7121_v49 = vcombine.low %v264_v32, %v268_v33 }
  0x60   :  { %v307_v51 = vld [vmem:[#allocation4 + $0x660] sm:$0xff]  ;;  %1959 = vmatpush2.bf16.msra.mxu1 %v7167_v53  ;;  %v120_v47 = vld [vmem:[#allocation4 + $0x88] sm:$0xff] }
  0x61   :  { %v7160_v55 = vcombine.high %v303_v50, %v307_v51  ;;  %v167_v57 = vld [vmem:[#allocation4 + $0x200] sm:$0xff]  ;;  %1897 = vmatprep.subr.bf16.mxu0 %v7032_v54  ;;  %v7159_v63 = vcombine.low %v303_v50, %v307_v51  ;;  %v124_v48 = vld [vmem:[#allocation4 + $0xa8] sm:$0xff]  ;;  %v6986_v50 = vcombine.high %v128_v40, %v132_v41  ;;  %v7114_v54 = vcombine.high %v256_v43, %v260_v44 }
  0x62   :  { %v171_v58 = vld [vmem:[#allocation4 + $0x220] sm:$0xff]  ;;  %1898 = vmatpush2.bf16.msra.mxu0 %v7031_v62  ;;  %v248_v51 = vld [vmem:[#allocation4 + $0x488] sm:$0xff]  ;;  %v6977_v2 = vcombine.low %v120_v47, %v124_v48 }
  0x63   :  { %v295_v60 = vld [vmem:[#allocation4 + $0x600] sm:$0xff]  ;;  %v7024_v0 = vcombine.high %v167_v57, %v171_v58  ;;  %1960 = vmatprep.subr.bf16.mxu1 %v7160_v55  ;;  %v7023_v6 = vcombine.low %v167_v57, %v171_v58  ;;  %v252_v52 = vld [vmem:[#allocation4 + $0x4a8] sm:$0xff]  ;;  %v6985_v57 = vcombine.low %v128_v40, %v132_v41  ;;  %v7113_v58 = vcombine.low %v256_v43, %v260_v44 }
  0x64   :  { %v299_v61 = vld [vmem:[#allocation4 + $0x620] sm:$0xff]  ;;  %1961 = vmatpush2.bf16.msra.mxu1 %v7159_v63  ;;  %v8453_v55 = vld [vmem:[%s11011_s0 + $0x48] ss:$16 sps:$4 sm:$0xff]   ;;  %v7105_v3 = vcombine.low %v248_v51, %v252_v52 }
  0x65   :  { %v7152_v1 = vcombine.high %v295_v60, %v299_v61  ;;  %1899 = vmatprep.subr.bf16.mxu0 %v7024_v0  ;;  %v7151_v7 = vcombine.low %v295_v60, %v299_v61  ;;  %v8401_v12 = vld [vmem:[%s11011_s0] ss:$16 sps:$4 sm:$0xff]   ;;  %v8411_v22 = vld [vmem:[%s11011_s0 + $0x24] ss:$16 sps:$4 sm:$0xff]   ;;  %v6978_v60 = vcombine.high %v120_v47, %v124_v48  ;;  %v112_v61 = vld [vmem:[#allocation4 + $0x48] sm:$0xff]  ;;  %v7106_v0 = vcombine.high %v248_v51, %v252_v52 }
  0x66   :  { %1900 = vmatpush2.bf16.msra.mxu0 %v7023_v6  ;;  %v8424_v34 = vld [vmem:[%s11011_s0 + $0x20] ss:$16 sps:$4 sm:$0xff]   ;;  %v8435_v42 = vld [vmem:[%s11011_s0 + $0x44] ss:$16 sps:$4 sm:$0xff]   ;;  %v116_v62 = vld [vmem:[#allocation4 + $0x68] sm:$0xff] }
  0x67   :  { %1962 = vmatprep.subr.bf16.mxu1 %v7152_v1  ;;  %1995 = vmatprep.subr.bf16.mxu0 %v7018_v8  ;;  %v8447_v53 = vld [vmem:[%s11011_s0 + $0x40] ss:$16 sps:$4 sm:$0xff]   ;;  %v240_v63 = vld [vmem:[#allocation4 + $0x448] sm:$0xff]  ;;  %v6970_v4 = vcombine.high %v112_v61, %v116_v62  ;;  %v6969_v10 = vcombine.low %v112_v61, %v116_v62 }
  0x68   :  { %1963 = vmatpush2.bf16.msra.mxu1 %v7151_v7  ;;  %v244_v1 = vld [vmem:[#allocation4 + $0x468] sm:$0xff] }
  0x69   :  { %2058 = vmatprep.subr.bf16.mxu1 %v7146_v9  ;;  %1902 = vmatmul.mubr.bf16.vlgmr.msra.gmra.mxu0 %v8401_v12  ;;  %v104_v5 = vld [vmem:[#allocation4 + $0x8] sm:$0xff]  ;;  %v7098_v8 = vcombine.high %v240_v63, %v244_v1  ;;  %v7097_v11 = vcombine.low %v240_v63, %v244_v1 }
  0x6a   :  { %1996 = vmatpush1.bf16.msra.mxu0 %v7017_v16  ;;  %1911 = vmatprep.mubr.bf16.mxu0 %v8411_v22  ;;  %v108_v6 = vld [vmem:[#allocation4 + $0x28] sm:$0xff] }
  0x6b   :  { %1965 = vmatmul.mubr.bf16.vlgmr.msra.gmra.mxu1 %v8406_v15  ;;  %1997 = vmatprep.subr.bf16.mxu0 %v7010_v18  ;;  %v232_v7 = vld [vmem:[#allocation4 + $0x408] sm:$0xff]  ;;  %v6962_v13 = vcombine.high %v104_v5, %v108_v6  ;;  %v6961_v20 = vcombine.low %v104_v5, %v108_v6 }
  0x6c   :  { %2059 = vmatpush1.bf16.msra.mxu1 %v7145_v17  ;;  %1974 = vmatprep.mubr.bf16.mxu1 %v8417_v25  ;;  %v236_v9 = vld [vmem:[#allocation4 + $0x428] sm:$0xff] }
  0x6d   :  { %2060 = vmatprep.subr.bf16.mxu1 %v7138_v19  ;;  %v224_v14 = vld [vmem:[#allocation4 + $0x3c8] sm:$0xff]  ;;  %v7090_v18 = vcombine.high %v232_v7, %v236_v9  ;;  %v7089_v21 = vcombine.low %v232_v7, %v236_v9 }
  0x6e   :  { %1998 = vmatpush1.bf16.msra.mxu0 %v7009_v26  ;;  %v228_v16 = vld [vmem:[#allocation4 + $0x3e8] sm:$0xff] }
  0x6f   :  { %1999 = vmatprep.subr.bf16.mxu0 %v7002_v28  ;;  %v352_v17 = vld [vmem:[#allocation4 + $0x7c8] sm:$0xff]  ;;  %v7082_v23 = vcombine.high %v224_v14, %v228_v16  ;;  %v7081_v30 = vcombine.low %v224_v14, %v228_v16 }
  0x70   :  { %2061 = vmatpush1.bf16.msra.mxu1 %v7137_v27  ;;  %v356_v19 = vld [vmem:[#allocation4 + $0x7e8] sm:$0xff] }
  0x71   :  { %2062 = vmatprep.subr.bf16.mxu1 %v7130_v29  ;;  %1912 = vmatmul.mubr.bf16.gmra.mxu0 %v8424_v34  ;;  %v7210_v24 = vcombine.high %v352_v17, %v356_v19  ;;  %v216_v26 = vld [vmem:[#allocation4 + $0x388] sm:$0xff]  ;;  %v7209_v31 = vcombine.low %v352_v17, %v356_v19 }
  0x72   :  { %2000 = vmatpush1.bf16.msra.mxu0 %v7001_v35  ;;  %1921 = vmatprep.mubr.bf16.mxu0 %v8435_v42  ;;  %v220_v27 = vld [vmem:[#allocation4 + $0x3a8] sm:$0xff] }
  0x73   :  { %1975 = vmatmul.mubr.bf16.gmra.mxu1 %v8430_v36  ;;  %2001 = vmatprep.subr.bf16.mxu0 %v6994_v38  ;;  %v344_v28 = vld [vmem:[#allocation4 + $0x788] sm:$0xff]  ;;  %v7074_v32 = vcombine.high %v216_v26, %v220_v27  ;;  %v7073_v40 = vcombine.low %v216_v26, %v220_v27 }
  0x74   :  { %2063 = vmatpush1.bf16.msra.mxu1 %v7129_v37  ;;  %1984 = vmatprep.mubr.bf16.mxu1 %v8441_v45  ;;  %v348_v29 = vld [vmem:[#allocation4 + $0x7a8] sm:$0xff] }
  0x75   :  { %2064 = vmatprep.subr.bf16.mxu1 %v7122_v39  ;;  %v7202_v33 = vcombine.high %v344_v28, %v348_v29  ;;  %v208_v35 = vld [vmem:[#allocation4 + $0x348] sm:$0xff]  ;;  %v7201_v41 = vcombine.low %v344_v28, %v348_v29 }
  0x76   :  { %2002 = vmatpush1.bf16.msra.mxu0 %v6993_v46  ;;  %v212_v37 = vld [vmem:[#allocation4 + $0x368] sm:$0xff] }
  0x77   :  { %2003 = vmatprep.subr.bf16.mxu0 %v6986_v50  ;;  %v336_v38 = vld [vmem:[#allocation4 + $0x748] sm:$0xff]  ;;  %v7066_v43 = vcombine.high %v208_v35, %v212_v37  ;;  %v7065_v50 = vcombine.low %v208_v35, %v212_v37 }
  0x78   :  { %2065 = vmatpush1.bf16.msra.mxu1 %v7121_v49  ;;  %v340_v39 = vld [vmem:[#allocation4 + $0x768] sm:$0xff] }
  0x79   :  { %2066 = vmatprep.subr.bf16.mxu1 %v7114_v54  ;;  %1922 = vmatmul.mubr.bf16.gmra.mxu0 %v8447_v53  ;;  %v7194_v44 = vcombine.high %v336_v38, %v340_v39  ;;  %v200_v46 = vld [vmem:[#allocation4 + $0x308] sm:$0xff]  ;;  %v7193_v51 = vcombine.low %v336_v38, %v340_v39 }
  0x7a   :  { %2004 = vmatpush1.bf16.msra.mxu0 %v6985_v57  ;;  %2027 = vmatprep.mubr.bf16.mxu0 %v8389_v56  ;;  %v204_v47 = vld [vmem:[#allocation4 + $0x328] sm:$0xff] }
  0x7b   :  { %1985 = vmatmul.mubr.bf16.gmra.mxu1 %v8453_v55  ;;  %2005 = vmatprep.subr.bf16.mxu0 %v6978_v60  ;;  %v328_v48 = vld [vmem:[#allocation4 + $0x708] sm:$0xff]  ;;  %v7058_v52 = vcombine.high %v200_v46, %v204_v47  ;;  %v7057_v62 = vcombine.low %v200_v46, %v204_v47 }
  0x7c   :  { %2067 = vmatpush1.bf16.msra.mxu1 %v7113_v58  ;;  %2090 = vmatprep.mubr.bf16.mxu1 %v8394_v59  ;;  %v332_v49 = vld [vmem:[#allocation4 + $0x728] sm:$0xff] }
  0x7d   :  { %2068 = vmatprep.subr.bf16.mxu1 %v7106_v0  ;;  %v7186_v54 = vcombine.high %v328_v48, %v332_v49  ;;  %v192_v57 = vld [vmem:[#allocation4 + $0x2c8] sm:$0xff]  ;;  %v7185_v63 = vcombine.low %v328_v48, %v332_v49 }
  0x7e   :  { %2006 = vmatpush1.bf16.msra.mxu0 %v6977_v2  ;;  %v196_v58 = vld [vmem:[#allocation4 + $0x2e8] sm:$0xff] }
  0x7f   :  { %2007 = vmatprep.subr.bf16.mxu0 %v6970_v4  ;;  %v320_v60 = vld [vmem:[#allocation4 + $0x6c8] sm:$0xff]  ;;  %v7050_v0 = vcombine.high %v192_v57, %v196_v58  ;;  %v7049_v6 = vcombine.low %v192_v57, %v196_v58 }
  0x80   :  { %2069 = vmatpush1.bf16.msra.mxu1 %v7105_v3  ;;  %v324_v61 = vld [vmem:[#allocation4 + $0x6e8] sm:$0xff] }
  0x81   :  { %2070 = vmatprep.subr.bf16.mxu1 %v7098_v8  ;;  %v7178_v1 = vcombine.high %v320_v60, %v324_v61  ;;  %v184_v2 = vld [vmem:[#allocation4 + $0x288] sm:$0xff]  ;;  %v7177_v7 = vcombine.low %v320_v60, %v324_v61 }
  0x82   :  { %2008 = vmatpush1.bf16.msra.mxu0 %v6969_v10  ;;  %v188_v3 = vld [vmem:[#allocation4 + $0x2a8] sm:$0xff] }
  0x83   :  { %2009 = vmatprep.subr.bf16.mxu0 %v6962_v13  ;;  %v312_v4 = vld [vmem:[#allocation4 + $0x688] sm:$0xff]  ;;  %v7042_v8 = vcombine.high %v184_v2, %v188_v3  ;;  %v7041_v16 = vcombine.low %v184_v2, %v188_v3 }
  0x84   :  { %2071 = vmatpush1.bf16.msra.mxu1 %v7097_v11  ;;  %v316_v5 = vld [vmem:[#allocation4 + $0x6a8] sm:$0xff] }
  0x85   :  { %2072 = vmatprep.subr.bf16.mxu1 %v7090_v18  ;;  %v7170_v9 = vcombine.high %v312_v4, %v316_v5  ;;  %v176_v10 = vld [vmem:[#allocation4 + $0x248] sm:$0xff]  ;;  %v7169_v17 = vcombine.low %v312_v4, %v316_v5 }
  0x86   :  { %2010 = vmatpush1.bf16.msra.mxu0 %v6961_v20  ;;  %v180_v11 = vld [vmem:[#allocation4 + $0x268] sm:$0xff] }
  0x87   :  { %2011 = vmatprep.subr.bf16.mxu0 %v7082_v23  ;;  %v304_v13 = vld [vmem:[#allocation4 + $0x648] sm:$0xff]  ;;  %v7034_v18 = vcombine.high %v176_v10, %v180_v11  ;;  %v7033_v26 = vcombine.low %v176_v10, %v180_v11 }
  0x88   :  { %2073 = vmatpush1.bf16.msra.mxu1 %v7089_v21  ;;  %v308_v14 = vld [vmem:[#allocation4 + $0x668] sm:$0xff] }
  0x89   :  { %2074 = vmatprep.subr.bf16.mxu1 %v7210_v24  ;;  %v7162_v19 = vcombine.high %v304_v13, %v308_v14  ;;  %v168_v20 = vld [vmem:[#allocation4 + $0x208] sm:$0xff]  ;;  %v7161_v27 = vcombine.low %v304_v13, %v308_v14 }
  0x8a   :  { %2012 = vmatpush2.bf16.msra.mxu0 %v7081_v30  ;;  %v172_v21 = vld [vmem:[#allocation4 + $0x228] sm:$0xff]  ;;  %v161_v30 = vld [vmem:[#allocation4 + $0x1d0] sm:$0xff] }
  0x8b   :  { %2013 = vmatprep.subr.bf16.mxu0 %v7074_v32  ;;  %v296_v23 = vld [vmem:[#allocation4 + $0x608] sm:$0xff]  ;;  %v7026_v28 = vcombine.high %v168_v20, %v172_v21  ;;  %v289_v32 = vld [vmem:[#allocation4 + $0x5d0] sm:$0xff]  ;;  %v7025_v35 = vcombine.low %v168_v20, %v172_v21 }
  0x8c   :  { %2075 = vmatpush2.bf16.msra.mxu1 %v7209_v31  ;;  %v300_v24 = vld [vmem:[#allocation4 + $0x628] sm:$0xff]  ;;  %v165_v31 = vld [vmem:[#allocation4 + $0x1f0] sm:$0xff] }
  0x8d   :  { %2076 = vmatprep.subr.bf16.mxu1 %v7202_v33  ;;  %v7154_v29 = vcombine.high %v296_v23, %v300_v24  ;;  %v293_v33 = vld [vmem:[#allocation4 + $0x5f0] sm:$0xff]  ;;  %v7153_v37 = vcombine.low %v296_v23, %v300_v24  ;;  %v7020_v38 = vcombine.high %v161_v30, %v165_v31  ;;  %v7019_v46 = vcombine.low %v161_v30, %v165_v31 }
  0x8e   :  { %2014 = vmatpush2.bf16.msra.mxu0 %v7073_v40  ;;  %v7148_v39 = vcombine.high %v289_v32, %v293_v33  ;;  %v153_v40 = vld [vmem:[#allocation4 + $0x190] sm:$0xff]  ;;  %v7147_v47 = vcombine.low %v289_v32, %v293_v33 }
  0x8f   :  { %2015 = vmatprep.subr.bf16.mxu0 %v7066_v43  ;;  %v281_v43 = vld [vmem:[#allocation4 + $0x590] sm:$0xff] }
  0x90   :  { %2077 = vmatpush2.bf16.msra.mxu1 %v7201_v41  ;;  %v157_v41 = vld [vmem:[#allocation4 + $0x1b0] sm:$0xff] }
  0x91   :  { %2078 = vmatprep.subr.bf16.mxu1 %v7194_v44  ;;  %v285_v44 = vld [vmem:[#allocation4 + $0x5b0] sm:$0xff]  ;;  %v7012_v48 = vcombine.high %v153_v40, %v157_v41  ;;  %v7011_v57 = vcombine.low %v153_v40, %v157_v41 }
  0x92   :  { %2016 = vmatpush2.bf16.msra.mxu0 %v7065_v50  ;;  %v7140_v49 = vcombine.high %v281_v43, %v285_v44  ;;  %v145_v50 = vld [vmem:[#allocation4 + $0x150] sm:$0xff]  ;;  %v7139_v58 = vcombine.low %v281_v43, %v285_v44 }
  0x93   :  { %2017 = vmatprep.subr.bf16.mxu0 %v7058_v52  ;;  %v273_v52 = vld [vmem:[#allocation4 + $0x550] sm:$0xff] }
  0x94   :  { %2079 = vmatpush2.bf16.msra.mxu1 %v7193_v51  ;;  %v149_v51 = vld [vmem:[#allocation4 + $0x170] sm:$0xff] }
  0x95   :  { %2080 = vmatprep.subr.bf16.mxu1 %v7186_v54  ;;  %v277_v54 = vld [vmem:[#allocation4 + $0x570] sm:$0xff]  ;;  %v7004_v60 = vcombine.high %v145_v50, %v149_v51  ;;  %v7003_v2 = vcombine.low %v145_v50, %v149_v51 }
  0x96   :  { %2018 = vmatpush2.bf16.msra.mxu0 %v7057_v62  ;;  %v7132_v61 = vcombine.high %v273_v52, %v277_v54  ;;  %v137_v62 = vld [vmem:[#allocation4 + $0x110] sm:$0xff]  ;;  %v7131_v3 = vcombine.low %v273_v52, %v277_v54 }
  0x97   :  { %2019 = vmatprep.subr.bf16.mxu0 %v7050_v0  ;;  %v265_v0 = vld [vmem:[#allocation4 + $0x510] sm:$0xff] }
  0x98   :  { %2081 = vmatpush2.bf16.msra.mxu1 %v7185_v63  ;;  %v141_v63 = vld [vmem:[#allocation4 + $0x130] sm:$0xff] }
  0x99   :  { %2082 = vmatprep.subr.bf16.mxu1 %v7178_v1  ;;  %v269_v1 = vld [vmem:[#allocation4 + $0x530] sm:$0xff]  ;;  %v6996_v4 = vcombine.high %v137_v62, %v141_v63  ;;  %v6995_v10 = vcombine.low %v137_v62, %v141_v63 }
  0x9a   :  { %2020 = vmatpush2.bf16.msra.mxu0 %v7049_v6  ;;  %v7124_v5 = vcombine.high %v265_v0, %v269_v1  ;;  %v129_v6 = vld [vmem:[#allocation4 + $0xd0] sm:$0xff]  ;;  %v7123_v11 = vcombine.low %v265_v0, %v269_v1 }
  0x9b   :  { %2021 = vmatprep.subr.bf16.mxu0 %v7042_v8  ;;  %v257_v8 = vld [vmem:[#allocation4 + $0x4d0] sm:$0xff] }
  0x9c   :  { %2083 = vmatpush2.bf16.msra.mxu1 %v7177_v7  ;;  %v133_v7 = vld [vmem:[#allocation4 + $0xf0] sm:$0xff] }
  0x9d   :  { %2084 = vmatprep.subr.bf16.mxu1 %v7170_v9  ;;  %v261_v9 = vld [vmem:[#allocation4 + $0x4f0] sm:$0xff]  ;;  %v6988_v13 = vcombine.high %v129_v6, %v133_v7  ;;  %v6987_v20 = vcombine.low %v129_v6, %v133_v7 }
  0x9e   :  { %2022 = vmatpush2.bf16.msra.mxu0 %v7041_v16  ;;  %v7116_v14 = vcombine.high %v257_v8, %v261_v9  ;;  %v121_v16 = vld [vmem:[#allocation4 + $0x90] sm:$0xff]  ;;  %v7115_v21 = vcombine.low %v257_v8, %v261_v9 }
  0x9f   :  { %2023 = vmatprep.subr.bf16.mxu0 %v7034_v18  ;;  %v249_v18 = vld [vmem:[#allocation4 + $0x490] sm:$0xff] }
  0xa0   :  { %2085 = vmatpush2.bf16.msra.mxu1 %v7169_v17  ;;  %v125_v17 = vld [vmem:[#allocation4 + $0xb0] sm:$0xff] }
  0xa1   :  { %2086 = vmatprep.subr.bf16.mxu1 %v7162_v19  ;;  %v253_v19 = vld [vmem:[#allocation4 + $0x4b0] sm:$0xff]  ;;  %v6980_v23 = vcombine.high %v121_v16, %v125_v17  ;;  %v6979_v30 = vcombine.low %v121_v16, %v125_v17 }
  0xa2   :  { %2024 = vmatpush2.bf16.msra.mxu0 %v7033_v26  ;;  %v7108_v24 = vcombine.high %v249_v18, %v253_v19  ;;  %v113_v26 = vld [vmem:[#allocation4 + $0x50] sm:$0xff]  ;;  %v7107_v31 = vcombine.low %v249_v18, %v253_v19 }
  0xa3   :  { %2025 = vmatprep.subr.bf16.mxu0 %v7026_v28  ;;  %v241_v28 = vld [vmem:[#allocation4 + $0x450] sm:$0xff] }
  0xa4   :  { %2087 = vmatpush2.bf16.msra.mxu1 %v7161_v27  ;;  %v117_v27 = vld [vmem:[#allocation4 + $0x70] sm:$0xff] }
  0xa5   :  { %2088 = vmatprep.subr.bf16.mxu1 %v7154_v29  ;;  %v245_v29 = vld [vmem:[#allocation4 + $0x470] sm:$0xff]  ;;  %v6972_v32 = vcombine.high %v113_v26, %v117_v27  ;;  %v6971_v40 = vcombine.low %v113_v26, %v117_v27 }
  0xa6   :  { %2026 = vmatpush2.bf16.msra.mxu0 %v7025_v35  ;;  %v7100_v33 = vcombine.high %v241_v28, %v245_v29  ;;  %v105_v35 = vld [vmem:[#allocation4 + $0x10] sm:$0xff]  ;;  %v7099_v41 = vcombine.low %v241_v28, %v245_v29 }
  0xa7   :  { %2121 = vmatprep.subr.bf16.mxu0 %v7020_v38  ;;  %v233_v38 = vld [vmem:[#allocation4 + $0x410] sm:$0xff] }
  0xa8   :  { %2089 = vmatpush2.bf16.msra.mxu1 %v7153_v37  ;;  %v109_v37 = vld [vmem:[#allocation4 + $0x30] sm:$0xff] }
  0xa9   :  { %2184 = vmatprep.subr.bf16.mxu1 %v7148_v39  ;;  %2028 = vmatmul.mubr.bf16.vlgmr.msra.gmra.mxu0 %v8401_v12  ;;  %v237_v39 = vld [vmem:[#allocation4 + $0x430] sm:$0xff]  ;;  %v6964_v43 = vcombine.high %v105_v35, %v109_v37  ;;  %v6963_v50 = vcombine.low %v105_v35, %v109_v37 }
  0xaa   :  { %2122 = vmatpush1.bf16.msra.mxu0 %v7019_v46  ;;  %2037 = vmatprep.mubr.bf16.mxu0 %v8411_v22  ;;  %v7092_v44 = vcombine.high %v233_v38, %v237_v39  ;;  %v225_v46 = vld [vmem:[#allocation4 + $0x3d0] sm:$0xff] }
  0xab   :  { %2091 = vmatmul.mubr.bf16.vlgmr.msra.gmra.mxu1 %v8406_v15  ;;  %2123 = vmatprep.subr.bf16.mxu0 %v7012_v48  ;;  %v353_v48 = vld [vmem:[#allocation4 + $0x7d0] sm:$0xff] }
  0xac   :  { %2185 = vmatpush1.bf16.msra.mxu1 %v7147_v47  ;;  %2100 = vmatprep.mubr.bf16.mxu1 %v8417_v25  ;;  %v229_v47 = vld [vmem:[#allocation4 + $0x3f0] sm:$0xff] }
  0xad   :  { %2186 = vmatprep.subr.bf16.mxu1 %v7140_v49  ;;  %v357_v49 = vld [vmem:[#allocation4 + $0x7f0] sm:$0xff]  ;;  %v7084_v51 = vcombine.high %v225_v46, %v229_v47 }
  0xae   :  { %2124 = vmatpush1.bf16.msra.mxu0 %v7011_v57  ;;  %v217_v52 = vld [vmem:[#allocation4 + $0x390] sm:$0xff] }
  0xaf   :  { %2125 = vmatprep.subr.bf16.mxu0 %v7004_v60  ;;  %v221_v54 = vld [vmem:[#allocation4 + $0x3b0] sm:$0xff]  ;;  %v7083_v60 = vcombine.low %v225_v46, %v229_v47 }
  0xb0   :  { %2187 = vmatpush1.bf16.msra.mxu1 %v7139_v58  ;;  %v345_v57 = vld [vmem:[#allocation4 + $0x790] sm:$0xff]  ;;  %v7076_v62 = vcombine.high %v217_v52, %v221_v54 }
  0xb1   :  { %2188 = vmatprep.subr.bf16.mxu1 %v7132_v61  ;;  %2038 = vmatmul.mubr.bf16.gmra.mxu0 %v8424_v34  ;;  %v349_v58 = vld [vmem:[#allocation4 + $0x7b0] sm:$0xff]  ;;  %v7211_v61 = vcombine.low %v353_v48, %v357_v49 }
  0xb2   :  { %2126 = vmatpush1.bf16.msra.mxu0 %v7003_v2  ;;  %2047 = vmatprep.mubr.bf16.mxu0 %v8435_v42  ;;  %v7204_v63 = vcombine.high %v345_v57, %v349_v58  ;;  %v209_v0 = vld [vmem:[#allocation4 + $0x350] sm:$0xff] }
  0xb3   :  { %2101 = vmatmul.mubr.bf16.gmra.mxu1 %v8430_v36  ;;  %2127 = vmatprep.subr.bf16.mxu0 %v6996_v4  ;;  %v213_v1 = vld [vmem:[#allocation4 + $0x370] sm:$0xff]  ;;  %v7075_v4 = vcombine.low %v217_v52, %v221_v54 }
  0xb4   :  { %2189 = vmatpush1.bf16.msra.mxu1 %v7131_v3  ;;  %2110 = vmatprep.mubr.bf16.mxu1 %v8441_v45  ;;  %v337_v2 = vld [vmem:[#allocation4 + $0x750] sm:$0xff]  ;;  %v7068_v6 = vcombine.high %v209_v0, %v213_v1 }
  0xb5   :  { %2190 = vmatprep.subr.bf16.mxu1 %v7124_v5  ;;  %v341_v3 = vld [vmem:[#allocation4 + $0x770] sm:$0xff]  ;;  %v7203_v5 = vcombine.low %v345_v57, %v349_v58  ;;  %v162_v57 = vld [vmem:[#allocation4 + $0x1d8] sm:$0xff] }
  0xb6   :  { %2128 = vmatpush1.bf16.msra.mxu0 %v6995_v10  ;;  %v7196_v7 = vcombine.high %v337_v2, %v341_v3  ;;  %v201_v8 = vld [vmem:[#allocation4 + $0x310] sm:$0xff]  ;;  %v166_v58 = vld [vmem:[#allocation4 + $0x1f8] sm:$0xff] }
  0xb7   :  { %2129 = vmatprep.subr.bf16.mxu0 %v6988_v13  ;;  %v205_v9 = vld [vmem:[#allocation4 + $0x330] sm:$0xff]  ;;  %v7067_v13 = vcombine.low %v209_v0, %v213_v1  ;;  %v7022_v0 = vcombine.high %v162_v57, %v166_v58 }
  0xb8   :  { %2191 = vmatpush1.bf16.msra.mxu1 %v7123_v11  ;;  %v329_v10 = vld [vmem:[#allocation4 + $0x710] sm:$0xff]  ;;  %v7060_v16 = vcombine.high %v201_v8, %v205_v9 }
  0xb9   :  { %2192 = vmatprep.subr.bf16.mxu1 %v7116_v14  ;;  %2048 = vmatmul.mubr.bf16.gmra.mxu0 %v8447_v53  ;;  %v333_v11 = vld [vmem:[#allocation4 + $0x730] sm:$0xff]  ;;  %v7195_v14 = vcombine.low %v337_v2, %v341_v3  ;;  %v154_v2 = vld [vmem:[#allocation4 + $0x198] sm:$0xff] }
  0xba   :  { %2130 = vmatpush1.bf16.msra.mxu0 %v6987_v20  ;;  %2153 = vmatprep.mubr.bf16.mxu0 %v8389_v56  ;;  %v7091_v56 = vcombine.low %v233_v38, %v237_v39  ;;  %v7188_v17 = vcombine.high %v329_v10, %v333_v11  ;;  %v193_v18 = vld [vmem:[#allocation4 + $0x2d0] sm:$0xff]  ;;  %v158_v3 = vld [vmem:[#allocation4 + $0x1b8] sm:$0xff] }
  0xbb   :  { %2111 = vmatmul.mubr.bf16.gmra.mxu1 %v8453_v55  ;;  %2131 = vmatprep.subr.bf16.mxu0 %v6980_v23  ;;  %v197_v19 = vld [vmem:[#allocation4 + $0x2f0] sm:$0xff]  ;;  %v7059_v23 = vcombine.low %v201_v8, %v205_v9  ;;  %v7014_v8 = vcombine.high %v154_v2, %v158_v3 }
  0xbc   :  { %2193 = vmatpush1.bf16.msra.mxu1 %v7115_v21  ;;  %2216 = vmatprep.mubr.bf16.mxu1 %v8394_v59  ;;  %v7212_v59 = vcombine.high %v353_v48, %v357_v49  ;;  %v321_v20 = vld [vmem:[#allocation4 + $0x6d0] sm:$0xff]  ;;  %v7052_v26 = vcombine.high %v193_v18, %v197_v19 }
  0xbd   :  { %2194 = vmatprep.subr.bf16.mxu1 %v7108_v24  ;;  %v325_v21 = vld [vmem:[#allocation4 + $0x6f0] sm:$0xff]  ;;  %v7187_v24 = vcombine.low %v329_v10, %v333_v11  ;;  %v146_v10 = vld [vmem:[#allocation4 + $0x158] sm:$0xff] }
  0xbe   :  { %2132 = vmatpush1.bf16.msra.mxu0 %v6979_v30  ;;  %v7180_v27 = vcombine.high %v321_v20, %v325_v21  ;;  %v185_v28 = vld [vmem:[#allocation4 + $0x290] sm:$0xff]  ;;  %v150_v11 = vld [vmem:[#allocation4 + $0x178] sm:$0xff] }
  0xbf   :  { %2133 = vmatprep.subr.bf16.mxu0 %v6972_v32  ;;  %v189_v29 = vld [vmem:[#allocation4 + $0x2b0] sm:$0xff]  ;;  %v7051_v32 = vcombine.low %v193_v18, %v197_v19  ;;  %v7006_v18 = vcombine.high %v146_v10, %v150_v11 }
  0xc0   :  { %2195 = vmatpush1.bf16.msra.mxu1 %v7107_v31  ;;  %v313_v30 = vld [vmem:[#allocation4 + $0x690] sm:$0xff]  ;;  %v7044_v35 = vcombine.high %v185_v28, %v189_v29 }
  0xc1   :  { %2196 = vmatprep.subr.bf16.mxu1 %v7100_v33  ;;  %v317_v31 = vld [vmem:[#allocation4 + $0x6b0] sm:$0xff]  ;;  %v7179_v33 = vcombine.low %v321_v20, %v325_v21  ;;  %v138_v20 = vld [vmem:[#allocation4 + $0x118] sm:$0xff] }
  0xc2   :  { %2134 = vmatpush1.bf16.msra.mxu0 %v6971_v40  ;;  %v7172_v37 = vcombine.high %v313_v30, %v317_v31  ;;  %v177_v38 = vld [vmem:[#allocation4 + $0x250] sm:$0xff]  ;;  %v142_v21 = vld [vmem:[#allocation4 + $0x138] sm:$0xff] }
  0xc3   :  { %2135 = vmatprep.subr.bf16.mxu0 %v6964_v43  ;;  %v181_v39 = vld [vmem:[#allocation4 + $0x270] sm:$0xff]  ;;  %v7043_v43 = vcombine.low %v185_v28, %v189_v29  ;;  %v130_v28 = vld [vmem:[#allocation4 + $0xd8] sm:$0xff] }
  0xc4   :  { %2197 = vmatpush1.bf16.msra.mxu1 %v7099_v41  ;;  %v305_v40 = vld [vmem:[#allocation4 + $0x650] sm:$0xff]  ;;  %v7036_v46 = vcombine.high %v177_v38, %v181_v39  ;;  %v134_v29 = vld [vmem:[#allocation4 + $0xf8] sm:$0xff] }
  0xc5   :  { %2198 = vmatprep.subr.bf16.mxu1 %v7092_v44  ;;  %v309_v41 = vld [vmem:[#allocation4 + $0x670] sm:$0xff]  ;;  %v7171_v44 = vcombine.low %v313_v30, %v317_v31  ;;  %v258_v30 = vld [vmem:[#allocation4 + $0x4d8] sm:$0xff] }
  0xc6   :  { %2136 = vmatpush1.bf16.msra.mxu0 %v6963_v50  ;;  %v7164_v47 = vcombine.high %v305_v40, %v309_v41  ;;  %v169_v48 = vld [vmem:[#allocation4 + $0x210] sm:$0xff]  ;;  %v262_v31 = vld [vmem:[#allocation4 + $0x4f8] sm:$0xff] }
  0xc7   :  { %2137 = vmatprep.subr.bf16.mxu0 %v7084_v51  ;;  %v173_v49 = vld [vmem:[#allocation4 + $0x230] sm:$0xff]  ;;  %v7035_v51 = vcombine.low %v177_v38, %v181_v39  ;;  %v250_v38 = vld [vmem:[#allocation4 + $0x498] sm:$0xff] }
  0xc8   :  { %2199 = vmatpush1.bf16.msra.mxu1 %v7091_v56  ;;  %v297_v50 = vld [vmem:[#allocation4 + $0x610] sm:$0xff]  ;;  %v7028_v52 = vcombine.high %v169_v48, %v173_v49  ;;  %v254_v39 = vld [vmem:[#allocation4 + $0x4b8] sm:$0xff] }
  0xc9   :  { %2200 = vmatprep.subr.bf16.mxu1 %v7212_v59  ;;  %v301_v56 = vld [vmem:[#allocation4 + $0x630] sm:$0xff]  ;;  %v7163_v59 = vcombine.low %v305_v40, %v309_v41  ;;  %v7117_v40 = vcombine.low %v258_v30, %v262_v31  ;;  %v7110_v41 = vcombine.high %v250_v38, %v254_v39 }
  0xca   :  { %2138 = vmatpush2.bf16.msra.mxu0 %v7083_v60  ;;  %v7156_v54 = vcombine.high %v297_v50, %v301_v56  ;;  %v290_v60 = vld [vmem:[#allocation4 + $0x5d8] sm:$0xff] }
  0xcb   :  { %2139 = vmatprep.subr.bf16.mxu0 %v7076_v62  ;;  %v7027_v62 = vcombine.low %v169_v48, %v173_v49 }
  0xcc   :  { %2201 = vmatpush2.bf16.msra.mxu1 %v7211_v61  ;;  %v294_v61 = vld [vmem:[#allocation4 + $0x5f8] sm:$0xff] }
  0xcd   :  { %2202 = vmatprep.subr.bf16.mxu1 %v7204_v63  ;;  %v7155_v63 = vcombine.low %v297_v50, %v301_v56  ;;  %v7150_v1 = vcombine.high %v290_v60, %v294_v61  ;;  %v106_v50 = vld [vmem:[#allocation4 + $0x18] sm:$0xff] }
  0xce   :  { %2140 = vmatpush2.bf16.msra.mxu0 %v7075_v4  ;;  %v282_v4 = vld [vmem:[#allocation4 + $0x598] sm:$0xff] }
  0xcf   :  { %2141 = vmatprep.subr.bf16.mxu0 %v7068_v6  ;;  %v7021_v6 = vcombine.low %v162_v57, %v166_v58  ;;  %v110_v56 = vld [vmem:[#allocation4 + $0x38] sm:$0xff] }
  0xd0   :  { %2203 = vmatpush2.bf16.msra.mxu1 %v7203_v5  ;;  %v286_v5 = vld [vmem:[#allocation4 + $0x5b8] sm:$0xff]  ;;  %v6966_v57 = vcombine.high %v106_v50, %v110_v56 }
  0xd1   :  { %2204 = vmatprep.subr.bf16.mxu1 %v7196_v7  ;;  %v7149_v7 = vcombine.low %v290_v60, %v294_v61  ;;  %v7142_v9 = vcombine.high %v282_v4, %v286_v5  ;;  %v226_v60 = vld [vmem:[#allocation4 + $0x3d8] sm:$0xff] }
  0xd2   :  { %2142 = vmatpush2.bf16.msra.mxu0 %v7067_v13  ;;  %v274_v13 = vld [vmem:[#allocation4 + $0x558] sm:$0xff] }
  0xd3   :  { %2143 = vmatprep.subr.bf16.mxu0 %v7060_v16  ;;  %v7013_v16 = vcombine.low %v154_v2, %v158_v3  ;;  %v230_v61 = vld [vmem:[#allocation4 + $0x3f8] sm:$0xff] }
  0xd4   :  { %2205 = vmatpush2.bf16.msra.mxu1 %v7195_v14  ;;  %v278_v14 = vld [vmem:[#allocation4 + $0x578] sm:$0xff]  ;;  %v7086_v2 = vcombine.high %v226_v60, %v230_v61 }
  0xd5   :  { %2206 = vmatprep.subr.bf16.mxu1 %v7188_v17  ;;  %v7141_v17 = vcombine.low %v282_v4, %v286_v5  ;;  %v7134_v19 = vcombine.high %v274_v13, %v278_v14  ;;  %v218_v4 = vld [vmem:[#allocation4 + $0x398] sm:$0xff] }
  0xd6   :  { %2144 = vmatpush2.bf16.msra.mxu0 %v7059_v23  ;;  %v266_v23 = vld [vmem:[#allocation4 + $0x518] sm:$0xff] }
  0xd7   :  { %2145 = vmatprep.subr.bf16.mxu0 %v7052_v26  ;;  %v6998_v26 = vcombine.high %v138_v20, %v142_v21  ;;  %v222_v5 = vld [vmem:[#allocation4 + $0x3b8] sm:$0xff] }
  0xd8   :  { %2207 = vmatpush2.bf16.msra.mxu1 %v7187_v24  ;;  %v270_v24 = vld [vmem:[#allocation4 + $0x538] sm:$0xff] }
  0xd9   :  { %2208 = vmatprep.subr.bf16.mxu1 %v7180_v27  ;;  %v7126_v27 = vcombine.high %v266_v23, %v270_v24 }
  0xda   :  { %2146 = vmatpush2.bf16.msra.mxu0 %v7051_v32  ;;  %v6990_v32 = vcombine.high %v130_v28, %v134_v29 }
  0xdb   :  { %2147 = vmatprep.subr.bf16.mxu0 %v7044_v35  ;;  %v122_v35 = vld [vmem:[#allocation4 + $0x98] sm:$0xff] }
  0xdc   :  { %2209 = vmatpush2.bf16.msra.mxu1 %v7179_v33  ;;  %v7118_v33 = vcombine.high %v258_v30, %v262_v31  ;;  %v194_v30 = vld [vmem:[#allocation4 + $0x2d8] sm:$0xff] }
  0xdd   :  { %2210 = vmatprep.subr.bf16.mxu1 %v7172_v37  ;;  %v126_v37 = vld [vmem:[#allocation4 + $0xb8] sm:$0xff] }
  0xde   :  { %2148 = vmatpush2.bf16.msra.mxu0 %v7043_v43  ;;  %v114_v43 = vld [vmem:[#allocation4 + $0x58] sm:$0xff] }
  0xdf   :  { %2149 = vmatprep.subr.bf16.mxu0 %v7036_v46  ;;  %v242_v46 = vld [vmem:[#allocation4 + $0x458] sm:$0xff] }
  0xe0   :  { %2211 = vmatpush2.bf16.msra.mxu1 %v7171_v44  ;;  %v118_v44 = vld [vmem:[#allocation4 + $0x78] sm:$0xff] }
  0xe1   :  { %2212 = vmatprep.subr.bf16.mxu1 %v7164_v47  ;;  %v246_v47 = vld [vmem:[#allocation4 + $0x478] sm:$0xff]  ;;  %v6974_v48 = vcombine.high %v114_v43, %v118_v44 }
  0xe2   :  { %2150 = vmatpush2.bf16.msra.mxu0 %v7035_v51  ;;  %v7102_v49 = vcombine.high %v242_v46, %v246_v47  ;;  %v8225_v51 = vld [vmem:[%s11011_s0 + $0x4] ss:$16 sps:$4 sm:$0xff]   ;;  %v198_v31 = vld [vmem:[#allocation4 + $0x2f8] sm:$0xff] }
  0xe3   :  { %2151 = vmatprep.subr.bf16.mxu0 %v7028_v52  ;;  %v238_v52 = vld [vmem:[#allocation4 + $0x438] sm:$0xff] }
  0xe4   :  { %2213 = vmatpush2.bf16.msra.mxu1 %v7163_v59  ;;  %v234_v59 = vld [vmem:[#allocation4 + $0x418] sm:$0xff] }
  0xe5   :  { %2214 = vmatprep.subr.bf16.mxu1 %v7156_v54  ;;  %v7101_v54 = vcombine.low %v242_v46, %v246_v47  ;;  %v7094_v58 = vcombine.high %v234_v59, %v238_v52  ;;  %v178_v46 = vld [vmem:[#allocation4 + $0x258] sm:$0xff] }
  0xe6   :  { %2152 = vmatpush2.bf16.msra.mxu0 %v7027_v62  ;;  %v354_v62 = vld [vmem:[#allocation4 + $0x7d8] sm:$0xff] }
  0xe7   :  { %2247 = vmatprep.subr.bf16.mxu0 %v7022_v0  ;;  %v6965_v0 = vcombine.low %v106_v50, %v110_v56  ;;  %v182_v47 = vld [vmem:[#allocation4 + $0x278] sm:$0xff] }
  0xe8   :  { %2215 = vmatpush2.bf16.msra.mxu1 %v7155_v63  ;;  %v358_v63 = vld [vmem:[#allocation4 + $0x7f8] sm:$0xff]  ;;  %v7038_v56 = vcombine.high %v178_v46, %v182_v47 }
  0xe9   :  { %2310 = vmatprep.subr.bf16.mxu1 %v7150_v1  ;;  %2154 = vmatmul.mubr.bf16.vlgmr.msra.gmra.mxu0 %v8401_v12  ;;  %v7005_v12 = vcombine.low %v146_v10, %v150_v11  ;;  %v7093_v1 = vcombine.low %v234_v59, %v238_v52  ;;  %v7214_v3 = vcombine.high %v354_v62, %v358_v63  ;;  %v170_v59 = vld [vmem:[#allocation4 + $0x218] sm:$0xff] }
  0xea   :  { %2248 = vmatpush1.bf16.msra.mxu0 %v7021_v6  ;;  %2163 = vmatprep.mubr.bf16.mxu0 %v8411_v22  ;;  %v6997_v22 = vcombine.low %v138_v20, %v142_v21  ;;  %v346_v6 = vld [vmem:[#allocation4 + $0x798] sm:$0xff]  ;;  %v7078_v10 = vcombine.high %v218_v4, %v222_v5 }
  0xeb   :  { %2217 = vmatmul.mubr.bf16.vlgmr.msra.gmra.mxu1 %v8406_v15  ;;  %2249 = vmatprep.subr.bf16.mxu0 %v7014_v8  ;;  %v7133_v15 = vcombine.low %v274_v13, %v278_v14  ;;  %v7085_v8 = vcombine.low %v226_v60, %v230_v61  ;;  %v210_v13 = vld [vmem:[#allocation4 + $0x358] sm:$0xff] }
  0xec   :  { %2311 = vmatpush1.bf16.msra.mxu1 %v7149_v7  ;;  %2226 = vmatprep.mubr.bf16.mxu1 %v8417_v25  ;;  %v7125_v25 = vcombine.low %v266_v23, %v270_v24  ;;  %v350_v7 = vld [vmem:[#allocation4 + $0x7b8] sm:$0xff] }
  0xed   :  { %2312 = vmatprep.subr.bf16.mxu1 %v7142_v9  ;;  %v7213_v9 = vcombine.low %v354_v62, %v358_v63  ;;  %v7206_v11 = vcombine.high %v346_v6, %v350_v7  ;;  %v214_v14 = vld [vmem:[#allocation4 + $0x378] sm:$0xff]  ;;  %v415_v62 = vld [vmem:[%s11015_s4 + $0x1c0] sm:$0xff] }
  0xee   :  { %2250 = vmatpush1.bf16.msra.mxu0 %v7013_v16  ;;  %v338_v16 = vld [vmem:[#allocation4 + $0x758] sm:$0xff]  ;;  %v7070_v20 = vcombine.high %v210_v13, %v214_v14  ;;  %v419_v63 = vld [vmem:[%s11015_s4 + $0x1e0] sm:$0xff] }
  0xef   :  { %2251 = vmatprep.subr.bf16.mxu0 %v7006_v18  ;;  %v7077_v18 = vcombine.low %v218_v4, %v222_v5  ;;  %v202_v23 = vld [vmem:[#allocation4 + $0x318] sm:$0xff]  ;;  %v8506_v5 = vld [vmem:[%s11016_s5] sm:$0xff] }
  0xf0   :  { %2313 = vmatpush1.bf16.msra.mxu1 %v7141_v17  ;;  %v342_v17 = vld [vmem:[#allocation4 + $0x778] sm:$0xff] }
  0xf1   :  { %2314 = vmatprep.subr.bf16.mxu1 %v7134_v19  ;;  %2164 = vmatmul.mubr.bf16.gmra.mxu0 %v8424_v34  ;;  %v6989_v34 = vcombine.low %v130_v28, %v134_v29  ;;  %v7205_v19 = vcombine.low %v346_v6, %v350_v7  ;;  %v7198_v21 = vcombine.high %v338_v16, %v342_v17  ;;  %v206_v24 = vld [vmem:[#allocation4 + $0x338] sm:$0xff] }
  0xf2   :  { %2252 = vmatpush1.bf16.msra.mxu0 %v7005_v12  ;;  %2173 = vmatprep.mubr.bf16.mxu0 %v8435_v42  ;;  %v6981_v42 = vcombine.low %v122_v35, %v126_v37  ;;  %v330_v12 = vld [vmem:[#allocation4 + $0x718] sm:$0xff]  ;;  %v7062_v28 = vcombine.high %v202_v23, %v206_v24  ;;  %v8508_v6 = vcombine.high %v415_v62, %v419_v63 }
  0xf3   :  { %2227 = vmatmul.mubr.bf16.gmra.mxu1 %v8430_v36  ;;  %2253 = vmatprep.subr.bf16.mxu0 %v6998_v26  ;;  %v6982_v36 = vcombine.high %v122_v35, %v126_v37  ;;  %v7069_v26 = vcombine.low %v210_v13, %v214_v14  ;;  %v7054_v35 = vcombine.high %v194_v30, %v198_v31  ;;  %v174_v52 = vld [vmem:[#allocation4 + $0x238] sm:$0xff]  ;;  %v412_v13 = vld [vmem:[%s11015_s4 + $0x1a8] sm:$0xff] }
  0xf4   :  { %2315 = vmatpush1.bf16.msra.mxu1 %v7133_v15  ;;  %2236 = vmatprep.mubr.bf16.mxu1 %v8441_v45  ;;  %v7109_v45 = vcombine.low %v250_v38, %v254_v39  ;;  %v334_v15 = vld [vmem:[#allocation4 + $0x738] sm:$0xff]  ;;  %v7030_v60 = vcombine.high %v170_v59, %v174_v52  ;;  %11427 = vst [vmem:[#allocation12_spill] sm:$0xff] %v8508_v6 }
  0xf5   :  { %2316 = vmatprep.subr.bf16.mxu1 %v7126_v27  ;;  %v7197_v27 = vcombine.low %v338_v16, %v342_v17  ;;  %v7190_v29 = vcombine.high %v330_v12, %v334_v15  ;;  %v186_v38 = vld [vmem:[#allocation4 + $0x298] sm:$0xff]  ;;  %v8530_v16 = vcombine.low %v415_v62, %v419_v63 }
  0xf6   :  { %2254 = vmatpush1.bf16.msra.mxu0 %v6997_v22  ;;  %v322_v22 = vld [vmem:[#allocation4 + $0x6d8] sm:$0xff] }
  0xf7   :  { %2255 = vmatprep.subr.bf16.mxu0 %v6990_v32  ;;  %v7061_v32 = vcombine.low %v202_v23, %v206_v24  ;;  %v190_v39 = vld [vmem:[#allocation4 + $0x2b8] sm:$0xff]  ;;  %11429 = vst [vmem:[#allocation14_spill] sm:$0xff] %v8530_v16  ;;  %v403_v23 = vld [vmem:[%s11015_s4 + $0x160] sm:$0xff] }
  0xf8   :  { %2317 = vmatpush1.bf16.msra.mxu1 %v7125_v25  ;;  %v326_v25 = vld [vmem:[#allocation4 + $0x6f8] sm:$0xff] }
  0xf9   :  { %2318 = vmatprep.subr.bf16.mxu1 %v7118_v33  ;;  %2174 = vmatmul.mubr.bf16.gmra.mxu0 %v8447_v53  ;;  %v8226_v53 = vld [vmem:[%s11011_s0 + $0xc] ss:$16 sps:$4 sm:$0xff]   ;;  %v7189_v33 = vcombine.low %v330_v12, %v334_v15  ;;  %v7182_v37 = vcombine.high %v322_v22, %v326_v25  ;;  %v8227_v12 = vld [vmem:[%s11011_s0] ss:$16 sps:$4 sm:$0xff]   ;;  %v8232_v63 = vld [vmem:[%s11011_s0 + $0x28] ss:$16 sps:$4 sm:$0xff]  }
  0xfa   :  { %2256 = vmatpush1.bf16.msra.mxu0 %v6989_v34  ;;  %2279 = vmatprep.mubr.bf16.mxu0 %v8225_v51  ;;  %v314_v34 = vld [vmem:[#allocation4 + $0x698] sm:$0xff]  ;;  %v400_v15 = vld [vmem:[%s11015_s4 + $0x148] sm:$0xff] }
  0xfb   :  { %2237 = vmatmul.mubr.bf16.gmra.mxu1 %v8453_v55  ;;  %2257 = vmatprep.subr.bf16.mxu0 %v6982_v36  ;;  %v6973_v55 = vcombine.low %v114_v43, %v118_v44  ;;  %v7053_v36 = vcombine.low %v194_v30, %v198_v31  ;;  %v7046_v43 = vcombine.high %v186_v38, %v190_v39 }
  0xfc   :  { %2319 = vmatpush1.bf16.msra.mxu1 %v7117_v40  ;;  %2342 = vmatprep.mubr.bf16.mxu1 %v8226_v53  ;;  %v318_v40 = vld [vmem:[#allocation4 + $0x6b8] sm:$0xff] }
  0xfd   :  { %2320 = vmatprep.subr.bf16.mxu1 %v7110_v41  ;;  %v7181_v41 = vcombine.low %v322_v22, %v326_v25  ;;  %v7174_v44 = vcombine.high %v314_v34, %v318_v40  ;;  %v7173_v50 = vcombine.low %v314_v34, %v318_v40  ;;  %v298_v53 = vld [vmem:[#allocation4 + $0x618] sm:$0xff]  ;;  %v8229_v34 = vld [vmem:[%s11011_s0 + $0x24] ss:$16 sps:$4 sm:$0xff]  }
  0xfe   :  { %2258 = vmatpush1.bf16.msra.mxu0 %v6981_v42  ;;  %v306_v42 = vld [vmem:[#allocation4 + $0x658] sm:$0xff] }
  0xff   :  { %2259 = vmatprep.subr.bf16.mxu0 %v6974_v48  ;;  %v7045_v48 = vcombine.low %v186_v38, %v190_v39  ;;  %v391_v38 = vld [vmem:[%s11015_s4 + $0x100] sm:$0xff] }
 0x100   :  { %2321 = vmatpush1.bf16.msra.mxu1 %v7109_v45  ;;  %v310_v45 = vld [vmem:[#allocation4 + $0x678] sm:$0xff]  ;;  %v395_v39 = vld [vmem:[%s11015_s4 + $0x120] sm:$0xff] }
 0x101   :  { %2322 = vmatprep.subr.bf16.mxu1 %v7102_v49  ;;  %v489_v49 = vlaneseq  ;;  %v7166_v51 = vcombine.high %v306_v42, %v310_v45 }
 0x102   :  { %2260 = vmatpush1.bf16.msra.mxu0 %v6973_v55  ;;  %v302_v55 = vld [vmem:[#allocation4 + $0x638] sm:$0xff] }
 0x103   :  { %2261 = vmatprep.subr.bf16.mxu0 %v6966_v57  ;;  %v8488_v57 = vshrl.u32 %v489_v49, 7  ;;  %v7158_v61 = vcombine.high %v298_v53, %v302_v55  ;;  %v7157_v4 = vcombine.low %v298_v53, %v302_v55  ;;  %v8609_v49 = vcombine.high %v391_v38, %v395_v39  ;;  %v384_v53 = vld [vmem:[%s11015_s4 + $0xc8] sm:$0xff] }
 0x104   :  { %2323 = vmatpush1.bf16.msra.mxu1 %v7101_v54  ;;  %v7037_v54 = vcombine.low %v178_v46, %v182_v47  ;;  %v388_v55 = vld [vmem:[%s11015_s4 + $0xe8] sm:$0xff] }
 0x105   :  { %2324 = vmatprep.subr.bf16.mxu1 %v7094_v58  ;;  %11426 = vst [vmem:[#allocation11_spill] sm:$0xff] %v8488_v57  ;;  %v7165_v58 = vcombine.low %v306_v42, %v310_v45  ;;  %11440 = vst [vmem:[#allocation25_spill] sm:$0xff] %v8609_v49 }
 0x106   :  { %2262 = vmatpush1.bf16.msra.mxu0 %v6965_v0  ;;  %v416_v0 = vld [vmem:[%s11015_s4 + $0x1c8] sm:$0xff] }
 0x107   :  { %2263 = vmatprep.subr.bf16.mxu0 %v7086_v2  ;;  %v7029_v2 = vcombine.low %v170_v59, %v174_v52  ;;  %v383_v59 = vld [vmem:[%s11015_s4 + $0xc0] sm:$0xff] }
 0x108   :  { %2325 = vmatpush1.bf16.msra.mxu1 %v7093_v1  ;;  %v420_v1 = vld [vmem:[%s11015_s4 + $0x1e8] sm:$0xff]  ;;  %v387_v52 = vld [vmem:[%s11015_s4 + $0xe0] sm:$0xff] }
 0x109   :  { %2326 = vmatprep.subr.bf16.mxu1 %v7214_v3  ;;  %v11026_v3 = vsub.s32 0, %v8488_v57  ;;  %v8510_v7 = vcombine.high %v416_v0, %v420_v1  ;;  %v8533_v17 = vcombine.low %v416_v0, %v420_v1  ;;  %v8644_v1 = vcombine.high %v383_v59, %v387_v52 }
 0x10a   :  { %2264 = vmatpush2.bf16.msra.mxu0 %v7085_v8  ;;  %v11025_v8 = vsub.s32 1, %v8488_v57 }
 0x10b   :  { %2265 = vmatprep.subr.bf16.mxu0 %v7078_v10  ;;  %11428 = vst [vmem:[#allocation13_spill] sm:$0xff] %v8510_v7  ;;  %v411_v10 = vld [vmem:[%s11015_s4 + $0x1a0] sm:$0xff]  ;;  %v8528_v14 = vrot.slane %v8506_v5, %v11026_v3  ;;  %11446 = vst [vmem:[#allocation31_spill] sm:$0xff] %v8644_v1 }
 0x10c   :  { %2327 = vmatpush2.bf16.msra.mxu1 %v7213_v9  ;;  %v407_v9 = vld [vmem:[%s11015_s4 + $0x180] sm:$0xff] }
 0x10d   :  { %2328 = vmatprep.subr.bf16.mxu1 %v7206_v11  ;;  %v408_v11 = vld [vmem:[%s11015_s4 + $0x188] sm:$0xff]  ;;  %v8565_v30 = vcombine.low %v407_v9, %v411_v10  ;;  %v463_v3 = vld [vmem:[%s11015_s4 + $0x340] sm:$0xff] }
 0x10e   :  { %2266 = vmatpush2.bf16.msra.mxu0 %v7077_v18  ;;  %v8535_v18 = vcombine.high %v407_v9, %v411_v10  ;;  %v8569_v22 = vcombine.low %v408_v11, %v412_v13  ;;  %v375_v9 = vld [vmem:[%s11015_s4 + $0x80] sm:$0xff] }
 0x10f   :  { %2267 = vmatprep.subr.bf16.mxu0 %v7070_v20  ;;  %v8543_v20 = vcombine.high %v408_v11, %v412_v13  ;;  %11431 = vst [vmem:[#allocation16_spill] sm:$0xff] %v8565_v30  ;;  %v379_v10 = vld [vmem:[%s11015_s4 + $0xa0] sm:$0xff]  ;;  %v376_v11 = vld [vmem:[%s11015_s4 + $0x88] sm:$0xff] }
 0x110   :  { %2329 = vmatpush2.bf16.msra.mxu1 %v7205_v19  ;;  %v8541_v19 = vrot.slane %v8506_v5, %v11025_v8  ;;  %11432 = vst [vmem:[#allocation17_spill] sm:$0xff] %v8569_v22 }
 0x111   :  { %2330 = vmatprep.subr.bf16.mxu1 %v7198_v21  ;;  %v399_v21 = vld [vmem:[%s11015_s4 + $0x140] sm:$0xff] }
 0x112   :  { %2268 = vmatpush2.bf16.msra.mxu0 %v7069_v26  ;;  %11430 = vst [vmem:[#allocation15_spill] sm:$0xff] %v8541_v19  ;;  %v404_v26 = vld [vmem:[%s11015_s4 + $0x168] sm:$0xff]  ;;  %v8571_v25 = vcombine.high %v399_v21, %v403_v23  ;;  %v8601_v42 = vcombine.low %v399_v21, %v403_v23 }
 0x113   :  { %2269 = vmatprep.subr.bf16.mxu0 %v7062_v28 }
 0x114   :  { %2331 = vmatpush2.bf16.msra.mxu1 %v7197_v27  ;;  %11433 = vst [vmem:[#allocation18_spill] sm:$0xff] %v8571_v25  ;;  %11437 = vst [vmem:[#allocation22_spill] sm:$0xff] %v8601_v42 }
 0x115   :  { %2332 = vmatprep.subr.bf16.mxu1 %v7190_v29  ;;  %v8228_v29 = vld [vmem:[%s11011_s0 + $0x8] ss:$16 sps:$4 sm:$0xff]  }
 0x116   :  { %2270 = vmatpush2.bf16.msra.mxu0 %v7061_v32 }
 0x117   :  { %2271 = vmatprep.subr.bf16.mxu0 %v7054_v35 }
 0x118   :  { %2333 = vmatpush2.bf16.msra.mxu1 %v7189_v33 }
 0x119   :  { %2334 = vmatprep.subr.bf16.mxu1 %v7182_v37  ;;  %v8577_v37 = vcombine.high %v400_v15, %v404_v26 }
 0x11a   :  { %2272 = vmatpush2.bf16.msra.mxu0 %v7053_v36  ;;  %v392_v36 = vld [vmem:[%s11015_s4 + $0x108] sm:$0xff] }
 0x11b   :  { %2273 = vmatprep.subr.bf16.mxu0 %v7046_v43  ;;  %11435 = vst [vmem:[#allocation20_spill] sm:$0xff] %v8577_v37  ;;  %v8230_v43 = vld [vmem:[%s11011_s0 + $0x2c] ss:$16 sps:$4 sm:$0xff]  }
 0x11c   :  { %2335 = vmatpush2.bf16.msra.mxu1 %v7181_v41  ;;  %v396_v41 = vld [vmem:[%s11015_s4 + $0x128] sm:$0xff] }
 0x11d   :  { %2336 = vmatprep.subr.bf16.mxu1 %v7174_v44  ;;  %v8642_v0 = vcombine.low %v392_v36, %v396_v41 }
 0x11e   :  { %2274 = vmatpush2.bf16.msra.mxu0 %v7045_v48  ;;  %v8607_v48 = vcombine.low %v400_v15, %v404_v26  ;;  %v8234_v26 = vld [vmem:[%s11011_s0 + $0x4c] ss:$16 sps:$4 sm:$0xff]  }
 0x11f   :  { %2275 = vmatprep.subr.bf16.mxu0 %v7038_v56  ;;  %11445 = vst [vmem:[#allocation30_spill] sm:$0xff] %v8642_v0 }
 0x120   :  { %2337 = vmatpush2.bf16.msra.mxu1 %v7173_v50  ;;  %11439 = vst [vmem:[#allocation24_spill] sm:$0xff] %v8607_v48 }
 0x121   :  { %2338 = vmatprep.subr.bf16.mxu1 %v7166_v51  ;;  %v8616_v51 = vcombine.high %v392_v36, %v396_v41  ;;  %v367_v36 = vld [vmem:[%s11015_s4 + $0x40] sm:$0xff] }
 0x122   :  { %2276 = vmatpush2.bf16.msra.mxu0 %v7037_v54  ;;  %v371_v41 = vld [vmem:[%s11015_s4 + $0x60] sm:$0xff] }
 0x123   :  { %2277 = vmatprep.subr.bf16.mxu0 %v7030_v60  ;;  %11443 = vst [vmem:[#allocation28_spill] sm:$0xff] %v8616_v51  ;;  %v8634_v60 = vcombine.low %v391_v38, %v395_v39  ;;  %v8684_v38 = vcombine.low %v384_v53, %v388_v55  ;;  %v8686_v39 = vcombine.high %v375_v9, %v379_v10 }
 0x124   :  { %2339 = vmatpush2.bf16.msra.mxu1 %v7165_v58  ;;  %v8231_v58 = vld [vmem:[%s11011_s0 + $0x20] ss:$16 sps:$4 sm:$0xff]  }
 0x125   :  { %2340 = vmatprep.subr.bf16.mxu1 %v7158_v61  ;;  %11444 = vst [vmem:[#allocation29_spill] sm:$0xff] %v8634_v60  ;;  %11451 = vst [vmem:[#allocation36_spill] sm:$0xff] %v8684_v38 }
 0x126   :  { %2278 = vmatpush2.bf16.msra.mxu0 %v7029_v2  ;;  %11452 = vst [vmem:[#allocation37_spill] sm:$0xff] %v8686_v39 }
 0x127   :  { %3015 = vmatprep.subr.bf16.mxu0 %v8508_v6 }
 0x128   :  { %2341 = vmatpush2.bf16.msra.mxu1 %v7157_v4  ;;  %v8647_v4 = vcombine.high %v384_v53, %v388_v55  ;;  %v8235_v55 = vld [vmem:[%s11011_s0 + $0x40] ss:$16 sps:$4 sm:$0xff]  }
 0x129   :  { %3058 = vmatprep.subr.bf16.mxu1 %v8510_v7  ;;  %v1903_v24 = vpop.f32.mrf.mxu0  ;;  %2280 = vmatmul.mubr.bf16.vlgmr.msra.gmra.mxu0 %v8227_v12  ;;  %v380_v12 = vld [vmem:[%s11015_s4 + $0xa8] sm:$0xff] }
 0x12a   :  { %v1904_v27 = vadd.f32 %v1903_v24, %v8528_v14  ;;  %3016 = vmatpush1.bf16.msra.mxu0 %v8530_v16  ;;  %2289 = vmatprep.mubr.bf16.mxu0 %v8229_v34  ;;  %11447 = vst [vmem:[#allocation32_spill] sm:$0xff] %v8647_v4  ;;  %v8233_v24 = vld [vmem:[%s11011_s0 + $0x44] ss:$16 sps:$4 sm:$0xff]  }
 0x12b   :  { %v1966_v28 = vpop.f32.mrf.mxu1  ;;  %2343 = vmatmul.mubr.bf16.vlgmr.msra.gmra.mxu1 %v8228_v29  ;;  %v1905_v31 = vpop.f32.mrf.mxu0  ;;  %3017 = vmatprep.subr.bf16.mxu0 %v8535_v18  ;;  %v8677_v29 = vcombine.low %v383_v59, %v387_v52  ;;  %v368_v59 = vld [vmem:[%s11015_s4 + $0x48] sm:$0xff] }
 0x12c   :  { %3059 = vmatpush1.bf16.msra.mxu1 %v8533_v17  ;;  %v8573_v32 = vadd.f32 %v1966_v28, %v1904_v27  ;;  %v1906_v33 = vadd.f32 %v1905_v31, %v8541_v19  ;;  %2352 = vmatprep.mubr.bf16.mxu1 %v8230_v43  ;;  %v96_v27 = vld [vmem:[%s11012_s1 + $0x8] sm:$0xff]  ;;  %v98_v28 = vld [vmem:[%s11012_s1 + $0x18] sm:$0xff] }
 0x12d   :  { %v1968_v35 = vpop.f32.mrf.mxu1  ;;  %3060 = vmatprep.subr.bf16.mxu1 %v8543_v20  ;;  %v1907_v40 = vpop.f32.mrf.mxu0  ;;  %11449 = vst [vmem:[#allocation34_spill] sm:$0xff] %v8677_v29  ;;  %v372_v52 = vld [vmem:[%s11015_s4 + $0x68] sm:$0xff] }
 0x12e   :  { %11434 = vst [vmem:[#allocation19_spill] sm:$0xff] %v8573_v32  ;;  %v8597_v44 = vadd.f32 %v1968_v35, %v1906_v33  ;;  %v1908_v46 = vadd.f32 %v1907_v40, %v8528_v14  ;;  %3018 = vmatpush1.bf16.msra.mxu0 %v8565_v30  ;;  %v8691_v40 = vcombine.high %v376_v11, %v380_v12  ;;  %v439_v32 = vld [vmem:[%s11015_s4 + $0x280] sm:$0xff] }
 0x12f   :  { %v1970_v47 = vpop.f32.mrf.mxu1  ;;  %v8604_v45 = vpop.f32.mrf.mxu0  ;;  %3019 = vmatprep.subr.bf16.mxu0 %v8571_v25 }
 0x130   :  { %11436 = vst [vmem:[#allocation21_spill] sm:$0xff] %v8597_v44  ;;  %3061 = vmatpush1.bf16.msra.mxu1 %v8569_v22  ;;  %11438 = vst [vmem:[#allocation23_spill] sm:$0xff] %v8604_v45  ;;  %v8611_v50 = vadd.f32 %v1970_v47, %v1908_v46  ;;  %v8703_v47 = vpack.c.bf16 %v98_v28, %v96_v27  ;;  %v8748_v28 = vcombine.low %v367_v36, %v371_v41 }
 0x131   :  { %v8613_v56 = vpop.f32.mrf.mxu1  ;;  %3062 = vmatprep.subr.bf16.mxu1 %v8577_v37  ;;  %v1913_v54 = vpop.f32.mrf.mxu0  ;;  %2290 = vmatmul.mubr.bf16.gmra.mxu0 %v8231_v58  ;;  %11454 = vst [vmem:[#allocation39_spill] sm:$0xff] %v8691_v40 }
 0x132   :  { %11441 = vst [vmem:[#allocation26_spill] sm:$0xff] %v8611_v50  ;;  %11442 = vst [vmem:[#allocation27_spill] sm:$0xff] %v8613_v56  ;;  %3020 = vmatpush1.bf16.msra.mxu0 %v8601_v42  ;;  %v1914_v61 = vadd.f32 %v1913_v54, %v8528_v14  ;;  %2299 = vmatprep.mubr.bf16.mxu0 %v8233_v24  ;;  %v8715_v54 = vcombine.low %v375_v9, %v379_v10  ;;  %v359_v10 = vld [vmem:[%s11015_s4] sm:$0xff] }
 0x133   :  { %v1976_v62 = vpop.f32.mrf.mxu1  ;;  %2353 = vmatmul.mubr.bf16.gmra.mxu1 %v8232_v63  ;;  %3021 = vmatprep.subr.bf16.mxu0 %v8609_v49  ;;  %v1915_v2 = vpop.f32.mrf.mxu0  ;;  %v8723_v63 = vcombine.low %v376_v11, %v380_v12  ;;  %v8728_v9 = vcombine.high %v368_v59, %v372_v52  ;;  %v360_v12 = vld [vmem:[%s11015_s4 + $0x8] sm:$0xff]  ;;  %11462 = vst [vmem:[#allocation47_spill] sm:$0xff] %v8748_v28 }
 0x134   :  { %3063 = vmatpush1.bf16.msra.mxu1 %v8607_v48  ;;  %v1916_v13 = vadd.f32 %v1915_v2, %v8541_v19  ;;  %v8659_v21 = vadd.f32 %v1976_v62, %v1914_v61  ;;  %2362 = vmatprep.mubr.bf16.mxu1 %v8234_v26  ;;  %11457 = vst [vmem:[#allocation42_spill] sm:$0xff] %v8715_v54  ;;  %v8236_v62 = vld [vmem:[%s11011_s0 + $0x48] ss:$16 sps:$4 sm:$0xff]  }
 0x135   :  { %3064 = vmatprep.subr.bf16.mxu1 %v8616_v51  ;;  %v1978_v23 = vpop.f32.mrf.mxu1  ;;  %v1917_v15 = vpop.f32.mrf.mxu0  ;;  %11458 = vst [vmem:[#allocation43_spill] sm:$0xff] %v8723_v63  ;;  %v8725_v2 = vcombine.high %v367_v36, %v371_v41  ;;  %11460 = vst [vmem:[#allocation45_spill] sm:$0xff] %v8728_v9  ;;  %v364_v26 = vld [vmem:[%s11015_s4 + $0x28] sm:$0xff]  ;;  %v479_v36 = vld [vmem:[%s11015_s4 + $0x3c0] sm:$0xff] }
 0x136   :  { %11448 = vst [vmem:[#allocation33_spill] sm:$0xff] %v8659_v21  ;;  %3022 = vmatpush1.bf16.msra.mxu0 %v8634_v60  ;;  %v1918_v31 = vadd.f32 %v1917_v15, %v8528_v14  ;;  %v8680_v33 = vadd.f32 %v1978_v23, %v1916_v13  ;;  %v363_v23 = vld [vmem:[%s11015_s4 + $0x20] sm:$0xff] }
 0x137   :  { %v1980_v35 = vpop.f32.mrf.mxu1  ;;  %3023 = vmatprep.subr.bf16.mxu0 %v8644_v1  ;;  %v8688_v34 = vpop.f32.mrf.mxu0  ;;  %11459 = vst [vmem:[#allocation44_spill] sm:$0xff] %v8725_v2 }
 0x138   :  { %11450 = vst [vmem:[#allocation35_spill] sm:$0xff] %v8680_v33  ;;  %3065 = vmatpush1.bf16.msra.mxu1 %v8642_v0  ;;  %11453 = vst [vmem:[#allocation38_spill] sm:$0xff] %v8688_v34  ;;  %v8699_v43 = vadd.f32 %v1980_v35, %v1918_v31  ;;  %v447_v34 = vld [vmem:[%s11015_s4 + $0x2c0] sm:$0xff] }
 0x139   :  { %3066 = vmatprep.subr.bf16.mxu1 %v8647_v4  ;;  %v8701_v46 = vpop.f32.mrf.mxu1  ;;  %v1923_v53 = vpop.f32.mrf.mxu0  ;;  %2300 = vmatmul.mubr.bf16.gmra.mxu0 %v8235_v55  ;;  %v8757_v55 = vcombine.high %v359_v10, %v363_v23 }
 0x13a   :  { %11455 = vst [vmem:[#allocation40_spill] sm:$0xff] %v8699_v43  ;;  %11456 = vst [vmem:[#allocation41_spill] sm:$0xff] %v8701_v46  ;;  %3024 = vmatpush1.bf16.msra.mxu0 %v8677_v29  ;;  %v1924_v58 = vadd.f32 %v1923_v53, %v8528_v14  ;;  %3047 = vmatprep.mubr.bf16.mxu0 %v8703_v47  ;;  %v8755_v53 = vcombine.low %v368_v59, %v372_v52  ;;  %v480_v59 = vld [vmem:[%s11015_s4 + $0x3c8] sm:$0xff]  ;;  %v455_v43 = vld [vmem:[%s11015_s4 + $0x300] sm:$0xff] }
 0x13b   :  { %v1986_v61 = vpop.f32.mrf.mxu1  ;;  %2363 = vmatmul.mubr.bf16.gmra.mxu1 %v8236_v62  ;;  %3025 = vmatprep.subr.bf16.mxu0 %v8686_v39  ;;  %v1925_v13 = vpop.f32.mrf.mxu0  ;;  %11465 = vst [vmem:[#allocation50_spill] sm:$0xff] %v8757_v55  ;;  %v484_v52 = vld [vmem:[%s11015_s4 + $0x3e8] sm:$0xff]  ;;  %v8777_v62 = vcombine.low %v359_v10, %v363_v23  ;;  %v475_v10 = vld [vmem:[%s11015_s4 + $0x3a0] sm:$0xff] }
 0x13c   :  { %3067 = vmatpush1.bf16.msra.mxu1 %v8684_v38  ;;  %v1926_v24 = vadd.f32 %v1925_v13, %v8541_v19  ;;  %v8737_v15 = vadd.f32 %v1986_v61, %v1924_v58  ;;  %3090 = vmatprep.mubr.bf16.mxu1 %v8703_v47  ;;  %11464 = vst [vmem:[#allocation49_spill] sm:$0xff] %v8755_v53  ;;  %v472_v23 = vld [vmem:[%s11015_s4 + $0x388] sm:$0xff] }
 0x13d   :  { %3068 = vmatprep.subr.bf16.mxu1 %v8691_v40  ;;  %v1988_v11 = vpop.f32.mrf.mxu1  ;;  %v1927_v27 = vpop.f32.mrf.mxu0  ;;  %v8760_v61 = vcombine.high %v360_v12, %v364_v26  ;;  %11468 = vst [vmem:[#allocation53_spill] sm:$0xff] %v8777_v62  ;;  %v8781_v13 = vcombine.low %v360_v12, %v364_v26  ;;  %v476_v12 = vld [vmem:[%s11015_s4 + $0x3a8] sm:$0xff] }
 0x13e   :  { %11461 = vst [vmem:[#allocation46_spill] sm:$0xff] %v8737_v15  ;;  %3026 = vmatpush1.bf16.msra.mxu0 %v8715_v54  ;;  %v1928_v31 = vadd.f32 %v1927_v27, %v8528_v14  ;;  %v8751_v35 = vadd.f32 %v1988_v11, %v1926_v24  ;;  %v483_v14 = vld [vmem:[%s11015_s4 + $0x3e0] sm:$0xff]  ;;  %v8786_v11 = vcombine.high %v480_v59, %v484_v52 }
 0x13f   :  { %3027 = vmatprep.subr.bf16.mxu0 %v8725_v2  ;;  %v1990_v58 = vpop.f32.mrf.mxu1  ;;  %11466 = vst [vmem:[#allocation51_spill] sm:$0xff] %v8760_v61  ;;  %11469 = vst [vmem:[#allocation54_spill] sm:$0xff] %v8781_v13  ;;  %v8783_v24 = vcombine.high %v479_v36, %v483_v14  ;;  %v471_v27 = vld [vmem:[%s11015_s4 + $0x380] sm:$0xff]  ;;  %v8801_v26 = vcombine.low %v479_v36, %v483_v14  ;;  %v8810_v8 = vcombine.high %v472_v23, %v476_v12  ;;  %v464_v14 = vld [vmem:[%s11015_s4 + $0x348] sm:$0xff] }
 0x140   :  { %11463 = vst [vmem:[#allocation48_spill] sm:$0xff] %v8751_v35  ;;  %3069 = vmatpush1.bf16.msra.mxu1 %v8723_v63  ;;  %v8768_v41 = vadd.f32 %v1990_v58, %v1928_v31  ;;  %11471 = vst [vmem:[#allocation56_spill] sm:$0xff] %v8786_v11  ;;  %v8805_v31 = vcombine.low %v480_v59, %v484_v52  ;;  %v8807_v58 = vcombine.high %v471_v27, %v475_v10  ;;  %v467_v36 = vld [vmem:[%s11015_s4 + $0x360] sm:$0xff]  ;;  %v468_v59 = vld [vmem:[%s11015_s4 + $0x368] sm:$0xff] }
 0x141   :  { %3070 = vmatprep.subr.bf16.mxu1 %v8728_v9  ;;  %11470 = vst [vmem:[#allocation55_spill] sm:$0xff] %v8783_v24  ;;  %11472 = vst [vmem:[#allocation57_spill] sm:$0xff] %v8801_v26  ;;  %v8825_v52 = vcombine.low %v471_v27, %v475_v10  ;;  %v8831_v35 = vcombine.high %v463_v3, %v467_v36  ;;  %v8834_v15 = vcombine.high %v464_v14, %v468_v59  ;;  %v459_v27 = vld [vmem:[%s11015_s4 + $0x320] sm:$0xff]  ;;  %v456_v10 = vld [vmem:[%s11015_s4 + $0x308] sm:$0xff] }
 0x142   :  { %11467 = vst [vmem:[#allocation52_spill] sm:$0xff] %v8768_v41  ;;  %3028 = vmatpush1.bf16.msra.mxu0 %v8748_v28  ;;  %11473 = vst [vmem:[#allocation58_spill] sm:$0xff] %v8805_v31  ;;  %v8829_v41 = vcombine.low %v472_v23, %v476_v12  ;;  %v460_v23 = vld [vmem:[%s11015_s4 + $0x328] sm:$0xff]  ;;  %v8849_v12 = vcombine.low %v463_v3, %v467_v36  ;;  %v8853_v46 = vcombine.low %v464_v14, %v468_v59  ;;  %v451_v3 = vld [vmem:[%s11015_s4 + $0x2e0] sm:$0xff] }
 0x143   :  { %3029 = vmatprep.subr.bf16.mxu0 %v8757_v55  ;;  %11474 = vst [vmem:[#allocation59_spill] sm:$0xff] %v8807_v58  ;;  %11475 = vst [vmem:[#allocation60_spill] sm:$0xff] %v8810_v8  ;;  %v8855_v33 = vcombine.high %v455_v43, %v459_v27  ;;  %v8858_v21 = vcombine.high %v456_v10, %v460_v23  ;;  %v448_v36 = vld [vmem:[%s11015_s4 + $0x2c8] sm:$0xff]  ;;  %v8873_v59 = vcombine.low %v455_v43, %v459_v27  ;;  %v443_v43 = vld [vmem:[%s11015_s4 + $0x2a0] sm:$0xff] }
 0x144   :  { %3071 = vmatpush1.bf16.msra.mxu1 %v8755_v53  ;;  %11476 = vst [vmem:[#allocation61_spill] sm:$0xff] %v8825_v52  ;;  %11477 = vst [vmem:[#allocation62_spill] sm:$0xff] %v8829_v41  ;;  %v452_v14 = vld [vmem:[%s11015_s4 + $0x2e8] sm:$0xff]  ;;  %v8877_v50 = vcombine.low %v456_v10, %v460_v23  ;;  %v8879_v56 = vcombine.high %v447_v34, %v451_v3  ;;  %v8897_v23 = vcombine.low %v447_v34, %v451_v3  ;;  %v435_v34 = vld [vmem:[%s11015_s4 + $0x260] sm:$0xff] }
 0x145   :  { %3072 = vmatprep.subr.bf16.mxu1 %v8760_v61  ;;  %11478 = vst [vmem:[#allocation63_spill] sm:$0xff] %v8831_v35  ;;  %11479 = vst [vmem:[#allocation64_spill] sm:$0xff] %v8834_v15  ;;  %v8882_v44 = vcombine.high %v448_v36, %v452_v14  ;;  %v440_v27 = vld [vmem:[%s11015_s4 + $0x288] sm:$0xff]  ;;  %v8901_v45 = vcombine.low %v448_v36, %v452_v14  ;;  %v8903_v19 = vcombine.high %v439_v32, %v443_v43 }
 0x146   :  { %3030 = vmatpush1.bf16.msra.mxu0 %v8777_v62  ;;  %11480 = vst [vmem:[#allocation65_spill] sm:$0xff] %v8849_v12  ;;  %11481 = vst [vmem:[#allocation66_spill] sm:$0xff] %v8853_v46  ;;  %v444_v10 = vld [vmem:[%s11015_s4 + $0x2a8] sm:$0xff]  ;;  %v8921_v14 = vcombine.low %v439_v32, %v443_v43  ;;  %v427_v32 = vld [vmem:[%s11015_s4 + $0x220] sm:$0xff] }
 0x147   :  { %3031 = vmatprep.subr.bf16.mxu0 %v8783_v24  ;;  %11482 = vst [vmem:[#allocation67_spill] sm:$0xff] %v8855_v33  ;;  %11483 = vst [vmem:[#allocation68_spill] sm:$0xff] %v8858_v21  ;;  %v432_v3 = vld [vmem:[%s11015_s4 + $0x248] sm:$0xff] }
 0x148   :  { %3073 = vmatpush1.bf16.msra.mxu1 %v8781_v13  ;;  %11484 = vst [vmem:[#allocation69_spill] sm:$0xff] %v8873_v59  ;;  %11485 = vst [vmem:[#allocation70_spill] sm:$0xff] %v8877_v50  ;;  %v436_v36 = vld [vmem:[%s11015_s4 + $0x268] sm:$0xff] }
 0x149   :  { %3074 = vmatprep.subr.bf16.mxu1 %v8786_v11  ;;  %11486 = vst [vmem:[#allocation71_spill] sm:$0xff] %v8879_v56  ;;  %11487 = vst [vmem:[#allocation72_spill] sm:$0xff] %v8882_v44  ;;  %v424_v43 = vld [vmem:[%s11015_s4 + $0x208] sm:$0xff] }
 0x14a   :  { %3032 = vmatpush2.bf16.msra.mxu0 %v8801_v26  ;;  %11488 = vst [vmem:[#allocation73_spill] sm:$0xff] %v8897_v23  ;;  %11489 = vst [vmem:[#allocation74_spill] sm:$0xff] %v8901_v45 }
 0x14b   :  { %3033 = vmatprep.subr.bf16.mxu0 %v8807_v58  ;;  %11490 = vst [vmem:[#allocation75_spill] sm:$0xff] %v8903_v19  ;;  %11492 = vst [vmem:[#allocation77_spill] sm:$0xff] %v8921_v14 }
 0x14c   :  { %3075 = vmatpush2.bf16.msra.mxu1 %v8805_v31 }
 0x14d   :  { %3076 = vmatprep.subr.bf16.mxu1 %v8810_v8 }
 0x14e   :  { %3034 = vmatpush2.bf16.msra.mxu0 %v8825_v52 }
 0x14f   :  { %3035 = vmatprep.subr.bf16.mxu0 %v8831_v35 }
 0x150   :  { %3077 = vmatpush2.bf16.msra.mxu1 %v8829_v41 }
 0x151   :  { %3078 = vmatprep.subr.bf16.mxu1 %v8834_v15  ;;  %v9018_v15 = vpop.f32.mrf.mxu1 }
 0x152   :  { %3036 = vmatpush2.bf16.msra.mxu0 %v8849_v12  ;;  %v9010_v12 = vpop.f32.mrf.mxu0  ;;  %11509 = vst [vmem:[#allocation93_spill] sm:$0xff] %v9018_v15  ;;  %v402_v15 = vld [vmem:[%s11015_s4 + $0x158] sm:$0xff] }
 0x153   :  { %3037 = vmatprep.subr.bf16.mxu0 %v8855_v33  ;;  %v431_v33 = vld [vmem:[%s11015_s4 + $0x240] sm:$0xff]  ;;  %11506 = vst [vmem:[#allocation90_spill] sm:$0xff] %v9010_v12 }
 0x154   :  { %3079 = vmatpush2.bf16.msra.mxu1 %v8853_v46 }
 0x155   :  { %3080 = vmatprep.subr.bf16.mxu1 %v8858_v21  ;;  %v8906_v21 = vcombine.high %v440_v27, %v444_v10 }
 0x156   :  { %3038 = vmatpush2.bf16.msra.mxu0 %v8873_v59  ;;  %v423_v59 = vld [vmem:[%s11015_s4 + $0x200] sm:$0xff] }
 0x157   :  { %3039 = vmatprep.subr.bf16.mxu0 %v8879_v56  ;;  %11491 = vst [vmem:[#allocation76_spill] sm:$0xff] %v8906_v21  ;;  %v8927_v56 = vcombine.high %v431_v33, %v435_v34 }
 0x158   :  { %3081 = vmatpush2.bf16.msra.mxu1 %v8877_v50  ;;  %v8930_v50 = vcombine.high %v432_v3, %v436_v36 }
 0x159   :  { %3082 = vmatprep.subr.bf16.mxu1 %v8882_v44  ;;  %v8925_v44 = vcombine.low %v440_v27, %v444_v10  ;;  %11494 = vst [vmem:[#allocation79_spill] sm:$0xff] %v8927_v56  ;;  %v428_v27 = vld [vmem:[%s11015_s4 + $0x228] sm:$0xff]  ;;  %v8945_v10 = vcombine.low %v431_v33, %v435_v34  ;;  %v421_v33 = vld [vmem:[%s11015_s4 + $0x1f0] sm:$0xff]  ;;  %v418_v34 = vld [vmem:[%s11015_s4 + $0x1d8] sm:$0xff] }
 0x15a   :  { %3040 = vmatpush2.bf16.msra.mxu0 %v8897_v23  ;;  %11495 = vst [vmem:[#allocation80_spill] sm:$0xff] %v8930_v50  ;;  %v417_v23 = vld [vmem:[%s11015_s4 + $0x1d0] sm:$0xff] }
 0x15b   :  { %3041 = vmatprep.subr.bf16.mxu0 %v8903_v19  ;;  %11493 = vst [vmem:[#allocation78_spill] sm:$0xff] %v8925_v44  ;;  %11496 = vst [vmem:[#allocation81_spill] sm:$0xff] %v8945_v10  ;;  %v8951_v19 = vcombine.high %v423_v59, %v427_v32  ;;  %v8982_v46 = vcombine.high %v417_v23, %v421_v33 }
 0x15c   :  { %3083 = vmatpush2.bf16.msra.mxu1 %v8901_v45  ;;  %v8954_v45 = vcombine.high %v424_v43, %v428_v27 }
 0x15d   :  { %3084 = vmatprep.subr.bf16.mxu1 %v8906_v21  ;;  %v8949_v21 = vcombine.low %v432_v3, %v436_v36  ;;  %11498 = vst [vmem:[#allocation83_spill] sm:$0xff] %v8951_v19  ;;  %v422_v3 = vld [vmem:[%s11015_s4 + $0x1f8] sm:$0xff]  ;;  %v8969_v36 = vcombine.low %v423_v59, %v427_v32  ;;  %11502 = vst [vmem:[#allocation87_spill] sm:$0xff] %v8982_v46  ;;  %v11504_v32 = vsub.s32 2, %v8488_v57 }
 0x15e   :  { %3042 = vmatpush2.bf16.msra.mxu0 %v8921_v14  ;;  %11499 = vst [vmem:[#allocation84_spill] sm:$0xff] %v8954_v45  ;;  %v8980_v14 = vcombine.low %v424_v43, %v428_v27  ;;  %v8985_v59 = vcombine.high %v418_v34, %v422_v3  ;;  %v410_v43 = vld [vmem:[%s11015_s4 + $0x198] sm:$0xff] }
 0x15f   :  { %3043 = vmatprep.subr.bf16.mxu0 %v8927_v56  ;;  %11497 = vst [vmem:[#allocation82_spill] sm:$0xff] %v8949_v21  ;;  %11500 = vst [vmem:[#allocation85_spill] sm:$0xff] %v8969_v36  ;;  %v95_v56 = vld [vmem:[%s11012_s1] sm:$0xff]  ;;  %v414_v27 = vld [vmem:[%s11015_s4 + $0x1b8] sm:$0xff] }
 0x160   :  { %3085 = vmatpush2.bf16.msra.mxu1 %v8925_v44  ;;  %v97_v44 = vld [vmem:[%s11012_s1 + $0x10] sm:$0xff]  ;;  %11501 = vst [vmem:[#allocation86_spill] sm:$0xff] %v8980_v14  ;;  %11503 = vst [vmem:[#allocation88_spill] sm:$0xff] %v8985_v59  ;;  %v9048_v35 = vcombine.low %v410_v43, %v414_v27 }
 0x161   :  { %3086 = vmatprep.subr.bf16.mxu1 %v8930_v50  ;;  %v409_v50 = vld [vmem:[%s11015_s4 + $0x190] sm:$0xff] }
 0x162   :  { %3044 = vmatpush2.bf16.msra.mxu0 %v8945_v10  ;;  %v8994_v10 = vpack.c.bf16 %v97_v44, %v95_v56  ;;  %v9014_v44 = vcombine.low %v418_v34, %v422_v3  ;;  %v405_v34 = vld [vmem:[%s11015_s4 + $0x170] sm:$0xff]  ;;  %11513 = vst [vmem:[#allocation96_spill] sm:$0xff] %v9048_v35 }
 0x163   :  { %3045 = vmatprep.subr.bf16.mxu0 %v8951_v19  ;;  %v9008_v19 = vcombine.low %v417_v23, %v421_v33  ;;  %v9026_v23 = vcombine.high %v410_v43, %v414_v27  ;;  %v401_v33 = vld [vmem:[%s11015_s4 + $0x150] sm:$0xff] }
 0x164   :  { %3087 = vmatpush2.bf16.msra.mxu1 %v8949_v21  ;;  %v413_v21 = vld [vmem:[%s11015_s4 + $0x1b0] sm:$0xff]  ;;  %11507 = vst [vmem:[#allocation91_spill] sm:$0xff] %v9014_v44  ;;  %v9050_v41 = vcombine.high %v401_v33, %v405_v34 }
 0x165   :  { %3088 = vmatprep.subr.bf16.mxu1 %v8954_v45  ;;  %v9006_v45 = vrot.slane %v8506_v5, %v11504_v32  ;;  %11505 = vst [vmem:[#allocation89_spill] sm:$0xff] %v9008_v19  ;;  %v9016_v56 = vcombine.high %v409_v50, %v413_v21  ;;  %11511 = vst [vmem:[#allocation94_spill] sm:$0xff] %v9026_v23 }
 0x166   :  { %3046 = vmatpush2.bf16.msra.mxu0 %v8969_v36  ;;  %v11510_v36 = vsub.s32 3, %v8488_v57  ;;  %11514 = vst [vmem:[#allocation97_spill] sm:$0xff] %v9050_v41 }
 0x167   :  { %3101 = vmatprep.subr.bf16.mxu0 %v8982_v46  ;;  %11508 = vst [vmem:[#allocation92_spill] sm:$0xff] %v9016_v56  ;;  %v9044_v46 = vcombine.low %v409_v50, %v413_v21  ;;  %v393_v50 = vld [vmem:[%s11015_s4 + $0x110] sm:$0xff] }
 0x168   :  { %3089 = vmatpush2.bf16.msra.mxu1 %v8980_v14  ;;  %v9024_v32 = vrot.slane %v8506_v5, %v11510_v36  ;;  %v406_v36 = vld [vmem:[%s11015_s4 + $0x178] sm:$0xff]  ;;  %v397_v21 = vld [vmem:[%s11015_s4 + $0x130] sm:$0xff] }
 0x169   :  { %3144 = vmatprep.subr.bf16.mxu1 %v8985_v59  ;;  %v2029_v3 = vpop.f32.mrf.mxu0  ;;  %3048 = vmatmul.mubr.bf16.vlgmr.msra.gmra.mxu0 %v8994_v10  ;;  %11512 = vst [vmem:[#allocation95_spill] sm:$0xff] %v9044_v46  ;;  %v9056_v58 = vcombine.high %v402_v15, %v406_v36 }
 0x16a   :  { %v2030_v12 = vadd.f32 %v2029_v3, %v9006_v45  ;;  %3102 = vmatpush1.bf16.msra.mxu0 %v9008_v19  ;;  %3133 = vmatprep.mubr.bf16.mxu0 %v8703_v47  ;;  %v9082_v19 = vcombine.low %v402_v15, %v406_v36  ;;  %v386_v15 = vld [vmem:[%s11015_s4 + $0xd8] sm:$0xff] }
 0x16b   :  { %v2092_v59 = vpop.f32.mrf.mxu1  ;;  %3091 = vmatmul.mubr.bf16.vlgmr.msra.gmra.mxu1 %v8994_v10  ;;  %v2031_v14 = vpop.f32.mrf.mxu0  ;;  %3103 = vmatprep.subr.bf16.mxu0 %v9016_v56  ;;  %11516 = vst [vmem:[#allocation99_spill] sm:$0xff] %v9056_v58  ;;  %v9076_v56 = vcombine.low %v401_v33, %v405_v34  ;;  %v385_v33 = vld [vmem:[%s11015_s4 + $0xd0] sm:$0xff] }
 0x16c   :  { %3145 = vmatpush1.bf16.msra.mxu1 %v9014_v44  ;;  %v9052_v52 = vadd.f32 %v2092_v59, %v2030_v12  ;;  %v2032_v3 = vadd.f32 %v2031_v14, %v9024_v32  ;;  %v394_v12 = vld [vmem:[%s11015_s4 + $0x118] sm:$0xff]  ;;  %3176 = vmatprep.mubr.bf16.mxu1 %v8703_v47  ;;  %11520 = vst [vmem:[#allocation103_spill] sm:$0xff] %v9082_v19  ;;  %v389_v34 = vld [vmem:[%s11015_s4 + $0xf0] sm:$0xff] }
 0x16d   :  { %v2094_v8 = vpop.f32.mrf.mxu1  ;;  %3146 = vmatprep.subr.bf16.mxu1 %v9026_v23  ;;  %v2033_v43 = vpop.f32.mrf.mxu0  ;;  %v398_v14 = vld [vmem:[%s11015_s4 + $0x138] sm:$0xff]  ;;  %11518 = vst [vmem:[#allocation101_spill] sm:$0xff] %v9076_v56 }
 0x16e   :  { %11515 = vst [vmem:[#allocation98_spill] sm:$0xff] %v9052_v52  ;;  %v9072_v59 = vadd.f32 %v2094_v8, %v2032_v3  ;;  %v2034_v27 = vadd.f32 %v2033_v43, %v9006_v45  ;;  %3104 = vmatpush1.bf16.msra.mxu0 %v9044_v46  ;;  %v9084_v52 = vcombine.high %v393_v50, %v397_v21 }
 0x16f   :  { %v2096_v23 = vpop.f32.mrf.mxu1  ;;  %v9079_v44 = vpop.f32.mrf.mxu0  ;;  %3105 = vmatprep.subr.bf16.mxu0 %v9050_v41  ;;  %v9091_v3 = vcombine.high %v394_v12, %v398_v14  ;;  %v9106_v43 = vcombine.low %v393_v50, %v397_v21  ;;  %v9111_v41 = vcombine.low %v394_v12, %v398_v14  ;;  %v377_v50 = vld [vmem:[%s11015_s4 + $0x90] sm:$0xff]  ;;  %v378_v14 = vld [vmem:[%s11015_s4 + $0x98] sm:$0xff] }
 0x170   :  { %11517 = vst [vmem:[#allocation100_spill] sm:$0xff] %v9072_v59  ;;  %3147 = vmatpush1.bf16.msra.mxu1 %v9048_v35  ;;  %11519 = vst [vmem:[#allocation102_spill] sm:$0xff] %v9079_v44  ;;  %v9086_v47 = vadd.f32 %v2096_v23, %v2034_v27  ;;  %v390_v23 = vld [vmem:[%s11015_s4 + $0xf8] sm:$0xff]  ;;  %v9113_v35 = vcombine.high %v385_v33, %v389_v34  ;;  %v381_v21 = vld [vmem:[%s11015_s4 + $0xb0] sm:$0xff] }
 0x171   :  { %11521 = vst [vmem:[#allocation104_spill] sm:$0xff] %v9084_v52  ;;  %v9088_v8 = vpop.f32.mrf.mxu1  ;;  %3148 = vmatprep.subr.bf16.mxu1 %v9056_v58  ;;  %11524 = vst [vmem:[#allocation107_spill] sm:$0xff] %v9091_v3  ;;  %v2039_v36 = vpop.f32.mrf.mxu0 }
 0x172   :  { %11522 = vst [vmem:[#allocation105_spill] sm:$0xff] %v9086_v47  ;;  %11523 = vst [vmem:[#allocation106_spill] sm:$0xff] %v9088_v8  ;;  %3106 = vmatpush1.bf16.msra.mxu0 %v9076_v56  ;;  %v2040_v27 = vadd.f32 %v2039_v36, %v9006_v45  ;;  %v9116_v8 = vcombine.high %v386_v15, %v390_v23  ;;  %v9134_v56 = vcombine.low %v385_v33, %v389_v34  ;;  %v373_v33 = vld [vmem:[%s11015_s4 + $0x70] sm:$0xff] }
 0x173   :  { %11525 = vst [vmem:[#allocation108_spill] sm:$0xff] %v9106_v43  ;;  %v2102_v58 = vpop.f32.mrf.mxu1  ;;  %3107 = vmatprep.subr.bf16.mxu0 %v9084_v52  ;;  %11526 = vst [vmem:[#allocation109_spill] sm:$0xff] %v9111_v41  ;;  %v2041_v46 = vpop.f32.mrf.mxu0 }
 0x174   :  { %3149 = vmatpush1.bf16.msra.mxu1 %v9082_v19  ;;  %11527 = vst [vmem:[#allocation110_spill] sm:$0xff] %v9113_v35  ;;  %11528 = vst [vmem:[#allocation111_spill] sm:$0xff] %v9116_v8  ;;  %v2042_v36 = vadd.f32 %v2041_v46, %v9024_v32  ;;  %v9125_v52 = vadd.f32 %v2102_v58, %v2040_v27  ;;  %v9141_v58 = vcombine.low %v386_v15, %v390_v23  ;;  %v370_v23 = vld [vmem:[%s11015_s4 + $0x58] sm:$0xff] }
 0x175   :  { %3150 = vmatprep.subr.bf16.mxu1 %v9091_v3  ;;  %v2104_v12 = vpop.f32.mrf.mxu1  ;;  %v382_v3 = vld [vmem:[%s11015_s4 + $0xb8] sm:$0xff]  ;;  %v2043_v19 = vpop.f32.mrf.mxu0  ;;  %11530 = vst [vmem:[#allocation113_spill] sm:$0xff] %v9134_v56  ;;  %v9143_v27 = vcombine.high %v377_v50, %v381_v21 }
 0x176   :  { %11529 = vst [vmem:[#allocation112_spill] sm:$0xff] %v9125_v52  ;;  %3108 = vmatpush1.bf16.msra.mxu0 %v9106_v43  ;;  %v2044_v47 = vadd.f32 %v2043_v19, %v9006_v45  ;;  %v9137_v59 = vadd.f32 %v2104_v12, %v2042_v36  ;;  %11532 = vst [vmem:[#allocation115_spill] sm:$0xff] %v9141_v58  ;;  %v9146_v44 = vcombine.high %v378_v14, %v382_v3  ;;  %v369_v19 = vld [vmem:[%s11015_s4 + $0x50] sm:$0xff]  ;;  %v374_v12 = vld [vmem:[%s11015_s4 + $0x78] sm:$0xff] }
 0x177   :  { %v2106_v46 = vpop.f32.mrf.mxu1  ;;  %3109 = vmatprep.subr.bf16.mxu0 %v9113_v35  ;;  %11533 = vst [vmem:[#allocation116_spill] sm:$0xff] %v9143_v27  ;;  %v2045_v52 = vpop.f32.mrf.mxu0  ;;  %v9176_v43 = vcombine.high %v370_v23, %v374_v12 }
 0x178   :  { %11531 = vst [vmem:[#allocation114_spill] sm:$0xff] %v9137_v59  ;;  %3151 = vmatpush1.bf16.msra.mxu1 %v9111_v41  ;;  %11534 = vst [vmem:[#allocation117_spill] sm:$0xff] %v9146_v44  ;;  %v2046_v34 = vadd.f32 %v2045_v52, %v9024_v32  ;;  %v9155_v36 = vadd.f32 %v2106_v46, %v2044_v47  ;;  %v9171_v47 = vcombine.low %v378_v14, %v382_v3  ;;  %v362_v14 = vld [vmem:[%s11015_s4 + $0x18] sm:$0xff] }
 0x179   :  { %3152 = vmatprep.subr.bf16.mxu1 %v9116_v8  ;;  %v2108_v15 = vpop.f32.mrf.mxu1  ;;  %v2049_v59 = vpop.f32.mrf.mxu0  ;;  %v9164_v8 = vcombine.low %v377_v50, %v381_v21  ;;  %v9173_v46 = vcombine.high %v369_v19, %v373_v33  ;;  %v365_v50 = vld [vmem:[%s11015_s4 + $0x30] sm:$0xff] }
 0x17a   :  { %11535 = vst [vmem:[#allocation118_spill] sm:$0xff] %v9155_v36  ;;  %3110 = vmatpush1.bf16.msra.mxu0 %v9134_v56  ;;  %v2050_v35 = vadd.f32 %v2049_v59, %v9006_v45  ;;  %v9167_v41 = vadd.f32 %v2108_v15, %v2046_v34  ;;  %v361_v59 = vld [vmem:[%s11015_s4 + $0x10] sm:$0xff]  ;;  %v366_v15 = vld [vmem:[%s11015_s4 + $0x38] sm:$0xff] }
 0x17b   :  { %v2112_v52 = vpop.f32.mrf.mxu1  ;;  %3111 = vmatprep.subr.bf16.mxu0 %v9143_v27  ;;  %v2051_v36 = vpop.f32.mrf.mxu0  ;;  %v9206_v56 = vcombine.high %v362_v14, %v366_v15 }
 0x17c   :  { %11536 = vst [vmem:[#allocation119_spill] sm:$0xff] %v9167_v41  ;;  %3153 = vmatpush1.bf16.msra.mxu1 %v9141_v58  ;;  %v2052_v21 = vadd.f32 %v2051_v36, %v9024_v32  ;;  %v9185_v34 = vadd.f32 %v2112_v52, %v2050_v35  ;;  %v9201_v36 = vcombine.low %v370_v23, %v374_v12  ;;  %v482_v12 = vld [vmem:[%s11015_s4 + $0x3d8] sm:$0xff] }
 0x17d   :  { %3154 = vmatprep.subr.bf16.mxu1 %v9146_v44  ;;  %v2114_v3 = vpop.f32.mrf.mxu1  ;;  %v2053_v41 = vpop.f32.mrf.mxu0  ;;  %v9194_v44 = vcombine.low %v369_v19, %v373_v33  ;;  %v9203_v52 = vcombine.high %v361_v59, %v365_v50  ;;  %11539 = vst [vmem:[#allocation122_spill] sm:$0xff] %v9206_v56 }
 0x17e   :  { %11537 = vst [vmem:[#allocation120_spill] sm:$0xff] %v9185_v34  ;;  %3112 = vmatpush1.bf16.msra.mxu0 %v9164_v8  ;;  %v2054_v27 = vadd.f32 %v2053_v41, %v9006_v45  ;;  %v9197_v58 = vadd.f32 %v2114_v3, %v2052_v21  ;;  %v481_v45 = vld [vmem:[%s11015_s4 + $0x3d0] sm:$0xff]  ;;  %v486_v21 = vld [vmem:[%s11015_s4 + $0x3f8] sm:$0xff]  ;;  %v9224_v3 = vcombine.low %v361_v59, %v365_v50 }
 0x17f   :  { %v2116_v35 = vpop.f32.mrf.mxu1  ;;  %3113 = vmatprep.subr.bf16.mxu0 %v9173_v46  ;;  %v2055_v34 = vpop.f32.mrf.mxu0  ;;  %v485_v41 = vld [vmem:[%s11015_s4 + $0x3f0] sm:$0xff]  ;;  %v474_v50 = vld [vmem:[%s11015_s4 + $0x398] sm:$0xff] }
 0x180   :  { %11538 = vst [vmem:[#allocation121_spill] sm:$0xff] %v9197_v58  ;;  %3155 = vmatpush1.bf16.msra.mxu1 %v9171_v47  ;;  %v2056_v19 = vadd.f32 %v2055_v34, %v9024_v32  ;;  %v9215_v33 = vadd.f32 %v2116_v35, %v2054_v27  ;;  %11541 = vst [vmem:[#allocation124_spill] sm:$0xff] %v9224_v3  ;;  %v9230_v27 = vcombine.low %v362_v14, %v366_v15  ;;  %v477_v59 = vld [vmem:[%s11015_s4 + $0x3b0] sm:$0xff]  ;;  %v478_v14 = vld [vmem:[%s11015_s4 + $0x3b8] sm:$0xff] }
 0x181   :  { %3156 = vmatprep.subr.bf16.mxu1 %v9176_v43  ;;  %v2118_v23 = vpop.f32.mrf.mxu1  ;;  %v9232_v34 = vcombine.high %v481_v45, %v485_v41  ;;  %v9235_v35 = vcombine.high %v482_v12, %v486_v21  ;;  %v9250_v15 = vcombine.low %v481_v45, %v485_v41  ;;  %v469_v45 = vld [vmem:[%s11015_s4 + $0x370] sm:$0xff]  ;;  %v466_v41 = vld [vmem:[%s11015_s4 + $0x358] sm:$0xff] }
 0x182   :  { %11540 = vst [vmem:[#allocation123_spill] sm:$0xff] %v9215_v33  ;;  %3114 = vmatpush1.bf16.msra.mxu0 %v9194_v44  ;;  %v9226_v58 = vadd.f32 %v2118_v23, %v2056_v19  ;;  %11543 = vst [vmem:[#allocation126_spill] sm:$0xff] %v9230_v27  ;;  %v473_v33 = vld [vmem:[%s11015_s4 + $0x390] sm:$0xff]  ;;  %v9254_v19 = vcombine.low %v482_v12, %v486_v21  ;;  %v470_v12 = vld [vmem:[%s11015_s4 + $0x378] sm:$0xff] }
 0x183   :  { %3115 = vmatprep.subr.bf16.mxu0 %v9203_v52  ;;  %11544 = vst [vmem:[#allocation127_spill] sm:$0xff] %v9232_v34  ;;  %11545 = vst [vmem:[#allocation128_spill] sm:$0xff] %v9235_v35  ;;  %v9256_v23 = vcombine.high %v473_v33, %v477_v59  ;;  %v9274_v21 = vcombine.low %v473_v33, %v477_v59  ;;  %v461_v33 = vld [vmem:[%s11015_s4 + $0x330] sm:$0xff]  ;;  %v458_v59 = vld [vmem:[%s11015_s4 + $0x318] sm:$0xff] }
 0x184   :  { %11542 = vst [vmem:[#allocation125_spill] sm:$0xff] %v9226_v58  ;;  %3157 = vmatpush1.bf16.msra.mxu1 %v9201_v36  ;;  %11546 = vst [vmem:[#allocation129_spill] sm:$0xff] %v9250_v15  ;;  %v9259_v58 = vcombine.high %v474_v50, %v478_v14 }
 0x185   :  { %3158 = vmatprep.subr.bf16.mxu1 %v9206_v56  ;;  %11547 = vst [vmem:[#allocation130_spill] sm:$0xff] %v9254_v19  ;;  %11548 = vst [vmem:[#allocation131_spill] sm:$0xff] %v9256_v23  ;;  %v465_v56 = vld [vmem:[%s11015_s4 + $0x350] sm:$0xff] }
 0x186   :  { %3116 = vmatpush1.bf16.msra.mxu0 %v9224_v3  ;;  %11549 = vst [vmem:[#allocation132_spill] sm:$0xff] %v9259_v58  ;;  %11550 = vst [vmem:[#allocation133_spill] sm:$0xff] %v9274_v21  ;;  %v457_v3 = vld [vmem:[%s11015_s4 + $0x310] sm:$0xff] }
 0x187   :  { %3117 = vmatprep.subr.bf16.mxu0 %v9232_v34  ;;  %v9280_v34 = vcombine.high %v465_v56, %v469_v45 }
 0x188   :  { %3159 = vmatpush1.bf16.msra.mxu1 %v9230_v27  ;;  %v9283_v27 = vcombine.high %v466_v41, %v470_v12 }
 0x189   :  { %3160 = vmatprep.subr.bf16.mxu1 %v9235_v35  ;;  %v9278_v35 = vcombine.low %v474_v50, %v478_v14  ;;  %11552 = vst [vmem:[#allocation135_spill] sm:$0xff] %v9280_v34  ;;  %v462_v50 = vld [vmem:[%s11015_s4 + $0x338] sm:$0xff]  ;;  %v9298_v14 = vcombine.low %v465_v56, %v469_v45  ;;  %v453_v56 = vld [vmem:[%s11015_s4 + $0x2f0] sm:$0xff] }
 0x18a   :  { %3118 = vmatpush2.bf16.msra.mxu0 %v9250_v15  ;;  %11553 = vst [vmem:[#allocation136_spill] sm:$0xff] %v9283_v27  ;;  %v449_v15 = vld [vmem:[%s11015_s4 + $0x2d0] sm:$0xff]  ;;  %v450_v45 = vld [vmem:[%s11015_s4 + $0x2d8] sm:$0xff] }
 0x18b   :  { %3119 = vmatprep.subr.bf16.mxu0 %v9256_v23  ;;  %11551 = vst [vmem:[#allocation134_spill] sm:$0xff] %v9278_v35  ;;  %11554 = vst [vmem:[#allocation137_spill] sm:$0xff] %v9298_v14  ;;  %v9304_v23 = vcombine.high %v457_v3, %v461_v33 }
 0x18c   :  { %3161 = vmatpush2.bf16.msra.mxu1 %v9254_v19  ;;  %v9307_v19 = vcombine.high %v458_v59, %v462_v50 }
 0x18d   :  { %3162 = vmatprep.subr.bf16.mxu1 %v9259_v58  ;;  %v9302_v58 = vcombine.low %v466_v41, %v470_v12  ;;  %11556 = vst [vmem:[#allocation139_spill] sm:$0xff] %v9304_v23  ;;  %v454_v41 = vld [vmem:[%s11015_s4 + $0x2f8] sm:$0xff]  ;;  %v9322_v12 = vcombine.low %v457_v3, %v461_v33  ;;  %v445_v3 = vld [vmem:[%s11015_s4 + $0x2b0] sm:$0xff] }
 0x18e   :  { %3120 = vmatpush2.bf16.msra.mxu0 %v9274_v21  ;;  %11557 = vst [vmem:[#allocation140_spill] sm:$0xff] %v9307_v19  ;;  %v441_v21 = vld [vmem:[%s11015_s4 + $0x290] sm:$0xff]  ;;  %v442_v33 = vld [vmem:[%s11015_s4 + $0x298] sm:$0xff] }
 0x18f   :  { %3121 = vmatprep.subr.bf16.mxu0 %v9280_v34  ;;  %11555 = vst [vmem:[#allocation138_spill] sm:$0xff] %v9302_v58  ;;  %11558 = vst [vmem:[#allocation141_spill] sm:$0xff] %v9322_v12  ;;  %v9328_v34 = vcombine.high %v449_v15, %v453_v56 }
 0x190   :  { %3163 = vmatpush2.bf16.msra.mxu1 %v9278_v35  ;;  %v9331_v35 = vcombine.high %v450_v45, %v454_v41 }
 0x191   :  { %3164 = vmatprep.subr.bf16.mxu1 %v9283_v27  ;;  %v9326_v27 = vcombine.low %v458_v59, %v462_v50  ;;  %11560 = vst [vmem:[#allocation143_spill] sm:$0xff] %v9328_v34  ;;  %v446_v59 = vld [vmem:[%s11015_s4 + $0x2b8] sm:$0xff]  ;;  %v9346_v50 = vcombine.low %v449_v15, %v453_v56  ;;  %v437_v15 = vld [vmem:[%s11015_s4 + $0x270] sm:$0xff] }
 0x192   :  { %3122 = vmatpush2.bf16.msra.mxu0 %v9298_v14  ;;  %11561 = vst [vmem:[#allocation144_spill] sm:$0xff] %v9331_v35  ;;  %v433_v14 = vld [vmem:[%s11015_s4 + $0x250] sm:$0xff]  ;;  %v434_v56 = vld [vmem:[%s11015_s4 + $0x258] sm:$0xff] }
 0x193   :  { %3123 = vmatprep.subr.bf16.mxu0 %v9304_v23  ;;  %11559 = vst [vmem:[#allocation142_spill] sm:$0xff] %v9326_v27  ;;  %11562 = vst [vmem:[#allocation145_spill] sm:$0xff] %v9346_v50  ;;  %v9352_v23 = vcombine.high %v441_v21, %v445_v3 }
 0x194   :  { %3165 = vmatpush2.bf16.msra.mxu1 %v9302_v58  ;;  %v9355_v58 = vcombine.high %v442_v33, %v446_v59 }
 0x195   :  { %3166 = vmatprep.subr.bf16.mxu1 %v9307_v19  ;;  %v9350_v19 = vcombine.low %v450_v45, %v454_v41  ;;  %11564 = vst [vmem:[#allocation147_spill] sm:$0xff] %v9352_v23  ;;  %v438_v45 = vld [vmem:[%s11015_s4 + $0x278] sm:$0xff]  ;;  %v9370_v41 = vcombine.low %v441_v21, %v445_v3  ;;  %v429_v21 = vld [vmem:[%s11015_s4 + $0x230] sm:$0xff] }
 0x196   :  { %3124 = vmatpush2.bf16.msra.mxu0 %v9322_v12  ;;  %11565 = vst [vmem:[#allocation148_spill] sm:$0xff] %v9355_v58  ;;  %v425_v12 = vld [vmem:[%s11015_s4 + $0x210] sm:$0xff]  ;;  %v426_v3 = vld [vmem:[%s11015_s4 + $0x218] sm:$0xff] }
 0x197   :  { %3125 = vmatprep.subr.bf16.mxu0 %v9328_v34  ;;  %11563 = vst [vmem:[#allocation146_spill] sm:$0xff] %v9350_v19  ;;  %11566 = vst [vmem:[#allocation149_spill] sm:$0xff] %v9370_v41  ;;  %v9376_v34 = vcombine.high %v433_v14, %v437_v15 }
 0x198   :  { %3167 = vmatpush2.bf16.msra.mxu1 %v9326_v27  ;;  %v9379_v27 = vcombine.high %v434_v56, %v438_v45 }
 0x199   :  { %3168 = vmatprep.subr.bf16.mxu1 %v9331_v35  ;;  %v9374_v35 = vcombine.low %v442_v33, %v446_v59  ;;  %11568 = vst [vmem:[#allocation151_spill] sm:$0xff] %v9376_v34  ;;  %v430_v33 = vld [vmem:[%s11015_s4 + $0x238] sm:$0xff]  ;;  %v9394_v59 = vcombine.low %v433_v14, %v437_v15  ;;  %v11182_v15 = vsub.s32 5, %v8488_v57 }
 0x19a   :  { %3126 = vmatpush2.bf16.msra.mxu0 %v9346_v50  ;;  %11569 = vst [vmem:[#allocation152_spill] sm:$0xff] %v9379_v27  ;;  %v9406_v50 = vcombine.low %v425_v12, %v429_v21  ;;  %v9411_v14 = vcombine.low %v426_v3, %v430_v33 }
 0x19b   :  { %3127 = vmatprep.subr.bf16.mxu0 %v9352_v23  ;;  %11567 = vst [vmem:[#allocation150_spill] sm:$0xff] %v9374_v35  ;;  %11570 = vst [vmem:[#allocation153_spill] sm:$0xff] %v9394_v59  ;;  %v9400_v23 = vcombine.high %v425_v12, %v429_v21  ;;  %v9426_v12 = vrot.slane %v8506_v5, %v11182_v15 }
 0x19c   :  { %3169 = vmatpush2.bf16.msra.mxu1 %v9350_v19  ;;  %v9403_v19 = vcombine.high %v426_v3, %v430_v33  ;;  %11574 = vst [vmem:[#allocation157_spill] sm:$0xff] %v9406_v50  ;;  %11575 = vst [vmem:[#allocation158_spill] sm:$0xff] %v9411_v14 }
 0x19d   :  { %3170 = vmatprep.subr.bf16.mxu1 %v9355_v58  ;;  %v9398_v58 = vcombine.low %v434_v56, %v438_v45  ;;  %11572 = vst [vmem:[#allocation155_spill] sm:$0xff] %v9400_v23 }
 0x19e   :  { %3128 = vmatpush2.bf16.msra.mxu0 %v9370_v41  ;;  %11573 = vst [vmem:[#allocation156_spill] sm:$0xff] %v9403_v19  ;;  %v11181_v41 = vsub.s32 4, %v8488_v57 }
 0x19f   :  { %3129 = vmatprep.subr.bf16.mxu0 %v9376_v34  ;;  %11571 = vst [vmem:[#allocation154_spill] sm:$0xff] %v9398_v58 }
 0x1a0   :  { %3171 = vmatpush2.bf16.msra.mxu1 %v9374_v35  ;;  %v9419_v56 = vrot.slane %v8506_v5, %v11181_v41 }
 0x1a1   :  { %3172 = vmatprep.subr.bf16.mxu1 %v9379_v27 }
 0x1a2   :  { %3130 = vmatpush2.bf16.msra.mxu0 %v9394_v59 }
 0x1a3   :  { %3131 = vmatprep.subr.bf16.mxu0 %v9400_v23 }
 0x1a4   :  { %3173 = vmatpush2.bf16.msra.mxu1 %v9398_v58 }
 0x1a5   :  { %3174 = vmatprep.subr.bf16.mxu1 %v9403_v19 }
 0x1a6   :  { %3132 = vmatpush2.bf16.msra.mxu0 %v9406_v50 }
 0x1a7   :  { %3313 = vmatprep.subr.bf16.mxu0 %v8508_v6 }
 0x1a8   :  { %3175 = vmatpush2.bf16.msra.mxu1 %v9411_v14 }
 0x1a9   :  { %3356 = vmatprep.subr.bf16.mxu1 %v8510_v7  ;;  %v2155_v45 = vpop.f32.mrf.mxu0  ;;  %3134 = vmatmul.mubr.bf16.vlgmr.msra.gmra.mxu0 %v8994_v10 }
 0x1aa   :  { %v2156_v21 = vadd.f32 %v2155_v45, %v9419_v56  ;;  %3314 = vmatpush1.bf16.msra.mxu0 %v8530_v16 }
 0x1ab   :  { %v2218_v3 = vpop.f32.mrf.mxu1  ;;  %3177 = vmatmul.mubr.bf16.vlgmr.msra.gmra.mxu1 %v8994_v10  ;;  %v2157_v33 = vpop.f32.mrf.mxu0  ;;  %3315 = vmatprep.subr.bf16.mxu0 %v8535_v18 }
 0x1ac   :  { %3357 = vmatpush1.bf16.msra.mxu1 %v8533_v17  ;;  %v9435_v41 = vadd.f32 %v2218_v3, %v2156_v21  ;;  %v2158_v5 = vadd.f32 %v2157_v33, %v9426_v12 }
 0x1ad   :  { %v2220_v15 = vpop.f32.mrf.mxu1  ;;  %3358 = vmatprep.subr.bf16.mxu1 %v8543_v20  ;;  %v2159_v7 = vpop.f32.mrf.mxu0 }
 0x1ae   :  { %v9439_v6 = vadd.f32 %v2220_v15, %v2158_v5  ;;  %v2160_v45 = vadd.f32 %v2159_v7, %v9419_v56  ;;  %3316 = vmatpush1.bf16.msra.mxu0 %v8565_v30 }
 0x1af   :  { %v2222_v10 = vpop.f32.mrf.mxu1  ;;  %v9443_v16 = vpop.f32.mrf.mxu0  ;;  %3317 = vmatprep.subr.bf16.mxu0 %v8571_v25 }
 0x1b0   :  { %3359 = vmatpush1.bf16.msra.mxu1 %v8569_v22  ;;  %v9447_v21 = vadd.f32 %v2222_v10, %v2160_v45 }
 0x1b1   :  { %v9449_v3 = vpop.f32.mrf.mxu1  ;;  %3360 = vmatprep.subr.bf16.mxu1 %v8577_v37  ;;  %v2165_v33 = vpop.f32.mrf.mxu0 }
 0x1b2   :  { %v2166_v15 = vadd.f32 %v2165_v33, %v9419_v56  ;;  %3318 = vmatpush1.bf16.msra.mxu0 %v8601_v42 }
 0x1b3   :  { %v2228_v5 = vpop.f32.mrf.mxu1  ;;  %v2167_v7 = vpop.f32.mrf.mxu0  ;;  %3319 = vmatprep.subr.bf16.mxu0 %v8609_v49 }
 0x1b4   :  { %3361 = vmatpush1.bf16.msra.mxu1 %v8607_v48  ;;  %v2168_v22 = vadd.f32 %v2167_v7, %v9426_v12  ;;  %v9457_v25 = vadd.f32 %v2228_v5, %v2166_v15 }
 0x1b5   :  { %v2230_v45 = vpop.f32.mrf.mxu1  ;;  %3362 = vmatprep.subr.bf16.mxu1 %v8616_v51  ;;  %v2169_v10 = vpop.f32.mrf.mxu0 }
 0x1b6   :  { %11576 = vst [vmem:[#allocation159_spill] sm:$0xff] %v9457_v25  ;;  %v2170_v37 = vadd.f32 %v2169_v10, %v9419_v56  ;;  %v9461_v30 = vadd.f32 %v2230_v45, %v2168_v22  ;;  %3320 = vmatpush1.bf16.msra.mxu0 %v8634_v60 }
 0x1b7   :  { %v2232_v33 = vpop.f32.mrf.mxu1  ;;  %v2171_v42 = vpop.f32.mrf.mxu0  ;;  %3321 = vmatprep.subr.bf16.mxu0 %v8644_v1 }
 0x1b8   :  { %11577 = vst [vmem:[#allocation160_spill] sm:$0xff] %v9461_v30  ;;  %3363 = vmatpush1.bf16.msra.mxu1 %v8642_v0  ;;  %v2172_v7 = vadd.f32 %v2171_v42, %v9426_v12  ;;  %v9467_v15 = vadd.f32 %v2232_v33, %v2170_v37  ;;  %v11630_v0 = vld [vmem:[#allocation26_spill] sm:$0xff] }
 0x1b9   :  { %v2234_v5 = vpop.f32.mrf.mxu1  ;;  %3364 = vmatprep.subr.bf16.mxu1 %v8647_v4  ;;  %v2175_v25 = vpop.f32.mrf.mxu0 }
 0x1ba   :  { %11578 = vst [vmem:[#allocation161_spill] sm:$0xff] %v9467_v15  ;;  %v2176_v10 = vadd.f32 %v2175_v25, %v9419_v56  ;;  %v9471_v22 = vadd.f32 %v2234_v5, %v2172_v7  ;;  %3322 = vmatpush1.bf16.msra.mxu0 %v8677_v29  ;;  %v11629_v29 = vld [vmem:[#allocation27_spill] sm:$0xff] }
 0x1bb   :  { %v2238_v45 = vpop.f32.mrf.mxu1  ;;  %v2177_v30 = vpop.f32.mrf.mxu0  ;;  %3323 = vmatprep.subr.bf16.mxu0 %v8686_v39 }
 0x1bc   :  { %11579 = vst [vmem:[#allocation162_spill] sm:$0xff] %v9471_v22  ;;  %3365 = vmatpush1.bf16.msra.mxu1 %v8684_v38  ;;  %v2178_v42 = vadd.f32 %v2177_v30, %v9426_v12  ;;  %v9477_v37 = vadd.f32 %v2238_v45, %v2176_v10 }
 0x1bd   :  { %v2240_v33 = vpop.f32.mrf.mxu1  ;;  %3366 = vmatprep.subr.bf16.mxu1 %v8691_v40  ;;  %v2179_v15 = vpop.f32.mrf.mxu0  ;;  %v11623_v40 = vld [vmem:[#allocation23_spill] sm:$0xff] }
 0x1be   :  { %11580 = vst [vmem:[#allocation163_spill] sm:$0xff] %v9477_v37  ;;  %v2180_v25 = vadd.f32 %v2179_v15, %v9419_v56  ;;  %v9481_v7 = vadd.f32 %v2240_v33, %v2178_v42  ;;  %3324 = vmatpush1.bf16.msra.mxu0 %v8715_v54  ;;  %v11584_v56 = vld [vmem:[#allocation59_spill] sm:$0xff]  ;;  %v11585_v15 = vld [vmem:[#allocation60_spill] sm:$0xff]  ;;  %v11587_v42 = vld [vmem:[#allocation62_spill] sm:$0xff] }
 0x1bf   :  { %v2242_v5 = vpop.f32.mrf.mxu1  ;;  %v2181_v22 = vpop.f32.mrf.mxu0  ;;  %3325 = vmatprep.subr.bf16.mxu0 %v8725_v2  ;;  %v11588_v33 = vld [vmem:[#allocation63_spill] sm:$0xff] }
 0x1c0   :  { %11581 = vst [vmem:[#allocation164_spill] sm:$0xff] %v9481_v7  ;;  %3367 = vmatpush1.bf16.msra.mxu1 %v8723_v63  ;;  %v2182_v30 = vadd.f32 %v2181_v22, %v9426_v12  ;;  %v9487_v10 = vadd.f32 %v2242_v5, %v2180_v25  ;;  %v11586_v22 = vld [vmem:[#allocation61_spill] sm:$0xff]  ;;  %v11589_v25 = vld [vmem:[#allocation64_spill] sm:$0xff]  ;;  %v11595_v7 = vld [vmem:[#allocation70_spill] sm:$0xff] }
 0x1c1   :  { %v2244_v45 = vpop.f32.mrf.mxu1  ;;  %3368 = vmatprep.subr.bf16.mxu1 %v8728_v9  ;;  %v11590_v5 = vld [vmem:[#allocation65_spill] sm:$0xff] }
 0x1c2   :  { %11582 = vst [vmem:[#allocation165_spill] sm:$0xff] %v9487_v10  ;;  %v9490_v37 = vadd.f32 %v2244_v45, %v2182_v30  ;;  %3326 = vmatpush1.bf16.msra.mxu0 %v8748_v28  ;;  %v11591_v30 = vld [vmem:[#allocation66_spill] sm:$0xff]  ;;  %v11592_v45 = vld [vmem:[#allocation67_spill] sm:$0xff]  ;;  %v11594_v10 = vld [vmem:[#allocation69_spill] sm:$0xff] }
 0x1c3   :  { %3327 = vmatprep.subr.bf16.mxu0 %v8757_v55 }
 0x1c4   :  { %11583 = vst [vmem:[#allocation166_spill] sm:$0xff] %v9490_v37  ;;  %3369 = vmatpush1.bf16.msra.mxu1 %v8755_v53  ;;  %v11593_v37 = vld [vmem:[#allocation68_spill] sm:$0xff] }
 0x1c5   :  { %3370 = vmatprep.subr.bf16.mxu1 %v8760_v61 }
 0x1c6   :  { %3328 = vmatpush1.bf16.msra.mxu0 %v8777_v62 }
 0x1c7   :  { %3329 = vmatprep.subr.bf16.mxu0 %v8783_v24 }
 0x1c8   :  { %3371 = vmatpush1.bf16.msra.mxu1 %v8781_v13 }
 0x1c9   :  { %3372 = vmatprep.subr.bf16.mxu1 %v8786_v11 }
 0x1ca   :  { %3330 = vmatpush2.bf16.msra.mxu0 %v8801_v26 }
 0x1cb   :  { %3331 = vmatprep.subr.bf16.mxu0 %v11584_v56 }
 0x1cc   :  { %3373 = vmatpush2.bf16.msra.mxu1 %v8805_v31 }
 0x1cd   :  { %3374 = vmatprep.subr.bf16.mxu1 %v11585_v15  ;;  %v11596_v15 = vld [vmem:[#allocation71_spill] sm:$0xff] }
 0x1ce   :  { %3332 = vmatpush2.bf16.msra.mxu0 %v11586_v22  ;;  %v11597_v22 = vld [vmem:[#allocation72_spill] sm:$0xff] }
 0x1cf   :  { %3333 = vmatprep.subr.bf16.mxu0 %v11588_v33  ;;  %v11599_v33 = vld [vmem:[#allocation74_spill] sm:$0xff] }
 0x1d0   :  { %3375 = vmatpush2.bf16.msra.mxu1 %v11587_v42  ;;  %v11598_v42 = vld [vmem:[#allocation73_spill] sm:$0xff] }
 0x1d1   :  { %3376 = vmatprep.subr.bf16.mxu1 %v11589_v25  ;;  %v11600_v25 = vld [vmem:[#allocation75_spill] sm:$0xff] }
 0x1d2   :  { %3334 = vmatpush2.bf16.msra.mxu0 %v11590_v5  ;;  %v11601_v5 = vld [vmem:[#allocation76_spill] sm:$0xff] }
 0x1d3   :  { %3335 = vmatprep.subr.bf16.mxu0 %v11592_v45  ;;  %v11603_v45 = vld [vmem:[#allocation78_spill] sm:$0xff] }
 0x1d4   :  { %3377 = vmatpush2.bf16.msra.mxu1 %v11591_v30  ;;  %v11602_v30 = vld [vmem:[#allocation77_spill] sm:$0xff] }
 0x1d5   :  { %3378 = vmatprep.subr.bf16.mxu1 %v11593_v37  ;;  %v11604_v37 = vld [vmem:[#allocation79_spill] sm:$0xff] }
 0x1d6   :  { %3336 = vmatpush2.bf16.msra.mxu0 %v11594_v10  ;;  %v11605_v10 = vld [vmem:[#allocation80_spill] sm:$0xff] }
 0x1d7   :  { %3337 = vmatprep.subr.bf16.mxu0 %v11596_v15  ;;  %v11607_v15 = vld [vmem:[#allocation82_spill] sm:$0xff] }
 0x1d8   :  { %3379 = vmatpush2.bf16.msra.mxu1 %v11595_v7  ;;  %v11606_v7 = vld [vmem:[#allocation81_spill] sm:$0xff] }
 0x1d9   :  { %3380 = vmatprep.subr.bf16.mxu1 %v11597_v22  ;;  %v11608_v22 = vld [vmem:[#allocation83_spill] sm:$0xff] }
 0x1da   :  { %3338 = vmatpush2.bf16.msra.mxu0 %v11598_v42  ;;  %v11609_v42 = vld [vmem:[#allocation84_spill] sm:$0xff] }
 0x1db   :  { %3339 = vmatprep.subr.bf16.mxu0 %v11600_v25  ;;  %v11611_v25 = vld [vmem:[#allocation86_spill] sm:$0xff] }
 0x1dc   :  { %3381 = vmatpush2.bf16.msra.mxu1 %v11599_v33  ;;  %v11610_v33 = vld [vmem:[#allocation85_spill] sm:$0xff] }
 0x1dd   :  { %3382 = vmatprep.subr.bf16.mxu1 %v11601_v5  ;;  %v11612_v5 = vld [vmem:[#allocation87_spill] sm:$0xff] }
 0x1de   :  { %3340 = vmatpush2.bf16.msra.mxu0 %v11602_v30  ;;  %v11613_v30 = vld [vmem:[#allocation88_spill] sm:$0xff] }
 0x1df   :  { %3341 = vmatprep.subr.bf16.mxu0 %v11604_v37 }
 0x1e0   :  { %3383 = vmatpush2.bf16.msra.mxu1 %v11603_v45 }
 0x1e1   :  { %3384 = vmatprep.subr.bf16.mxu1 %v11605_v10 }
 0x1e2   :  { %3342 = vmatpush2.bf16.msra.mxu0 %v11606_v7 }
 0x1e3   :  { %3343 = vmatprep.subr.bf16.mxu0 %v11608_v22 }
 0x1e4   :  { %3385 = vmatpush2.bf16.msra.mxu1 %v11607_v15  ;;  %v11200_v15 = vsub.s32 6, %v8488_v57 }
 0x1e5   :  { %3386 = vmatprep.subr.bf16.mxu1 %v11609_v42 }
 0x1e6   :  { %3344 = vmatpush2.bf16.msra.mxu0 %v11610_v33  ;;  %v11206_v33 = vsub.s32 7, %v8488_v57 }
 0x1e7   :  { %3399 = vmatprep.subr.bf16.mxu0 %v11612_v5 }
 0x1e8   :  { %3387 = vmatpush2.bf16.msra.mxu1 %v11611_v25 }
 0x1e9   :  { %3442 = vmatprep.subr.bf16.mxu1 %v11613_v30  ;;  %v9532_v45 = vpop.f32.mrf.mxu0  ;;  %v8237_v30 = vld [vmem:[%s11016_s5] sm:$0xff] }
 0x1ea   :  { %v9553_v5 = vrot.slane %v8237_v30, %v11200_v15  ;;  %v9559_v26 = vrot.slane %v8237_v30, %v11206_v33 }
 0x1eb   :  { %v9534_v37 = vpop.f32.mrf.mxu1  ;;  %v9536_v10 = vpop.f32.mrf.mxu0 }
 0x1ed   :  { %v9539_v7 = vpop.f32.mrf.mxu1  ;;  %v9541_v22 = vpop.f32.mrf.mxu0 }
 0x1ef   :  { %v9544_v42 = vpop.f32.mrf.mxu1  ;;  %v9546_v25 = vpop.f32.mrf.mxu0 }
 0x1f1   :  { %v9555_v56 = vpop.f32.mrf.mxu1  ;;  %v2291_v31 = vpop.f32.mrf.mxu0 }
 0x1f2   :  { %v2292_v11 = vadd.f32 %v2291_v31, %v9553_v5 }
 0x1f3   :  { %v2354_v24 = vpop.f32.mrf.mxu1  ;;  %v2293_v13 = vpop.f32.mrf.mxu0 }
 0x1f4   :  { %v2294_v62 = vadd.f32 %v2293_v13, %v9559_v26  ;;  %v9563_v61 = vadd.f32 %v2354_v24, %v2292_v11 }
 0x1f5   :  { %v2356_v55 = vpop.f32.mrf.mxu1  ;;  %v2295_v53 = vpop.f32.mrf.mxu0 }
 0x1f6   :  { %11614 = vst [vmem:[#allocation167_spill] sm:$0xff] %v9563_v61  ;;  %v2296_v15 = vadd.f32 %v2295_v53, %v9553_v5  ;;  %v9566_v28 = vadd.f32 %v2356_v55, %v2294_v62 }
 0x1f7   :  { %v2358_v9 = vpop.f32.mrf.mxu1  ;;  %v2297_v2 = vpop.f32.mrf.mxu0 }
 0x1f8   :  { %11615 = vst [vmem:[#allocation168_spill] sm:$0xff] %v9566_v28  ;;  %v2298_v57 = vadd.f32 %v2297_v2, %v9559_v26  ;;  %v9569_v30 = vadd.f32 %v2358_v9, %v2296_v15 }
 0x1f9   :  { %v2360_v33 = vpop.f32.mrf.mxu1  ;;  %v2301_v31 = vpop.f32.mrf.mxu0 }
 0x1fa   :  { %11616 = vst [vmem:[#allocation169_spill] sm:$0xff] %v9569_v30  ;;  %v2302_v63 = vadd.f32 %v2301_v31, %v9553_v5  ;;  %v9572_v54 = vadd.f32 %v2360_v33, %v2298_v57 }
 0x1fb   :  { %v2364_v13 = vpop.f32.mrf.mxu1  ;;  %v2303_v24 = vpop.f32.mrf.mxu0 }
 0x1fc   :  { %11617 = vst [vmem:[#allocation170_spill] sm:$0xff] %v9572_v54  ;;  %v2304_v11 = vadd.f32 %v2303_v24, %v9559_v26  ;;  %v9575_v61 = vadd.f32 %v2364_v13, %v2302_v63 }
 0x1fd   :  { %v2366_v53 = vpop.f32.mrf.mxu1  ;;  %v2305_v55 = vpop.f32.mrf.mxu0 }
 0x1fe   :  { %11618 = vst [vmem:[#allocation171_spill] sm:$0xff] %v9575_v61  ;;  %v2306_v62 = vadd.f32 %v2305_v55, %v9553_v5  ;;  %v9578_v28 = vadd.f32 %v2366_v53, %v2304_v11  ;;  %v11622_v61 = vld [vmem:[#allocation15_spill] sm:$0xff]  ;;  %v11625_v53 = vld [vmem:[#allocation98_spill] sm:$0xff] }
 0x1ff   :  { %v2368_v2 = vpop.f32.mrf.mxu1  ;;  %v2307_v9 = vpop.f32.mrf.mxu0  ;;  %v1910_v39 = vadd.f32 %v11623_v40, %v11622_v61  ;;  %v11624_v55 = vld [vmem:[#allocation19_spill] sm:$0xff]  ;;  %v11631_v40 = vld [vmem:[#allocation105_spill] sm:$0xff] }
 0x200   :  { %11619 = vst [vmem:[#allocation172_spill] sm:$0xff] %v9578_v28  ;;  %v2308_v15 = vadd.f32 %v2307_v9, %v9559_v26  ;;  %v9581_v30 = vadd.f32 %v2368_v2, %v2306_v62  ;;  %v11626_v9 = vld [vmem:[#allocation102_spill] sm:$0xff]  ;;  %v11627_v2 = vld [vmem:[#allocation21_spill] sm:$0xff] }
 0x201   :  { %v2370_v57 = vpop.f32.mrf.mxu1  ;;  %v2036_v62 = vadd.f32 %v11626_v9, %v9024_v32  ;;  %v1973_v4 = vadd.f32 %v11629_v29, %v1910_v39 }
 0x202   :  { %11620 = vst [vmem:[#allocation173_spill] sm:$0xff] %v9581_v30  ;;  %v9583_v33 = vadd.f32 %v2370_v57, %v2308_v15  ;;  %v11628_v15 = vld [vmem:[#allocation100_spill] sm:$0xff] }
 0x204   :  { %11621 = vst [vmem:[#allocation174_spill] sm:$0xff] %v9583_v33 }
 0x229   :  { %v3049_v31 = vpop.f32.mrf.mxu0 }
 0x22a   :  { %v3187_v11 = vadd.f32 %v3049_v31, %v11624_v55  ;;  %v11632_v55 = vld [vmem:[#allocation106_spill] sm:$0xff] }
 0x22b   :  { %v3092_v54 = vpop.f32.mrf.mxu1  ;;  %v3051_v24 = vpop.f32.mrf.mxu0 }
 0x22c   :  { %v3189_v28 = vadd.f32 %v3092_v54, %v11625_v53  ;;  %v3188_v30 = vadd.f32 %v3051_v24, %v11627_v2  ;;  %v7343_v1 = vmul.f32 -1.442695, %v3187_v11  ;;  %v2099_v54 = vadd.f32 %v11632_v55, %v2036_v62 }
 0x22d   :  { %v3094_v63 = vpop.f32.mrf.mxu1  ;;  %v3053_v13 = vpop.f32.mrf.mxu0  ;;  %v2284_v62 = vadd.f32 %v9536_v10, %v9559_v26 }
 0x22e   :  { %v3190_v57 = vadd.f32 %v3094_v63, %v11628_v15  ;;  %v3195_v60 = vadd.f32 %v3053_v13, %v11630_v0  ;;  %v7347_v51 = vmul.f32 -1.442695, %v3189_v28  ;;  %v7344_v53 = vmul.f32 -1.442695, %v3188_v30 }
 0x22f   :  { %v3096_v38 = vpop.f32.mrf.mxu1  ;;  %v3055_v33 = vpop.f32.mrf.mxu0  ;;  %7841 = vpow2.f32 %v7343_v1  ;;  %v2347_v10 = vadd.f32 %v9539_v7, %v2284_v62  ;;  %v101_v62 = vld [vmem:[%s11013_s2 + $0x10] sm:$0xff] }
 0x230   :  { %v3197_v61 = vadd.f32 %v3096_v38, %v11631_v40  ;;  %v3196_v49 = vadd.f32 %v3055_v33, %v1973_v4  ;;  %v7348_v48 = vmul.f32 -1.442695, %v3190_v57  ;;  %v7345_v32 = vmul.f32 -1.442695, %v3195_v60 }
 0x231   :  { %v3098_v31 = vpop.f32.mrf.mxu1  ;;  %7843 = vpow2.f32 %v7347_v51  ;;  %v2286_v57 = vadd.f32 %v9541_v22, %v9553_v5 }
 0x232   :  { %v3198_v24 = vadd.f32 %v3098_v31, %v2099_v54  ;;  %v7349_v63 = vmul.f32 -1.442695, %v3197_v61  ;;  %7845 = vpow2.f32 %v7344_v53  ;;  %v7346_v9 = vmul.f32 -1.442695, %v3196_v49 }
 0x233   :  { %7847 = vpow2.f32 %v7348_v48  ;;  %v2282_v49 = vadd.f32 %v9532_v45, %v9553_v5  ;;  %v2162_v45 = vadd.f32 %v9443_v16, %v9426_v12  ;;  %v2288_v53 = vadd.f32 %v9546_v25, %v9559_v26 }
 0x234   :  { %7849 = vpow2.f32 %v7345_v32  ;;  %v7350_v29 = vmul.f32 -1.442695, %v3198_v24  ;;  %v2349_v24 = vadd.f32 %v9544_v42, %v2286_v57 }
 0x235   :  { %7851 = vpow2.f32 %v7349_v63  ;;  %v2345_v15 = vadd.f32 %v9534_v37, %v2282_v49  ;;  %v2351_v26 = vadd.f32 %v9555_v56, %v2288_v53 }
 0x236   :  { %7853 = vpow2.f32 %v7346_v9 }
 0x237   :  { %7855 = vpow2.f32 %v7350_v29 }
 0x23c   :  { %v7842_v0 = vpop.eup %7841 }
 0x23d   :  { %v3215_v30 = vadd.f32 1.0, %v7842_v0 }
 0x23e   :  { %v7844_v38 = vpop.eup %7843 }
 0x23f   :  { %v7846_v39 = vpop.eup %7845  ;;  %v3239_v33 = vadd.f32 1.0, %v7844_v38  ;;  %7857 = vrcp.f32 %v3215_v30 }
 0x240   :  { %v7848_v28 = vpop.eup %7847  ;;  %v3216_v60 = vadd.f32 1.0, %v7846_v39 }
 0x241   :  { %v7850_v4 = vpop.eup %7849  ;;  %v3240_v51 = vadd.f32 1.0, %v7848_v28  ;;  %7859 = vrcp.f32 %v3239_v33 }
 0x242   :  { %v7852_v1 = vpop.eup %7851  ;;  %v3217_v48 = vadd.f32 1.0, %v7850_v4  ;;  %7861 = vrcp.f32 %v3216_v60 }
 0x243   :  { %v7854_v13 = vpop.eup %7853  ;;  %v3241_v11 = vadd.f32 1.0, %v7852_v1  ;;  %7863 = vrcp.f32 %v3240_v51  ;;  %v99_v1 = vld [vmem:[%s11013_s2] sm:$0xff]  ;;  %v100_v51 = vld [vmem:[%s11013_s2 + $0x8] sm:$0xff] }
 0x244   :  { %v7856_v61 = vpop.eup %7855  ;;  %v3218_v2 = vadd.f32 1.0, %v7854_v13  ;;  %7865 = vrcp.f32 %v3217_v48 }
 0x245   :  { %v3242_v40 = vadd.f32 1.0, %v7856_v61  ;;  %7867 = vrcp.f32 %v3241_v11 }
 0x246   :  { %7869 = vrcp.f32 %v3218_v2 }
 0x24c   :  { %v7858_v28 = vpop.eup %7857 }
 0x24e   :  { %v7860_v30 = vpop.eup %7859 }
 0x24f   :  { %v7862_v4 = vpop.eup %7861  ;;  %v3279_v48 = vmul.f32 %v7860_v30, %v99_v1  ;;  %v11636_v1 = vld [vmem:[#allocation91_spill] sm:$0xff] }
 0x269   :  { %v3135_v31 = vpop.f32.mrf.mxu0 }
 0x26a   :  { %v3191_v55 = vadd.f32 %v3135_v31, %v9435_v41  ;;  %v2225_v41 = vadd.f32 %v9449_v3, %v2162_v45 }
 0x26b   :  { %v3178_v54 = vpop.f32.mrf.mxu1  ;;  %v3137_v32 = vpop.f32.mrf.mxu0 }
 0x26c   :  { %v3193_v37 = vadd.f32 %v3178_v54, %v2345_v15  ;;  %7871 = vtanh.f32 %v3191_v55  ;;  %v3192_v22 = vadd.f32 %v3137_v32, %v9439_v6  ;;  %v102_v55 = vld [vmem:[%s11013_s2 + $0x18] sm:$0xff] }
 0x26d   :  { %v3180_v5 = vpop.f32.mrf.mxu1  ;;  %7873 = vrcp.f32 %v3242_v40  ;;  %v3139_v63 = vpop.f32.mrf.mxu0 }
 0x26e   :  { %v7351_v16 = vmul.f32 -1.442695, %v3193_v37  ;;  %v3194_v12 = vadd.f32 %v3180_v5, %v2347_v10  ;;  %7875 = vtanh.f32 %v3192_v22  ;;  %v3199_v7 = vadd.f32 %v3139_v63, %v9447_v21  ;;  %v7864_v21 = vpop.eup %7863 }
 0x26f   :  { %v3182_v9 = vpop.f32.mrf.mxu1  ;;  %v3141_v0 = vpop.f32.mrf.mxu0  ;;  %v3280_v57 = vmul.f32 %v7864_v21, %v100_v51  ;;  %v11639_v51 = vld [vmem:[#allocation95_spill] sm:$0xff] }
 0x270   :  { %7877 = vpow2.f32 %v7351_v16  ;;  %v7352_v25 = vmul.f32 -1.442695, %v3194_v12  ;;  %v3201_v29 = vadd.f32 %v3182_v9, %v2349_v24  ;;  %v3200_v6 = vadd.f32 %v3141_v0, %v2225_v41  ;;  %v7866_v33 = vpop.eup %7865 }
 0x271   :  { %7879 = vtanh.f32 %v3199_v7  ;;  %v3184_v38 = vpop.f32.mrf.mxu1  ;;  %v7868_v56 = vpop.eup %7867 }
 0x272   :  { %7881 = vpow2.f32 %v7352_v25  ;;  %v7353_v42 = vmul.f32 -1.442695, %v3201_v29  ;;  %v3202_v39 = vadd.f32 %v3184_v38, %v2351_v26  ;;  %v7870_v60 = vpop.eup %7869  ;;  %v3281_v53 = vmul.f32 %v7868_v56, %v101_v62  ;;  %v11635_v56 = vld [vmem:[#allocation89_spill] sm:$0xff]  ;;  %v11644_v62 = vld [vmem:[#allocation103_spill] sm:$0xff] }
 0x273   :  { %7883 = vtanh.f32 %v3200_v6 }
 0x274   :  { %7885 = vpow2.f32 %v7353_v42  ;;  %v7354_v3 = vmul.f32 -1.442695, %v3202_v39 }
 0x276   :  { %7887 = vpow2.f32 %v7354_v3 }
 0x279   :  { %v7872_v13 = vpop.eup %7871 }
 0x27a   :  { %v7874_v49 = vpop.eup %7873  ;;  %v3283_v61 = vmul.f32 %v7872_v13, %v7858_v28  ;;  %v11638_v13 = vld [vmem:[#allocation94_spill] sm:$0xff] }
 0x27b   :  { %v7876_v11 = vpop.eup %7875  ;;  %v3282_v16 = vmul.f32 %v7874_v49, %v102_v55  ;;  %v11640_v49 = vld [vmem:[#allocation96_spill] sm:$0xff]  ;;  %v11650_v55 = vld [vmem:[#allocation111_spill] sm:$0xff] }
 0x27c   :  { %v9624_v15 = vadd.f32 %v3283_v61, %v3279_v48  ;;  %v3284_v40 = vmul.f32 %v7876_v11, %v7862_v4  ;;  %v11641_v48 = vld [vmem:[#allocation97_spill] sm:$0xff]  ;;  %v11642_v61 = vld [vmem:[#allocation99_spill] sm:$0xff] }
 0x27d   :  { %v7878_v2 = vpop.eup %7877  ;;  %v11643_v11 = vld [vmem:[#allocation101_spill] sm:$0xff] }
 0x27e   :  { %v7880_v31 = vpop.eup %7879  ;;  %v3267_v45 = vadd.f32 1.0, %v7878_v2  ;;  %7889 = vtanh.f32 %v9624_v15  ;;  %v9630_v10 = vadd.f32 %v3284_v40, %v3280_v57  ;;  %v11645_v2 = vld [vmem:[#allocation104_spill] sm:$0xff]  ;;  %v11646_v57 = vld [vmem:[#allocation107_spill] sm:$0xff] }
 0x27f   :  { %v7882_v54 = vpop.eup %7881  ;;  %v3285_v37 = vmul.f32 %v7880_v31, %v7866_v33  ;;  %v11647_v40 = vld [vmem:[#allocation108_spill] sm:$0xff]  ;;  %v11648_v31 = vld [vmem:[#allocation109_spill] sm:$0xff] }
 0x280   :  { %v7884_v32 = vpop.eup %7883  ;;  %7891 = vrcp.f32 %v3267_v45  ;;  %v3268_v22 = vadd.f32 1.0, %v7882_v54  ;;  %v11649_v45 = vld [vmem:[#allocation110_spill] sm:$0xff]  ;;  %v11651_v54 = vld [vmem:[#allocation113_spill] sm:$0xff] }
 0x281   :  { %v7886_v5 = vpop.eup %7885  ;;  %7893 = vtanh.f32 %v9630_v10  ;;  %v9633_v24 = vadd.f32 %v3285_v37, %v3281_v53  ;;  %v3286_v12 = vmul.f32 %v7884_v32, %v7870_v60  ;;  %v11637_v60 = vld [vmem:[#allocation92_spill] sm:$0xff]  ;;  %v11652_v53 = vld [vmem:[#allocation115_spill] sm:$0xff]  ;;  %v11654_v32 = vld [vmem:[#allocation117_spill] sm:$0xff] }
 0x282   :  { %7895 = vrcp.f32 %v3268_v22  ;;  %v3269_v63 = vadd.f32 1.0, %v7886_v5  ;;  %v11653_v37 = vld [vmem:[#allocation116_spill] sm:$0xff]  ;;  %v11655_v22 = vld [vmem:[#allocation122_spill] sm:$0xff] }
 0x283   :  { %v7888_v41 = vpop.eup %7887  ;;  %7897 = vtanh.f32 %v9633_v24  ;;  %v9636_v7 = vadd.f32 %v3286_v12, %v3282_v16  ;;  %v11656_v5 = vld [vmem:[#allocation124_spill] sm:$0xff]  ;;  %v11657_v16 = vld [vmem:[#allocation126_spill] sm:$0xff]  ;;  %v11658_v12 = vld [vmem:[#allocation127_spill] sm:$0xff] }
 0x284   :  { %7899 = vrcp.f32 %v3269_v63  ;;  %v3270_v9 = vadd.f32 1.0, %v7888_v41  ;;  %v11659_v63 = vld [vmem:[#allocation128_spill] sm:$0xff]  ;;  %v11660_v41 = vld [vmem:[#allocation129_spill] sm:$0xff] }
 0x285   :  { %7901 = vtanh.f32 %v9636_v7 }
 0x286   :  { %7903 = vrcp.f32 %v3270_v9  ;;  %v11661_v9 = vld [vmem:[#allocation130_spill] sm:$0xff] }
 0x28b   :  { %v7890_v26 = vpop.eup %7889 }
 0x28d   :  { %v7892_v25 = vpop.eup %7891 }
 0x28e   :  { %v7894_v29 = vpop.eup %7893  ;;  %v3295_v4 = vmul.f32 %v7892_v25, %v7890_v26  ;;  %v11662_v26 = vld [vmem:[#allocation131_spill] sm:$0xff]  ;;  %v11663_v25 = vld [vmem:[#allocation132_spill] sm:$0xff] }
 0x28f   :  { %v7896_v0 = vpop.eup %7895 }
 0x290   :  { %v7898_v6 = vpop.eup %7897  ;;  %v3296_v30 = vmul.f32 %v7896_v0, %v7894_v29  ;;  %v11664_v29 = vld [vmem:[#allocation133_spill] sm:$0xff]  ;;  %v11665_v0 = vld [vmem:[#allocation134_spill] sm:$0xff] }
 0x291   :  { %v7900_v38 = vpop.eup %7899 }
 0x292   :  { %v7902_v42 = vpop.eup %7901  ;;  %v3297_v28 = vmul.f32 %v7900_v38, %v7898_v6  ;;  %v11666_v6 = vld [vmem:[#allocation135_spill] sm:$0xff]  ;;  %v11667_v38 = vld [vmem:[#allocation136_spill] sm:$0xff] }
 0x293   :  { %v7904_v39 = vpop.eup %7903 }
 0x294   :  { %v3298_v3 = vmul.f32 %v7904_v39, %v7902_v42  ;;  %v9641_v33 = vpack.c.bf16 %v3297_v28, %v3295_v4  ;;  %v11668_v42 = vld [vmem:[#allocation137_spill] sm:$0xff]  ;;  %v11669_v39 = vld [vmem:[#allocation138_spill] sm:$0xff]  ;;  %v11670_v28 = vld [vmem:[#allocation139_spill] sm:$0xff] }
 0x295   :  { %v11673_v4 = vld [vmem:[#allocation142_spill] sm:$0xff] }
 0x296   :  { %v9639_v21 = vpack.c.bf16 %v3298_v3, %v3296_v30  ;;  %11634 = vst [vmem:[#allocation19_spill] sm:$0xff] %v9641_v33  ;;  %v11671_v30 = vld [vmem:[#allocation140_spill] sm:$0xff]  ;;  %v11672_v3 = vld [vmem:[#allocation141_spill] sm:$0xff] }
 0x298   :  { %11633 = vst [vmem:[#allocation23_spill] sm:$0xff] %v9639_v21  ;;  %3345 = vmatprep.mubr.bf16.mxu0 %v9639_v21  ;;  %3388 = vmatprep.mubr.bf16.mxu1 %v9639_v21 }
 0x299   :  { %3346 = vmatmul.mubr.bf16.vlgmr.msra.gmra.mxu0 %v9641_v33  ;;  %3389 = vmatmul.mubr.bf16.vlgmr.msra.gmra.mxu1 %v9641_v33 }
 0x29a   :  { %3400 = vmatpush1.bf16.msra.mxu0 %v11635_v56  ;;  %3443 = vmatpush1.bf16.msra.mxu1 %v11636_v1 }
 0x29b   :  { %3431 = vmatprep.mubr.bf16.mxu0 %v9639_v21  ;;  %3474 = vmatprep.mubr.bf16.mxu1 %v9639_v21  ;;  %v11674_v21 = vld [vmem:[#allocation143_spill] sm:$0xff] }
 0x29c   :  { %3401 = vmatprep.subr.bf16.mxu0 %v11637_v60  ;;  %3444 = vmatprep.subr.bf16.mxu1 %v11638_v13 }
 0x29e   :  { %3402 = vmatpush1.bf16.msra.mxu0 %v11639_v51  ;;  %3445 = vmatpush1.bf16.msra.mxu1 %v11640_v49 }
 0x29f   :  { %3403 = vmatprep.subr.bf16.mxu0 %v11641_v48  ;;  %3446 = vmatprep.subr.bf16.mxu1 %v11642_v61 }
 0x2a2   :  { %3404 = vmatpush1.bf16.msra.mxu0 %v11643_v11  ;;  %3447 = vmatpush1.bf16.msra.mxu1 %v11644_v62 }
 0x2a3   :  { %3405 = vmatprep.subr.bf16.mxu0 %v11645_v2  ;;  %3448 = vmatprep.subr.bf16.mxu1 %v11646_v57 }
 0x2a6   :  { %3406 = vmatpush1.bf16.msra.mxu0 %v11647_v40  ;;  %3449 = vmatpush1.bf16.msra.mxu1 %v11648_v31 }
 0x2a7   :  { %3407 = vmatprep.subr.bf16.mxu0 %v11649_v45  ;;  %3450 = vmatprep.subr.bf16.mxu1 %v11650_v55 }
 0x2aa   :  { %3408 = vmatpush1.bf16.msra.mxu0 %v11651_v54  ;;  %3451 = vmatpush1.bf16.msra.mxu1 %v11652_v53 }
 0x2ab   :  { %3409 = vmatprep.subr.bf16.mxu0 %v11653_v37  ;;  %3452 = vmatprep.subr.bf16.mxu1 %v11654_v32 }
 0x2ae   :  { %3410 = vmatpush1.bf16.msra.mxu0 %v9164_v8  ;;  %3453 = vmatpush1.bf16.msra.mxu1 %v9171_v47 }
 0x2af   :  { %3411 = vmatprep.subr.bf16.mxu0 %v9173_v46  ;;  %3454 = vmatprep.subr.bf16.mxu1 %v9176_v43 }
 0x2b2   :  { %3412 = vmatpush1.bf16.msra.mxu0 %v9194_v44  ;;  %3455 = vmatpush1.bf16.msra.mxu1 %v9201_v36 }
 0x2b3   :  { %3413 = vmatprep.subr.bf16.mxu0 %v9203_v52  ;;  %3456 = vmatprep.subr.bf16.mxu1 %v11655_v22 }
 0x2b6   :  { %3414 = vmatpush1.bf16.msra.mxu0 %v11656_v5  ;;  %3457 = vmatpush1.bf16.msra.mxu1 %v11657_v16 }
 0x2b7   :  { %3415 = vmatprep.subr.bf16.mxu0 %v11658_v12  ;;  %3458 = vmatprep.subr.bf16.mxu1 %v11659_v63 }
 0x2ba   :  { %3416 = vmatpush2.bf16.msra.mxu0 %v11660_v41  ;;  %3459 = vmatpush2.bf16.msra.mxu1 %v11661_v9 }
 0x2bb   :  { %3417 = vmatprep.subr.bf16.mxu0 %v11662_v26  ;;  %3460 = vmatprep.subr.bf16.mxu1 %v11663_v25  ;;  %v11752_v25 = vld [vmem:[#allocation118_spill] sm:$0xff] }
 0x2be   :  { %3418 = vmatpush2.bf16.msra.mxu0 %v11664_v29  ;;  %3461 = vmatpush2.bf16.msra.mxu1 %v11665_v0  ;;  %v11675_v29 = vld [vmem:[#allocation144_spill] sm:$0xff]  ;;  %v11676_v0 = vld [vmem:[#allocation145_spill] sm:$0xff] }
 0x2bf   :  { %3419 = vmatprep.subr.bf16.mxu0 %v11666_v6  ;;  %3462 = vmatprep.subr.bf16.mxu1 %v11667_v38  ;;  %v11677_v6 = vld [vmem:[#allocation146_spill] sm:$0xff]  ;;  %v11678_v38 = vld [vmem:[#allocation147_spill] sm:$0xff] }
 0x2c2   :  { %3420 = vmatpush2.bf16.msra.mxu0 %v11668_v42  ;;  %3463 = vmatpush2.bf16.msra.mxu1 %v11669_v39  ;;  %v11679_v42 = vld [vmem:[#allocation148_spill] sm:$0xff]  ;;  %v11680_v39 = vld [vmem:[#allocation149_spill] sm:$0xff] }
 0x2c3   :  { %3421 = vmatprep.subr.bf16.mxu0 %v11670_v28  ;;  %3464 = vmatprep.subr.bf16.mxu1 %v11671_v30 }
 0x2c6   :  { %3422 = vmatpush2.bf16.msra.mxu0 %v11672_v3  ;;  %3465 = vmatpush2.bf16.msra.mxu1 %v11673_v4  ;;  %v11751_v3 = vld [vmem:[#allocation40_spill] sm:$0xff] }
 0x2c7   :  { %3423 = vmatprep.subr.bf16.mxu0 %v11674_v21  ;;  %3466 = vmatprep.subr.bf16.mxu1 %v11675_v29  ;;  %v11750_v21 = vld [vmem:[#allocation41_spill] sm:$0xff] }
 0x2ca   :  { %3424 = vmatpush2.bf16.msra.mxu0 %v11676_v0  ;;  %3467 = vmatpush2.bf16.msra.mxu1 %v11677_v6 }
 0x2cb   :  { %3425 = vmatprep.subr.bf16.mxu0 %v11678_v38  ;;  %3468 = vmatprep.subr.bf16.mxu1 %v11679_v42  ;;  %v11681_v42 = vld [vmem:[#allocation12_spill] sm:$0xff] }
 0x2cc   :  { %v11747_v38 = vld [vmem:[#allocation112_spill] sm:$0xff] }
 0x2ce   :  { %3426 = vmatpush2.bf16.msra.mxu0 %v11680_v39  ;;  %3469 = vmatpush2.bf16.msra.mxu1 %v9374_v35  ;;  %v11682_v39 = vld [vmem:[#allocation13_spill] sm:$0xff] }
 0x2cf   :  { %3427 = vmatprep.subr.bf16.mxu0 %v9376_v34  ;;  %3470 = vmatprep.subr.bf16.mxu1 %v9379_v27  ;;  %v11683_v27 = vld [vmem:[#allocation14_spill] sm:$0xff]  ;;  %v11746_v35 = vld [vmem:[#allocation33_spill] sm:$0xff] }
 0x2d0   :  { %v11745_v34 = vld [vmem:[#allocation38_spill] sm:$0xff] }
 0x2d2   :  { %3428 = vmatpush2.bf16.msra.mxu0 %v9394_v59  ;;  %3471 = vmatpush2.bf16.msra.mxu1 %v9398_v58 }
 0x2d3   :  { %3429 = vmatprep.subr.bf16.mxu0 %v9400_v23  ;;  %3472 = vmatprep.subr.bf16.mxu1 %v9403_v19  ;;  %v11684_v19 = vld [vmem:[#allocation16_spill] sm:$0xff] }
 0x2d4   :  { %v11689_v23 = vld [vmem:[#allocation24_spill] sm:$0xff] }
 0x2d6   :  { %3430 = vmatpush2.bf16.msra.mxu0 %v9406_v50  ;;  %3473 = vmatpush2.bf16.msra.mxu1 %v9411_v14  ;;  %v11685_v50 = vld [vmem:[#allocation17_spill] sm:$0xff]  ;;  %v11686_v14 = vld [vmem:[#allocation18_spill] sm:$0xff] }
 0x2d7   :  { %3611 = vmatprep.subr.bf16.mxu0 %v11681_v42  ;;  %3654 = vmatprep.subr.bf16.mxu1 %v11682_v39  ;;  %v11687_v42 = vld [vmem:[#allocation20_spill] sm:$0xff]  ;;  %v11688_v39 = vld [vmem:[#allocation22_spill] sm:$0xff] }
 0x2d9   :  { %3432 = vmatmul.mubr.bf16.vlgmr.msra.gmra.mxu0 %v9641_v33  ;;  %3475 = vmatmul.mubr.bf16.vlgmr.msra.gmra.mxu1 %v9641_v33  ;;  %v11690_v33 = vld [vmem:[#allocation25_spill] sm:$0xff] }
 0x2da   :  { %3612 = vmatpush1.bf16.msra.mxu0 %v11683_v27  ;;  %3655 = vmatpush1.bf16.msra.mxu1 %v8533_v17  ;;  %v11691_v27 = vld [vmem:[#allocation28_spill] sm:$0xff]  ;;  %v11692_v17 = vld [vmem:[#allocation29_spill] sm:$0xff] }
 0x2db   :  { %3613 = vmatprep.subr.bf16.mxu0 %v8535_v18  ;;  %3656 = vmatprep.subr.bf16.mxu1 %v8543_v20  ;;  %v11693_v18 = vld [vmem:[#allocation30_spill] sm:$0xff]  ;;  %v11694_v20 = vld [vmem:[#allocation31_spill] sm:$0xff] }
 0x2de   :  { %3614 = vmatpush1.bf16.msra.mxu0 %v11684_v19  ;;  %3657 = vmatpush1.bf16.msra.mxu1 %v11685_v50  ;;  %v11695_v19 = vld [vmem:[#allocation32_spill] sm:$0xff]  ;;  %v11696_v50 = vld [vmem:[#allocation34_spill] sm:$0xff] }
 0x2df   :  { %3615 = vmatprep.subr.bf16.mxu0 %v11686_v14  ;;  %3658 = vmatprep.subr.bf16.mxu1 %v11687_v42  ;;  %v11697_v14 = vld [vmem:[#allocation36_spill] sm:$0xff]  ;;  %v11698_v42 = vld [vmem:[#allocation37_spill] sm:$0xff] }
 0x2e2   :  { %3616 = vmatpush1.bf16.msra.mxu0 %v11688_v39  ;;  %3659 = vmatpush1.bf16.msra.mxu1 %v11689_v23  ;;  %v11699_v39 = vld [vmem:[#allocation39_spill] sm:$0xff]  ;;  %v11700_v23 = vld [vmem:[#allocation42_spill] sm:$0xff] }
 0x2e3   :  { %3617 = vmatprep.subr.bf16.mxu0 %v11690_v33  ;;  %3660 = vmatprep.subr.bf16.mxu1 %v11691_v27  ;;  %v11701_v33 = vld [vmem:[#allocation43_spill] sm:$0xff]  ;;  %v11702_v27 = vld [vmem:[#allocation44_spill] sm:$0xff] }
 0x2e6   :  { %3618 = vmatpush1.bf16.msra.mxu0 %v11692_v17  ;;  %3661 = vmatpush1.bf16.msra.mxu1 %v11693_v18  ;;  %v11703_v17 = vld [vmem:[#allocation45_spill] sm:$0xff]  ;;  %v11704_v18 = vld [vmem:[#allocation47_spill] sm:$0xff] }
 0x2e7   :  { %3619 = vmatprep.subr.bf16.mxu0 %v11694_v20  ;;  %3662 = vmatprep.subr.bf16.mxu1 %v11695_v19  ;;  %v11705_v20 = vld [vmem:[#allocation49_spill] sm:$0xff]  ;;  %v11706_v19 = vld [vmem:[#allocation50_spill] sm:$0xff] }
 0x2ea   :  { %3620 = vmatpush1.bf16.msra.mxu0 %v11696_v50  ;;  %3663 = vmatpush1.bf16.msra.mxu1 %v11697_v14  ;;  %v11707_v50 = vld [vmem:[#allocation51_spill] sm:$0xff]  ;;  %v11708_v14 = vld [vmem:[#allocation53_spill] sm:$0xff] }
 0x2eb   :  { %3621 = vmatprep.subr.bf16.mxu0 %v11698_v42  ;;  %3664 = vmatprep.subr.bf16.mxu1 %v11699_v39  ;;  %v11709_v42 = vld [vmem:[#allocation54_spill] sm:$0xff]  ;;  %v11710_v39 = vld [vmem:[#allocation55_spill] sm:$0xff] }
 0x2ee   :  { %3622 = vmatpush1.bf16.msra.mxu0 %v11700_v23  ;;  %3665 = vmatpush1.bf16.msra.mxu1 %v11701_v33  ;;  %v11711_v23 = vld [vmem:[#allocation56_spill] sm:$0xff]  ;;  %v11712_v33 = vld [vmem:[#allocation57_spill] sm:$0xff] }
 0x2ef   :  { %3623 = vmatprep.subr.bf16.mxu0 %v11702_v27  ;;  %3666 = vmatprep.subr.bf16.mxu1 %v11703_v17  ;;  %v11713_v27 = vld [vmem:[#allocation58_spill] sm:$0xff]  ;;  %v11714_v17 = vld [vmem:[#allocation59_spill] sm:$0xff] }
 0x2f2   :  { %3624 = vmatpush1.bf16.msra.mxu0 %v11704_v18  ;;  %3667 = vmatpush1.bf16.msra.mxu1 %v11705_v20  ;;  %v11715_v18 = vld [vmem:[#allocation60_spill] sm:$0xff]  ;;  %v11716_v20 = vld [vmem:[#allocation61_spill] sm:$0xff] }
 0x2f3   :  { %3625 = vmatprep.subr.bf16.mxu0 %v11706_v19  ;;  %3668 = vmatprep.subr.bf16.mxu1 %v11707_v50  ;;  %v11717_v19 = vld [vmem:[#allocation62_spill] sm:$0xff]  ;;  %v11718_v50 = vld [vmem:[#allocation63_spill] sm:$0xff] }
 0x2f6   :  { %3626 = vmatpush1.bf16.msra.mxu0 %v11708_v14  ;;  %3669 = vmatpush1.bf16.msra.mxu1 %v11709_v42  ;;  %v11719_v14 = vld [vmem:[#allocation64_spill] sm:$0xff]  ;;  %v11720_v42 = vld [vmem:[#allocation65_spill] sm:$0xff] }
 0x2f7   :  { %3627 = vmatprep.subr.bf16.mxu0 %v11710_v39  ;;  %3670 = vmatprep.subr.bf16.mxu1 %v11711_v23  ;;  %v11721_v39 = vld [vmem:[#allocation66_spill] sm:$0xff]  ;;  %v11722_v23 = vld [vmem:[#allocation67_spill] sm:$0xff] }
 0x2fa   :  { %3628 = vmatpush2.bf16.msra.mxu0 %v11712_v33  ;;  %3671 = vmatpush2.bf16.msra.mxu1 %v11713_v27  ;;  %v11723_v33 = vld [vmem:[#allocation68_spill] sm:$0xff]  ;;  %v11724_v27 = vld [vmem:[#allocation69_spill] sm:$0xff] }
 0x2fb   :  { %3629 = vmatprep.subr.bf16.mxu0 %v11714_v17  ;;  %3672 = vmatprep.subr.bf16.mxu1 %v11715_v18  ;;  %v11725_v17 = vld [vmem:[#allocation70_spill] sm:$0xff]  ;;  %v11726_v18 = vld [vmem:[#allocation71_spill] sm:$0xff] }
 0x2fe   :  { %3630 = vmatpush2.bf16.msra.mxu0 %v11716_v20  ;;  %3673 = vmatpush2.bf16.msra.mxu1 %v11717_v19  ;;  %v11727_v20 = vld [vmem:[#allocation72_spill] sm:$0xff]  ;;  %v11728_v19 = vld [vmem:[#allocation73_spill] sm:$0xff] }
 0x2ff   :  { %3631 = vmatprep.subr.bf16.mxu0 %v11718_v50  ;;  %3674 = vmatprep.subr.bf16.mxu1 %v11719_v14  ;;  %v11729_v50 = vld [vmem:[#allocation74_spill] sm:$0xff]  ;;  %v11730_v14 = vld [vmem:[#allocation75_spill] sm:$0xff] }
 0x302   :  { %3632 = vmatpush2.bf16.msra.mxu0 %v11720_v42  ;;  %3675 = vmatpush2.bf16.msra.mxu1 %v11721_v39  ;;  %v11731_v42 = vld [vmem:[#allocation76_spill] sm:$0xff]  ;;  %v11732_v39 = vld [vmem:[#allocation77_spill] sm:$0xff] }
 0x303   :  { %3633 = vmatprep.subr.bf16.mxu0 %v11722_v23  ;;  %3676 = vmatprep.subr.bf16.mxu1 %v11723_v33  ;;  %v11733_v23 = vld [vmem:[#allocation78_spill] sm:$0xff]  ;;  %v11734_v33 = vld [vmem:[#allocation79_spill] sm:$0xff] }
 0x306   :  { %3634 = vmatpush2.bf16.msra.mxu0 %v11724_v27  ;;  %3677 = vmatpush2.bf16.msra.mxu1 %v11725_v17  ;;  %v11735_v27 = vld [vmem:[#allocation80_spill] sm:$0xff]  ;;  %v11736_v17 = vld [vmem:[#allocation81_spill] sm:$0xff] }
 0x307   :  { %3635 = vmatprep.subr.bf16.mxu0 %v11726_v18  ;;  %3678 = vmatprep.subr.bf16.mxu1 %v11727_v20  ;;  %v11737_v18 = vld [vmem:[#allocation82_spill] sm:$0xff]  ;;  %v11738_v20 = vld [vmem:[#allocation83_spill] sm:$0xff] }
 0x30a   :  { %3636 = vmatpush2.bf16.msra.mxu0 %v11728_v19  ;;  %3679 = vmatpush2.bf16.msra.mxu1 %v11729_v50  ;;  %v11739_v19 = vld [vmem:[#allocation84_spill] sm:$0xff]  ;;  %v11740_v50 = vld [vmem:[#allocation85_spill] sm:$0xff] }
 0x30b   :  { %3637 = vmatprep.subr.bf16.mxu0 %v11730_v14  ;;  %3680 = vmatprep.subr.bf16.mxu1 %v11731_v42  ;;  %v11741_v14 = vld [vmem:[#allocation86_spill] sm:$0xff]  ;;  %v11742_v42 = vld [vmem:[#allocation87_spill] sm:$0xff] }
 0x30e   :  { %3638 = vmatpush2.bf16.msra.mxu0 %v11732_v39  ;;  %3681 = vmatpush2.bf16.msra.mxu1 %v11733_v23  ;;  %v11743_v39 = vld [vmem:[#allocation88_spill] sm:$0xff] }
 0x30f   :  { %3639 = vmatprep.subr.bf16.mxu0 %v11734_v33  ;;  %3682 = vmatprep.subr.bf16.mxu1 %v11735_v27 }
 0x312   :  { %3640 = vmatpush2.bf16.msra.mxu0 %v11736_v17  ;;  %3683 = vmatpush2.bf16.msra.mxu1 %v11737_v18  ;;  %v11744_v17 = vld [vmem:[#allocation15_spill] sm:$0xff] }
 0x313   :  { %3641 = vmatprep.subr.bf16.mxu0 %v11738_v20  ;;  %3684 = vmatprep.subr.bf16.mxu1 %v11739_v19  ;;  %v1920_v18 = vadd.f32 %v11745_v34, %v11744_v17 }
 0x316   :  { %3642 = vmatpush2.bf16.msra.mxu0 %v11740_v50  ;;  %3685 = vmatpush2.bf16.msra.mxu1 %v11741_v14  ;;  %v11748_v50 = vld [vmem:[#allocation35_spill] sm:$0xff]  ;;  %v11749_v14 = vld [vmem:[#allocation114_spill] sm:$0xff] }
 0x317   :  { %3697 = vmatprep.subr.bf16.mxu0 %v11742_v42  ;;  %3740 = vmatprep.subr.bf16.mxu1 %v11743_v39  ;;  %v1983_v39 = vadd.f32 %v11750_v21, %v1920_v18 }
 0x359   :  { %v3347_v23 = vpop.f32.mrf.mxu0  ;;  %v3390_v33 = vpop.f32.mrf.mxu1 }
 0x35a   :  { %v3485_v20 = vadd.f32 %v3347_v23, %v11746_v35  ;;  %v3487_v19 = vadd.f32 %v3390_v33, %v11747_v38  ;;  %v11753_v23 = vld [vmem:[#allocation119_spill] sm:$0xff] }
 0x35b   :  { %v3349_v58 = vpop.f32.mrf.mxu0  ;;  %v3392_v27 = vpop.f32.mrf.mxu1 }
 0x35c   :  { %v3486_v0 = vadd.f32 %v3349_v58, %v11748_v50  ;;  %v3488_v29 = vadd.f32 %v3392_v27, %v11749_v14  ;;  %v7357_v4 = vmul.f32 -1.442695, %v3485_v20  ;;  %v7361_v28 = vmul.f32 -1.442695, %v3487_v19 }
 0x35d   :  { %v3351_v59 = vpop.f32.mrf.mxu0  ;;  %v3394_v6 = vpop.f32.mrf.mxu1 }
 0x35e   :  { %v3493_v30 = vadd.f32 %v3351_v59, %v11751_v3  ;;  %v3495_v26 = vadd.f32 %v3394_v6, %v11752_v25  ;;  %v7358_v34 = vmul.f32 -1.442695, %v3486_v0  ;;  %v7362_v35 = vmul.f32 -1.442695, %v3488_v29 }
 0x35f   :  { %v3353_v42 = vpop.f32.mrf.mxu0  ;;  %v3396_v9 = vpop.f32.mrf.mxu1  ;;  %7905 = vpow2.f32 %v7357_v4 }
 0x360   :  { %v3494_v17 = vadd.f32 %v3353_v42, %v1983_v39  ;;  %v7359_v38 = vmul.f32 -1.442695, %v3493_v30  ;;  %v3496_v33 = vadd.f32 %v3396_v9, %v11753_v23  ;;  %7907 = vpow2.f32 %v7361_v28  ;;  %v11754_v39 = vld [vmem:[#allocation159_spill] sm:$0xff] }
 0x361   :  { %v7363_v58 = vmul.f32 -1.442695, %v3495_v26  ;;  %7909 = vpow2.f32 %v7358_v34 }
 0x362   :  { %v7360_v27 = vmul.f32 -1.442695, %v3494_v17  ;;  %7911 = vpow2.f32 %v7362_v35  ;;  %v7364_v21 = vmul.f32 -1.442695, %v3496_v33  ;;  %v11755_v35 = vld [vmem:[#allocation167_spill] sm:$0xff] }
 0x363   :  { %7913 = vpow2.f32 %v7359_v38 }
 0x364   :  { %7915 = vpow2.f32 %v7363_v58 }
 0x365   :  { %7917 = vpow2.f32 %v7360_v27  ;;  %v11756_v27 = vld [vmem:[#allocation160_spill] sm:$0xff] }
 0x366   :  { %7919 = vpow2.f32 %v7364_v21 }
 0x36c   :  { %v7906_v59 = vpop.eup %7905 }
 0x36d   :  { %v7908_v25 = vpop.eup %7907  ;;  %v3513_v3 = vadd.f32 1.0, %v7906_v59  ;;  %v11757_v59 = vld [vmem:[#allocation168_spill] sm:$0xff] }
 0x36e   :  { %v7910_v6 = vpop.eup %7909  ;;  %v3537_v4 = vadd.f32 1.0, %v7908_v25 }
 0x36f   :  { %v7912_v0 = vpop.eup %7911  ;;  %v3514_v18 = vadd.f32 1.0, %v7910_v6  ;;  %7921 = vrcp.f32 %v3513_v3 }
 0x370   :  { %v7914_v29 = vpop.eup %7913  ;;  %v3538_v28 = vadd.f32 1.0, %v7912_v0  ;;  %7923 = vrcp.f32 %v3537_v4 }
 0x371   :  { %v7916_v30 = vpop.eup %7915  ;;  %v3515_v26 = vadd.f32 1.0, %v7914_v29  ;;  %7925 = vrcp.f32 %v3514_v18  ;;  %v11758_v29 = vld [vmem:[#allocation161_spill] sm:$0xff] }
 0x372   :  { %v7918_v9 = vpop.eup %7917  ;;  %v3539_v20 = vadd.f32 1.0, %v7916_v30  ;;  %7927 = vrcp.f32 %v3538_v28  ;;  %v11759_v30 = vld [vmem:[#allocation169_spill] sm:$0xff] }
 0x373   :  { %v7920_v17 = vpop.eup %7919  ;;  %v3516_v19 = vadd.f32 1.0, %v7918_v9  ;;  %7929 = vrcp.f32 %v3515_v26 }
 0x374   :  { %v3540_v50 = vadd.f32 1.0, %v7920_v17  ;;  %7931 = vrcp.f32 %v3539_v20  ;;  %v11760_v17 = vld [vmem:[#allocation162_spill] sm:$0xff] }
 0x375   :  { %7933 = vrcp.f32 %v3516_v19  ;;  %v11761_v19 = vld [vmem:[#allocation170_spill] sm:$0xff] }
 0x399   :  { %v3433_v14 = vpop.f32.mrf.mxu0  ;;  %v3476_v42 = vpop.f32.mrf.mxu1 }
 0x39a   :  { %v3489_v34 = vadd.f32 %v3433_v14, %v11754_v39  ;;  %v3491_v38 = vadd.f32 %v3476_v42, %v11755_v35  ;;  %v7922_v42 = vpop.eup %7921 }
 0x39b   :  { %v3435_v23 = vpop.f32.mrf.mxu0  ;;  %v3478_v33 = vpop.f32.mrf.mxu1 }
 0x39c   :  { %7935 = vtanh.f32 %v3489_v34  ;;  %v7365_v58 = vmul.f32 -1.442695, %v3491_v38  ;;  %v3490_v21 = vadd.f32 %v3435_v23, %v11756_v27  ;;  %v3492_v25 = vadd.f32 %v3478_v33, %v11757_v59  ;;  %v7924_v39 = vpop.eup %7923 }
 0x39d   :  { %7937 = vrcp.f32 %v3540_v50  ;;  %v3437_v6 = vpop.f32.mrf.mxu0  ;;  %v3480_v0 = vpop.f32.mrf.mxu1 }
 0x39e   :  { %7939 = vpow2.f32 %v7365_v58  ;;  %v7366_v3 = vmul.f32 -1.442695, %v3492_v25  ;;  %v3497_v4 = vadd.f32 %v3437_v6, %v11758_v29  ;;  %v3499_v18 = vadd.f32 %v3480_v0, %v11759_v30  ;;  %v7926_v34 = vpop.eup %7925 }
 0x39f   :  { %7941 = vtanh.f32 %v3490_v21  ;;  %v3439_v9 = vpop.f32.mrf.mxu0  ;;  %v3482_v28 = vpop.f32.mrf.mxu1  ;;  %v3577_v21 = vmul.f32 %v7924_v39, %v9624_v15 }
 0x3a0   :  { %7943 = vpow2.f32 %v7366_v3  ;;  %v7367_v26 = vmul.f32 -1.442695, %v3499_v18  ;;  %v3498_v20 = vadd.f32 %v3439_v9, %v11760_v17  ;;  %v3500_v14 = vadd.f32 %v3482_v28, %v11761_v19  ;;  %v7928_v35 = vpop.eup %7927 }
 0x3a1   :  { %7945 = vtanh.f32 %v3497_v4  ;;  %v7930_v38 = vpop.eup %7929  ;;  %v3578_v4 = vmul.f32 %v7928_v35, %v9630_v10 }
 0x3a2   :  { %7947 = vpow2.f32 %v7367_v26  ;;  %v7368_v50 = vmul.f32 -1.442695, %v3500_v14  ;;  %v7932_v23 = vpop.eup %7931 }
 0x3a3   :  { %7949 = vtanh.f32 %v3498_v20  ;;  %v7934_v33 = vpop.eup %7933  ;;  %v3579_v15 = vmul.f32 %v7932_v23, %v9633_v24 }
 0x3a4   :  { %7951 = vpow2.f32 %v7368_v50 }
 0x3a9   :  { %v7936_v58 = vpop.eup %7935 }
 0x3aa   :  { %v7938_v27 = vpop.eup %7937  ;;  %v3581_v59 = vmul.f32 %v7936_v58, %v7922_v42 }
 0x3ab   :  { %v7940_v25 = vpop.eup %7939  ;;  %v3580_v10 = vmul.f32 %v7938_v27, %v9636_v7 }
 0x3ac   :  { %v7942_v6 = vpop.eup %7941  ;;  %v9798_v0 = vadd.f32 %v3581_v59, %v3577_v21  ;;  %v3565_v3 = vadd.f32 1.0, %v7940_v25 }
 0x3ad   :  { %v7944_v29 = vpop.eup %7943  ;;  %v3582_v30 = vmul.f32 %v7942_v6, %v7926_v34 }
 0x3ae   :  { %v7946_v18 = vpop.eup %7945  ;;  %7953 = vtanh.f32 %v9798_v0  ;;  %v3566_v9 = vadd.f32 1.0, %v7944_v29 }
 0x3af   :  { %v7948_v28 = vpop.eup %7947  ;;  %7955 = vrcp.f32 %v3565_v3  ;;  %v9802_v26 = vadd.f32 %v3582_v30, %v3578_v4  ;;  %v3583_v17 = vmul.f32 %v7946_v18, %v7930_v38  ;;  %v3973_v4 = vld [vmem:[#allocation6 + $0x180] sm:$0xff]  ;;  %v3974_v18 = vld [vmem:[#allocation6 + $0x188] sm:$0xff] }
 0x3b0   :  { %v7950_v20 = vpop.eup %7949  ;;  %7957 = vrcp.f32 %v3566_v9  ;;  %v3567_v19 = vadd.f32 1.0, %v7948_v28  ;;  %v3977_v30 = vld [vmem:[#allocation6 + $0x1a0] sm:$0xff]  ;;  %v3978_v9 = vld [vmem:[#allocation6 + $0x1a8] sm:$0xff]  ;;  %v11789_v28 = vld [vmem:[#allocation157_spill] sm:$0xff] }
 0x3b1   :  { %v7952_v14 = vpop.eup %7951  ;;  %7959 = vtanh.f32 %v9802_v26  ;;  %v9806_v42 = vadd.f32 %v3583_v17, %v3579_v15  ;;  %v3584_v50 = vmul.f32 %v7950_v20, %v7934_v33  ;;  %v11790_v15 = vld [vmem:[#allocation158_spill] sm:$0xff] }
 0x3b2   :  { %7961 = vrcp.f32 %v3567_v19  ;;  %v3568_v39 = vadd.f32 1.0, %v7952_v14  ;;  %v7448_v19 = vcombine.high %v3973_v4, %v3977_v30  ;;  %v7450_v14 = vcombine.high %v3974_v18, %v3978_v9 }
 0x3b3   :  { %7963 = vtanh.f32 %v9806_v42  ;;  %v9810_v34 = vadd.f32 %v3584_v50, %v3580_v10  ;;  %v3965_v10 = vld [vmem:[#allocation6 + $0x140] sm:$0xff] }
 0x3b4   :  { %7965 = vrcp.f32 %v3568_v39  ;;  %v3969_v50 = vld [vmem:[#allocation6 + $0x160] sm:$0xff]  ;;  %v3966_v39 = vld [vmem:[#allocation6 + $0x148] sm:$0xff] }
 0x3b5   :  { %7967 = vtanh.f32 %v9810_v34 }
 0x3bb   :  { %v7954_v24 = vpop.eup %7953 }
 0x3bc   :  { %v7956_v35 = vpop.eup %7955 }
 0x3bd   :  { %v7958_v38 = vpop.eup %7957  ;;  %v3593_v25 = vmul.f32 %v7956_v35, %v7954_v24  ;;  %v3970_v24 = vld [vmem:[#allocation6 + $0x168] sm:$0xff]  ;;  %v11791_v35 = vld [vmem:[#allocation23_spill] sm:$0xff] }
 0x3be   :  { %v7960_v23 = vpop.eup %7959 }
 0x3bf   :  { %v7962_v58 = vpop.eup %7961  ;;  %v3594_v33 = vmul.f32 %v7960_v23, %v7958_v38  ;;  %v7447_v38 = vcombine.low %v3973_v4, %v3977_v30  ;;  %v7449_v23 = vcombine.low %v3974_v18, %v3978_v9  ;;  %v4045_v30 = vld [vmem:[#allocation6 + $0x3c0] sm:$0xff]  ;;  %v4046_v9 = vld [vmem:[#allocation6 + $0x3c8] sm:$0xff] }
 0x3c0   :  { %v7964_v21 = vpop.eup %7963  ;;  %v4049_v18 = vld [vmem:[#allocation6 + $0x3e0] sm:$0xff] }
 0x3c1   :  { %v7966_v59 = vpop.eup %7965  ;;  %v3595_v6 = vmul.f32 %v7964_v21, %v7962_v58  ;;  %v7440_v58 = vcombine.high %v3965_v10, %v3969_v50  ;;  %v7442_v21 = vcombine.high %v3966_v39, %v3970_v24 }
 0x3c2   :  { %v7968_v7 = vpop.eup %7967 }
 0x3c3   :  { %v9813_v27 = vpack.c.bf16 %v3595_v6, %v3593_v25  ;;  %v3596_v3 = vmul.f32 %v7968_v7, %v7966_v59  ;;  %v3957_v59 = vld [vmem:[#allocation6 + $0x100] sm:$0xff]  ;;  %v3958_v6 = vld [vmem:[#allocation6 + $0x108] sm:$0xff] }
 0x3c4   :  { %v3961_v25 = vld [vmem:[#allocation6 + $0x120] sm:$0xff]  ;;  %v3962_v7 = vld [vmem:[#allocation6 + $0x128] sm:$0xff] }
 0x3c5   :  { %v9815_v29 = vpack.c.bf16 %v3596_v3, %v3594_v33  ;;  %v7439_v33 = vcombine.low %v3965_v10, %v3969_v50  ;;  %v7441_v3 = vcombine.low %v3966_v39, %v3970_v24  ;;  %v4041_v10 = vld [vmem:[#allocation6 + $0x3a0] sm:$0xff]  ;;  %v4038_v50 = vld [vmem:[#allocation6 + $0x388] sm:$0xff]  ;;  %v7519_v24 = vcombine.low %v4045_v30, %v4049_v18 }
 0x3c6   :  { %v4042_v39 = vld [vmem:[#allocation6 + $0x3a8] sm:$0xff] }
 0x3c7   :  { %3643 = vmatprep.mubr.bf16.mxu0 %v9815_v29  ;;  %3686 = vmatprep.mubr.bf16.mxu1 %v9815_v29 }
 0x3c8   :  { %3644 = vmatmul.mubr.bf16.vlgmr.msra.gmra.mxu0 %v9813_v27  ;;  %3687 = vmatmul.mubr.bf16.vlgmr.msra.gmra.mxu1 %v9813_v27 }
 0x3c9   :  { %3698 = vmatpush1.bf16.msra.mxu0 %v11635_v56  ;;  %3741 = vmatpush1.bf16.msra.mxu1 %v11636_v1  ;;  %v11769_v56 = vld [vmem:[#allocation137_spill] sm:$0xff]  ;;  %v11770_v1 = vld [vmem:[#allocation138_spill] sm:$0xff] }
 0x3ca   :  { %3729 = vmatprep.mubr.bf16.mxu0 %v9815_v29  ;;  %3772 = vmatprep.mubr.bf16.mxu1 %v9815_v29 }
 0x3cb   :  { %3699 = vmatprep.subr.bf16.mxu0 %v11637_v60  ;;  %3742 = vmatprep.subr.bf16.mxu1 %v11638_v13  ;;  %v11771_v60 = vld [vmem:[#allocation139_spill] sm:$0xff]  ;;  %v11772_v13 = vld [vmem:[#allocation140_spill] sm:$0xff] }
 0x3cd   :  { %3700 = vmatpush1.bf16.msra.mxu0 %v11639_v51  ;;  %3743 = vmatpush1.bf16.msra.mxu1 %v11640_v49  ;;  %v11773_v51 = vld [vmem:[#allocation141_spill] sm:$0xff]  ;;  %v11774_v49 = vld [vmem:[#allocation142_spill] sm:$0xff] }
 0x3ce   :  { %3701 = vmatprep.subr.bf16.mxu0 %v11641_v48  ;;  %3744 = vmatprep.subr.bf16.mxu1 %v11642_v61  ;;  %v11775_v48 = vld [vmem:[#allocation143_spill] sm:$0xff]  ;;  %v11776_v61 = vld [vmem:[#allocation144_spill] sm:$0xff] }
 0x3d1   :  { %3702 = vmatpush1.bf16.msra.mxu0 %v11643_v11  ;;  %3745 = vmatpush1.bf16.msra.mxu1 %v11644_v62  ;;  %v11777_v11 = vld [vmem:[#allocation145_spill] sm:$0xff]  ;;  %v11778_v62 = vld [vmem:[#allocation146_spill] sm:$0xff] }
 0x3d2   :  { %3703 = vmatprep.subr.bf16.mxu0 %v11645_v2  ;;  %3746 = vmatprep.subr.bf16.mxu1 %v11646_v57  ;;  %v11779_v2 = vld [vmem:[#allocation147_spill] sm:$0xff]  ;;  %v11780_v57 = vld [vmem:[#allocation148_spill] sm:$0xff] }
 0x3d5   :  { %3704 = vmatpush1.bf16.msra.mxu0 %v11647_v40  ;;  %3747 = vmatpush1.bf16.msra.mxu1 %v11648_v31  ;;  %v11781_v40 = vld [vmem:[#allocation149_spill] sm:$0xff]  ;;  %v11782_v31 = vld [vmem:[#allocation150_spill] sm:$0xff] }
 0x3d6   :  { %3705 = vmatprep.subr.bf16.mxu0 %v11649_v45  ;;  %3748 = vmatprep.subr.bf16.mxu1 %v11650_v55  ;;  %v11783_v45 = vld [vmem:[#allocation151_spill] sm:$0xff]  ;;  %v11784_v55 = vld [vmem:[#allocation152_spill] sm:$0xff] }
 0x3d9   :  { %3706 = vmatpush1.bf16.msra.mxu0 %v11651_v54  ;;  %3749 = vmatpush1.bf16.msra.mxu1 %v11652_v53  ;;  %v3981_v54 = vld [vmem:[#allocation6 + $0x1c0] sm:$0xff] }
 0x3da   :  { %3707 = vmatprep.subr.bf16.mxu0 %v11653_v37  ;;  %3750 = vmatprep.subr.bf16.mxu1 %v11654_v32  ;;  %v3985_v53 = vld [vmem:[#allocation6 + $0x1e0] sm:$0xff]  ;;  %v3982_v37 = vld [vmem:[#allocation6 + $0x1c8] sm:$0xff] }
 0x3db   :  { %v3986_v32 = vld [vmem:[#allocation6 + $0x1e8] sm:$0xff]  ;;  %v7455_v17 = vcombine.low %v3981_v54, %v3985_v53 }
 0x3dc   :  { %v7457_v20 = vcombine.low %v3982_v37, %v3986_v32 }
 0x3dd   :  { %3708 = vmatpush1.bf16.msra.mxu0 %v9164_v8  ;;  %3751 = vmatpush1.bf16.msra.mxu1 %v9171_v47  ;;  %v11762_v8 = vld [vmem:[#allocation130_spill] sm:$0xff]  ;;  %v11765_v47 = vld [vmem:[#allocation133_spill] sm:$0xff] }
 0x3de   :  { %3709 = vmatprep.subr.bf16.mxu0 %v9173_v46  ;;  %3752 = vmatprep.subr.bf16.mxu1 %v9176_v43  ;;  %v11763_v43 = vld [vmem:[#allocation131_spill] sm:$0xff]  ;;  %v11766_v46 = vld [vmem:[#allocation134_spill] sm:$0xff] }
 0x3e1   :  { %3710 = vmatpush1.bf16.msra.mxu0 %v9194_v44  ;;  %3753 = vmatpush1.bf16.msra.mxu1 %v9201_v36  ;;  %v11764_v44 = vld [vmem:[#allocation132_spill] sm:$0xff]  ;;  %v11767_v36 = vld [vmem:[#allocation135_spill] sm:$0xff] }
 0x3e2   :  { %3711 = vmatprep.subr.bf16.mxu0 %v9203_v52  ;;  %3754 = vmatprep.subr.bf16.mxu1 %v11655_v22  ;;  %v11768_v52 = vld [vmem:[#allocation136_spill] sm:$0xff]  ;;  %v11785_v22 = vld [vmem:[#allocation153_spill] sm:$0xff] }
 0x3e5   :  { %3712 = vmatpush1.bf16.msra.mxu0 %v11656_v5  ;;  %3755 = vmatpush1.bf16.msra.mxu1 %v11657_v16  ;;  %v11786_v5 = vld [vmem:[#allocation154_spill] sm:$0xff]  ;;  %v11787_v16 = vld [vmem:[#allocation155_spill] sm:$0xff] }
 0x3e6   :  { %3713 = vmatprep.subr.bf16.mxu0 %v11658_v12  ;;  %3756 = vmatprep.subr.bf16.mxu1 %v11659_v63  ;;  %v11788_v12 = vld [vmem:[#allocation156_spill] sm:$0xff]  ;;  %v7456_v63 = vcombine.high %v3981_v54, %v3985_v53 }
 0x3e9   :  { %3714 = vmatpush2.bf16.msra.mxu0 %v11660_v41  ;;  %3757 = vmatpush2.bf16.msra.mxu1 %v11762_v8  ;;  %v7458_v41 = vcombine.high %v3982_v37, %v3986_v32  ;;  %v7432_v8 = vcombine.high %v3957_v59, %v3961_v25  ;;  %v3925_v32 = vld [vmem:[#allocation6] sm:$0xff] }
 0x3ea   :  { %3715 = vmatprep.subr.bf16.mxu0 %v11763_v43  ;;  %3758 = vmatprep.subr.bf16.mxu1 %v11764_v44  ;;  %v7434_v43 = vcombine.high %v3958_v6, %v3962_v7  ;;  %v3949_v44 = vld [vmem:[#allocation6 + $0xc0] sm:$0xff] }
 0x3ed   :  { %3716 = vmatpush2.bf16.msra.mxu0 %v11765_v47  ;;  %3759 = vmatpush2.bf16.msra.mxu1 %v11766_v46  ;;  %v3953_v47 = vld [vmem:[#allocation6 + $0xe0] sm:$0xff]  ;;  %v3950_v46 = vld [vmem:[#allocation6 + $0xc8] sm:$0xff] }
 0x3ee   :  { %3717 = vmatprep.subr.bf16.mxu0 %v11767_v36  ;;  %3760 = vmatprep.subr.bf16.mxu1 %v11768_v52  ;;  %v3954_v36 = vld [vmem:[#allocation6 + $0xe8] sm:$0xff]  ;;  %v7431_v52 = vcombine.low %v3957_v59, %v3961_v25  ;;  %v4033_v59 = vld [vmem:[#allocation6 + $0x360] sm:$0xff] }
 0x3ef   :  { %v4030_v25 = vld [vmem:[#allocation6 + $0x348] sm:$0xff] }
 0x3f1   :  { %3718 = vmatpush2.bf16.msra.mxu0 %v11769_v56  ;;  %3761 = vmatpush2.bf16.msra.mxu1 %v11770_v1  ;;  %v7433_v56 = vcombine.low %v3958_v6, %v3962_v7  ;;  %v7424_v1 = vcombine.high %v3949_v44, %v3953_v47  ;;  %v4034_v6 = vld [vmem:[#allocation6 + $0x368] sm:$0xff] }
 0x3f2   :  { %3719 = vmatprep.subr.bf16.mxu0 %v11771_v60  ;;  %3762 = vmatprep.subr.bf16.mxu1 %v11772_v13  ;;  %v7426_v60 = vcombine.high %v3950_v46, %v3954_v36  ;;  %v3941_v13 = vld [vmem:[#allocation6 + $0x80] sm:$0xff] }
 0x3f5   :  { %3720 = vmatpush2.bf16.msra.mxu0 %v11773_v51  ;;  %3763 = vmatpush2.bf16.msra.mxu1 %v11774_v49  ;;  %v3945_v51 = vld [vmem:[#allocation6 + $0xa0] sm:$0xff]  ;;  %v3942_v49 = vld [vmem:[#allocation6 + $0x88] sm:$0xff] }
 0x3f6   :  { %3721 = vmatprep.subr.bf16.mxu0 %v11775_v48  ;;  %3764 = vmatprep.subr.bf16.mxu1 %v11776_v61  ;;  %v3946_v48 = vld [vmem:[#allocation6 + $0xa8] sm:$0xff]  ;;  %v7423_v61 = vcombine.low %v3949_v44, %v3953_v47  ;;  %v4025_v44 = vld [vmem:[#allocation6 + $0x320] sm:$0xff] }
 0x3f7   :  { %v7417_v54 = vcombine.low %v3942_v49, %v3946_v48  ;;  %v4022_v47 = vld [vmem:[#allocation6 + $0x308] sm:$0xff] }
 0x3f9   :  { %3722 = vmatpush2.bf16.msra.mxu0 %v11777_v11  ;;  %3765 = vmatpush2.bf16.msra.mxu1 %v11778_v62  ;;  %v7425_v11 = vcombine.low %v3950_v46, %v3954_v36  ;;  %v7416_v62 = vcombine.high %v3941_v13, %v3945_v51  ;;  %v4026_v46 = vld [vmem:[#allocation6 + $0x328] sm:$0xff] }
 0x3fa   :  { %3723 = vmatprep.subr.bf16.mxu0 %v11779_v2  ;;  %3766 = vmatprep.subr.bf16.mxu1 %v11780_v57  ;;  %v7418_v2 = vcombine.high %v3942_v49, %v3946_v48  ;;  %v3933_v57 = vld [vmem:[#allocation6 + $0x40] sm:$0xff]  ;;  %v4018_v49 = vld [vmem:[#allocation6 + $0x2e8] sm:$0xff] }
 0x3fd   :  { %3724 = vmatpush2.bf16.msra.mxu0 %v11781_v40  ;;  %3767 = vmatpush2.bf16.msra.mxu1 %v11782_v31  ;;  %v3937_v40 = vld [vmem:[#allocation6 + $0x60] sm:$0xff]  ;;  %v3934_v31 = vld [vmem:[#allocation6 + $0x48] sm:$0xff] }
 0x3fe   :  { %3725 = vmatprep.subr.bf16.mxu0 %v11783_v45  ;;  %3768 = vmatprep.subr.bf16.mxu1 %v11784_v55  ;;  %v3938_v45 = vld [vmem:[#allocation6 + $0x68] sm:$0xff]  ;;  %v7415_v55 = vcombine.low %v3941_v13, %v3945_v51  ;;  %v7408_v53 = vcombine.high %v3933_v57, %v3937_v40  ;;  %v4017_v13 = vld [vmem:[#allocation6 + $0x2e0] sm:$0xff] }
 0x3ff   :  { %v7410_v37 = vcombine.high %v3934_v31, %v3938_v45  ;;  %v4014_v51 = vld [vmem:[#allocation6 + $0x2c8] sm:$0xff] }
 0x401   :  { %3726 = vmatpush2.bf16.msra.mxu0 %v11785_v22  ;;  %3769 = vmatpush2.bf16.msra.mxu1 %v11786_v5  ;;  %v3929_v22 = vld [vmem:[#allocation6 + $0x20] sm:$0xff]  ;;  %v3926_v5 = vld [vmem:[#allocation6 + $0x8] sm:$0xff] }
 0x402   :  { %3727 = vmatprep.subr.bf16.mxu0 %v11787_v16  ;;  %3770 = vmatprep.subr.bf16.mxu1 %v11788_v12  ;;  %v3930_v16 = vld [vmem:[#allocation6 + $0x28] sm:$0xff]  ;;  %v7407_v12 = vcombine.low %v3933_v57, %v3937_v40  ;;  %v4009_v57 = vld [vmem:[#allocation6 + $0x2a0] sm:$0xff] }
 0x403   :  { %v7402_v4 = vcombine.high %v3926_v5, %v3930_v16  ;;  %v4006_v40 = vld [vmem:[#allocation6 + $0x288] sm:$0xff] }
 0x405   :  { %3728 = vmatpush2.bf16.msra.mxu0 %v11789_v28  ;;  %3771 = vmatpush2.bf16.msra.mxu1 %v11790_v15  ;;  %v4050_v28 = vld [vmem:[#allocation6 + $0x3e8] sm:$0xff]  ;;  %v7399_v15 = vcombine.low %v3925_v32, %v3929_v22 }
 0x406   :  { %4893 = vmatprep.subr.bf16.mxu0 %v7456_v63  ;;  %4956 = vmatprep.subr.bf16.mxu1 %v7458_v41  ;;  %v7409_v63 = vcombine.low %v3934_v31, %v3938_v45  ;;  %v7400_v41 = vcombine.high %v3925_v32, %v3929_v22  ;;  %v4010_v31 = vld [vmem:[#allocation6 + $0x2a8] sm:$0xff]  ;;  %v4001_v32 = vld [vmem:[#allocation6 + $0x260] sm:$0xff] }
 0x407   :  { %v3998_v22 = vld [vmem:[#allocation6 + $0x248] sm:$0xff] }
 0x408   :  { %3730 = vmatmul.mubr.bf16.vlgmr.msra.gmra.mxu0 %v9813_v27  ;;  %3773 = vmatmul.mubr.bf16.vlgmr.msra.gmra.mxu1 %v9813_v27 }
 0x409   :  { %4894 = vmatpush1.bf16.msra.mxu0 %v7455_v17  ;;  %4925 = vmatprep.mubr.bf16.mxu0 %v11791_v35  ;;  %v7401_v17 = vcombine.low %v3926_v5, %v3930_v16  ;;  %v4002_v5 = vld [vmem:[#allocation6 + $0x268] sm:$0xff] }
 0x40a   :  { %4957 = vmatpush1.bf16.msra.mxu1 %v7457_v20  ;;  %4988 = vmatprep.mubr.bf16.mxu1 %v11791_v35  ;;  %v7520_v20 = vcombine.high %v4045_v30, %v4049_v18  ;;  %v3993_v30 = vld [vmem:[#allocation6 + $0x220] sm:$0xff]  ;;  %v3990_v18 = vld [vmem:[#allocation6 + $0x208] sm:$0xff] }
 0x40b   :  { %4895 = vmatprep.subr.bf16.mxu0 %v7448_v19  ;;  %4958 = vmatprep.subr.bf16.mxu1 %v7450_v14  ;;  %v7522_v19 = vcombine.high %v4046_v9, %v4050_v28  ;;  %v4037_v14 = vld [vmem:[#allocation6 + $0x380] sm:$0xff] }
 0x40c   :  { %v7511_v7 = vcombine.low %v4037_v14, %v4041_v10 }
 0x40d   :  { %4896 = vmatpush1.bf16.msra.mxu0 %v7447_v38  ;;  %v7521_v38 = vcombine.low %v4046_v9, %v4050_v28  ;;  %v3994_v9 = vld [vmem:[#allocation6 + $0x228] sm:$0xff] }
 0x40e   :  { %4959 = vmatpush1.bf16.msra.mxu1 %v7449_v23  ;;  %4897 = vmatprep.subr.bf16.mxu0 %v7440_v58  ;;  %v7512_v23 = vcombine.high %v4037_v14, %v4041_v10  ;;  %v7514_v58 = vcombine.high %v4038_v50, %v4042_v39  ;;  %v3987_v14 = vld [vmem:[#allocation6 + $0x1f0] sm:$0xff]  ;;  %v3984_v10 = vld [vmem:[#allocation6 + $0x1d8] sm:$0xff] }
 0x40f   :  { %4960 = vmatprep.subr.bf16.mxu1 %v7442_v21  ;;  %v4029_v21 = vld [vmem:[#allocation6 + $0x340] sm:$0xff] }
 0x410   :  { %v7503_v36 = vcombine.low %v4029_v21, %v4033_v59 }
 0x411   :  { %4898 = vmatpush1.bf16.msra.mxu0 %v7439_v33  ;;  %v7513_v33 = vcombine.low %v4038_v50, %v4042_v39  ;;  %v3988_v50 = vld [vmem:[#allocation6 + $0x1f8] sm:$0xff] }
 0x412   :  { %4961 = vmatpush1.bf16.msra.mxu1 %v7441_v3  ;;  %4899 = vmatprep.subr.bf16.mxu0 %v7432_v8  ;;  %v7504_v3 = vcombine.high %v4029_v21, %v4033_v59  ;;  %v7506_v8 = vcombine.high %v4030_v25, %v4034_v6  ;;  %v3979_v21 = vld [vmem:[#allocation6 + $0x1b0] sm:$0xff]  ;;  %v3976_v59 = vld [vmem:[#allocation6 + $0x198] sm:$0xff] }
 0x413   :  { %4962 = vmatprep.subr.bf16.mxu1 %v7434_v43  ;;  %v4021_v43 = vld [vmem:[#allocation6 + $0x300] sm:$0xff] }
 0x414   :  { %v7495_v48 = vcombine.low %v4021_v43, %v4025_v44 }
 0x415   :  { %4900 = vmatpush1.bf16.msra.mxu0 %v7431_v52  ;;  %v7505_v52 = vcombine.low %v4030_v25, %v4034_v6  ;;  %v3980_v25 = vld [vmem:[#allocation6 + $0x1b8] sm:$0xff] }
 0x416   :  { %4963 = vmatpush1.bf16.msra.mxu1 %v7433_v56  ;;  %4901 = vmatprep.subr.bf16.mxu0 %v7424_v1  ;;  %v7496_v56 = vcombine.high %v4021_v43, %v4025_v44  ;;  %v7498_v1 = vcombine.high %v4022_v47, %v4026_v46  ;;  %v3967_v43 = vld [vmem:[#allocation6 + $0x150] sm:$0xff] }
 0x417   :  { %4964 = vmatprep.subr.bf16.mxu1 %v7426_v60  ;;  %v4013_v60 = vld [vmem:[#allocation6 + $0x2c0] sm:$0xff]  ;;  %v3971_v44 = vld [vmem:[#allocation6 + $0x170] sm:$0xff] }
 0x418   :  { %v7487_v45 = vcombine.low %v4013_v60, %v4017_v13 }
 0x419   :  { %4902 = vmatpush1.bf16.msra.mxu0 %v7423_v61  ;;  %v7497_v61 = vcombine.low %v4022_v47, %v4026_v46  ;;  %v3968_v47 = vld [vmem:[#allocation6 + $0x158] sm:$0xff] }
 0x41a   :  { %4965 = vmatpush1.bf16.msra.mxu1 %v7425_v11  ;;  %4903 = vmatprep.subr.bf16.mxu0 %v7416_v62  ;;  %v7488_v11 = vcombine.high %v4013_v60, %v4017_v13  ;;  %v7490_v62 = vcombine.high %v4014_v51, %v4018_v49  ;;  %v3972_v46 = vld [vmem:[#allocation6 + $0x178] sm:$0xff]  ;;  %v3959_v60 = vld [vmem:[#allocation6 + $0x110] sm:$0xff] }
 0x41b   :  { %4966 = vmatprep.subr.bf16.mxu1 %v7418_v2  ;;  %v4005_v2 = vld [vmem:[#allocation6 + $0x280] sm:$0xff]  ;;  %v3963_v13 = vld [vmem:[#allocation6 + $0x130] sm:$0xff] }
 0x41c   :  { %v7479_v16 = vcombine.low %v4005_v2, %v4009_v57 }
 0x41d   :  { %4904 = vmatpush1.bf16.msra.mxu0 %v7415_v55  ;;  %v7489_v55 = vcombine.low %v4014_v51, %v4018_v49  ;;  %v3960_v51 = vld [vmem:[#allocation6 + $0x118] sm:$0xff] }
 0x41e   :  { %4967 = vmatpush1.bf16.msra.mxu1 %v7417_v54  ;;  %4905 = vmatprep.subr.bf16.mxu0 %v7408_v53  ;;  %v7480_v54 = vcombine.high %v4005_v2, %v4009_v57  ;;  %v7482_v53 = vcombine.high %v4006_v40, %v4010_v31  ;;  %v3964_v49 = vld [vmem:[#allocation6 + $0x138] sm:$0xff]  ;;  %v3951_v2 = vld [vmem:[#allocation6 + $0xd0] sm:$0xff] }
 0x41f   :  { %4968 = vmatprep.subr.bf16.mxu1 %v7410_v37  ;;  %v3997_v37 = vld [vmem:[#allocation6 + $0x240] sm:$0xff]  ;;  %v3955_v57 = vld [vmem:[#allocation6 + $0xf0] sm:$0xff] }
 0x420   :  { %v7471_v28 = vcombine.low %v3997_v37, %v4001_v32 }
 0x421   :  { %4906 = vmatpush1.bf16.msra.mxu0 %v7407_v12  ;;  %v7481_v12 = vcombine.low %v4006_v40, %v4010_v31  ;;  %v3952_v40 = vld [vmem:[#allocation6 + $0xd8] sm:$0xff] }
 0x422   :  { %4969 = vmatpush1.bf16.msra.mxu1 %v7409_v63  ;;  %4907 = vmatprep.subr.bf16.mxu0 %v7400_v41  ;;  %v7472_v63 = vcombine.high %v3997_v37, %v4001_v32  ;;  %v7474_v41 = vcombine.high %v3998_v22, %v4002_v5  ;;  %v3956_v31 = vld [vmem:[#allocation6 + $0xf8] sm:$0xff]  ;;  %v3943_v37 = vld [vmem:[#allocation6 + $0x90] sm:$0xff] }
 0x423   :  { %4970 = vmatprep.subr.bf16.mxu1 %v7402_v4  ;;  %v3989_v4 = vld [vmem:[#allocation6 + $0x200] sm:$0xff]  ;;  %v3947_v32 = vld [vmem:[#allocation6 + $0xb0] sm:$0xff] }
 0x424   :  { %v7463_v39 = vcombine.low %v3989_v4, %v3993_v30 }
 0x425   :  { %4908 = vmatpush1.bf16.msra.mxu0 %v7399_v15  ;;  %v7473_v15 = vcombine.low %v3998_v22, %v4002_v5  ;;  %v3944_v22 = vld [vmem:[#allocation6 + $0x98] sm:$0xff] }
 0x426   :  { %4971 = vmatpush1.bf16.msra.mxu1 %v7401_v17  ;;  %4909 = vmatprep.subr.bf16.mxu0 %v7520_v20  ;;  %v7464_v17 = vcombine.high %v3989_v4, %v3993_v30  ;;  %v7466_v20 = vcombine.high %v3990_v18, %v3994_v9  ;;  %v3948_v5 = vld [vmem:[#allocation6 + $0xb8] sm:$0xff]  ;;  %v3935_v4 = vld [vmem:[#allocation6 + $0x50] sm:$0xff] }
 0x427   :  { %4972 = vmatprep.subr.bf16.mxu1 %v7522_v19  ;;  %v3983_v19 = vld [vmem:[#allocation6 + $0x1d0] sm:$0xff] }
 0x428   :  { %v7459_v6 = vcombine.low %v3983_v19, %v3987_v14  ;;  %v3939_v30 = vld [vmem:[#allocation6 + $0x70] sm:$0xff] }
 0x429   :  { %4910 = vmatpush2.bf16.msra.mxu0 %v7519_v24  ;;  %v7465_v24 = vcombine.low %v3990_v18, %v3994_v9  ;;  %v3936_v18 = vld [vmem:[#allocation6 + $0x58] sm:$0xff] }
 0x42a   :  { %4973 = vmatpush2.bf16.msra.mxu1 %v7521_v38  ;;  %4911 = vmatprep.subr.bf16.mxu0 %v7512_v23  ;;  %v7460_v38 = vcombine.high %v3983_v19, %v3987_v14  ;;  %v7462_v23 = vcombine.high %v3984_v10, %v3988_v50  ;;  %v3940_v9 = vld [vmem:[#allocation6 + $0x78] sm:$0xff]  ;;  %v3927_v19 = vld [vmem:[#allocation6 + $0x10] sm:$0xff] }
 0x42b   :  { %4974 = vmatprep.subr.bf16.mxu1 %v7514_v58  ;;  %v3975_v58 = vld [vmem:[#allocation6 + $0x190] sm:$0xff] }
 0x42c   :  { %v3931_v14 = vld [vmem:[#allocation6 + $0x30] sm:$0xff] }
 0x42d   :  { %4912 = vmatpush2.bf16.msra.mxu0 %v7511_v7  ;;  %v7461_v7 = vcombine.low %v3984_v10, %v3988_v50  ;;  %v3928_v10 = vld [vmem:[#allocation6 + $0x18] sm:$0xff] }
 0x42e   :  { %4975 = vmatpush2.bf16.msra.mxu1 %v7513_v33  ;;  %4913 = vmatprep.subr.bf16.mxu0 %v7504_v3  ;;  %v7452_v33 = vcombine.high %v3975_v58, %v3979_v21  ;;  %v11792_v3 = vld [vmem:[#allocation19_spill] sm:$0xff]  ;;  %v3932_v50 = vld [vmem:[#allocation6 + $0x38] sm:$0xff] }
 0x42f   :  { %4976 = vmatprep.subr.bf16.mxu1 %v7506_v8  ;;  %v7454_v8 = vcombine.high %v3976_v59, %v3980_v25 }
 0x431   :  { %4914 = vmatpush2.bf16.msra.mxu0 %v7503_v36  ;;  %v7451_v36 = vcombine.low %v3975_v58, %v3979_v21  ;;  %v4047_v58 = vld [vmem:[#allocation6 + $0x3d0] sm:$0xff] }
 0x432   :  { %4977 = vmatpush2.bf16.msra.mxu1 %v7505_v52  ;;  %4915 = vmatprep.subr.bf16.mxu0 %v7496_v56  ;;  %v7453_v52 = vcombine.low %v3976_v59, %v3980_v25  ;;  %v7444_v56 = vcombine.high %v3967_v43, %v3971_v44  ;;  %v4051_v21 = vld [vmem:[#allocation6 + $0x3f0] sm:$0xff]  ;;  %v4048_v59 = vld [vmem:[#allocation6 + $0x3d8] sm:$0xff] }
 0x433   :  { %4978 = vmatprep.subr.bf16.mxu1 %v7498_v1  ;;  %v7446_v1 = vcombine.high %v3968_v47, %v3972_v46  ;;  %v4052_v25 = vld [vmem:[#allocation6 + $0x3f8] sm:$0xff] }
 0x435   :  { %4916 = vmatpush2.bf16.msra.mxu0 %v7495_v48  ;;  %v7443_v48 = vcombine.low %v3967_v43, %v3971_v44  ;;  %v4039_v43 = vld [vmem:[#allocation6 + $0x390] sm:$0xff] }
 0x436   :  { %4979 = vmatpush2.bf16.msra.mxu1 %v7497_v61  ;;  %4917 = vmatprep.subr.bf16.mxu0 %v7488_v11  ;;  %v7445_v61 = vcombine.low %v3968_v47, %v3972_v46  ;;  %v7436_v11 = vcombine.high %v3959_v60, %v3963_v13  ;;  %v4043_v44 = vld [vmem:[#allocation6 + $0x3b0] sm:$0xff]  ;;  %v4040_v47 = vld [vmem:[#allocation6 + $0x398] sm:$0xff] }
 0x437   :  { %4980 = vmatprep.subr.bf16.mxu1 %v7490_v62  ;;  %v7438_v62 = vcombine.high %v3960_v51, %v3964_v49  ;;  %v4044_v46 = vld [vmem:[#allocation6 + $0x3b8] sm:$0xff] }
 0x439   :  { %4918 = vmatpush2.bf16.msra.mxu0 %v7487_v45  ;;  %v7435_v45 = vcombine.low %v3959_v60, %v3963_v13  ;;  %v4031_v60 = vld [vmem:[#allocation6 + $0x350] sm:$0xff] }
 0x43a   :  { %4981 = vmatpush2.bf16.msra.mxu1 %v7489_v55  ;;  %4919 = vmatprep.subr.bf16.mxu0 %v7480_v54  ;;  %v7437_v55 = vcombine.low %v3960_v51, %v3964_v49  ;;  %v7428_v54 = vcombine.high %v3951_v2, %v3955_v57  ;;  %v4035_v13 = vld [vmem:[#allocation6 + $0x370] sm:$0xff]  ;;  %v4032_v51 = vld [vmem:[#allocation6 + $0x358] sm:$0xff] }
 0x43b   :  { %4982 = vmatprep.subr.bf16.mxu1 %v7482_v53  ;;  %v7430_v53 = vcombine.high %v3952_v40, %v3956_v31  ;;  %v4036_v49 = vld [vmem:[#allocation6 + $0x378] sm:$0xff] }
 0x43d   :  { %4920 = vmatpush2.bf16.msra.mxu0 %v7479_v16  ;;  %v7427_v16 = vcombine.low %v3951_v2, %v3955_v57  ;;  %v4023_v2 = vld [vmem:[#allocation6 + $0x310] sm:$0xff] }
 0x43e   :  { %4983 = vmatpush2.bf16.msra.mxu1 %v7481_v12  ;;  %4921 = vmatprep.subr.bf16.mxu0 %v7472_v63  ;;  %v7429_v12 = vcombine.low %v3952_v40, %v3956_v31  ;;  %v7420_v63 = vcombine.high %v3943_v37, %v3947_v32  ;;  %v4027_v57 = vld [vmem:[#allocation6 + $0x330] sm:$0xff]  ;;  %v4024_v40 = vld [vmem:[#allocation6 + $0x318] sm:$0xff] }
 0x43f   :  { %4984 = vmatprep.subr.bf16.mxu1 %v7474_v41  ;;  %v7422_v41 = vcombine.high %v3944_v22, %v3948_v5  ;;  %v4028_v31 = vld [vmem:[#allocation6 + $0x338] sm:$0xff] }
 0x441   :  { %4922 = vmatpush2.bf16.msra.mxu0 %v7471_v28  ;;  %v7419_v28 = vcombine.low %v3943_v37, %v3947_v32  ;;  %v4015_v37 = vld [vmem:[#allocation6 + $0x2d0] sm:$0xff] }
 0x442   :  { %4985 = vmatpush2.bf16.msra.mxu1 %v7473_v15  ;;  %4923 = vmatprep.subr.bf16.mxu0 %v7464_v17  ;;  %v7421_v15 = vcombine.low %v3944_v22, %v3948_v5  ;;  %v7412_v17 = vcombine.high %v3935_v4, %v3939_v30  ;;  %v4019_v32 = vld [vmem:[#allocation6 + $0x2f0] sm:$0xff]  ;;  %v4016_v22 = vld [vmem:[#allocation6 + $0x2d8] sm:$0xff] }
 0x443   :  { %4986 = vmatprep.subr.bf16.mxu1 %v7466_v20  ;;  %v7414_v20 = vcombine.high %v3936_v18, %v3940_v9  ;;  %v4020_v5 = vld [vmem:[#allocation6 + $0x2f8] sm:$0xff] }
 0x445   :  { %4924 = vmatpush2.bf16.msra.mxu0 %v7463_v39  ;;  %v7411_v39 = vcombine.low %v3935_v4, %v3939_v30  ;;  %v4007_v4 = vld [vmem:[#allocation6 + $0x290] sm:$0xff] }
 0x446   :  { %4987 = vmatpush2.bf16.msra.mxu1 %v7465_v24  ;;  %5019 = vmatprep.subr.bf16.mxu0 %v7460_v38  ;;  %v7413_v24 = vcombine.low %v3936_v18, %v3940_v9  ;;  %v7404_v38 = vcombine.high %v3927_v19, %v3931_v14  ;;  %v4011_v30 = vld [vmem:[#allocation6 + $0x2b0] sm:$0xff]  ;;  %v4008_v18 = vld [vmem:[#allocation6 + $0x298] sm:$0xff] }
 0x447   :  { %5082 = vmatprep.subr.bf16.mxu1 %v7462_v23  ;;  %v7406_v23 = vcombine.high %v3928_v10, %v3932_v50  ;;  %v4012_v9 = vld [vmem:[#allocation6 + $0x2b8] sm:$0xff] }
 0x448   :  { %4926 = vmatmul.mubr.bf16.vlgmr.msra.gmra.mxu0 %v11792_v3 }
 0x449   :  { %4989 = vmatmul.mubr.bf16.vlgmr.msra.gmra.mxu1 %v11792_v3  ;;  %4935 = vmatprep.mubr.bf16.mxu0 %v9815_v29 }
 0x44a   :  { %4998 = vmatprep.mubr.bf16.mxu1 %v9815_v29  ;;  %5020 = vmatpush1.bf16.msra.mxu0 %v7459_v6  ;;  %v7403_v6 = vcombine.low %v3927_v19, %v3931_v14  ;;  %v4003_v19 = vld [vmem:[#allocation6 + $0x270] sm:$0xff]  ;;  %v7486_v14 = vcombine.high %v4008_v18, %v4012_v9 }
 0x44b   :  { %5083 = vmatpush1.bf16.msra.mxu1 %v7461_v7  ;;  %5021 = vmatprep.subr.bf16.mxu0 %v7452_v33  ;;  %v7405_v7 = vcombine.low %v3928_v10, %v3932_v50  ;;  %v7524_v33 = vcombine.high %v4047_v58, %v4051_v21  ;;  %v4000_v10 = vld [vmem:[#allocation6 + $0x258] sm:$0xff]  ;;  %v4109_v50 = vld [vmem:[#allocation8 + $0x1c0] sm:$0xff] }
 0x44c   :  { %5084 = vmatprep.subr.bf16.mxu1 %v7454_v8  ;;  %v7526_v8 = vcombine.high %v4048_v59, %v4052_v25 }
 0x44e   :  { %5022 = vmatpush1.bf16.msra.mxu0 %v7451_v36  ;;  %v7523_v36 = vcombine.low %v4047_v58, %v4051_v21  ;;  %v4114_v58 = vld [vmem:[#allocation8 + $0x1e8] sm:$0xff]  ;;  %v7483_v21 = vcombine.low %v4007_v4, %v4011_v30 }
 0x44f   :  { %5085 = vmatpush1.bf16.msra.mxu1 %v7453_v52  ;;  %5023 = vmatprep.subr.bf16.mxu0 %v7444_v56  ;;  %v7525_v52 = vcombine.low %v4048_v59, %v4052_v25  ;;  %v7516_v56 = vcombine.high %v4039_v43, %v4043_v44  ;;  %v7485_v25 = vcombine.low %v4008_v18, %v4012_v9  ;;  %v11801_v18 = vld [vmem:[#allocation123_spill] sm:$0xff] }
 0x450   :  { %4936 = vmatmul.mubr.bf16.gmra.mxu0 %v9813_v27  ;;  %5086 = vmatprep.subr.bf16.mxu1 %v7446_v1  ;;  %v7518_v1 = vcombine.high %v4040_v47, %v4044_v46 }
 0x451   :  { %4999 = vmatmul.mubr.bf16.gmra.mxu1 %v9813_v27 }
 0x452   :  { %5024 = vmatpush1.bf16.msra.mxu0 %v7443_v48  ;;  %v7515_v48 = vcombine.low %v4039_v43, %v4043_v44  ;;  %v3992_v43 = vld [vmem:[#allocation6 + $0x218] sm:$0xff] }
 0x453   :  { %5087 = vmatpush1.bf16.msra.mxu1 %v7445_v61  ;;  %5025 = vmatprep.subr.bf16.mxu0 %v7436_v11  ;;  %v7517_v61 = vcombine.low %v4040_v47, %v4044_v46  ;;  %v7508_v11 = vcombine.high %v4031_v60, %v4035_v13  ;;  %v3996_v44 = vld [vmem:[#allocation6 + $0x238] sm:$0xff] }
 0x454   :  { %5088 = vmatprep.subr.bf16.mxu1 %v7438_v62  ;;  %v7510_v62 = vcombine.high %v4032_v51, %v4036_v49 }
 0x456   :  { %5026 = vmatpush1.bf16.msra.mxu0 %v7435_v45  ;;  %v7507_v45 = vcombine.low %v4031_v60, %v4035_v13 }
 0x457   :  { %5089 = vmatpush1.bf16.msra.mxu1 %v7437_v55  ;;  %5027 = vmatprep.subr.bf16.mxu0 %v7428_v54  ;;  %v7509_v55 = vcombine.low %v4032_v51, %v4036_v49  ;;  %v7500_v54 = vcombine.high %v4023_v2, %v4027_v57 }
 0x458   :  { %5090 = vmatprep.subr.bf16.mxu1 %v7430_v53  ;;  %v7502_v53 = vcombine.high %v4024_v40, %v4028_v31 }
 0x45a   :  { %5028 = vmatpush1.bf16.msra.mxu0 %v7427_v16  ;;  %v7499_v16 = vcombine.low %v4023_v2, %v4027_v57  ;;  %v11794_v2 = vld [vmem:[#allocation90_spill] sm:$0xff] }
 0x45b   :  { %5091 = vmatpush1.bf16.msra.mxu1 %v7429_v12  ;;  %5029 = vmatprep.subr.bf16.mxu0 %v7420_v63  ;;  %v7501_v12 = vcombine.low %v4024_v40, %v4028_v31  ;;  %v7492_v63 = vcombine.high %v4015_v37, %v4019_v32  ;;  %v11795_v40 = vld [vmem:[#allocation46_spill] sm:$0xff] }
 0x45c   :  { %5092 = vmatprep.subr.bf16.mxu1 %v7422_v41  ;;  %v7494_v41 = vcombine.high %v4016_v22, %v4020_v5 }
 0x45e   :  { %5030 = vmatpush1.bf16.msra.mxu0 %v7419_v28  ;;  %v7491_v28 = vcombine.low %v4015_v37, %v4019_v32  ;;  %v11798_v32 = vld [vmem:[#allocation121_spill] sm:$0xff] }
 0x45f   :  { %5093 = vmatpush1.bf16.msra.mxu1 %v7421_v15  ;;  %5031 = vmatprep.subr.bf16.mxu0 %v7412_v17  ;;  %v7493_v15 = vcombine.low %v4016_v22, %v4020_v5  ;;  %v7484_v17 = vcombine.high %v4007_v4, %v4011_v30 }
 0x460   :  { %5094 = vmatprep.subr.bf16.mxu1 %v7414_v20  ;;  %v3999_v20 = vld [vmem:[#allocation6 + $0x250] sm:$0xff] }
 0x461   :  { %v7475_v47 = vcombine.low %v3999_v20, %v4003_v19 }
 0x462   :  { %5032 = vmatpush1.bf16.msra.mxu0 %v7411_v39  ;;  %v4113_v39 = vld [vmem:[#allocation8 + $0x1e0] sm:$0xff] }
 0x463   :  { %5095 = vmatpush1.bf16.msra.mxu1 %v7413_v24  ;;  %5033 = vmatprep.subr.bf16.mxu0 %v7404_v38  ;;  %v4004_v24 = vld [vmem:[#allocation6 + $0x278] sm:$0xff]  ;;  %v9895_v38 = vcombine.low %v4109_v50, %v4113_v39  ;;  %v9899_v60 = vcombine.high %v4109_v50, %v4113_v39 }
 0x464   :  { %5096 = vmatprep.subr.bf16.mxu1 %v7406_v23  ;;  %v4110_v23 = vld [vmem:[#allocation8 + $0x1c8] sm:$0xff]  ;;  %v7477_v46 = vcombine.low %v4000_v10, %v4004_v24 }
 0x465   :  { %v9897_v59 = vcombine.low %v4110_v23, %v4114_v58  ;;  %v9901_v13 = vcombine.high %v4110_v23, %v4114_v58 }
 0x466   :  { %5034 = vmatpush1.bf16.msra.mxu0 %v7403_v6  ;;  %v7476_v6 = vcombine.high %v3999_v20, %v4003_v19 }
 0x467   :  { %5097 = vmatpush1.bf16.msra.mxu1 %v7405_v7  ;;  %5035 = vmatprep.subr.bf16.mxu0 %v7524_v33  ;;  %v7478_v7 = vcombine.high %v4000_v10, %v4004_v24  ;;  %v3991_v33 = vld [vmem:[#allocation6 + $0x210] sm:$0xff] }
 0x468   :  { %5098 = vmatprep.subr.bf16.mxu1 %v7526_v8  ;;  %v3995_v8 = vld [vmem:[#allocation6 + $0x230] sm:$0xff] }
 0x46a   :  { %5036 = vmatpush2.bf16.msra.mxu0 %v7523_v36  ;;  %v7468_v36 = vcombine.high %v3991_v33, %v3995_v8 }
 0x46b   :  { %5099 = vmatpush2.bf16.msra.mxu1 %v7525_v52  ;;  %5037 = vmatprep.subr.bf16.mxu0 %v7516_v56  ;;  %v7470_v52 = vcombine.high %v3992_v43, %v3996_v44  ;;  %v7467_v56 = vcombine.low %v3991_v33, %v3995_v8 }
 0x46c   :  { %5100 = vmatprep.subr.bf16.mxu1 %v7518_v1  ;;  %v7469_v1 = vcombine.low %v3992_v43, %v3996_v44 }
 0x46e   :  { %5038 = vmatpush2.bf16.msra.mxu0 %v7515_v48 }
 0x46f   :  { %5101 = vmatpush2.bf16.msra.mxu1 %v7517_v61  ;;  %5039 = vmatprep.subr.bf16.mxu0 %v7508_v11 }
 0x470   :  { %5102 = vmatprep.subr.bf16.mxu1 %v7510_v62  ;;  %v11793_v62 = vld [vmem:[#allocation15_spill] sm:$0xff] }
 0x471   :  { %v1930_v57 = vadd.f32 %v11794_v2, %v11793_v62 }
 0x472   :  { %5040 = vmatpush2.bf16.msra.mxu0 %v7507_v45  ;;  %v11796_v45 = vld [vmem:[#allocation120_spill] sm:$0xff] }
 0x473   :  { %5103 = vmatpush2.bf16.msra.mxu1 %v7509_v55  ;;  %5041 = vmatprep.subr.bf16.mxu0 %v7500_v54 }
 0x474   :  { %5104 = vmatprep.subr.bf16.mxu1 %v7502_v53  ;;  %v11797_v53 = vld [vmem:[#allocation48_spill] sm:$0xff] }
 0x476   :  { %5042 = vmatpush2.bf16.msra.mxu0 %v7499_v16  ;;  %v11799_v16 = vld [vmem:[#allocation93_spill] sm:$0xff] }
 0x477   :  { %5105 = vmatpush2.bf16.msra.mxu1 %v7501_v12  ;;  %5043 = vmatprep.subr.bf16.mxu0 %v7492_v63  ;;  %v1993_v12 = vadd.f32 %v11799_v16, %v1930_v57  ;;  %v11808_v16 = vld [vmem:[#allocation173_spill] sm:$0xff] }
 0x478   :  { %5106 = vmatprep.subr.bf16.mxu1 %v7494_v41  ;;  %v11800_v41 = vld [vmem:[#allocation52_spill] sm:$0xff] }
 0x47a   :  { %5044 = vmatpush2.bf16.msra.mxu0 %v7491_v28 }
 0x47b   :  { %5107 = vmatpush2.bf16.msra.mxu1 %v7493_v15  ;;  %5045 = vmatprep.subr.bf16.mxu0 %v7484_v17 }
 0x47c   :  { %5108 = vmatprep.subr.bf16.mxu1 %v7486_v14  ;;  %v11802_v14 = vld [vmem:[#allocation125_spill] sm:$0xff] }
 0x47e   :  { %5046 = vmatpush2.bf16.msra.mxu0 %v7483_v21 }
 0x47f   :  { %5109 = vmatpush2.bf16.msra.mxu1 %v7485_v25  ;;  %5047 = vmatprep.subr.bf16.mxu0 %v7476_v6 }
 0x480   :  { %5110 = vmatprep.subr.bf16.mxu1 %v7478_v7 }
 0x482   :  { %5048 = vmatpush2.bf16.msra.mxu0 %v7475_v47 }
 0x483   :  { %5111 = vmatpush2.bf16.msra.mxu1 %v7477_v46  ;;  %5049 = vmatprep.subr.bf16.mxu0 %v7468_v36 }
 0x484   :  { %5112 = vmatprep.subr.bf16.mxu1 %v7470_v52 }
 0x486   :  { %5050 = vmatpush2.bf16.msra.mxu0 %v7467_v56 }
 0x487   :  { %5113 = vmatpush2.bf16.msra.mxu1 %v7469_v1  ;;  %5787 = vmatprep.subr.bf16.mxu0 %v9899_v60 }
 0x488   :  { %5830 = vmatprep.subr.bf16.mxu1 %v9901_v13  ;;  %v3645_v51 = vpop.f32.mrf.mxu0  ;;  %v3688_v49 = vpop.f32.mrf.mxu1 }
 0x489   :  { %v3783_v31 = vadd.f32 %v3645_v51, %v11795_v40  ;;  %v3785_v55 = vadd.f32 %v3688_v49, %v11796_v45 }
 0x48a   :  { %v3647_v48 = vpop.f32.mrf.mxu0  ;;  %v3690_v61 = vpop.f32.mrf.mxu1 }
 0x48b   :  { %v3784_v37 = vadd.f32 %v3647_v48, %v11797_v53  ;;  %v3786_v22 = vadd.f32 %v3690_v61, %v11798_v32  ;;  %v7371_v63 = vmul.f32 -1.442695, %v3783_v31  ;;  %v7375_v30 = vmul.f32 -1.442695, %v3785_v55  ;;  %v11803_v48 = vld [vmem:[#allocation163_spill] sm:$0xff]  ;;  %v11805_v31 = vld [vmem:[#allocation164_spill] sm:$0xff] }
 0x48c   :  { %v3649_v11 = vpop.f32.mrf.mxu0  ;;  %v3692_v54 = vpop.f32.mrf.mxu1  ;;  %v11806_v55 = vld [vmem:[#allocation172_spill] sm:$0xff] }
 0x48d   :  { %v3791_v4 = vadd.f32 %v3649_v11, %v11800_v41  ;;  %v3793_v9 = vadd.f32 %v3692_v54, %v11801_v18  ;;  %v7372_v15 = vmul.f32 -1.442695, %v3784_v37  ;;  %v7376_v20 = vmul.f32 -1.442695, %v3786_v22  ;;  %v11804_v11 = vld [vmem:[#allocation171_spill] sm:$0xff]  ;;  %v11807_v22 = vld [vmem:[#allocation165_spill] sm:$0xff] }
 0x48e   :  { %v3651_v5 = vpop.f32.mrf.mxu0  ;;  %v3694_v28 = vpop.f32.mrf.mxu1  ;;  %7969 = vpow2.f32 %v7371_v63 }
 0x48f   :  { %v3792_v17 = vadd.f32 %v3651_v5, %v1993_v12  ;;  %v7373_v19 = vmul.f32 -1.442695, %v3791_v4  ;;  %v3794_v10 = vadd.f32 %v3694_v28, %v11802_v14  ;;  %7971 = vpow2.f32 %v7375_v30  ;;  %v11809_v30 = vld [vmem:[#allocation166_spill] sm:$0xff] }
 0x490   :  { %v7377_v50 = vmul.f32 -1.442695, %v3793_v9  ;;  %7973 = vpow2.f32 %v7372_v15  ;;  %v11810_v9 = vld [vmem:[#allocation174_spill] sm:$0xff] }
 0x491   :  { %v7374_v39 = vmul.f32 -1.442695, %v3792_v17  ;;  %7975 = vpow2.f32 %v7376_v20  ;;  %v7378_v24 = vmul.f32 -1.442695, %v3794_v10 }
 0x492   :  { %7977 = vpow2.f32 %v7373_v19 }
 0x493   :  { %7979 = vpow2.f32 %v7377_v50 }
 0x494   :  { %7981 = vpow2.f32 %v7374_v39 }
 0x495   :  { %7983 = vpow2.f32 %v7378_v24 }
 0x49b   :  { %v7970_v23 = vpop.eup %7969 }
 0x49c   :  { %v7972_v58 = vpop.eup %7971  ;;  %v3811_v6 = vadd.f32 1.0, %v7970_v23 }
 0x49d   :  { %v7974_v21 = vpop.eup %7973  ;;  %v3835_v33 = vadd.f32 1.0, %v7972_v58 }
 0x49e   :  { %v7976_v25 = vpop.eup %7975  ;;  %v3812_v43 = vadd.f32 1.0, %v7974_v21  ;;  %7985 = vrcp.f32 %v3811_v6 }
 0x49f   :  { %v7978_v7 = vpop.eup %7977  ;;  %v3836_v47 = vadd.f32 1.0, %v7976_v25  ;;  %7987 = vrcp.f32 %v3835_v33 }
 0x4a0   :  { %v7980_v8 = vpop.eup %7979  ;;  %v3813_v46 = vadd.f32 1.0, %v7978_v7  ;;  %7989 = vrcp.f32 %v3812_v43 }
 0x4a1   :  { %v7982_v44 = vpop.eup %7981  ;;  %v3837_v52 = vadd.f32 1.0, %v7980_v8  ;;  %7991 = vrcp.f32 %v3836_v47 }
 0x4a2   :  { %v7984_v36 = vpop.eup %7983  ;;  %v3814_v56 = vadd.f32 1.0, %v7982_v44  ;;  %7993 = vrcp.f32 %v3813_v46 }
 0x4a3   :  { %v3838_v1 = vadd.f32 1.0, %v7984_v36  ;;  %7995 = vrcp.f32 %v3837_v52 }
 0x4a4   :  { %7997 = vrcp.f32 %v3814_v56 }
 0x4ab   :  { %v7986_v15 = vpop.eup %7985 }
 0x4ac   :  { %v7988_v20 = vpop.eup %7987 }
 0x4ad   :  { %v7990_v19 = vpop.eup %7989  ;;  %v3875_v58 = vmul.f32 %v7988_v20, %v9798_v0 }
 0x4ae   :  { %v7992_v14 = vpop.eup %7991 }
 0x4af   :  { %v7994_v10 = vpop.eup %7993  ;;  %v3876_v43 = vmul.f32 %v7992_v14, %v9802_v26  ;;  %v4089_v14 = vld [vmem:[#allocation8 + $0x120] sm:$0xff] }
 0x4b0   :  { %v7996_v50 = vpop.eup %7995 }
 0x4b1   :  { %v7998_v39 = vpop.eup %7997  ;;  %v3877_v0 = vmul.f32 %v7996_v50, %v9806_v42  ;;  %v4090_v50 = vld [vmem:[#allocation8 + $0x128] sm:$0xff] }
 0x4c8   :  { %v3731_v51 = vpop.f32.mrf.mxu0  ;;  %v3774_v49 = vpop.f32.mrf.mxu1 }
 0x4c9   :  { %v3787_v61 = vadd.f32 %v3731_v51, %v11803_v48  ;;  %v3789_v62 = vadd.f32 %v3774_v49, %v11804_v11 }
 0x4ca   :  { %v3733_v2 = vpop.f32.mrf.mxu0  ;;  %v3776_v57 = vpop.f32.mrf.mxu1 }
 0x4cb   :  { %7999 = vtanh.f32 %v3787_v61  ;;  %v7379_v40 = vmul.f32 -1.442695, %v3789_v62  ;;  %v3788_v45 = vadd.f32 %v3733_v2, %v11805_v31  ;;  %v3790_v54 = vadd.f32 %v3776_v57, %v11806_v55 }
 0x4cc   :  { %8001 = vrcp.f32 %v3838_v1  ;;  %v3735_v53 = vpop.f32.mrf.mxu0  ;;  %v3778_v37 = vpop.f32.mrf.mxu1 }
 0x4cd   :  { %8003 = vpow2.f32 %v7379_v40  ;;  %v7380_v32 = vmul.f32 -1.442695, %v3790_v54  ;;  %v3795_v5 = vadd.f32 %v3735_v53, %v11807_v22  ;;  %v3797_v12 = vadd.f32 %v3778_v37, %v11808_v16  ;;  %v4101_v16 = vld [vmem:[#allocation8 + $0x180] sm:$0xff] }
 0x4ce   :  { %8005 = vtanh.f32 %v3788_v45  ;;  %v3737_v63 = vpop.f32.mrf.mxu0  ;;  %v3780_v41 = vpop.f32.mrf.mxu1 }
 0x4cf   :  { %8007 = vpow2.f32 %v7380_v32  ;;  %v7381_v4 = vmul.f32 -1.442695, %v3797_v12  ;;  %v3796_v18 = vadd.f32 %v3737_v63, %v11809_v30  ;;  %v3798_v28 = vadd.f32 %v3780_v41, %v11810_v9  ;;  %v4105_v12 = vld [vmem:[#allocation8 + $0x1a0] sm:$0xff]  ;;  %v4102_v63 = vld [vmem:[#allocation8 + $0x188] sm:$0xff] }
 0x4d0   :  { %8009 = vtanh.f32 %v3795_v5  ;;  %v4106_v41 = vld [vmem:[#allocation8 + $0x1a8] sm:$0xff]  ;;  %v9957_v30 = vcombine.high %v4101_v16, %v4105_v12  ;;  %v4097_v9 = vld [vmem:[#allocation8 + $0x160] sm:$0xff] }
 0x4d1   :  { %8011 = vpow2.f32 %v7381_v4  ;;  %v7382_v17 = vmul.f32 -1.442695, %v3798_v28  ;;  %v4093_v4 = vld [vmem:[#allocation8 + $0x140] sm:$0xff]  ;;  %v4094_v28 = vld [vmem:[#allocation8 + $0x148] sm:$0xff] }
 0x4d2   :  { %8013 = vtanh.f32 %v3796_v18  ;;  %v9959_v18 = vcombine.high %v4102_v63, %v4106_v41  ;;  %v9971_v20 = vcombine.high %v4093_v4, %v4097_v9 }
 0x4d3   :  { %8015 = vpow2.f32 %v7382_v17  ;;  %v9967_v17 = vcombine.low %v4102_v63, %v4106_v41 }
 0x4d8   :  { %v8000_v24 = vpop.eup %7999 }
 0x4d9   :  { %v8002_v23 = vpop.eup %8001  ;;  %v3879_v21 = vmul.f32 %v8000_v24, %v7986_v15  ;;  %v4098_v15 = vld [vmem:[#allocation8 + $0x168] sm:$0xff] }
 0x4da   :  { %v8004_v25 = vpop.eup %8003  ;;  %v3878_v48 = vmul.f32 %v8002_v23, %v9810_v34  ;;  %v9981_v24 = vcombine.low %v4094_v28, %v4098_v15 }
 0x4db   :  { %v8006_v6 = vpop.eup %8005  ;;  %v3883_v7 = vadd.f32 %v3879_v21, %v3875_v58  ;;  %v3863_v33 = vadd.f32 1.0, %v8004_v25  ;;  %v4081_v21 = vld [vmem:[#allocation8 + $0xe0] sm:$0xff]  ;;  %v4078_v25 = vld [vmem:[#allocation8 + $0xc8] sm:$0xff] }
 0x4dc   :  { %v8008_v8 = vpop.eup %8007  ;;  %v3880_v44 = vmul.f32 %v8006_v6, %v7990_v19  ;;  %v9973_v19 = vcombine.high %v4094_v28, %v4098_v15  ;;  %11813 = vst [vmem:[#allocation21_spill] sm:$0xff] %v9981_v24  ;;  %v4082_v6 = vld [vmem:[#allocation8 + $0xe8] sm:$0xff]  ;;  %v4169_v28 = vld [vmem:[#allocation8 + $0x3a0] sm:$0xff] }
 0x4dd   :  { %v8010_v47 = vpop.eup %8009  ;;  %8017 = vtanh.f32 %v3883_v7  ;;  %6690 = vst [vmem:[%s11024_s13] sm:$0xff] %v3883_v7  ;;  %v3864_v46 = vadd.f32 1.0, %v8008_v8  ;;  %v4166_v15 = vld [vmem:[#allocation8 + $0x388] sm:$0xff] }
 0x4de   :  { %v8012_v36 = vpop.eup %8011  ;;  %8019 = vrcp.f32 %v3863_v33  ;;  %v3884_v52 = vadd.f32 %v3880_v44, %v3876_v43  ;;  %v3881_v56 = vmul.f32 %v8010_v47, %v7994_v10  ;;  %11811 = vst [vmem:[#allocation98_spill] sm:$0xff] %v9973_v19  ;;  %v4086_v10 = vld [vmem:[#allocation8 + $0x108] sm:$0xff]  ;;  %v9999_v43 = vcombine.high %v4078_v25, %v4082_v6  ;;  %v4069_v44 = vld [vmem:[#allocation8 + $0x80] sm:$0xff] }
 0x4df   :  { %v8014_v1 = vpop.eup %8013  ;;  %8021 = vrcp.f32 %v3864_v46  ;;  %v3865_v51 = vadd.f32 1.0, %v8012_v36  ;;  %v9987_v58 = vcombine.high %v4086_v10, %v4090_v50  ;;  %v9995_v33 = vcombine.low %v4086_v10, %v4090_v50  ;;  %v4070_v47 = vld [vmem:[#allocation8 + $0x88] sm:$0xff] }
 0x4e0   :  { %v8016_v49 = vpop.eup %8015  ;;  %8023 = vtanh.f32 %v3884_v52  ;;  %6691 = vst [vmem:[%s11024_s13 + $0x8] sm:$0xff] %v3884_v52  ;;  %v3885_v26 = vadd.f32 %v3881_v56, %v3877_v0  ;;  %v3882_v61 = vmul.f32 %v8014_v1, %v7998_v39  ;;  %v9979_v39 = vcombine.low %v4093_v4, %v4097_v9  ;;  %11819 = vst [vmem:[#allocation89_spill] sm:$0xff] %v9999_v43  ;;  %v4074_v46 = vld [vmem:[#allocation8 + $0xa8] sm:$0xff]  ;;  %v7388_v52 = vld [vmem:[%s11012_s1 + $0x38] sm:$0xff] }
 0x4e1   :  { %8025 = vrcp.f32 %v3865_v51  ;;  %v3866_v11 = vadd.f32 1.0, %v8016_v49  ;;  %11815 = vst [vmem:[#allocation27_spill] sm:$0xff] %v9987_v58  ;;  %11817 = vst [vmem:[#allocation105_spill] sm:$0xff] %v9995_v33  ;;  %v7386_v36 = vld [vmem:[%s11012_s1 + $0x28] sm:$0xff]  ;;  %v10013_v56 = vcombine.low %v4078_v25, %v4082_v6  ;;  %v10019_v51 = vcombine.high %v4070_v47, %v4074_v46  ;;  %v4061_v49 = vld [vmem:[#allocation8 + $0x40] sm:$0xff] }
 0x4e2   :  { %8027 = vtanh.f32 %v3885_v26  ;;  %6692 = vst [vmem:[%s11024_s13 + $0x10] sm:$0xff] %v3885_v26  ;;  %v3886_v42 = vadd.f32 %v3882_v61, %v3878_v48  ;;  %11812 = vst [vmem:[#allocation102_spill] sm:$0xff] %v9979_v39  ;;  %v4065_v26 = vld [vmem:[#allocation8 + $0x60] sm:$0xff]  ;;  %v4062_v48 = vld [vmem:[#allocation8 + $0x48] sm:$0xff] }
 0x4e3   :  { %8029 = vrcp.f32 %v3866_v11  ;;  %11821 = vst [vmem:[#allocation92_spill] sm:$0xff] %v10013_v56  ;;  %11823 = vst [vmem:[#allocation95_spill] sm:$0xff] %v10019_v51  ;;  %v4066_v61 = vld [vmem:[#allocation8 + $0x68] sm:$0xff]  ;;  %v10021_v11 = vpack.c.bf16 %v7388_v52, %v7386_v36  ;;  %v4165_v9 = vld [vmem:[#allocation8 + $0x380] sm:$0xff] }
 0x4e4   :  { %8031 = vtanh.f32 %v3886_v42  ;;  %6693 = vst [vmem:[%s11024_s13 + $0x18] sm:$0xff] %v3886_v42  ;;  %v10071_v50 = vcombine.high %v4165_v9, %v4169_v28  ;;  %v4161_v25 = vld [vmem:[#allocation8 + $0x360] sm:$0xff]  ;;  %v4158_v6 = vld [vmem:[#allocation8 + $0x348] sm:$0xff] }
 0x4e5   :  { %v4149_v52 = vld [vmem:[#allocation8 + $0x300] sm:$0xff] }
 0x4e6   :  { %11838 = vst [vmem:[#allocation117_spill] sm:$0xff] %v10071_v50 }
 0x4ea   :  { %v8018_v62 = vpop.eup %8017 }
 0x4eb   :  { %v8020_v2 = vpop.eup %8019 }
 0x4ec   :  { %v8022_v57 = vpop.eup %8021  ;;  %v3891_v40 = vmul.f32 %v8020_v2, %v8018_v62  ;;  %v10029_v62 = vcombine.low %v4070_v47, %v4074_v46  ;;  %v10033_v2 = vcombine.high %v4061_v49, %v4065_v26 }
 0x4ed   :  { %v8024_v34 = vpop.eup %8023 }
 0x4ee   :  { %v8026_v31 = vpop.eup %8025  ;;  %v3892_v45 = vmul.f32 %v8024_v34, %v8022_v57  ;;  %6681 = vst [vmem:[%s11023_s12] sm:$0xff] %v3891_v40  ;;  %11825 = vst [vmem:[#allocation97_spill] sm:$0xff] %v10029_v62  ;;  %v10035_v57 = vcombine.high %v4062_v48, %v4066_v61  ;;  %v4057_v34 = vld [vmem:[#allocation8 + $0x20] sm:$0xff] }
 0x4ef   :  { %v8028_v55 = vpop.eup %8027  ;;  %11826 = vst [vmem:[#allocation99_spill] sm:$0xff] %v10033_v2 }
 0x4f0   :  { %v8030_v54 = vpop.eup %8029  ;;  %6682 = vst [vmem:[%s11023_s12 + $0x8] sm:$0xff] %v3892_v45  ;;  %v3893_v53 = vmul.f32 %v8028_v55, %v8026_v31  ;;  %11827 = vst [vmem:[#allocation101_spill] sm:$0xff] %v10035_v57  ;;  %v4054_v31 = vld [vmem:[#allocation8 + $0x8] sm:$0xff]  ;;  %v10041_v55 = vcombine.low %v4061_v49, %v4065_v26  ;;  %v4153_v49 = vld [vmem:[#allocation8 + $0x320] sm:$0xff] }
 0x4f1   :  { %v8032_v37 = vpop.eup %8031  ;;  %v4150_v26 = vld [vmem:[#allocation8 + $0x308] sm:$0xff] }
 0x4f2   :  { %v3894_v32 = vmul.f32 %v8032_v37, %v8030_v54  ;;  %v9945_v22 = vpack.c.bf16 %v3893_v53, %v3891_v40  ;;  %6683 = vst [vmem:[%s11023_s12 + $0x10] sm:$0xff] %v3893_v53  ;;  %v4053_v40 = vld [vmem:[#allocation8] sm:$0xff]  ;;  %11828 = vst [vmem:[#allocation103_spill] sm:$0xff] %v10041_v55  ;;  %v10043_v54 = vcombine.low %v4062_v48, %v4066_v61  ;;  %v4154_v48 = vld [vmem:[#allocation8 + $0x328] sm:$0xff] }
 0x4f3   :  { %v10047_v53 = vcombine.high %v4053_v40, %v4057_v34 }
 0x4f4   :  { %v7745_v5 = vpack.c.bf16 %v3894_v32, %v3892_v45  ;;  %6684 = vst [vmem:[%s11023_s12 + $0x18] sm:$0xff] %v3894_v32  ;;  %v4058_v45 = vld [vmem:[#allocation8 + $0x28] sm:$0xff]  ;;  %11829 = vst [vmem:[#allocation104_spill] sm:$0xff] %v10043_v54  ;;  %v4173_v32 = vld [vmem:[#allocation8 + $0x3c0] sm:$0xff] }
 0x4f5   :  { %11830 = vst [vmem:[#allocation107_spill] sm:$0xff] %v10047_v53  ;;  %v10049_v37 = vcombine.high %v4054_v31, %v4058_v45  ;;  %v10055_v63 = vcombine.low %v4054_v31, %v4058_v45  ;;  %v10097_v31 = vcombine.high %v4150_v26, %v4154_v48  ;;  %v4141_v45 = vld [vmem:[#allocation8 + $0x2c0] sm:$0xff] }
 0x4f6   :  { %4945 = vmatprep.mubr.bf16.mxu0 %v7745_v5  ;;  %5008 = vmatprep.mubr.bf16.mxu1 %v7745_v5 }
 0x4f7   :  { %4946 = vmatmul.mubr.bf16.gmra.mxu0 %v9945_v22  ;;  %5009 = vmatmul.mubr.bf16.gmra.mxu1 %v9945_v22  ;;  %11831 = vst [vmem:[#allocation108_spill] sm:$0xff] %v10049_v37  ;;  %11833 = vst [vmem:[#allocation110_spill] sm:$0xff] %v10055_v63 }
 0x4f8   :  { %5051 = vmatprep.mubr.bf16.mxu0 %v11791_v35  ;;  %5114 = vmatprep.mubr.bf16.mxu1 %v11791_v35  ;;  %v9965_v35 = vcombine.low %v4101_v16, %v4105_v12  ;;  %v4178_v16 = vld [vmem:[#allocation8 + $0x3e8] sm:$0xff]  ;;  %v10053_v12 = vcombine.low %v4053_v40, %v4057_v34  ;;  %v10095_v34 = vcombine.high %v4149_v52, %v4153_v49 }
 0x4f9   :  { %11847 = vst [vmem:[#allocation14_spill] sm:$0xff] %v10097_v31 }
 0x4fa   :  { %11832 = vst [vmem:[#allocation109_spill] sm:$0xff] %v10053_v12  ;;  %11846 = vst [vmem:[#allocation13_spill] sm:$0xff] %v10095_v34 }
 0x4ff   :  { %5052 = vmatmul.mubr.bf16.vlgmr.msra.gmra.mxu0 %v11792_v3  ;;  %5115 = vmatmul.mubr.bf16.vlgmr.msra.gmra.mxu1 %v11792_v3  ;;  %v4085_v3 = vld [vmem:[#allocation8 + $0x100] sm:$0xff] }
 0x500   :  { %5788 = vmatpush1.bf16.msra.mxu0 %v9895_v38  ;;  %5831 = vmatpush1.bf16.msra.mxu1 %v9897_v59  ;;  %v9985_v23 = vcombine.high %v4085_v3, %v4089_v14  ;;  %v9993_v7 = vcombine.low %v4085_v3, %v4089_v14  ;;  %v4170_v3 = vld [vmem:[#allocation8 + $0x3a8] sm:$0xff] }
 0x501   :  { %5061 = vmatprep.mubr.bf16.mxu0 %v9815_v29  ;;  %5124 = vmatprep.mubr.bf16.mxu1 %v9815_v29  ;;  %v4077_v29 = vld [vmem:[#allocation8 + $0xc0] sm:$0xff]  ;;  %v10079_v47 = vcombine.low %v4166_v15, %v4170_v3 }
 0x502   :  { %5789 = vmatprep.subr.bf16.mxu0 %v9957_v30  ;;  %5832 = vmatprep.subr.bf16.mxu1 %v9959_v18  ;;  %11814 = vst [vmem:[#allocation100_spill] sm:$0xff] %v9985_v23  ;;  %11816 = vst [vmem:[#allocation26_spill] sm:$0xff] %v9993_v7  ;;  %v9997_v8 = vcombine.high %v4077_v29, %v4081_v21  ;;  %v10011_v0 = vcombine.low %v4077_v29, %v4081_v21  ;;  %v4157_v21 = vld [vmem:[#allocation8 + $0x340] sm:$0xff] }
 0x503   :  { %v10073_v29 = vcombine.high %v4166_v15, %v4170_v3  ;;  %11841 = vst [vmem:[#allocation126_spill] sm:$0xff] %v10079_v47  ;;  %v10083_v46 = vcombine.high %v4157_v21, %v4161_v25  ;;  %v10089_v61 = vcombine.low %v4157_v21, %v4161_v25  ;;  %v4133_v3 = vld [vmem:[#allocation8 + $0x280] sm:$0xff]  ;;  %v4134_v25 = vld [vmem:[#allocation8 + $0x288] sm:$0xff] }
 0x504   :  { %5790 = vmatpush1.bf16.msra.mxu0 %v9965_v35  ;;  %5833 = vmatpush1.bf16.msra.mxu1 %v9967_v17  ;;  %11818 = vst [vmem:[#allocation106_spill] sm:$0xff] %v9997_v8  ;;  %11820 = vst [vmem:[#allocation91_spill] sm:$0xff] %v10011_v0  ;;  %v4137_v21 = vld [vmem:[#allocation8 + $0x2a0] sm:$0xff] }
 0x505   :  { %5791 = vmatprep.subr.bf16.mxu0 %v9971_v20  ;;  %5834 = vmatprep.subr.bf16.mxu1 %v9973_v19  ;;  %11839 = vst [vmem:[#allocation122_spill] sm:$0xff] %v10073_v29  ;;  %11842 = vst [vmem:[#allocation127_spill] sm:$0xff] %v10083_v46 }
 0x506   :  { %11844 = vst [vmem:[#allocation129_spill] sm:$0xff] %v10089_v61 }
 0x507   :  { %5062 = vmatmul.mubr.bf16.gmra.mxu0 %v9813_v27  ;;  %5125 = vmatmul.mubr.bf16.gmra.mxu1 %v9813_v27  ;;  %v4073_v27 = vld [vmem:[#allocation8 + $0xa0] sm:$0xff] }
 0x508   :  { %5792 = vmatpush1.bf16.msra.mxu0 %v9979_v39  ;;  %5835 = vmatpush1.bf16.msra.mxu1 %v9981_v24  ;;  %v10017_v1 = vcombine.high %v4069_v44, %v4073_v27  ;;  %v10027_v42 = vcombine.low %v4069_v44, %v4073_v27  ;;  %v4162_v44 = vld [vmem:[#allocation8 + $0x368] sm:$0xff]  ;;  %v10077_v27 = vcombine.low %v4165_v9, %v4169_v28 }
 0x509   :  { %5071 = vmatprep.mubr.bf16.mxu0 %v7745_v5  ;;  %5134 = vmatprep.mubr.bf16.mxu1 %v7745_v5  ;;  %v4174_v5 = vld [vmem:[#allocation8 + $0x3c8] sm:$0xff]  ;;  %v10085_v36 = vcombine.high %v4158_v6, %v4162_v44  ;;  %v10091_v40 = vcombine.low %v4158_v6, %v4162_v44  ;;  %v10103_v9 = vcombine.low %v4150_v26, %v4154_v48  ;;  %v4125_v48 = vld [vmem:[#allocation8 + $0x240] sm:$0xff] }
 0x50a   :  { %5793 = vmatprep.subr.bf16.mxu0 %v9985_v23  ;;  %5836 = vmatprep.subr.bf16.mxu1 %v9987_v58  ;;  %11822 = vst [vmem:[#allocation94_spill] sm:$0xff] %v10017_v1  ;;  %11824 = vst [vmem:[#allocation96_spill] sm:$0xff] %v10027_v42  ;;  %v10061_v4 = vcombine.high %v4174_v5, %v4178_v16  ;;  %v10067_v10 = vcombine.low %v4174_v5, %v4178_v16  ;;  %v4146_v5 = vld [vmem:[#allocation8 + $0x2e8] sm:$0xff] }
 0x50b   :  { %11840 = vst [vmem:[#allocation124_spill] sm:$0xff] %v10077_v27  ;;  %11843 = vst [vmem:[#allocation128_spill] sm:$0xff] %v10085_v36  ;;  %v10101_v16 = vcombine.low %v4149_v52, %v4153_v49  ;;  %v4138_v6 = vld [vmem:[#allocation8 + $0x2a8] sm:$0xff]  ;;  %v10119_v49 = vcombine.high %v4133_v3, %v4137_v21 }
 0x50c   :  { %5794 = vmatpush1.bf16.msra.mxu0 %v9993_v7  ;;  %5837 = vmatpush1.bf16.msra.mxu1 %v9995_v33  ;;  %11835 = vst [vmem:[#allocation113_spill] sm:$0xff] %v10061_v4  ;;  %11837 = vst [vmem:[#allocation116_spill] sm:$0xff] %v10067_v10  ;;  %v10121_v26 = vcombine.high %v4134_v25, %v4138_v6 }
 0x50d   :  { %5795 = vmatprep.subr.bf16.mxu0 %v9997_v8  ;;  %5838 = vmatprep.subr.bf16.mxu1 %v9999_v43  ;;  %11845 = vst [vmem:[#allocation12_spill] sm:$0xff] %v10091_v40  ;;  %11848 = vst [vmem:[#allocation16_spill] sm:$0xff] %v10101_v16 }
 0x50e   :  { %11849 = vst [vmem:[#allocation17_spill] sm:$0xff] %v10103_v9  ;;  %11854 = vst [vmem:[#allocation25_spill] sm:$0xff] %v10119_v49 }
 0x50f   :  { %5072 = vmatmul.mubr.bf16.gmra.mxu0 %v9945_v22  ;;  %5135 = vmatmul.mubr.bf16.gmra.mxu1 %v9945_v22  ;;  %v4177_v22 = vld [vmem:[#allocation8 + $0x3e0] sm:$0xff]  ;;  %11855 = vst [vmem:[#allocation28_spill] sm:$0xff] %v10121_v26 }
 0x510   :  { %5796 = vmatpush1.bf16.msra.mxu0 %v10011_v0  ;;  %5839 = vmatpush1.bf16.msra.mxu1 %v10013_v56  ;;  %v10059_v41 = vcombine.high %v4173_v32, %v4177_v22  ;;  %v10065_v14 = vcombine.low %v4173_v32, %v4177_v22  ;;  %v4145_v32 = vld [vmem:[#allocation8 + $0x2e0] sm:$0xff]  ;;  %v4142_v22 = vld [vmem:[#allocation8 + $0x2c8] sm:$0xff] }
 0x511   :  { %5797 = vmatprep.subr.bf16.mxu0 %v10017_v1  ;;  %5840 = vmatprep.subr.bf16.mxu1 %v10019_v51  ;;  %v10107_v28 = vcombine.high %v4141_v45, %v4145_v32  ;;  %v10109_v15 = vcombine.high %v4142_v22, %v4146_v5  ;;  %v10113_v44 = vcombine.low %v4141_v45, %v4145_v32 }
 0x512   :  { %5819 = vmatprep.mubr.bf16.mxu0 %v10021_v11  ;;  %5862 = vmatprep.mubr.bf16.mxu1 %v10021_v11  ;;  %11834 = vst [vmem:[#allocation111_spill] sm:$0xff] %v10059_v41  ;;  %11836 = vst [vmem:[#allocation115_spill] sm:$0xff] %v10065_v14  ;;  %v10115_v52 = vcombine.low %v4142_v22, %v4146_v5  ;;  %v10125_v45 = vcombine.low %v4133_v3, %v4137_v21 }
 0x513   :  { %11850 = vst [vmem:[#allocation18_spill] sm:$0xff] %v10107_v28  ;;  %11851 = vst [vmem:[#allocation20_spill] sm:$0xff] %v10109_v15  ;;  %v10127_v32 = vcombine.low %v4134_v25, %v4138_v6 }
 0x514   :  { %5798 = vmatpush1.bf16.msra.mxu0 %v10027_v42  ;;  %5841 = vmatpush1.bf16.msra.mxu1 %v10029_v62  ;;  %11852 = vst [vmem:[#allocation22_spill] sm:$0xff] %v10113_v44  ;;  %11853 = vst [vmem:[#allocation24_spill] sm:$0xff] %v10115_v52 }
 0x515   :  { %5799 = vmatprep.subr.bf16.mxu0 %v10033_v2  ;;  %5842 = vmatprep.subr.bf16.mxu1 %v10035_v57  ;;  %11856 = vst [vmem:[#allocation29_spill] sm:$0xff] %v10125_v45  ;;  %11857 = vst [vmem:[#allocation30_spill] sm:$0xff] %v10127_v32 }
 0x518   :  { %5800 = vmatpush1.bf16.msra.mxu0 %v10041_v55  ;;  %5843 = vmatpush1.bf16.msra.mxu1 %v10043_v54 }
 0x519   :  { %5801 = vmatprep.subr.bf16.mxu0 %v10047_v53  ;;  %5844 = vmatprep.subr.bf16.mxu1 %v10049_v37 }
 0x51c   :  { %5802 = vmatpush1.bf16.msra.mxu0 %v10053_v12  ;;  %5845 = vmatpush1.bf16.msra.mxu1 %v10055_v63 }
 0x51d   :  { %5803 = vmatprep.subr.bf16.mxu0 %v10059_v41  ;;  %5846 = vmatprep.subr.bf16.mxu1 %v10061_v4 }
 0x520   :  { %5804 = vmatpush2.bf16.msra.mxu0 %v10065_v14  ;;  %5847 = vmatpush2.bf16.msra.mxu1 %v10067_v10 }
 0x521   :  { %5805 = vmatprep.subr.bf16.mxu0 %v10071_v50  ;;  %5848 = vmatprep.subr.bf16.mxu1 %v10073_v29 }
 0x524   :  { %5806 = vmatpush2.bf16.msra.mxu0 %v10077_v27  ;;  %5849 = vmatpush2.bf16.msra.mxu1 %v10079_v47 }
 0x525   :  { %5807 = vmatprep.subr.bf16.mxu0 %v10083_v46  ;;  %5850 = vmatprep.subr.bf16.mxu1 %v10085_v36 }
 0x528   :  { %5808 = vmatpush2.bf16.msra.mxu0 %v10089_v61  ;;  %5851 = vmatpush2.bf16.msra.mxu1 %v10091_v40  ;;  %v4130_v40 = vld [vmem:[#allocation8 + $0x268] sm:$0xff]  ;;  %v4099_v61 = vld [vmem:[#allocation8 + $0x170] sm:$0xff] }
 0x529   :  { %5809 = vmatprep.subr.bf16.mxu0 %v10095_v34  ;;  %5852 = vmatprep.subr.bf16.mxu1 %v10097_v31  ;;  %v4129_v31 = vld [vmem:[#allocation8 + $0x260] sm:$0xff]  ;;  %v4126_v34 = vld [vmem:[#allocation8 + $0x248] sm:$0xff] }
 0x52a   :  { %v10131_v22 = vcombine.high %v4125_v48, %v4129_v31  ;;  %v10133_v5 = vcombine.high %v4126_v34, %v4130_v40  ;;  %v10137_v3 = vcombine.low %v4125_v48, %v4129_v31  ;;  %v10139_v21 = vcombine.low %v4126_v34, %v4130_v40  ;;  %v7385_v34 = vld [vmem:[%s11012_s1 + $0x20] sm:$0xff]  ;;  %v7387_v48 = vld [vmem:[%s11012_s1 + $0x30] sm:$0xff] }
 0x52c   :  { %5810 = vmatpush2.bf16.msra.mxu0 %v10101_v16  ;;  %5853 = vmatpush2.bf16.msra.mxu1 %v10103_v9  ;;  %11858 = vst [vmem:[#allocation31_spill] sm:$0xff] %v10131_v22  ;;  %11859 = vst [vmem:[#allocation32_spill] sm:$0xff] %v10133_v5  ;;  %v4118_v9 = vld [vmem:[#allocation8 + $0x208] sm:$0xff] }
 0x52d   :  { %5811 = vmatprep.subr.bf16.mxu0 %v10107_v28  ;;  %5854 = vmatprep.subr.bf16.mxu1 %v10109_v15  ;;  %v4117_v15 = vld [vmem:[#allocation8 + $0x200] sm:$0xff]  ;;  %v4122_v16 = vld [vmem:[#allocation8 + $0x228] sm:$0xff]  ;;  %11860 = vst [vmem:[#allocation34_spill] sm:$0xff] %v10137_v3  ;;  %11861 = vst [vmem:[#allocation36_spill] sm:$0xff] %v10139_v21 }
 0x52e   :  { %v4121_v28 = vld [vmem:[#allocation8 + $0x220] sm:$0xff]  ;;  %v10145_v6 = vcombine.high %v4118_v9, %v4122_v16  ;;  %v10151_v40 = vcombine.low %v4118_v9, %v4122_v16  ;;  %v4104_v16 = vld [vmem:[#allocation8 + $0x198] sm:$0xff] }
 0x52f   :  { %v10143_v25 = vcombine.high %v4117_v15, %v4121_v28  ;;  %v10149_v31 = vcombine.low %v4117_v15, %v4121_v28  ;;  %v4103_v28 = vld [vmem:[#allocation8 + $0x190] sm:$0xff]  ;;  %v4108_v9 = vld [vmem:[#allocation8 + $0x1b8] sm:$0xff] }
 0x530   :  { %5812 = vmatpush2.bf16.msra.mxu0 %v10113_v44  ;;  %5855 = vmatpush2.bf16.msra.mxu1 %v10115_v52  ;;  %11863 = vst [vmem:[#allocation39_spill] sm:$0xff] %v10145_v6  ;;  %v4112_v52 = vld [vmem:[#allocation8 + $0x1d8] sm:$0xff]  ;;  %11865 = vst [vmem:[#allocation43_spill] sm:$0xff] %v10151_v40  ;;  %v4107_v15 = vld [vmem:[#allocation8 + $0x1b0] sm:$0xff] }
 0x531   :  { %5813 = vmatprep.subr.bf16.mxu0 %v10119_v49  ;;  %5856 = vmatprep.subr.bf16.mxu1 %v10121_v26  ;;  %11862 = vst [vmem:[#allocation37_spill] sm:$0xff] %v10143_v25  ;;  %v4111_v26 = vld [vmem:[#allocation8 + $0x1d0] sm:$0xff]  ;;  %v4116_v44 = vld [vmem:[#allocation8 + $0x1f8] sm:$0xff]  ;;  %11864 = vst [vmem:[#allocation42_spill] sm:$0xff] %v10149_v31 }
 0x532   :  { %v4115_v49 = vld [vmem:[#allocation8 + $0x1f0] sm:$0xff] }
 0x534   :  { %5814 = vmatpush2.bf16.msra.mxu0 %v10125_v45  ;;  %5857 = vmatpush2.bf16.msra.mxu1 %v10127_v32  ;;  %v10171_v32 = vcombine.low %v4112_v52, %v4116_v44  ;;  %v4095_v45 = vld [vmem:[#allocation8 + $0x150] sm:$0xff] }
 0x535   :  { %5815 = vmatprep.subr.bf16.mxu0 %v10131_v22  ;;  %5858 = vmatprep.subr.bf16.mxu1 %v10133_v5  ;;  %v10161_v5 = vcombine.high %v4111_v26, %v4115_v49  ;;  %v10169_v22 = vcombine.low %v4111_v26, %v4115_v49  ;;  %v10189_v49 = vcombine.high %v4095_v45, %v4099_v61 }
 0x536   :  { %11868 = vst [vmem:[#allocation47_spill] sm:$0xff] %v10171_v32 }
 0x537   :  { %11866 = vst [vmem:[#allocation44_spill] sm:$0xff] %v10161_v5  ;;  %11873 = vst [vmem:[#allocation54_spill] sm:$0xff] %v10189_v49 }
 0x538   :  { %5816 = vmatpush2.bf16.msra.mxu0 %v10137_v3  ;;  %5859 = vmatpush2.bf16.msra.mxu1 %v10139_v21  ;;  %v10163_v3 = vcombine.high %v4112_v52, %v4116_v44  ;;  %v10165_v21 = vpack.c.bf16 %v7387_v48, %v7385_v34  ;;  %v4096_v34 = vld [vmem:[#allocation8 + $0x158] sm:$0xff]  ;;  %v10183_v44 = vcombine.low %v4103_v28, %v4107_v15 }
 0x539   :  { %5817 = vmatprep.subr.bf16.mxu0 %v10143_v25  ;;  %5860 = vmatprep.subr.bf16.mxu1 %v10145_v6  ;;  %v10175_v6 = vcombine.high %v4103_v28, %v4107_v15  ;;  %v10177_v25 = vcombine.high %v4104_v16, %v4108_v9  ;;  %v4100_v48 = vld [vmem:[#allocation8 + $0x178] sm:$0xff]  ;;  %v10185_v52 = vcombine.low %v4104_v16, %v4108_v9 }
 0x53a   :  { %11867 = vst [vmem:[#allocation45_spill] sm:$0xff] %v10163_v3  ;;  %11871 = vst [vmem:[#allocation51_spill] sm:$0xff] %v10183_v44  ;;  %v10191_v26 = vcombine.high %v4096_v34, %v4100_v48  ;;  %v10197_v28 = vcombine.low %v4095_v45, %v4099_v61  ;;  %v10199_v15 = vcombine.low %v4096_v34, %v4100_v48 }
 0x53b   :  { %11869 = vst [vmem:[#allocation49_spill] sm:$0xff] %v10175_v6  ;;  %11870 = vst [vmem:[#allocation50_spill] sm:$0xff] %v10177_v25 }
 0x53c   :  { %5818 = vmatpush2.bf16.msra.mxu0 %v10149_v31  ;;  %5861 = vmatpush2.bf16.msra.mxu1 %v10151_v40  ;;  %11872 = vst [vmem:[#allocation53_spill] sm:$0xff] %v10185_v52  ;;  %11874 = vst [vmem:[#allocation55_spill] sm:$0xff] %v10191_v26  ;;  %v4088_v40 = vld [vmem:[#allocation8 + $0x118] sm:$0xff] }
 0x53d   :  { %5873 = vmatprep.subr.bf16.mxu0 %v10161_v5  ;;  %5916 = vmatprep.subr.bf16.mxu1 %v10163_v3  ;;  %v4087_v3 = vld [vmem:[#allocation8 + $0x110] sm:$0xff]  ;;  %v4092_v31 = vld [vmem:[#allocation8 + $0x138] sm:$0xff]  ;;  %11875 = vst [vmem:[#allocation56_spill] sm:$0xff] %v10197_v28  ;;  %11876 = vst [vmem:[#allocation57_spill] sm:$0xff] %v10199_v15 }
 0x53e   :  { %v4091_v5 = vld [vmem:[#allocation8 + $0x130] sm:$0xff]  ;;  %v10205_v9 = vcombine.high %v4088_v40, %v4092_v31  ;;  %v10211_v45 = vcombine.low %v4088_v40, %v4092_v31 }
 0x53f   :  { %5820 = vmatmul.mubr.bf16.vlgmr.msra.gmra.mxu0 %v10165_v21  ;;  %5863 = vmatmul.mubr.bf16.vlgmr.msra.gmra.mxu1 %v10165_v21  ;;  %v10203_v16 = vcombine.high %v4087_v3, %v4091_v5  ;;  %v10209_v61 = vcombine.low %v4087_v3, %v4091_v5 }
 0x540   :  { %5874 = vmatpush1.bf16.msra.mxu0 %v10169_v22  ;;  %5917 = vmatpush1.bf16.msra.mxu1 %v10171_v32  ;;  %11878 = vst [vmem:[#allocation59_spill] sm:$0xff] %v10205_v9  ;;  %v4080_v32 = vld [vmem:[#allocation8 + $0xd8] sm:$0xff]  ;;  %11880 = vst [vmem:[#allocation61_spill] sm:$0xff] %v10211_v45 }
 0x541   :  { %5875 = vmatprep.subr.bf16.mxu0 %v10175_v6  ;;  %5918 = vmatprep.subr.bf16.mxu1 %v10177_v25  ;;  %11877 = vst [vmem:[#allocation58_spill] sm:$0xff] %v10203_v16  ;;  %v4079_v25 = vld [vmem:[#allocation8 + $0xd0] sm:$0xff]  ;;  %11879 = vst [vmem:[#allocation60_spill] sm:$0xff] %v10209_v61 }
 0x542   :  { %5905 = vmatprep.mubr.bf16.mxu0 %v10021_v11  ;;  %5948 = vmatprep.mubr.bf16.mxu1 %v10021_v11  ;;  %v4083_v6 = vld [vmem:[#allocation8 + $0xf0] sm:$0xff]  ;;  %v4084_v11 = vld [vmem:[#allocation8 + $0xf8] sm:$0xff] }
 0x543   :  { %v10215_v34 = vcombine.high %v4079_v25, %v4083_v6  ;;  %v10217_v48 = vcombine.high %v4080_v32, %v4084_v11  ;;  %v10221_v5 = vcombine.low %v4079_v25, %v4083_v6  ;;  %v10223_v3 = vcombine.low %v4080_v32, %v4084_v11 }
 0x544   :  { %5876 = vmatpush1.bf16.msra.mxu0 %v10183_v44  ;;  %5919 = vmatpush1.bf16.msra.mxu1 %v10185_v52  ;;  %v4072_v52 = vld [vmem:[#allocation8 + $0x98] sm:$0xff] }
 0x545   :  { %5877 = vmatprep.subr.bf16.mxu0 %v10189_v49  ;;  %5920 = vmatprep.subr.bf16.mxu1 %v10191_v26  ;;  %11881 = vst [vmem:[#allocation62_spill] sm:$0xff] %v10215_v34  ;;  %11882 = vst [vmem:[#allocation63_spill] sm:$0xff] %v10217_v48  ;;  %v4071_v26 = vld [vmem:[#allocation8 + $0x90] sm:$0xff]  ;;  %v4076_v44 = vld [vmem:[#allocation8 + $0xb8] sm:$0xff] }
 0x546   :  { %v4075_v49 = vld [vmem:[#allocation8 + $0xb0] sm:$0xff]  ;;  %11883 = vst [vmem:[#allocation64_spill] sm:$0xff] %v10221_v5  ;;  %11884 = vst [vmem:[#allocation65_spill] sm:$0xff] %v10223_v3  ;;  %v10229_v40 = vcombine.high %v4072_v52, %v4076_v44  ;;  %v10235_v32 = vcombine.low %v4072_v52, %v4076_v44 }
 0x547   :  { %v10227_v31 = vcombine.high %v4071_v26, %v4075_v49  ;;  %v10233_v25 = vcombine.low %v4071_v26, %v4075_v49 }
 0x548   :  { %5878 = vmatpush1.bf16.msra.mxu0 %v10197_v28  ;;  %5921 = vmatpush1.bf16.msra.mxu1 %v10199_v15  ;;  %11886 = vst [vmem:[#allocation67_spill] sm:$0xff] %v10229_v40  ;;  %v4064_v15 = vld [vmem:[#allocation8 + $0x58] sm:$0xff]  ;;  %11888 = vst [vmem:[#allocation69_spill] sm:$0xff] %v10235_v32 }
 0x549   :  { %5879 = vmatprep.subr.bf16.mxu0 %v10203_v16  ;;  %5922 = vmatprep.subr.bf16.mxu1 %v10205_v9  ;;  %11885 = vst [vmem:[#allocation66_spill] sm:$0xff] %v10227_v31  ;;  %v4063_v9 = vld [vmem:[#allocation8 + $0x50] sm:$0xff]  ;;  %v4068_v28 = vld [vmem:[#allocation8 + $0x78] sm:$0xff]  ;;  %11887 = vst [vmem:[#allocation68_spill] sm:$0xff] %v10233_v25 }
 0x54a   :  { %v4067_v16 = vld [vmem:[#allocation8 + $0x70] sm:$0xff]  ;;  %v10241_v11 = vcombine.high %v4064_v15, %v4068_v28  ;;  %v10247_v44 = vcombine.low %v4064_v15, %v4068_v28 }
 0x54b   :  { %v10239_v6 = vcombine.high %v4063_v9, %v4067_v16  ;;  %v10245_v49 = vcombine.low %v4063_v9, %v4067_v16 }
 0x54c   :  { %5880 = vmatpush1.bf16.msra.mxu0 %v10209_v61  ;;  %5923 = vmatpush1.bf16.msra.mxu1 %v10211_v45  ;;  %11890 = vst [vmem:[#allocation71_spill] sm:$0xff] %v10241_v11  ;;  %v4056_v45 = vld [vmem:[#allocation8 + $0x18] sm:$0xff]  ;;  %11892 = vst [vmem:[#allocation73_spill] sm:$0xff] %v10247_v44 }
 0x54d   :  { %5881 = vmatprep.subr.bf16.mxu0 %v10215_v34  ;;  %5924 = vmatprep.subr.bf16.mxu1 %v10217_v48  ;;  %11889 = vst [vmem:[#allocation70_spill] sm:$0xff] %v10239_v6  ;;  %v4055_v48 = vld [vmem:[#allocation8 + $0x10] sm:$0xff]  ;;  %v4060_v61 = vld [vmem:[#allocation8 + $0x38] sm:$0xff]  ;;  %11891 = vst [vmem:[#allocation72_spill] sm:$0xff] %v10245_v49 }
 0x54e   :  { %v4059_v34 = vld [vmem:[#allocation8 + $0x30] sm:$0xff]  ;;  %v10253_v26 = vcombine.high %v4056_v45, %v4060_v61  ;;  %v10259_v28 = vcombine.low %v4056_v45, %v4060_v61 }
 0x54f   :  { %v10251_v52 = vcombine.high %v4055_v48, %v4059_v34  ;;  %v10257_v16 = vcombine.low %v4055_v48, %v4059_v34 }
 0x550   :  { %5882 = vmatpush1.bf16.msra.mxu0 %v10221_v5  ;;  %5925 = vmatpush1.bf16.msra.mxu1 %v10223_v3  ;;  %11894 = vst [vmem:[#allocation75_spill] sm:$0xff] %v10253_v26  ;;  %v4176_v3 = vld [vmem:[#allocation8 + $0x3d8] sm:$0xff]  ;;  %11896 = vst [vmem:[#allocation77_spill] sm:$0xff] %v10259_v28 }
 0x551   :  { %5883 = vmatprep.subr.bf16.mxu0 %v10227_v31  ;;  %5926 = vmatprep.subr.bf16.mxu1 %v10229_v40  ;;  %11893 = vst [vmem:[#allocation74_spill] sm:$0xff] %v10251_v52  ;;  %v4175_v40 = vld [vmem:[#allocation8 + $0x3d0] sm:$0xff]  ;;  %v4180_v5 = vld [vmem:[#allocation8 + $0x3f8] sm:$0xff]  ;;  %11895 = vst [vmem:[#allocation76_spill] sm:$0xff] %v10257_v16 }
 0x552   :  { %v4179_v31 = vld [vmem:[#allocation8 + $0x3f0] sm:$0xff]  ;;  %v10265_v9 = vcombine.high %v4176_v3, %v4180_v5  ;;  %v10271_v61 = vcombine.low %v4176_v3, %v4180_v5 }
 0x553   :  { %v10263_v15 = vcombine.high %v4175_v40, %v4179_v31  ;;  %v10269_v34 = vcombine.low %v4175_v40, %v4179_v31 }
 0x554   :  { %5884 = vmatpush1.bf16.msra.mxu0 %v10233_v25  ;;  %5927 = vmatpush1.bf16.msra.mxu1 %v10235_v32  ;;  %11898 = vst [vmem:[#allocation79_spill] sm:$0xff] %v10265_v9  ;;  %v4168_v32 = vld [vmem:[#allocation8 + $0x398] sm:$0xff]  ;;  %11900 = vst [vmem:[#allocation81_spill] sm:$0xff] %v10271_v61 }
 0x555   :  { %5885 = vmatprep.subr.bf16.mxu0 %v10239_v6  ;;  %5928 = vmatprep.subr.bf16.mxu1 %v10241_v11  ;;  %11897 = vst [vmem:[#allocation78_spill] sm:$0xff] %v10263_v15  ;;  %v4167_v11 = vld [vmem:[#allocation8 + $0x390] sm:$0xff]  ;;  %v4172_v25 = vld [vmem:[#allocation8 + $0x3b8] sm:$0xff]  ;;  %11899 = vst [vmem:[#allocation80_spill] sm:$0xff] %v10269_v34 }
 0x556   :  { %v4171_v6 = vld [vmem:[#allocation8 + $0x3b0] sm:$0xff]  ;;  %v10277_v48 = vcombine.high %v4168_v32, %v4172_v25  ;;  %v10283_v5 = vcombine.low %v4168_v32, %v4172_v25 }
 0x557   :  { %v10275_v45 = vcombine.high %v4167_v11, %v4171_v6  ;;  %v10281_v31 = vcombine.low %v4167_v11, %v4171_v6 }
 0x558   :  { %5886 = vmatpush1.bf16.msra.mxu0 %v10245_v49  ;;  %5929 = vmatpush1.bf16.msra.mxu1 %v10247_v44  ;;  %11902 = vst [vmem:[#allocation83_spill] sm:$0xff] %v10277_v48  ;;  %v4160_v44 = vld [vmem:[#allocation8 + $0x358] sm:$0xff]  ;;  %11904 = vst [vmem:[#allocation85_spill] sm:$0xff] %v10283_v5 }
 0x559   :  { %5887 = vmatprep.subr.bf16.mxu0 %v10251_v52  ;;  %5930 = vmatprep.subr.bf16.mxu1 %v10253_v26  ;;  %11901 = vst [vmem:[#allocation82_spill] sm:$0xff] %v10275_v45  ;;  %v4159_v26 = vld [vmem:[#allocation8 + $0x350] sm:$0xff]  ;;  %v4164_v49 = vld [vmem:[#allocation8 + $0x378] sm:$0xff]  ;;  %11903 = vst [vmem:[#allocation84_spill] sm:$0xff] %v10281_v31 }
 0x55a   :  { %v4163_v52 = vld [vmem:[#allocation8 + $0x370] sm:$0xff]  ;;  %v10289_v40 = vcombine.high %v4160_v44, %v4164_v49  ;;  %v10295_v25 = vcombine.low %v4160_v44, %v4164_v49 }
 0x55b   :  { %v10287_v3 = vcombine.high %v4159_v26, %v4163_v52  ;;  %v10293_v6 = vcombine.low %v4159_v26, %v4163_v52 }
 0x55c   :  { %5888 = vmatpush1.bf16.msra.mxu0 %v10257_v16  ;;  %5931 = vmatpush1.bf16.msra.mxu1 %v10259_v28  ;;  %11906 = vst [vmem:[#allocation87_spill] sm:$0xff] %v10289_v40  ;;  %v4152_v28 = vld [vmem:[#allocation8 + $0x318] sm:$0xff]  ;;  %11908 = vst [vmem:[#allocation38_spill] sm:$0xff] %v10295_v25 }
 0x55d   :  { %5889 = vmatprep.subr.bf16.mxu0 %v10263_v15  ;;  %5932 = vmatprep.subr.bf16.mxu1 %v10265_v9  ;;  %11905 = vst [vmem:[#allocation86_spill] sm:$0xff] %v10287_v3  ;;  %v4151_v9 = vld [vmem:[#allocation8 + $0x310] sm:$0xff]  ;;  %v4156_v16 = vld [vmem:[#allocation8 + $0x338] sm:$0xff]  ;;  %11907 = vst [vmem:[#allocation88_spill] sm:$0xff] %v10293_v6 }
 0x55e   :  { %v4155_v15 = vld [vmem:[#allocation8 + $0x330] sm:$0xff]  ;;  %v10301_v11 = vcombine.high %v4152_v28, %v4156_v16  ;;  %v10307_v49 = vcombine.low %v4152_v28, %v4156_v16 }
 0x55f   :  { %v10299_v32 = vcombine.high %v4151_v9, %v4155_v15  ;;  %v10305_v52 = vcombine.low %v4151_v9, %v4155_v15 }
 0x560   :  { %5890 = vmatpush2.bf16.msra.mxu0 %v10269_v34  ;;  %5933 = vmatpush2.bf16.msra.mxu1 %v10271_v61  ;;  %11910 = vst [vmem:[#allocation112_spill] sm:$0xff] %v10301_v11  ;;  %v4144_v61 = vld [vmem:[#allocation8 + $0x2d8] sm:$0xff]  ;;  %11912 = vst [vmem:[#allocation114_spill] sm:$0xff] %v10307_v49 }
 0x561   :  { %5891 = vmatprep.subr.bf16.mxu0 %v10275_v45  ;;  %5934 = vmatprep.subr.bf16.mxu1 %v10277_v48  ;;  %11909 = vst [vmem:[#allocation33_spill] sm:$0xff] %v10299_v32  ;;  %v4143_v48 = vld [vmem:[#allocation8 + $0x2d0] sm:$0xff]  ;;  %v4148_v34 = vld [vmem:[#allocation8 + $0x2f8] sm:$0xff]  ;;  %11911 = vst [vmem:[#allocation35_spill] sm:$0xff] %v10305_v52 }
 0x562   :  { %v4147_v45 = vld [vmem:[#allocation8 + $0x2f0] sm:$0xff]  ;;  %v10313_v26 = vcombine.high %v4144_v61, %v4148_v34  ;;  %v10319_v16 = vcombine.low %v4144_v61, %v4148_v34 }
 0x563   :  { %v10311_v44 = vcombine.high %v4143_v48, %v4147_v45  ;;  %v10317_v15 = vcombine.low %v4143_v48, %v4147_v45 }
 0x564   :  { %5892 = vmatpush2.bf16.msra.mxu0 %v10281_v31  ;;  %5935 = vmatpush2.bf16.msra.mxu1 %v10283_v5  ;;  %11914 = vst [vmem:[#allocation40_spill] sm:$0xff] %v10313_v26  ;;  %v4136_v5 = vld [vmem:[#allocation8 + $0x298] sm:$0xff]  ;;  %11916 = vst [vmem:[#allocation119_spill] sm:$0xff] %v10319_v16 }
 0x565   :  { %5893 = vmatprep.subr.bf16.mxu0 %v10287_v3  ;;  %5936 = vmatprep.subr.bf16.mxu1 %v10289_v40  ;;  %11913 = vst [vmem:[#allocation41_spill] sm:$0xff] %v10311_v44  ;;  %v4135_v40 = vld [vmem:[#allocation8 + $0x290] sm:$0xff]  ;;  %v4140_v31 = vld [vmem:[#allocation8 + $0x2b8] sm:$0xff]  ;;  %11915 = vst [vmem:[#allocation118_spill] sm:$0xff] %v10317_v15 }
 0x566   :  { %v4139_v3 = vld [vmem:[#allocation8 + $0x2b0] sm:$0xff]  ;;  %v10325_v9 = vcombine.high %v4136_v5, %v4140_v31  ;;  %v10331_v34 = vcombine.low %v4136_v5, %v4140_v31 }
 0x567   :  { %v10323_v28 = vcombine.high %v4135_v40, %v4139_v3  ;;  %v10329_v45 = vcombine.low %v4135_v40, %v4139_v3 }
 0x568   :  { %5894 = vmatpush2.bf16.msra.mxu0 %v10293_v6  ;;  %5937 = vmatpush2.bf16.msra.mxu1 %v10295_v25  ;;  %11918 = vst [vmem:[#allocation167_spill] sm:$0xff] %v10325_v9  ;;  %v4128_v25 = vld [vmem:[#allocation8 + $0x258] sm:$0xff]  ;;  %11920 = vst [vmem:[#allocation168_spill] sm:$0xff] %v10331_v34 }
 0x569   :  { %5895 = vmatprep.subr.bf16.mxu0 %v10299_v32  ;;  %5938 = vmatprep.subr.bf16.mxu1 %v10301_v11  ;;  %11917 = vst [vmem:[#allocation159_spill] sm:$0xff] %v10323_v28  ;;  %v4127_v11 = vld [vmem:[#allocation8 + $0x250] sm:$0xff]  ;;  %v4132_v6 = vld [vmem:[#allocation8 + $0x278] sm:$0xff]  ;;  %11919 = vst [vmem:[#allocation160_spill] sm:$0xff] %v10329_v45 }
 0x56a   :  { %v4131_v32 = vld [vmem:[#allocation8 + $0x270] sm:$0xff]  ;;  %v10337_v48 = vcombine.high %v4128_v25, %v4132_v6  ;;  %v10343_v31 = vcombine.low %v4128_v25, %v4132_v6  ;;  %v10393_v6 = vpop.f32.mrf.mxu1 }
 0x56b   :  { %v10335_v61 = vcombine.high %v4127_v11, %v4131_v32  ;;  %v10341_v3 = vcombine.low %v4127_v11, %v4131_v32 }
 0x56c   :  { %5896 = vmatpush2.bf16.msra.mxu0 %v10305_v52  ;;  %5939 = vmatpush2.bf16.msra.mxu1 %v10307_v49  ;;  %11922 = vst [vmem:[#allocation169_spill] sm:$0xff] %v10337_v48  ;;  %v4120_v49 = vld [vmem:[#allocation8 + $0x218] sm:$0xff]  ;;  %11924 = vst [vmem:[#allocation170_spill] sm:$0xff] %v10343_v31  ;;  %v10401_v32 = vpop.f32.mrf.mxu1 }
 0x56d   :  { %5897 = vmatprep.subr.bf16.mxu0 %v10311_v44  ;;  %5940 = vmatprep.subr.bf16.mxu1 %v10313_v26  ;;  %11921 = vst [vmem:[#allocation161_spill] sm:$0xff] %v10335_v61  ;;  %v4119_v26 = vld [vmem:[#allocation8 + $0x210] sm:$0xff]  ;;  %v4124_v52 = vld [vmem:[#allocation8 + $0x238] sm:$0xff]  ;;  %11923 = vst [vmem:[#allocation162_spill] sm:$0xff] %v10341_v3 }
 0x56e   :  { %v4123_v44 = vld [vmem:[#allocation8 + $0x230] sm:$0xff]  ;;  %v10349_v40 = vcombine.high %v4120_v49, %v4124_v52 }
 0x56f   :  { %v10347_v5 = vcombine.high %v4119_v26, %v4123_v44 }
 0x570   :  { %5898 = vmatpush2.bf16.msra.mxu0 %v10317_v15  ;;  %5941 = vmatpush2.bf16.msra.mxu1 %v10319_v16  ;;  %11926 = vst [vmem:[#allocation131_spill] sm:$0xff] %v10349_v40 }
 0x571   :  { %5899 = vmatprep.subr.bf16.mxu0 %v10323_v28  ;;  %5942 = vmatprep.subr.bf16.mxu1 %v10325_v9  ;;  %11925 = vst [vmem:[#allocation130_spill] sm:$0xff] %v10347_v5  ;;  %v10353_v9 = vcombine.low %v4119_v26, %v4123_v44  ;;  %v11929_v26 = vld [vmem:[#allocation129_spill] sm:$0xff] }
 0x573   :  { %11927 = vst [vmem:[#allocation132_spill] sm:$0xff] %v10353_v9 }
 0x574   :  { %5900 = vmatpush2.bf16.msra.mxu0 %v10329_v45  ;;  %5943 = vmatpush2.bf16.msra.mxu1 %v10331_v34  ;;  %v10355_v45 = vcombine.low %v4120_v49, %v4124_v52  ;;  %v10409_v52 = vpop.f32.mrf.mxu1 }
 0x575   :  { %5901 = vmatprep.subr.bf16.mxu0 %v10335_v61  ;;  %5944 = vmatprep.subr.bf16.mxu1 %v10337_v48 }
 0x576   :  { %11928 = vst [vmem:[#allocation133_spill] sm:$0xff] %v10355_v45  ;;  %v10417_v44 = vpop.f32.mrf.mxu1 }
 0x578   :  { %5902 = vmatpush2.bf16.msra.mxu0 %v10341_v3  ;;  %5945 = vmatpush2.bf16.msra.mxu1 %v10343_v31 }
 0x579   :  { %5903 = vmatprep.subr.bf16.mxu0 %v10347_v5  ;;  %5946 = vmatprep.subr.bf16.mxu1 %v10349_v40 }
 0x57c   :  { %5904 = vmatpush2.bf16.msra.mxu0 %v10353_v9  ;;  %5947 = vmatpush2.bf16.msra.mxu1 %v10355_v45 }
 0x57d   :  { %6085 = vmatprep.subr.bf16.mxu0 %v9899_v60  ;;  %6128 = vmatprep.subr.bf16.mxu1 %v9901_v13 }
 0x57f   :  { %5906 = vmatmul.mubr.bf16.vlgmr.msra.gmra.mxu0 %v10165_v21  ;;  %5949 = vmatmul.mubr.bf16.vlgmr.msra.gmra.mxu1 %v10165_v21  ;;  %v10391_v21 = vpop.f32.mrf.mxu0 }
 0x580   :  { %6086 = vmatpush1.bf16.msra.mxu0 %v9895_v38  ;;  %6129 = vmatpush1.bf16.msra.mxu1 %v9897_v59 }
 0x581   :  { %6087 = vmatprep.subr.bf16.mxu0 %v9957_v30  ;;  %6130 = vmatprep.subr.bf16.mxu1 %v9959_v18  ;;  %v10399_v25 = vpop.f32.mrf.mxu0 }
 0x583   :  { %v10407_v11 = vpop.f32.mrf.mxu0 }
 0x584   :  { %6088 = vmatpush1.bf16.msra.mxu0 %v9965_v35  ;;  %6131 = vmatpush1.bf16.msra.mxu1 %v9967_v17 }
 0x585   :  { %6089 = vmatprep.subr.bf16.mxu0 %v9971_v20  ;;  %6132 = vmatprep.subr.bf16.mxu1 %v9973_v19  ;;  %v10415_v49 = vpop.f32.mrf.mxu0 }
 0x588   :  { %6090 = vmatpush1.bf16.msra.mxu0 %v9979_v39  ;;  %6133 = vmatpush1.bf16.msra.mxu1 %v9981_v24 }
 0x589   :  { %6091 = vmatprep.subr.bf16.mxu0 %v9985_v23  ;;  %6134 = vmatprep.subr.bf16.mxu1 %v9987_v58 }
 0x58c   :  { %6092 = vmatpush1.bf16.msra.mxu0 %v9993_v7  ;;  %6135 = vmatpush1.bf16.msra.mxu1 %v9995_v33 }
 0x58d   :  { %6093 = vmatprep.subr.bf16.mxu0 %v9997_v8  ;;  %6136 = vmatprep.subr.bf16.mxu1 %v9999_v43 }
 0x590   :  { %6094 = vmatpush1.bf16.msra.mxu0 %v10011_v0  ;;  %6137 = vmatpush1.bf16.msra.mxu1 %v10013_v56 }
 0x591   :  { %6095 = vmatprep.subr.bf16.mxu0 %v10017_v1  ;;  %6138 = vmatprep.subr.bf16.mxu1 %v10019_v51 }
 0x594   :  { %6096 = vmatpush1.bf16.msra.mxu0 %v10027_v42  ;;  %6139 = vmatpush1.bf16.msra.mxu1 %v10029_v62 }
 0x595   :  { %6097 = vmatprep.subr.bf16.mxu0 %v10033_v2  ;;  %6140 = vmatprep.subr.bf16.mxu1 %v10035_v57 }
 0x598   :  { %6098 = vmatpush1.bf16.msra.mxu0 %v10041_v55  ;;  %6141 = vmatpush1.bf16.msra.mxu1 %v10043_v54 }
 0x599   :  { %6099 = vmatprep.subr.bf16.mxu0 %v10047_v53  ;;  %6142 = vmatprep.subr.bf16.mxu1 %v10049_v37 }
 0x59c   :  { %6100 = vmatpush1.bf16.msra.mxu0 %v10053_v12  ;;  %6143 = vmatpush1.bf16.msra.mxu1 %v10055_v63 }
 0x59d   :  { %6101 = vmatprep.subr.bf16.mxu0 %v10059_v41  ;;  %6144 = vmatprep.subr.bf16.mxu1 %v10061_v4  ;;  %v11936_v4 = vld [vmem:[#allocation17_spill] sm:$0xff] }
 0x5a0   :  { %6102 = vmatpush2.bf16.msra.mxu0 %v10065_v14  ;;  %6145 = vmatpush2.bf16.msra.mxu1 %v10067_v10  ;;  %v11930_v10 = vld [vmem:[#allocation12_spill] sm:$0xff]  ;;  %v10423_v14 = vpop.f32.mrf.mxu0 }
 0x5a1   :  { %6103 = vmatprep.subr.bf16.mxu0 %v10071_v50  ;;  %6146 = vmatprep.subr.bf16.mxu1 %v10073_v29  ;;  %11931 = vst [vmem:[#allocation134_spill] sm:$0xff] %v10423_v14  ;;  %v10425_v50 = vpop.f32.mrf.mxu1  ;;  %v11933_v29 = vld [vmem:[#allocation13_spill] sm:$0xff]  ;;  %v11942_v14 = vld [vmem:[#allocation24_spill] sm:$0xff] }
 0x5a2   :  { %11932 = vst [vmem:[#allocation135_spill] sm:$0xff] %v10425_v50  ;;  %v10431_v41 = vpop.f32.mrf.mxu0 }
 0x5a3   :  { %11937 = vst [vmem:[#allocation136_spill] sm:$0xff] %v10431_v41  ;;  %v11948_v41 = vld [vmem:[#allocation30_spill] sm:$0xff] }
 0x5a4   :  { %6104 = vmatpush2.bf16.msra.mxu0 %v10077_v27  ;;  %6147 = vmatpush2.bf16.msra.mxu1 %v10079_v47  ;;  %v11934_v27 = vld [vmem:[#allocation14_spill] sm:$0xff]  ;;  %v11935_v47 = vld [vmem:[#allocation16_spill] sm:$0xff]  ;;  %v10439_v50 = vpop.f32.mrf.mxu0 }
 0x5a5   :  { %6105 = vmatprep.subr.bf16.mxu0 %v10083_v46  ;;  %6148 = vmatprep.subr.bf16.mxu1 %v10085_v36  ;;  %v10433_v46 = vpop.f32.mrf.mxu1  ;;  %v11939_v36 = vld [vmem:[#allocation18_spill] sm:$0xff]  ;;  %11943 = vst [vmem:[#allocation138_spill] sm:$0xff] %v10439_v50 }
 0x5a6   :  { %11938 = vst [vmem:[#allocation137_spill] sm:$0xff] %v10433_v46  ;;  %v10447_v46 = vpop.f32.mrf.mxu0 }
 0x5a7   :  { %11949 = vst [vmem:[#allocation140_spill] sm:$0xff] %v10447_v46  ;;  %v11960_v46 = vld [vmem:[#allocation39_spill] sm:$0xff] }
 0x5a8   :  { %6106 = vmatpush2.bf16.msra.mxu0 %v11929_v26  ;;  %6149 = vmatpush2.bf16.msra.mxu1 %v11930_v10  ;;  %v11940_v26 = vld [vmem:[#allocation20_spill] sm:$0xff]  ;;  %v11941_v10 = vld [vmem:[#allocation22_spill] sm:$0xff] }
 0x5a9   :  { %6107 = vmatprep.subr.bf16.mxu0 %v11933_v29  ;;  %6150 = vmatprep.subr.bf16.mxu1 %v11934_v27  ;;  %v10441_v29 = vpop.f32.mrf.mxu1  ;;  %v11945_v27 = vld [vmem:[#allocation25_spill] sm:$0xff] }
 0x5aa   :  { %11944 = vst [vmem:[#allocation139_spill] sm:$0xff] %v10441_v29  ;;  %v11955_v29 = vld [vmem:[#allocation34_spill] sm:$0xff] }
 0x5ac   :  { %6108 = vmatpush2.bf16.msra.mxu0 %v11935_v47  ;;  %6151 = vmatpush2.bf16.msra.mxu1 %v11936_v4  ;;  %v11946_v47 = vld [vmem:[#allocation28_spill] sm:$0xff]  ;;  %v11947_v4 = vld [vmem:[#allocation29_spill] sm:$0xff] }
 0x5ad   :  { %6109 = vmatprep.subr.bf16.mxu0 %v11939_v36  ;;  %6152 = vmatprep.subr.bf16.mxu1 %v11940_v26  ;;  %v10449_v36 = vpop.f32.mrf.mxu1  ;;  %v11951_v26 = vld [vmem:[#allocation31_spill] sm:$0xff] }
 0x5ae   :  { %11950 = vst [vmem:[#allocation141_spill] sm:$0xff] %v10449_v36 }
 0x5b0   :  { %6110 = vmatpush2.bf16.msra.mxu0 %v11941_v10  ;;  %6153 = vmatpush2.bf16.msra.mxu1 %v11942_v14  ;;  %v11952_v10 = vld [vmem:[#allocation32_spill] sm:$0xff] }
 0x5b1   :  { %6111 = vmatprep.subr.bf16.mxu0 %v11945_v27  ;;  %6154 = vmatprep.subr.bf16.mxu1 %v11946_v47  ;;  %v11956_v27 = vld [vmem:[#allocation36_spill] sm:$0xff] }
 0x5b4   :  { %6112 = vmatpush2.bf16.msra.mxu0 %v11947_v4  ;;  %6155 = vmatpush2.bf16.msra.mxu1 %v11948_v41  ;;  %v11959_v41 = vld [vmem:[#allocation37_spill] sm:$0xff] }
 0x5b5   :  { %6113 = vmatprep.subr.bf16.mxu0 %v11951_v26  ;;  %6156 = vmatprep.subr.bf16.mxu1 %v11952_v10  ;;  %v11963_v10 = vld [vmem:[#allocation42_spill] sm:$0xff] }
 0x5b7   :  { %v10453_v14 = vpop.f32.mrf.mxu0  ;;  %v10455_v50 = vpop.f32.mrf.mxu1 }
 0x5b8   :  { %11953 = vst [vmem:[#allocation142_spill] sm:$0xff] %v10453_v14  ;;  %11954 = vst [vmem:[#allocation143_spill] sm:$0xff] %v10455_v50  ;;  %6114 = vmatpush2.bf16.msra.mxu0 %v11955_v29  ;;  %6157 = vmatpush2.bf16.msra.mxu1 %v11956_v27  ;;  %v11964_v14 = vld [vmem:[#allocation43_spill] sm:$0xff]  ;;  %v11967_v27 = vld [vmem:[#allocation44_spill] sm:$0xff] }
 0x5b9   :  { %v10459_v47 = vpop.f32.mrf.mxu0  ;;  %v10461_v4 = vpop.f32.mrf.mxu1  ;;  %6115 = vmatprep.subr.bf16.mxu0 %v11959_v41  ;;  %6158 = vmatprep.subr.bf16.mxu1 %v11960_v46 }
 0x5ba   :  { %11957 = vst [vmem:[#allocation144_spill] sm:$0xff] %v10459_v47  ;;  %11958 = vst [vmem:[#allocation145_spill] sm:$0xff] %v10461_v4  ;;  %v11968_v47 = vld [vmem:[#allocation45_spill] sm:$0xff] }
 0x5bb   :  { %v10465_v36 = vpop.f32.mrf.mxu0  ;;  %v10467_v26 = vpop.f32.mrf.mxu1 }
 0x5bc   :  { %11961 = vst [vmem:[#allocation146_spill] sm:$0xff] %v10465_v36  ;;  %11962 = vst [vmem:[#allocation147_spill] sm:$0xff] %v10467_v26  ;;  %6116 = vmatpush2.bf16.msra.mxu0 %v11963_v10  ;;  %6159 = vmatpush2.bf16.msra.mxu1 %v11964_v14 }
 0x5bd   :  { %v10471_v50 = vpop.f32.mrf.mxu0  ;;  %v10473_v29 = vpop.f32.mrf.mxu1  ;;  %6171 = vmatprep.subr.bf16.mxu0 %v11967_v27  ;;  %6214 = vmatprep.subr.bf16.mxu1 %v11968_v47  ;;  %v11969_v47 = vld [vmem:[#allocation11_spill] sm:$0xff] }
 0x5be   :  { %11965 = vst [vmem:[#allocation148_spill] sm:$0xff] %v10471_v50  ;;  %11966 = vst [vmem:[#allocation149_spill] sm:$0xff] %v10473_v29  ;;  %v4181_v29 = vld [vmem:[%s11019_s8] sm:$0xff]  ;;  %v11970_v14 = vsub.s32 4, %v11969_v47  ;;  %v11971_v12 = vsub.s32 6, %v11969_v47  ;;  %v11972_v55 = vsub.s32 5, %v11969_v47 }
 0x5bf   :  { %v10477_v4 = vpop.f32.mrf.mxu0  ;;  %v10479_v41 = vpop.f32.mrf.mxu1  ;;  %v11973_v2 = vsub.s32 7, %v11969_v47 }
 0x5c0   :  { %v10498_v63 = vrot.slane %v4181_v29, %v11970_v14  ;;  %v10502_v37 = vrot.slane %v4181_v29, %v11971_v12  ;;  %v10506_v57 = vrot.slane %v4181_v29, %v11972_v55 }
 0x5c1   :  { %v10481_v46 = vpop.f32.mrf.mxu0  ;;  %v10483_v36 = vpop.f32.mrf.mxu1  ;;  %v10510_v62 = vrot.slane %v4181_v29, %v11973_v2 }
 0x5c3   :  { %v10485_v26 = vpop.f32.mrf.mxu0  ;;  %v10487_v10 = vpop.f32.mrf.mxu1 }
 0x5c5   :  { %v10492_v50 = vpop.f32.mrf.mxu0  ;;  %v10494_v27 = vpop.f32.mrf.mxu1 }
 0x5c7   :  { %v5063_v53 = vpop.f32.mrf.mxu0  ;;  %v5126_v54 = vpop.f32.mrf.mxu1 }
 0x5c8   :  { %v10513_v42 = vadd.f32 %v5063_v53, %v10498_v63  ;;  %v10516_v14 = vadd.f32 %v5126_v54, %v10502_v37 }
 0x5c9   :  { %v5065_v51 = vpop.f32.mrf.mxu0  ;;  %v5128_v1 = vpop.f32.mrf.mxu1 }
 0x5ca   :  { %11974 = vst [vmem:[#allocation150_spill] sm:$0xff] %v10513_v42  ;;  %11975 = vst [vmem:[#allocation151_spill] sm:$0xff] %v10516_v14  ;;  %v10519_v12 = vadd.f32 %v5065_v51, %v10506_v57  ;;  %v10522_v56 = vadd.f32 %v5128_v1, %v10510_v62 }
 0x5cb   :  { %v5067_v55 = vpop.f32.mrf.mxu0  ;;  %v5130_v0 = vpop.f32.mrf.mxu1 }
 0x5cc   :  { %11976 = vst [vmem:[#allocation152_spill] sm:$0xff] %v10519_v12  ;;  %11977 = vst [vmem:[#allocation153_spill] sm:$0xff] %v10522_v56  ;;  %v10525_v43 = vadd.f32 %v5067_v55, %v10498_v63  ;;  %v10528_v2 = vadd.f32 %v5130_v0, %v10502_v37 }
 0x5cd   :  { %v5069_v53 = vpop.f32.mrf.mxu0  ;;  %v5132_v42 = vpop.f32.mrf.mxu1 }
 0x5ce   :  { %11978 = vst [vmem:[#allocation154_spill] sm:$0xff] %v10525_v43  ;;  %11979 = vst [vmem:[#allocation155_spill] sm:$0xff] %v10528_v2  ;;  %v10531_v54 = vadd.f32 %v5069_v53, %v10506_v57  ;;  %v10534_v14 = vadd.f32 %v5132_v42, %v10510_v62 }
 0x5cf   :  { %v5073_v51 = vpop.f32.mrf.mxu0  ;;  %v5136_v12 = vpop.f32.mrf.mxu1 }
 0x5d0   :  { %11980 = vst [vmem:[#allocation156_spill] sm:$0xff] %v10531_v54  ;;  %11981 = vst [vmem:[#allocation157_spill] sm:$0xff] %v10534_v14  ;;  %v10537_v1 = vadd.f32 %v5073_v51, %v10498_v63  ;;  %v10540_v56 = vadd.f32 %v5136_v12, %v10502_v37 }
 0x5d1   :  { %v5075_v55 = vpop.f32.mrf.mxu0  ;;  %v5138_v43 = vpop.f32.mrf.mxu1 }
 0x5d2   :  { %11982 = vst [vmem:[#allocation158_spill] sm:$0xff] %v10537_v1  ;;  %11983 = vst [vmem:[#allocation23_spill] sm:$0xff] %v10540_v56  ;;  %v10543_v0 = vadd.f32 %v5075_v55, %v10506_v57  ;;  %v10546_v2 = vadd.f32 %v5138_v43, %v10510_v62  ;;  %v11990_v43 = vsub.s32 0, %v11969_v47 }
 0x5d3   :  { %v5077_v53 = vpop.f32.mrf.mxu0  ;;  %v5140_v54 = vpop.f32.mrf.mxu1 }
 0x5d4   :  { %11984 = vst [vmem:[#allocation19_spill] sm:$0xff] %v10543_v0  ;;  %11985 = vst [vmem:[#allocation15_spill] sm:$0xff] %v10546_v2  ;;  %v10549_v42 = vadd.f32 %v5077_v53, %v10498_v63  ;;  %v10552_v14 = vadd.f32 %v5140_v54, %v10502_v37  ;;  %v10562_v2 = vrot.slane %v4181_v29, %v11990_v43  ;;  %v11991_v53 = vsub.s32 2, %v11969_v47 }
 0x5d5   :  { %v5079_v51 = vpop.f32.mrf.mxu0  ;;  %v5142_v1 = vpop.f32.mrf.mxu1 }
 0x5d6   :  { %11986 = vst [vmem:[#allocation90_spill] sm:$0xff] %v10549_v42  ;;  %11987 = vst [vmem:[#allocation46_spill] sm:$0xff] %v10552_v14  ;;  %v10555_v12 = vadd.f32 %v5079_v51, %v10506_v57  ;;  %v10558_v56 = vadd.f32 %v5142_v1, %v10510_v62  ;;  %v10566_v42 = vrot.slane %v4181_v29, %v11991_v53  ;;  %v11992_v14 = vsub.s32 1, %v11969_v47 }
 0x5d7   :  { %v11993_v51 = vsub.s32 3, %v11969_v47 }
 0x5d8   :  { %11988 = vst [vmem:[#allocation120_spill] sm:$0xff] %v10555_v12  ;;  %11989 = vst [vmem:[#allocation48_spill] sm:$0xff] %v10558_v56  ;;  %v10570_v8 = vrot.slane %v4181_v29, %v11992_v14  ;;  %v4928_v56 = vadd.f32 %v10391_v21, %v10562_v2  ;;  %v4991_v43 = vadd.f32 %v10393_v6, %v10566_v42 }
 0x5d9   :  { %v10574_v12 = vrot.slane %v4181_v29, %v11993_v51  ;;  %v4932_v29 = vadd.f32 %v10407_v11, %v10562_v2  ;;  %v4995_v21 = vadd.f32 %v10409_v52, %v10566_v42 }
 0x5da   :  { %v4930_v53 = vadd.f32 %v10399_v25, %v10570_v8  ;;  %v4934_v6 = vadd.f32 %v10415_v49, %v10570_v8 }
 0x5db   :  { %v4993_v14 = vadd.f32 %v10401_v32, %v10574_v12  ;;  %v4997_v32 = vadd.f32 %v10417_v44, %v10574_v12 }
 0x5ff   :  { %v5821_v55 = vpop.f32.mrf.mxu0  ;;  %v5864_v0 = vpop.f32.mrf.mxu1 }
 0x600   :  { %v5959_v7 = vadd.f32 %v5821_v55, %v4928_v56  ;;  %v5961_v58 = vadd.f32 %v5864_v0, %v4991_v43 }
 0x601   :  { %v5823_v54 = vpop.f32.mrf.mxu0  ;;  %v5866_v1 = vpop.f32.mrf.mxu1 }
 0x602   :  { %v5960_v47 = vadd.f32 %v5823_v54, %v4930_v53  ;;  %v5962_v51 = vadd.f32 %v5866_v1, %v4993_v14  ;;  %v7655_v39 = vmul.f32 -1.442695, %v5959_v7  ;;  %v7659_v56 = vmul.f32 -1.442695, %v5961_v58 }
 0x603   :  { %v5825_v33 = vpop.f32.mrf.mxu0  ;;  %v5868_v23 = vpop.f32.mrf.mxu1 }
 0x604   :  { %v5967_v25 = vadd.f32 %v5825_v33, %v4932_v29  ;;  %v5969_v55 = vadd.f32 %v5868_v23, %v4995_v21  ;;  %v7656_v0 = vmul.f32 -1.442695, %v5960_v47  ;;  %v7660_v11 = vmul.f32 -1.442695, %v5962_v51 }
 0x605   :  { %v5827_v24 = vpop.f32.mrf.mxu0  ;;  %v5870_v19 = vpop.f32.mrf.mxu1  ;;  %8033 = vpow2.f32 %v7655_v39 }
 0x606   :  { %v5968_v43 = vadd.f32 %v5827_v24, %v4934_v6  ;;  %v7657_v54 = vmul.f32 -1.442695, %v5967_v25  ;;  %v5970_v53 = vadd.f32 %v5870_v19, %v4997_v32  ;;  %8035 = vpow2.f32 %v7659_v56 }
 0x607   :  { %v7661_v52 = vmul.f32 -1.442695, %v5969_v55  ;;  %8037 = vpow2.f32 %v7656_v0  ;;  %v5054_v56 = vadd.f32 %v10477_v4, %v10498_v63  ;;  %v5117_v55 = vadd.f32 %v10479_v41, %v10502_v37 }
 0x608   :  { %v7658_v1 = vmul.f32 -1.442695, %v5968_v43  ;;  %8039 = vpow2.f32 %v7660_v11  ;;  %v7662_v7 = vmul.f32 -1.442695, %v5970_v53  ;;  %v5056_v32 = vadd.f32 %v10481_v46, %v10506_v57 }
 0x609   :  { %8041 = vpow2.f32 %v7657_v54  ;;  %v5119_v54 = vadd.f32 %v10483_v36, %v10510_v62  ;;  %v5058_v4 = vadd.f32 %v10485_v26, %v10498_v63  ;;  %v5121_v41 = vadd.f32 %v10487_v10, %v10502_v37 }
 0x60a   :  { %8043 = vpow2.f32 %v7661_v52  ;;  %v5123_v36 = vadd.f32 %v10494_v27, %v10510_v62 }
 0x60b   :  { %8045 = vpow2.f32 %v7658_v1 }
 0x60c   :  { %8047 = vpow2.f32 %v7662_v7 }
 0x612   :  { %v8034_v23 = vpop.eup %8033 }
 0x613   :  { %v8036_v58 = vpop.eup %8035  ;;  %v5987_v44 = vadd.f32 1.0, %v8034_v23 }
 0x614   :  { %v8038_v33 = vpop.eup %8037  ;;  %v6011_v14 = vadd.f32 1.0, %v8036_v58 }
 0x615   :  { %v8040_v49 = vpop.eup %8039  ;;  %v5988_v29 = vadd.f32 1.0, %v8038_v33  ;;  %8049 = vrcp.f32 %v5987_v44  ;;  %v5060_v33 = vadd.f32 %v10492_v50, %v10506_v57 }
 0x616   :  { %v8042_v24 = vpop.eup %8041  ;;  %v6012_v47 = vadd.f32 1.0, %v8040_v49  ;;  %8051 = vrcp.f32 %v6011_v14 }
 0x617   :  { %v8044_v39 = vpop.eup %8043  ;;  %v5989_v21 = vadd.f32 1.0, %v8042_v24  ;;  %8053 = vrcp.f32 %v5988_v29 }
 0x618   :  { %v8046_v19 = vpop.eup %8045  ;;  %v6013_v6 = vadd.f32 1.0, %v8044_v39  ;;  %8055 = vrcp.f32 %v6012_v47 }
 0x619   :  { %v8048_v51 = vpop.eup %8047  ;;  %v5990_v25 = vadd.f32 1.0, %v8046_v19  ;;  %8057 = vrcp.f32 %v5989_v21 }
 0x61a   :  { %v6014_v0 = vadd.f32 1.0, %v8048_v51  ;;  %8059 = vrcp.f32 %v6013_v6  ;;  %v7389_v51 = vld [vmem:[%s11013_s2 + $0x20] sm:$0xff] }
 0x61b   :  { %8061 = vrcp.f32 %v5990_v25 }
 0x622   :  { %v8050_v19 = vpop.eup %8049 }
 0x623   :  { %v8052_v50 = vpop.eup %8051 }
 0x624   :  { %v8054_v62 = vpop.eup %8053 }
 0x625   :  { %v8056_v27 = vpop.eup %8055 }
 0x626   :  { %v8058_v47 = vpop.eup %8057 }
 0x627   :  { %v8060_v21 = vpop.eup %8059 }
 0x628   :  { %v8062_v6 = vpop.eup %8061 }
 0x63f   :  { %v5907_v43 = vpop.f32.mrf.mxu0  ;;  %v5950_v11 = vpop.f32.mrf.mxu1 }
 0x640   :  { %v5963_v53 = vadd.f32 %v5907_v43, %v5054_v56  ;;  %v5965_v52 = vadd.f32 %v5950_v11, %v5117_v55  ;;  %v6051_v55 = vmul.f32 %v8052_v50, %v7389_v51 }
 0x641   :  { %v5909_v1 = vpop.f32.mrf.mxu0  ;;  %v5952_v7 = vpop.f32.mrf.mxu1 }
 0x642   :  { %8063 = vtanh.f32 %v5963_v53  ;;  %v7663_v46 = vmul.f32 -1.442695, %v5965_v52  ;;  %v5964_v23 = vadd.f32 %v5909_v1, %v5056_v32  ;;  %v5966_v58 = vadd.f32 %v5952_v7, %v5119_v54  ;;  %v7391_v52 = vld [vmem:[%s11013_s2 + $0x30] sm:$0xff] }
 0x643   :  { %8065 = vrcp.f32 %v6014_v0  ;;  %v5911_v49 = vpop.f32.mrf.mxu0  ;;  %v5954_v44 = vpop.f32.mrf.mxu1  ;;  %v7390_v0 = vld [vmem:[%s11013_s2 + $0x28] sm:$0xff] }
 0x644   :  { %8067 = vpow2.f32 %v7663_v46  ;;  %v7664_v63 = vmul.f32 -1.442695, %v5966_v58  ;;  %v5971_v26 = vadd.f32 %v5911_v49, %v5058_v4  ;;  %v5973_v37 = vadd.f32 %v5954_v44, %v5121_v41 }
 0x645   :  { %8069 = vtanh.f32 %v5964_v23  ;;  %v5913_v10 = vpop.f32.mrf.mxu0  ;;  %v5956_v24 = vpop.f32.mrf.mxu1  ;;  %v6052_v41 = vmul.f32 %v8056_v27, %v7390_v0  ;;  %v7392_v23 = vld [vmem:[%s11013_s2 + $0x38] sm:$0xff]  ;;  %v11996_v0 = vld [vmem:[#allocation47_spill] sm:$0xff] }
 0x646   :  { %8071 = vpow2.f32 %v7664_v63  ;;  %v7665_v14 = vmul.f32 -1.442695, %v5973_v37  ;;  %v5972_v39 = vadd.f32 %v5913_v10, %v5060_v33  ;;  %v5974_v29 = vadd.f32 %v5956_v24, %v5123_v36 }
 0x647   :  { %8073 = vtanh.f32 %v5971_v26  ;;  %v6053_v36 = vmul.f32 %v8060_v21, %v7391_v52  ;;  %v12000_v52 = vld [vmem:[#allocation53_spill] sm:$0xff] }
 0x648   :  { %8075 = vpow2.f32 %v7665_v14  ;;  %v7666_v57 = vmul.f32 -1.442695, %v5974_v29 }
 0x649   :  { %8077 = vtanh.f32 %v5972_v39 }
 0x64a   :  { %8079 = vpow2.f32 %v7666_v57 }
 0x64f   :  { %v8064_v25 = vpop.eup %8063 }
 0x650   :  { %v8066_v56 = vpop.eup %8065  ;;  %v6055_v32 = vmul.f32 %v8064_v25, %v8050_v19 }
 0x651   :  { %v8068_v43 = vpop.eup %8067  ;;  %v6054_v10 = vmul.f32 %v8066_v56, %v7392_v23  ;;  %v12006_v23 = vld [vmem:[#allocation59_spill] sm:$0xff] }
 0x652   :  { %v8070_v11 = vpop.eup %8069  ;;  %v10614_v54 = vadd.f32 %v6055_v32, %v6051_v55  ;;  %v6039_v53 = vadd.f32 1.0, %v8068_v43  ;;  %v11997_v43 = vld [vmem:[#allocation49_spill] sm:$0xff] }
 0x653   :  { %v8072_v4 = vpop.eup %8071  ;;  %v6056_v1 = vmul.f32 %v8070_v11, %v8054_v62  ;;  %v11998_v11 = vld [vmem:[#allocation50_spill] sm:$0xff] }
 0x654   :  { %v8074_v7 = vpop.eup %8073  ;;  %8081 = vtanh.f32 %v10614_v54  ;;  %v6040_v46 = vadd.f32 1.0, %v8072_v4  ;;  %v12001_v4 = vld [vmem:[#allocation54_spill] sm:$0xff] }
 0x655   :  { %v8076_v58 = vpop.eup %8075  ;;  %8083 = vrcp.f32 %v6039_v53  ;;  %v10623_v33 = vadd.f32 %v6056_v1, %v6052_v41  ;;  %v6057_v49 = vmul.f32 %v8074_v7, %v8058_v47  ;;  %v11999_v53 = vld [vmem:[#allocation51_spill] sm:$0xff]  ;;  %v12003_v1 = vld [vmem:[#allocation56_spill] sm:$0xff]  ;;  %v12004_v7 = vld [vmem:[#allocation57_spill] sm:$0xff] }
 0x656   :  { %v8078_v44 = vpop.eup %8077  ;;  %8085 = vrcp.f32 %v6040_v46  ;;  %v6041_v63 = vadd.f32 1.0, %v8076_v58  ;;  %v12002_v41 = vld [vmem:[#allocation55_spill] sm:$0xff]  ;;  %v12005_v46 = vld [vmem:[#allocation58_spill] sm:$0xff]  ;;  %v12007_v58 = vld [vmem:[#allocation60_spill] sm:$0xff] }
 0x657   :  { %v8080_v26 = vpop.eup %8079  ;;  %8087 = vtanh.f32 %v10623_v33  ;;  %v10626_v37 = vadd.f32 %v6057_v49, %v6053_v36  ;;  %v6058_v24 = vmul.f32 %v8078_v44, %v8062_v6  ;;  %v12008_v36 = vld [vmem:[#allocation61_spill] sm:$0xff]  ;;  %v12009_v49 = vld [vmem:[#allocation62_spill] sm:$0xff]  ;;  %v12010_v44 = vld [vmem:[#allocation63_spill] sm:$0xff] }
 0x658   :  { %8089 = vrcp.f32 %v6041_v63  ;;  %v6042_v14 = vadd.f32 1.0, %v8080_v26  ;;  %v12011_v63 = vld [vmem:[#allocation64_spill] sm:$0xff]  ;;  %v12012_v26 = vld [vmem:[#allocation65_spill] sm:$0xff] }
 0x659   :  { %8091 = vtanh.f32 %v10626_v37  ;;  %v10629_v39 = vadd.f32 %v6058_v24, %v6054_v10  ;;  %v12013_v10 = vld [vmem:[#allocation66_spill] sm:$0xff]  ;;  %v12014_v24 = vld [vmem:[#allocation67_spill] sm:$0xff] }
 0x65a   :  { %8093 = vrcp.f32 %v6042_v14  ;;  %v12015_v14 = vld [vmem:[#allocation68_spill] sm:$0xff] }
 0x65b   :  { %8095 = vtanh.f32 %v10629_v39 }
 0x661   :  { %v8082_v29 = vpop.eup %8081 }
 0x662   :  { %v8084_v19 = vpop.eup %8083 }
 0x663   :  { %v8086_v57 = vpop.eup %8085  ;;  %v6067_v56 = vmul.f32 %v8084_v19, %v8082_v29  ;;  %v12016_v29 = vld [vmem:[#allocation69_spill] sm:$0xff]  ;;  %v12017_v19 = vld [vmem:[#allocation70_spill] sm:$0xff] }
 0x664   :  { %v8088_v50 = vpop.eup %8087 }
 0x665   :  { %v8090_v62 = vpop.eup %8089  ;;  %v6068_v25 = vmul.f32 %v8088_v50, %v8086_v57  ;;  %v12018_v57 = vld [vmem:[#allocation71_spill] sm:$0xff]  ;;  %v12019_v50 = vld [vmem:[#allocation72_spill] sm:$0xff] }
 0x666   :  { %v8092_v27 = vpop.eup %8091 }
 0x667   :  { %v8094_v47 = vpop.eup %8093  ;;  %v6069_v51 = vmul.f32 %v8092_v27, %v8090_v62  ;;  %v12020_v62 = vld [vmem:[#allocation73_spill] sm:$0xff]  ;;  %v12021_v27 = vld [vmem:[#allocation74_spill] sm:$0xff] }
 0x668   :  { %v8096_v21 = vpop.eup %8095 }
 0x669   :  { %v6070_v6 = vmul.f32 %v8096_v21, %v8094_v47  ;;  %v10634_v32 = vpack.c.bf16 %v6069_v51, %v6067_v56  ;;  %v12022_v47 = vld [vmem:[#allocation75_spill] sm:$0xff]  ;;  %v12023_v21 = vld [vmem:[#allocation76_spill] sm:$0xff]  ;;  %v12024_v51 = vld [vmem:[#allocation77_spill] sm:$0xff] }
 0x66a   :  { %v12027_v56 = vld [vmem:[#allocation80_spill] sm:$0xff] }
 0x66b   :  { %v10632_v55 = vpack.c.bf16 %v6070_v6, %v6068_v25  ;;  %11995 = vst [vmem:[#allocation93_spill] sm:$0xff] %v10634_v32  ;;  %v12025_v25 = vld [vmem:[#allocation78_spill] sm:$0xff]  ;;  %v12026_v6 = vld [vmem:[#allocation79_spill] sm:$0xff] }
 0x66d   :  { %11994 = vst [vmem:[#allocation121_spill] sm:$0xff] %v10632_v55  ;;  %6117 = vmatprep.mubr.bf16.mxu0 %v10632_v55  ;;  %6160 = vmatprep.mubr.bf16.mxu1 %v10632_v55 }
 0x66e   :  { %6118 = vmatmul.mubr.bf16.vlgmr.msra.gmra.mxu0 %v10634_v32  ;;  %6161 = vmatmul.mubr.bf16.vlgmr.msra.gmra.mxu1 %v10634_v32 }
 0x66f   :  { %6172 = vmatpush1.bf16.msra.mxu0 %v10169_v22  ;;  %6215 = vmatpush1.bf16.msra.mxu1 %v11996_v0 }
 0x670   :  { %6203 = vmatprep.mubr.bf16.mxu0 %v10632_v55  ;;  %6246 = vmatprep.mubr.bf16.mxu1 %v10632_v55  ;;  %v12028_v55 = vld [vmem:[#allocation81_spill] sm:$0xff] }
 0x671   :  { %6173 = vmatprep.subr.bf16.mxu0 %v11997_v43  ;;  %6216 = vmatprep.subr.bf16.mxu1 %v11998_v11 }
 0x673   :  { %6174 = vmatpush1.bf16.msra.mxu0 %v11999_v53  ;;  %6217 = vmatpush1.bf16.msra.mxu1 %v12000_v52 }
 0x674   :  { %6175 = vmatprep.subr.bf16.mxu0 %v12001_v4  ;;  %6218 = vmatprep.subr.bf16.mxu1 %v12002_v41 }
 0x677   :  { %6176 = vmatpush1.bf16.msra.mxu0 %v12003_v1  ;;  %6219 = vmatpush1.bf16.msra.mxu1 %v12004_v7 }
 0x678   :  { %6177 = vmatprep.subr.bf16.mxu0 %v12005_v46  ;;  %6220 = vmatprep.subr.bf16.mxu1 %v12006_v23 }
 0x67b   :  { %6178 = vmatpush1.bf16.msra.mxu0 %v12007_v58  ;;  %6221 = vmatpush1.bf16.msra.mxu1 %v12008_v36 }
 0x67c   :  { %6179 = vmatprep.subr.bf16.mxu0 %v12009_v49  ;;  %6222 = vmatprep.subr.bf16.mxu1 %v12010_v44 }
 0x67f   :  { %6180 = vmatpush1.bf16.msra.mxu0 %v12011_v63  ;;  %6223 = vmatpush1.bf16.msra.mxu1 %v12012_v26 }
 0x680   :  { %6181 = vmatprep.subr.bf16.mxu0 %v12013_v10  ;;  %6224 = vmatprep.subr.bf16.mxu1 %v12014_v24 }
 0x683   :  { %6182 = vmatpush1.bf16.msra.mxu0 %v12015_v14  ;;  %6225 = vmatpush1.bf16.msra.mxu1 %v12016_v29 }
 0x684   :  { %6183 = vmatprep.subr.bf16.mxu0 %v12017_v19  ;;  %6226 = vmatprep.subr.bf16.mxu1 %v12018_v57  ;;  %v12029_v57 = vld [vmem:[#allocation82_spill] sm:$0xff] }
 0x687   :  { %6184 = vmatpush1.bf16.msra.mxu0 %v12019_v50  ;;  %6227 = vmatpush1.bf16.msra.mxu1 %v12020_v62  ;;  %v12030_v50 = vld [vmem:[#allocation83_spill] sm:$0xff]  ;;  %v12031_v62 = vld [vmem:[#allocation84_spill] sm:$0xff] }
 0x688   :  { %6185 = vmatprep.subr.bf16.mxu0 %v12021_v27  ;;  %6228 = vmatprep.subr.bf16.mxu1 %v12022_v47  ;;  %v12032_v27 = vld [vmem:[#allocation85_spill] sm:$0xff]  ;;  %v12033_v47 = vld [vmem:[#allocation86_spill] sm:$0xff] }
 0x68b   :  { %6186 = vmatpush1.bf16.msra.mxu0 %v12023_v21  ;;  %6229 = vmatpush1.bf16.msra.mxu1 %v12024_v51  ;;  %v12034_v21 = vld [vmem:[#allocation87_spill] sm:$0xff]  ;;  %v12035_v51 = vld [vmem:[#allocation88_spill] sm:$0xff] }
 0x68c   :  { %6187 = vmatprep.subr.bf16.mxu0 %v12025_v25  ;;  %6230 = vmatprep.subr.bf16.mxu1 %v12026_v6  ;;  %v12036_v25 = vld [vmem:[#allocation38_spill] sm:$0xff]  ;;  %v12037_v6 = vld [vmem:[#allocation33_spill] sm:$0xff] }
 0x68f   :  { %6188 = vmatpush2.bf16.msra.mxu0 %v12027_v56  ;;  %6231 = vmatpush2.bf16.msra.mxu1 %v12028_v55  ;;  %v12038_v56 = vld [vmem:[#allocation112_spill] sm:$0xff]  ;;  %v12039_v55 = vld [vmem:[#allocation35_spill] sm:$0xff] }
 0x690   :  { %6189 = vmatprep.subr.bf16.mxu0 %v12029_v57  ;;  %6232 = vmatprep.subr.bf16.mxu1 %v12030_v50  ;;  %v12040_v57 = vld [vmem:[#allocation114_spill] sm:$0xff]  ;;  %v12041_v50 = vld [vmem:[#allocation41_spill] sm:$0xff] }
 0x693   :  { %6190 = vmatpush2.bf16.msra.mxu0 %v12031_v62  ;;  %6233 = vmatpush2.bf16.msra.mxu1 %v12032_v27  ;;  %v12042_v62 = vld [vmem:[#allocation40_spill] sm:$0xff] }
 0x694   :  { %6191 = vmatprep.subr.bf16.mxu0 %v12033_v47  ;;  %6234 = vmatprep.subr.bf16.mxu1 %v12034_v21 }
 0x697   :  { %6192 = vmatpush2.bf16.msra.mxu0 %v12035_v51  ;;  %6235 = vmatpush2.bf16.msra.mxu1 %v12036_v25  ;;  %v12043_v51 = vld [vmem:[#allocation167_spill] sm:$0xff]  ;;  %v12044_v25 = vld [vmem:[#allocation160_spill] sm:$0xff] }
 0x698   :  { %6193 = vmatprep.subr.bf16.mxu0 %v12037_v6  ;;  %6236 = vmatprep.subr.bf16.mxu1 %v12038_v56 }
 0x69b   :  { %6194 = vmatpush2.bf16.msra.mxu0 %v12039_v55  ;;  %6237 = vmatpush2.bf16.msra.mxu1 %v12040_v57 }
 0x69c   :  { %6195 = vmatprep.subr.bf16.mxu0 %v12041_v50  ;;  %6238 = vmatprep.subr.bf16.mxu1 %v12042_v62 }
 0x69f   :  { %6196 = vmatpush2.bf16.msra.mxu0 %v10317_v15  ;;  %6239 = vmatpush2.bf16.msra.mxu1 %v10319_v16 }
 0x6a0   :  { %6197 = vmatprep.subr.bf16.mxu0 %v10323_v28  ;;  %6240 = vmatprep.subr.bf16.mxu1 %v12043_v51 }
 0x6a3   :  { %6198 = vmatpush2.bf16.msra.mxu0 %v12044_v25  ;;  %6241 = vmatpush2.bf16.msra.mxu1 %v10331_v34  ;;  %v12107_v25 = vld [vmem:[#allocation139_spill] sm:$0xff] }
 0x6a4   :  { %6199 = vmatprep.subr.bf16.mxu0 %v10335_v61  ;;  %6242 = vmatprep.subr.bf16.mxu1 %v10337_v48  ;;  %v12106_v48 = vld [vmem:[#allocation138_spill] sm:$0xff] }
 0x6a5   :  { %v4942_v61 = vadd.f32 %v12106_v48, %v10562_v2 }
 0x6a7   :  { %6200 = vmatpush2.bf16.msra.mxu0 %v10341_v3  ;;  %6243 = vmatpush2.bf16.msra.mxu1 %v10343_v31 }
 0x6a8   :  { %6201 = vmatprep.subr.bf16.mxu0 %v10347_v5  ;;  %6244 = vmatprep.subr.bf16.mxu1 %v10349_v40 }
 0x6ab   :  { %6202 = vmatpush2.bf16.msra.mxu0 %v10353_v9  ;;  %6245 = vmatpush2.bf16.msra.mxu1 %v10355_v45  ;;  %v12047_v45 = vld [vmem:[#allocation21_spill] sm:$0xff] }
 0x6ac   :  { %6383 = vmatprep.subr.bf16.mxu0 %v9899_v60  ;;  %6426 = vmatprep.subr.bf16.mxu1 %v9901_v13  ;;  %v12045_v60 = vld [vmem:[#allocation98_spill] sm:$0xff] }
 0x6ad   :  { %v12046_v13 = vld [vmem:[#allocation102_spill] sm:$0xff] }
 0x6ae   :  { %6204 = vmatmul.mubr.bf16.vlgmr.msra.gmra.mxu0 %v10634_v32  ;;  %6247 = vmatmul.mubr.bf16.vlgmr.msra.gmra.mxu1 %v10634_v32  ;;  %v12048_v32 = vld [vmem:[#allocation100_spill] sm:$0xff] }
 0x6af   :  { %6384 = vmatpush1.bf16.msra.mxu0 %v9895_v38  ;;  %6427 = vmatpush1.bf16.msra.mxu1 %v9897_v59  ;;  %v12049_v38 = vld [vmem:[#allocation27_spill] sm:$0xff]  ;;  %v12050_v59 = vld [vmem:[#allocation26_spill] sm:$0xff] }
 0x6b0   :  { %6385 = vmatprep.subr.bf16.mxu0 %v9957_v30  ;;  %6428 = vmatprep.subr.bf16.mxu1 %v9959_v18  ;;  %v12051_v30 = vld [vmem:[#allocation105_spill] sm:$0xff]  ;;  %v12052_v18 = vld [vmem:[#allocation106_spill] sm:$0xff] }
 0x6b3   :  { %6386 = vmatpush1.bf16.msra.mxu0 %v9965_v35  ;;  %6429 = vmatpush1.bf16.msra.mxu1 %v9967_v17  ;;  %v12053_v35 = vld [vmem:[#allocation89_spill] sm:$0xff]  ;;  %v12054_v17 = vld [vmem:[#allocation91_spill] sm:$0xff] }
 0x6b4   :  { %6387 = vmatprep.subr.bf16.mxu0 %v9971_v20  ;;  %6430 = vmatprep.subr.bf16.mxu1 %v12045_v60  ;;  %v12055_v20 = vld [vmem:[#allocation92_spill] sm:$0xff]  ;;  %v12056_v60 = vld [vmem:[#allocation94_spill] sm:$0xff] }
 0x6b7   :  { %6388 = vmatpush1.bf16.msra.mxu0 %v12046_v13  ;;  %6431 = vmatpush1.bf16.msra.mxu1 %v12047_v45  ;;  %v12057_v13 = vld [vmem:[#allocation95_spill] sm:$0xff]  ;;  %v12058_v45 = vld [vmem:[#allocation96_spill] sm:$0xff] }
 0x6b8   :  { %6389 = vmatprep.subr.bf16.mxu0 %v12048_v32  ;;  %6432 = vmatprep.subr.bf16.mxu1 %v12049_v38  ;;  %v12059_v32 = vld [vmem:[#allocation97_spill] sm:$0xff]  ;;  %v12060_v38 = vld [vmem:[#allocation99_spill] sm:$0xff] }
 0x6bb   :  { %6390 = vmatpush1.bf16.msra.mxu0 %v12050_v59  ;;  %6433 = vmatpush1.bf16.msra.mxu1 %v12051_v30  ;;  %v12061_v59 = vld [vmem:[#allocation101_spill] sm:$0xff]  ;;  %v12062_v30 = vld [vmem:[#allocation103_spill] sm:$0xff] }
 0x6bc   :  { %6391 = vmatprep.subr.bf16.mxu0 %v12052_v18  ;;  %6434 = vmatprep.subr.bf16.mxu1 %v12053_v35  ;;  %v12063_v18 = vld [vmem:[#allocation104_spill] sm:$0xff]  ;;  %v12064_v35 = vld [vmem:[#allocation107_spill] sm:$0xff] }
 0x6bf   :  { %6392 = vmatpush1.bf16.msra.mxu0 %v12054_v17  ;;  %6435 = vmatpush1.bf16.msra.mxu1 %v12055_v20  ;;  %v12065_v17 = vld [vmem:[#allocation108_spill] sm:$0xff]  ;;  %v12066_v20 = vld [vmem:[#allocation109_spill] sm:$0xff] }
 0x6c0   :  { %6393 = vmatprep.subr.bf16.mxu0 %v12056_v60  ;;  %6436 = vmatprep.subr.bf16.mxu1 %v12057_v13  ;;  %v12067_v60 = vld [vmem:[#allocation110_spill] sm:$0xff]  ;;  %v12068_v13 = vld [vmem:[#allocation111_spill] sm:$0xff] }
 0x6c3   :  { %6394 = vmatpush1.bf16.msra.mxu0 %v12058_v45  ;;  %6437 = vmatpush1.bf16.msra.mxu1 %v12059_v32  ;;  %v12069_v45 = vld [vmem:[#allocation113_spill] sm:$0xff]  ;;  %v12070_v32 = vld [vmem:[#allocation115_spill] sm:$0xff] }
 0x6c4   :  { %6395 = vmatprep.subr.bf16.mxu0 %v12060_v38  ;;  %6438 = vmatprep.subr.bf16.mxu1 %v12061_v59  ;;  %v12071_v38 = vld [vmem:[#allocation116_spill] sm:$0xff]  ;;  %v12072_v59 = vld [vmem:[#allocation117_spill] sm:$0xff] }
 0x6c7   :  { %6396 = vmatpush1.bf16.msra.mxu0 %v12062_v30  ;;  %6439 = vmatpush1.bf16.msra.mxu1 %v12063_v18  ;;  %v12073_v30 = vld [vmem:[#allocation122_spill] sm:$0xff]  ;;  %v12074_v18 = vld [vmem:[#allocation124_spill] sm:$0xff] }
 0x6c8   :  { %6397 = vmatprep.subr.bf16.mxu0 %v12064_v35  ;;  %6440 = vmatprep.subr.bf16.mxu1 %v12065_v17  ;;  %v12075_v35 = vld [vmem:[#allocation126_spill] sm:$0xff]  ;;  %v12076_v17 = vld [vmem:[#allocation127_spill] sm:$0xff] }
 0x6cb   :  { %6398 = vmatpush1.bf16.msra.mxu0 %v12066_v20  ;;  %6441 = vmatpush1.bf16.msra.mxu1 %v12067_v60  ;;  %v12077_v20 = vld [vmem:[#allocation128_spill] sm:$0xff]  ;;  %v12078_v60 = vld [vmem:[#allocation129_spill] sm:$0xff] }
 0x6cc   :  { %6399 = vmatprep.subr.bf16.mxu0 %v12068_v13  ;;  %6442 = vmatprep.subr.bf16.mxu1 %v12069_v45  ;;  %v12079_v13 = vld [vmem:[#allocation12_spill] sm:$0xff]  ;;  %v12080_v45 = vld [vmem:[#allocation13_spill] sm:$0xff] }
 0x6cf   :  { %6400 = vmatpush2.bf16.msra.mxu0 %v12070_v32  ;;  %6443 = vmatpush2.bf16.msra.mxu1 %v12071_v38  ;;  %v12081_v32 = vld [vmem:[#allocation14_spill] sm:$0xff]  ;;  %v12082_v38 = vld [vmem:[#allocation16_spill] sm:$0xff] }
 0x6d0   :  { %6401 = vmatprep.subr.bf16.mxu0 %v12072_v59  ;;  %6444 = vmatprep.subr.bf16.mxu1 %v12073_v30  ;;  %v12083_v59 = vld [vmem:[#allocation17_spill] sm:$0xff]  ;;  %v12084_v30 = vld [vmem:[#allocation18_spill] sm:$0xff] }
 0x6d3   :  { %6402 = vmatpush2.bf16.msra.mxu0 %v12074_v18  ;;  %6445 = vmatpush2.bf16.msra.mxu1 %v12075_v35  ;;  %v12085_v18 = vld [vmem:[#allocation20_spill] sm:$0xff]  ;;  %v12086_v35 = vld [vmem:[#allocation22_spill] sm:$0xff] }
 0x6d4   :  { %6403 = vmatprep.subr.bf16.mxu0 %v12076_v17  ;;  %6446 = vmatprep.subr.bf16.mxu1 %v12077_v20  ;;  %v12087_v17 = vld [vmem:[#allocation24_spill] sm:$0xff]  ;;  %v12088_v20 = vld [vmem:[#allocation25_spill] sm:$0xff] }
 0x6d7   :  { %6404 = vmatpush2.bf16.msra.mxu0 %v12078_v60  ;;  %6447 = vmatpush2.bf16.msra.mxu1 %v12079_v13  ;;  %v12089_v60 = vld [vmem:[#allocation28_spill] sm:$0xff]  ;;  %v12090_v13 = vld [vmem:[#allocation29_spill] sm:$0xff] }
 0x6d8   :  { %6405 = vmatprep.subr.bf16.mxu0 %v12080_v45  ;;  %6448 = vmatprep.subr.bf16.mxu1 %v12081_v32  ;;  %v12091_v45 = vld [vmem:[#allocation30_spill] sm:$0xff]  ;;  %v12092_v32 = vld [vmem:[#allocation31_spill] sm:$0xff] }
 0x6db   :  { %6406 = vmatpush2.bf16.msra.mxu0 %v12082_v38  ;;  %6449 = vmatpush2.bf16.msra.mxu1 %v12083_v59  ;;  %v12093_v38 = vld [vmem:[#allocation32_spill] sm:$0xff]  ;;  %v12094_v59 = vld [vmem:[#allocation34_spill] sm:$0xff] }
 0x6dc   :  { %6407 = vmatprep.subr.bf16.mxu0 %v12084_v30  ;;  %6450 = vmatprep.subr.bf16.mxu1 %v12085_v18  ;;  %v12095_v30 = vld [vmem:[#allocation36_spill] sm:$0xff]  ;;  %v12096_v18 = vld [vmem:[#allocation37_spill] sm:$0xff] }
 0x6df   :  { %6408 = vmatpush2.bf16.msra.mxu0 %v12086_v35  ;;  %6451 = vmatpush2.bf16.msra.mxu1 %v12087_v17  ;;  %v12097_v35 = vld [vmem:[#allocation39_spill] sm:$0xff]  ;;  %v12098_v17 = vld [vmem:[#allocation42_spill] sm:$0xff] }
 0x6e0   :  { %6409 = vmatprep.subr.bf16.mxu0 %v12088_v20  ;;  %6452 = vmatprep.subr.bf16.mxu1 %v12089_v60  ;;  %v12099_v20 = vld [vmem:[#allocation43_spill] sm:$0xff]  ;;  %v12100_v60 = vld [vmem:[#allocation44_spill] sm:$0xff] }
 0x6e3   :  { %6410 = vmatpush2.bf16.msra.mxu0 %v12090_v13  ;;  %6453 = vmatpush2.bf16.msra.mxu1 %v12091_v45  ;;  %v12101_v13 = vld [vmem:[#allocation45_spill] sm:$0xff] }
 0x6e4   :  { %6411 = vmatprep.subr.bf16.mxu0 %v12092_v32  ;;  %6454 = vmatprep.subr.bf16.mxu1 %v12093_v38 }
 0x6e7   :  { %6412 = vmatpush2.bf16.msra.mxu0 %v12094_v59  ;;  %6455 = vmatpush2.bf16.msra.mxu1 %v12095_v30  ;;  %v12102_v59 = vld [vmem:[#allocation134_spill] sm:$0xff]  ;;  %v12103_v30 = vld [vmem:[#allocation135_spill] sm:$0xff] }
 0x6e8   :  { %6413 = vmatprep.subr.bf16.mxu0 %v12096_v18  ;;  %6456 = vmatprep.subr.bf16.mxu1 %v12097_v35  ;;  %v4938_v40 = vadd.f32 %v12102_v59, %v10562_v2  ;;  %v5001_v18 = vadd.f32 %v12103_v30, %v10566_v42  ;;  %v12104_v35 = vld [vmem:[#allocation136_spill] sm:$0xff]  ;;  %v5005_v59 = vadd.f32 %v12107_v25, %v10566_v42 }
 0x6e9   :  { %v12108_v30 = vld [vmem:[#allocation140_spill] sm:$0xff] }
 0x6ea   :  { %v4944_v16 = vadd.f32 %v12108_v30, %v10570_v8 }
 0x6eb   :  { %6414 = vmatpush2.bf16.msra.mxu0 %v12098_v17  ;;  %6457 = vmatpush2.bf16.msra.mxu1 %v12099_v20  ;;  %v4940_v17 = vadd.f32 %v12104_v35, %v10570_v8  ;;  %v12105_v20 = vld [vmem:[#allocation137_spill] sm:$0xff] }
 0x6ec   :  { %6469 = vmatprep.subr.bf16.mxu0 %v12100_v60  ;;  %6512 = vmatprep.subr.bf16.mxu1 %v12101_v13  ;;  %v5003_v60 = vadd.f32 %v12105_v20, %v10574_v12 }
 0x72e   :  { %v6119_v45 = vpop.f32.mrf.mxu0  ;;  %v6162_v32 = vpop.f32.mrf.mxu1 }
 0x72f   :  { %v6257_v31 = vadd.f32 %v6119_v45, %v4938_v40  ;;  %v6259_v3 = vadd.f32 %v6162_v32, %v5001_v18  ;;  %v12109_v32 = vld [vmem:[#allocation141_spill] sm:$0xff] }
 0x730   :  { %v6121_v9 = vpop.f32.mrf.mxu0  ;;  %v6164_v38 = vpop.f32.mrf.mxu1  ;;  %v5007_v18 = vadd.f32 %v12109_v32, %v10574_v12 }
 0x731   :  { %v6258_v34 = vadd.f32 %v6121_v9, %v4940_v17  ;;  %v6260_v51 = vadd.f32 %v6164_v38, %v5003_v60  ;;  %v7669_v15 = vmul.f32 -1.442695, %v6257_v31  ;;  %v7673_v40 = vmul.f32 -1.442695, %v6259_v3 }
 0x732   :  { %v6123_v5 = vpop.f32.mrf.mxu0  ;;  %v6166_v13 = vpop.f32.mrf.mxu1 }
 0x733   :  { %v6265_v35 = vadd.f32 %v6123_v5, %v4942_v61  ;;  %v6267_v45 = vadd.f32 %v6166_v13, %v5005_v59  ;;  %v7670_v20 = vmul.f32 -1.442695, %v6258_v34  ;;  %v7674_v48 = vmul.f32 -1.442695, %v6260_v51 }
 0x734   :  { %v6125_v28 = vpop.f32.mrf.mxu0  ;;  %v6168_v62 = vpop.f32.mrf.mxu1  ;;  %8097 = vpow2.f32 %v7669_v15 }
 0x735   :  { %v6266_v50 = vadd.f32 %v6125_v28, %v4944_v16  ;;  %v7671_v9 = vmul.f32 -1.442695, %v6265_v35  ;;  %v6268_v17 = vadd.f32 %v6168_v62, %v5007_v18  ;;  %8099 = vpow2.f32 %v7673_v40  ;;  %v12110_v18 = vld [vmem:[#allocation150_spill] sm:$0xff] }
 0x736   :  { %v7675_v25 = vmul.f32 -1.442695, %v6267_v45  ;;  %8101 = vpow2.f32 %v7670_v20 }
 0x737   :  { %v7672_v38 = vmul.f32 -1.442695, %v6266_v50  ;;  %8103 = vpow2.f32 %v7674_v48  ;;  %v7676_v31 = vmul.f32 -1.442695, %v6268_v17  ;;  %v12111_v48 = vld [vmem:[#allocation151_spill] sm:$0xff] }
 0x738   :  { %8105 = vpow2.f32 %v7671_v9 }
 0x739   :  { %8107 = vpow2.f32 %v7675_v25 }
 0x73a   :  { %8109 = vpow2.f32 %v7672_v38 }
 0x73b   :  { %8111 = vpow2.f32 %v7676_v31  ;;  %v12112_v31 = vld [vmem:[#allocation152_spill] sm:$0xff] }
 0x741   :  { %v8098_v61 = vpop.eup %8097 }
 0x742   :  { %v8100_v3 = vpop.eup %8099  ;;  %v6285_v34 = vadd.f32 1.0, %v8098_v61 }
 0x743   :  { %v8102_v5 = vpop.eup %8101  ;;  %v6309_v28 = vadd.f32 1.0, %v8100_v3  ;;  %v12113_v3 = vld [vmem:[#allocation153_spill] sm:$0xff] }
 0x744   :  { %v8104_v60 = vpop.eup %8103  ;;  %v6286_v51 = vadd.f32 1.0, %v8102_v5  ;;  %8113 = vrcp.f32 %v6285_v34 }
 0x745   :  { %v8106_v16 = vpop.eup %8105  ;;  %v6310_v13 = vadd.f32 1.0, %v8104_v60  ;;  %8115 = vrcp.f32 %v6309_v28  ;;  %v12114_v28 = vld [vmem:[#allocation154_spill] sm:$0xff] }
 0x746   :  { %v8108_v15 = vpop.eup %8107  ;;  %v6287_v59 = vadd.f32 1.0, %v8106_v16  ;;  %8117 = vrcp.f32 %v6286_v51  ;;  %v12115_v51 = vld [vmem:[#allocation155_spill] sm:$0xff] }
 0x747   :  { %v8110_v62 = vpop.eup %8109  ;;  %v6311_v30 = vadd.f32 1.0, %v8108_v15  ;;  %8119 = vrcp.f32 %v6310_v13 }
 0x748   :  { %v8112_v50 = vpop.eup %8111  ;;  %v6288_v35 = vadd.f32 1.0, %v8110_v62  ;;  %8121 = vrcp.f32 %v6287_v59 }
 0x749   :  { %v6312_v40 = vadd.f32 1.0, %v8112_v50  ;;  %8123 = vrcp.f32 %v6311_v30  ;;  %v12116_v30 = vld [vmem:[#allocation156_spill] sm:$0xff] }
 0x74a   :  { %8125 = vrcp.f32 %v6288_v35 }
 0x76e   :  { %v6205_v45 = vpop.f32.mrf.mxu0  ;;  %v6248_v32 = vpop.f32.mrf.mxu1 }
 0x76f   :  { %v6261_v20 = vadd.f32 %v6205_v45, %v12110_v18  ;;  %v6263_v9 = vadd.f32 %v6248_v32, %v12111_v48  ;;  %v12117_v45 = vld [vmem:[#allocation157_spill] sm:$0xff]  ;;  %v8114_v18 = vpop.eup %8113 }
 0x770   :  { %v6207_v17 = vpop.f32.mrf.mxu0  ;;  %v6250_v25 = vpop.f32.mrf.mxu1 }
 0x771   :  { %8127 = vtanh.f32 %v6261_v20  ;;  %v7677_v38 = vmul.f32 -1.442695, %v6263_v9  ;;  %v6262_v61 = vadd.f32 %v6207_v17, %v12112_v31  ;;  %v6264_v5 = vadd.f32 %v6250_v25, %v12113_v3  ;;  %v8116_v20 = vpop.eup %8115 }
 0x772   :  { %8129 = vrcp.f32 %v6312_v40  ;;  %v6209_v60 = vpop.f32.mrf.mxu0  ;;  %v6252_v34 = vpop.f32.mrf.mxu1  ;;  %v6349_v3 = vmul.f32 %v8116_v20, %v10614_v54 }
 0x773   :  { %8131 = vpow2.f32 %v7677_v38  ;;  %v7678_v16 = vmul.f32 -1.442695, %v6264_v5  ;;  %v6269_v15 = vadd.f32 %v6209_v60, %v12114_v28  ;;  %v6271_v62 = vadd.f32 %v6252_v34, %v12115_v51  ;;  %v8118_v48 = vpop.eup %8117 }
 0x774   :  { %8133 = vtanh.f32 %v6262_v61  ;;  %v6211_v13 = vpop.f32.mrf.mxu0  ;;  %v6254_v59 = vpop.f32.mrf.mxu1 }
 0x775   :  { %8135 = vpow2.f32 %v7678_v16  ;;  %v7679_v50 = vmul.f32 -1.442695, %v6271_v62  ;;  %v6270_v35 = vadd.f32 %v6211_v13, %v12116_v30  ;;  %v6272_v32 = vadd.f32 %v6254_v59, %v12117_v45  ;;  %v8120_v9 = vpop.eup %8119 }
 0x776   :  { %8137 = vtanh.f32 %v6269_v15  ;;  %v8122_v17 = vpop.eup %8121  ;;  %v6350_v51 = vmul.f32 %v8120_v9, %v10623_v33 }
 0x777   :  { %8139 = vpow2.f32 %v7679_v50  ;;  %v7680_v40 = vmul.f32 -1.442695, %v6272_v32  ;;  %v8124_v25 = vpop.eup %8123 }
 0x778   :  { %8141 = vtanh.f32 %v6270_v35  ;;  %v8126_v38 = vpop.eup %8125  ;;  %v6351_v54 = vmul.f32 %v8124_v25, %v10626_v37 }
 0x779   :  { %8143 = vpow2.f32 %v7680_v40 }
 0x77e   :  { %v8128_v31 = vpop.eup %8127 }
 0x77f   :  { %v8130_v61 = vpop.eup %8129  ;;  %v6353_v5 = vmul.f32 %v8128_v31, %v8114_v18 }
 0x780   :  { %v8132_v60 = vpop.eup %8131  ;;  %v6352_v33 = vmul.f32 %v8130_v61, %v10629_v39 }
 0x781   :  { %v8134_v34 = vpop.eup %8133  ;;  %v10797_v16 = vadd.f32 %v6353_v5, %v6349_v3  ;;  %v6337_v28 = vadd.f32 1.0, %v8132_v60 }
 0x782   :  { %v8136_v15 = vpop.eup %8135  ;;  %v6354_v62 = vmul.f32 %v8134_v34, %v8118_v48 }
 0x783   :  { %v8138_v13 = vpop.eup %8137  ;;  %8145 = vtanh.f32 %v10797_v16  ;;  %v6338_v59 = vadd.f32 1.0, %v8136_v15 }
 0x784   :  { %v8140_v50 = vpop.eup %8139  ;;  %8147 = vrcp.f32 %v6337_v28  ;;  %v10801_v30 = vadd.f32 %v6354_v62, %v6350_v51  ;;  %v6355_v35 = vmul.f32 %v8138_v13, %v8122_v17  ;;  %v7825_v62 = vld [vmem:[%s11020_s9 + $0x78] sm:$0xff]   ;;  %v12148_v13 = vld [vmem:[#allocation132_spill] sm:$0xff] }
 0x785   :  { %v8142_v45 = vpop.eup %8141  ;;  %8149 = vrcp.f32 %v6338_v59  ;;  %v6339_v32 = vadd.f32 1.0, %v8140_v50  ;;  %v12149_v59 = vld [vmem:[#allocation133_spill] sm:$0xff]  ;;  %v7826_v50 = vld [vmem:[%s11020_s9 + $0x38] sm:$0xff]  }
 0x786   :  { %v8144_v18 = vpop.eup %8143  ;;  %8151 = vtanh.f32 %v10801_v30  ;;  %v10805_v40 = vadd.f32 %v6355_v35, %v6351_v54  ;;  %v6356_v20 = vmul.f32 %v8142_v45, %v8126_v38  ;;  %v7827_v54 = vld [vmem:[%s11020_s9 + $0x70] sm:$0xff]  }
 0x787   :  { %8153 = vrcp.f32 %v6339_v32  ;;  %v6340_v48 = vadd.f32 1.0, %v8144_v18  ;;  %v7828_v35 = vld [vmem:[%s11020_s9 + $0x30] sm:$0xff]   ;;  %v7829_v32 = vld [vmem:[%s11020_s9 + $0x68] sm:$0xff]  }
 0x788   :  { %8155 = vtanh.f32 %v10805_v40  ;;  %v10809_v9 = vadd.f32 %v6356_v20, %v6352_v33  ;;  %v12150_v45 = vld [vmem:[#allocation121_spill] sm:$0xff]  ;;  %v7830_v18 = vld [vmem:[%s11020_s9 + $0x28] sm:$0xff]   ;;  %v7831_v33 = vld [vmem:[%s11020_s9 + $0x60] sm:$0xff]  }
 0x789   :  { %8157 = vrcp.f32 %v6340_v48  ;;  %v7832_v20 = vld [vmem:[%s11020_s9 + $0x20] sm:$0xff]   ;;  %v7833_v48 = vld [vmem:[%s11020_s9 + $0x58] sm:$0xff]  }
 0x78a   :  { %8159 = vtanh.f32 %v10809_v9 }
 0x790   :  { %v8146_v37 = vpop.eup %8145 }
 0x791   :  { %v8148_v17 = vpop.eup %8147 }
 0x792   :  { %v8150_v25 = vpop.eup %8149  ;;  %v6365_v34 = vmul.f32 %v8148_v17, %v8146_v37  ;;  %v7834_v37 = vld [vmem:[%s11020_s9 + $0x18] sm:$0xff]   ;;  %v7835_v17 = vld [vmem:[%s11020_s9 + $0x50] sm:$0xff]  }
 0x793   :  { %v8152_v31 = vpop.eup %8151 }
 0x794   :  { %v8154_v3 = vpop.eup %8153  ;;  %v6366_v38 = vmul.f32 %v8152_v31, %v8150_v25  ;;  %v7836_v25 = vld [vmem:[%s11020_s9 + $0x10] sm:$0xff]   ;;  %v7837_v31 = vld [vmem:[%s11020_s9 + $0x48] sm:$0xff]  }
 0x795   :  { %v8156_v5 = vpop.eup %8155 }
 0x796   :  { %v8158_v60 = vpop.eup %8157  ;;  %v6367_v28 = vmul.f32 %v8156_v5, %v8154_v3  ;;  %v7838_v3 = vld [vmem:[%s11020_s9 + $0x8] sm:$0xff]   ;;  %v7839_v5 = vld [vmem:[%s11020_s9 + $0x40] sm:$0xff]  }
 0x797   :  { %v8160_v39 = vpop.eup %8159 }
 0x798   :  { %v6368_v61 = vmul.f32 %v8160_v39, %v8158_v60  ;;  %v10812_v15 = vpack.c.bf16 %v6367_v28, %v6365_v34  ;;  %v7840_v60 = vld [vmem:[%s11020_s9] sm:$0xff]   ;;  %v12151_v34 = vld [vmem:[#allocation93_spill] sm:$0xff] }
 0x79a   :  { %v10814_v51 = vpack.c.bf16 %v6368_v61, %v6366_v38 }
 0x79c   :  { %6415 = vmatprep.mubr.bf16.mxu0 %v10814_v51  ;;  %6458 = vmatprep.mubr.bf16.mxu1 %v10814_v51 }
 0x79d   :  { %6416 = vmatmul.mubr.bf16.vlgmr.msra.gmra.mxu0 %v10812_v15  ;;  %6459 = vmatmul.mubr.bf16.vlgmr.msra.gmra.mxu1 %v10812_v15 }
 0x79e   :  { %6470 = vmatpush1.bf16.msra.mxu0 %v10169_v22  ;;  %6513 = vmatpush1.bf16.msra.mxu1 %v11996_v0  ;;  %v12118_v22 = vld [vmem:[#allocation71_spill] sm:$0xff]  ;;  %v12119_v0 = vld [vmem:[#allocation72_spill] sm:$0xff] }
 0x79f   :  { %6501 = vmatprep.mubr.bf16.mxu0 %v10814_v51  ;;  %6544 = vmatprep.mubr.bf16.mxu1 %v10814_v51 }
 0x7a0   :  { %6471 = vmatprep.subr.bf16.mxu0 %v11997_v43  ;;  %6514 = vmatprep.subr.bf16.mxu1 %v11998_v11  ;;  %v12120_v43 = vld [vmem:[#allocation73_spill] sm:$0xff]  ;;  %v12121_v11 = vld [vmem:[#allocation74_spill] sm:$0xff] }
 0x7a2   :  { %6472 = vmatpush1.bf16.msra.mxu0 %v11999_v53  ;;  %6515 = vmatpush1.bf16.msra.mxu1 %v12000_v52  ;;  %v12122_v53 = vld [vmem:[#allocation75_spill] sm:$0xff]  ;;  %v12123_v52 = vld [vmem:[#allocation76_spill] sm:$0xff] }
 0x7a3   :  { %6473 = vmatprep.subr.bf16.mxu0 %v12001_v4  ;;  %6516 = vmatprep.subr.bf16.mxu1 %v12002_v41  ;;  %v12124_v4 = vld [vmem:[#allocation77_spill] sm:$0xff]  ;;  %v12125_v41 = vld [vmem:[#allocation78_spill] sm:$0xff] }
 0x7a6   :  { %6474 = vmatpush1.bf16.msra.mxu0 %v12003_v1  ;;  %6517 = vmatpush1.bf16.msra.mxu1 %v12004_v7  ;;  %v12126_v1 = vld [vmem:[#allocation79_spill] sm:$0xff]  ;;  %v12127_v7 = vld [vmem:[#allocation80_spill] sm:$0xff] }
 0x7a7   :  { %6475 = vmatprep.subr.bf16.mxu0 %v12005_v46  ;;  %6518 = vmatprep.subr.bf16.mxu1 %v12006_v23  ;;  %v12128_v46 = vld [vmem:[#allocation81_spill] sm:$0xff]  ;;  %v12129_v23 = vld [vmem:[#allocation82_spill] sm:$0xff] }
 0x7aa   :  { %6476 = vmatpush1.bf16.msra.mxu0 %v12007_v58  ;;  %6519 = vmatpush1.bf16.msra.mxu1 %v12008_v36  ;;  %v12130_v58 = vld [vmem:[#allocation83_spill] sm:$0xff]  ;;  %v12131_v36 = vld [vmem:[#allocation84_spill] sm:$0xff] }
 0x7ab   :  { %6477 = vmatprep.subr.bf16.mxu0 %v12009_v49  ;;  %6520 = vmatprep.subr.bf16.mxu1 %v12010_v44  ;;  %v12132_v49 = vld [vmem:[#allocation88_spill] sm:$0xff]  ;;  %v12133_v44 = vld [vmem:[#allocation38_spill] sm:$0xff] }
 0x7ae   :  { %6478 = vmatpush1.bf16.msra.mxu0 %v12011_v63  ;;  %6521 = vmatpush1.bf16.msra.mxu1 %v12012_v26  ;;  %v12134_v63 = vld [vmem:[#allocation41_spill] sm:$0xff]  ;;  %v12135_v26 = vld [vmem:[#allocation40_spill] sm:$0xff] }
 0x7af   :  { %6479 = vmatprep.subr.bf16.mxu0 %v12013_v10  ;;  %6522 = vmatprep.subr.bf16.mxu1 %v12014_v24  ;;  %v12136_v10 = vld [vmem:[#allocation118_spill] sm:$0xff]  ;;  %v12137_v24 = vld [vmem:[#allocation119_spill] sm:$0xff] }
 0x7b2   :  { %6480 = vmatpush1.bf16.msra.mxu0 %v12015_v14  ;;  %6523 = vmatpush1.bf16.msra.mxu1 %v12016_v29  ;;  %v12138_v14 = vld [vmem:[#allocation159_spill] sm:$0xff] }
 0x7b3   :  { %6481 = vmatprep.subr.bf16.mxu0 %v12017_v19  ;;  %6524 = vmatprep.subr.bf16.mxu1 %v12118_v22  ;;  %v12139_v29 = vld [vmem:[#allocation167_spill] sm:$0xff]  ;;  %v12140_v19 = vld [vmem:[#allocation160_spill] sm:$0xff] }
 0x7b6   :  { %6482 = vmatpush1.bf16.msra.mxu0 %v12119_v0  ;;  %6525 = vmatpush1.bf16.msra.mxu1 %v12120_v43  ;;  %v12153_v0 = vld [vmem:[#allocation143_spill] sm:$0xff] }
 0x7b7   :  { %6483 = vmatprep.subr.bf16.mxu0 %v12121_v11  ;;  %6526 = vmatprep.subr.bf16.mxu1 %v12122_v53  ;;  %v5011_v43 = vadd.f32 %v12153_v0, %v10566_v42  ;;  %v12154_v53 = vld [vmem:[#allocation144_spill] sm:$0xff] }
 0x7ba   :  { %6484 = vmatpush1.bf16.msra.mxu0 %v12123_v52  ;;  %6527 = vmatpush1.bf16.msra.mxu1 %v12124_v4  ;;  %v4950_v52 = vadd.f32 %v12154_v53, %v10570_v8 }
 0x7bb   :  { %6485 = vmatprep.subr.bf16.mxu0 %v12125_v41  ;;  %6528 = vmatprep.subr.bf16.mxu1 %v12126_v1  ;;  %v12155_v41 = vld [vmem:[#allocation145_spill] sm:$0xff] }
 0x7bc   :  { %v5013_v1 = vadd.f32 %v12155_v41, %v10574_v12  ;;  %v12164_v41 = vld [vmem:[#allocation90_spill] sm:$0xff] }
 0x7be   :  { %6486 = vmatpush2.bf16.msra.mxu0 %v12127_v7  ;;  %6529 = vmatpush2.bf16.msra.mxu1 %v12128_v46  ;;  %v12156_v46 = vld [vmem:[#allocation146_spill] sm:$0xff] }
 0x7bf   :  { %6487 = vmatprep.subr.bf16.mxu0 %v12129_v23  ;;  %6530 = vmatprep.subr.bf16.mxu1 %v12130_v58  ;;  %v4952_v23 = vadd.f32 %v12156_v46, %v10562_v2 }
 0x7c2   :  { %6488 = vmatpush2.bf16.msra.mxu0 %v12131_v36  ;;  %6531 = vmatpush2.bf16.msra.mxu1 %v12032_v27  ;;  %v12141_v27 = vld [vmem:[#allocation168_spill] sm:$0xff]  ;;  %v12157_v36 = vld [vmem:[#allocation147_spill] sm:$0xff] }
 0x7c3   :  { %6489 = vmatprep.subr.bf16.mxu0 %v12033_v47  ;;  %6532 = vmatprep.subr.bf16.mxu1 %v12034_v21  ;;  %v12142_v47 = vld [vmem:[#allocation161_spill] sm:$0xff]  ;;  %v12145_v21 = vld [vmem:[#allocation170_spill] sm:$0xff] }
 0x7c6   :  { %6490 = vmatpush2.bf16.msra.mxu0 %v12132_v49  ;;  %6533 = vmatpush2.bf16.msra.mxu1 %v12133_v44  ;;  %v5015_v49 = vadd.f32 %v12157_v36, %v10566_v42  ;;  %v12166_v36 = vld [vmem:[#allocation120_spill] sm:$0xff] }
 0x7c7   :  { %6491 = vmatprep.subr.bf16.mxu0 %v12037_v6  ;;  %6534 = vmatprep.subr.bf16.mxu1 %v12038_v56  ;;  %v12146_v6 = vld [vmem:[#allocation130_spill] sm:$0xff]  ;;  %v12147_v56 = vld [vmem:[#allocation131_spill] sm:$0xff] }
 0x7ca   :  { %6492 = vmatpush2.bf16.msra.mxu0 %v12039_v55  ;;  %6535 = vmatpush2.bf16.msra.mxu1 %v12040_v57  ;;  %v12143_v55 = vld [vmem:[#allocation169_spill] sm:$0xff]  ;;  %v12144_v57 = vld [vmem:[#allocation162_spill] sm:$0xff] }
 0x7cb   :  { %6493 = vmatprep.subr.bf16.mxu0 %v12134_v63  ;;  %6536 = vmatprep.subr.bf16.mxu1 %v12135_v26  ;;  %v12158_v26 = vld [vmem:[#allocation148_spill] sm:$0xff] }
 0x7ce   :  { %6494 = vmatpush2.bf16.msra.mxu0 %v12136_v10  ;;  %6537 = vmatpush2.bf16.msra.mxu1 %v12137_v24  ;;  %v4954_v10 = vadd.f32 %v12158_v26, %v10570_v8 }
 0x7cf   :  { %6495 = vmatprep.subr.bf16.mxu0 %v12138_v14  ;;  %6538 = vmatprep.subr.bf16.mxu1 %v12139_v29 }
 0x7d2   :  { %6496 = vmatpush2.bf16.msra.mxu0 %v12140_v19  ;;  %6539 = vmatpush2.bf16.msra.mxu1 %v12141_v27 }
 0x7d3   :  { %6497 = vmatprep.subr.bf16.mxu0 %v12142_v47  ;;  %6540 = vmatprep.subr.bf16.mxu1 %v12143_v55  ;;  %v12159_v47 = vld [vmem:[#allocation149_spill] sm:$0xff] }
 0x7d4   :  { %v5017_v55 = vadd.f32 %v12159_v47, %v10574_v12 }
 0x7d6   :  { %6498 = vmatpush2.bf16.msra.mxu0 %v12144_v57  ;;  %6541 = vmatpush2.bf16.msra.mxu1 %v12145_v21 }
 0x7d7   :  { %6499 = vmatprep.subr.bf16.mxu0 %v12146_v6  ;;  %6542 = vmatprep.subr.bf16.mxu1 %v12147_v56 }
 0x7da   :  { %6500 = vmatpush2.bf16.msra.mxu0 %v12148_v13  ;;  %6543 = vmatpush2.bf16.msra.mxu1 %v12149_v59 }
 0x7db   :  { %7752 = vmatprep.subr.bf16.mxu0 %v7825_v62  ;;  %7786 = vmatprep.subr.bf16.mxu1 %v7825_v62 }
 0x7dd   :  { %6502 = vmatmul.mubr.bf16.vlgmr.msra.gmra.mxu0 %v10812_v15  ;;  %6545 = vmatmul.mubr.bf16.vlgmr.msra.gmra.mxu1 %v10812_v15 }
 0x7de   :  { %7753 = vmatpush3.bf16.msra.mxu0 %v7826_v50  ;;  %7794 = vmatpush3.bf16.msra.mxu1 %v7826_v50 }
 0x7df   :  { %6902 = vmatprep.mubr.bf16.mxu0 %v12150_v45  ;;  %6910 = vmatprep.mubr.bf16.mxu1 %v10814_v51  ;;  %v12152_v51 = vld [vmem:[#allocation142_spill] sm:$0xff] }
 0x7e0   :  { %7754 = vmatprep.subr.bf16.mxu0 %v7827_v54  ;;  %7787 = vmatprep.subr.bf16.mxu1 %v7827_v54  ;;  %v4948_v22 = vadd.f32 %v12152_v51, %v10562_v2 }
 0x7e2   :  { %7755 = vmatpush3.bf16.msra.mxu0 %v7828_v35  ;;  %7795 = vmatpush3.bf16.msra.mxu1 %v7828_v35 }
 0x7e3   :  { %7756 = vmatprep.subr.bf16.mxu0 %v7829_v32  ;;  %7788 = vmatprep.subr.bf16.mxu1 %v7829_v32 }
 0x7e6   :  { %7757 = vmatpush3.bf16.msra.mxu0 %v7830_v18  ;;  %7796 = vmatpush3.bf16.msra.mxu1 %v7830_v18 }
 0x7e7   :  { %7758 = vmatprep.subr.bf16.mxu0 %v7831_v33  ;;  %7789 = vmatprep.subr.bf16.mxu1 %v7831_v33 }
 0x7ea   :  { %7759 = vmatpush3.bf16.msra.mxu0 %v7832_v20  ;;  %7797 = vmatpush3.bf16.msra.mxu1 %v7832_v20 }
 0x7eb   :  { %7760 = vmatprep.subr.bf16.mxu0 %v7833_v48  ;;  %7790 = vmatprep.subr.bf16.mxu1 %v7833_v48 }
 0x7ee   :  { %7761 = vmatpush3.bf16.msra.mxu0 %v7834_v37  ;;  %7798 = vmatpush3.bf16.msra.mxu1 %v7834_v37 }
 0x7ef   :  { %7762 = vmatprep.subr.bf16.mxu0 %v7835_v17  ;;  %7791 = vmatprep.subr.bf16.mxu1 %v7835_v17 }
 0x7f2   :  { %7763 = vmatpush3.bf16.msra.mxu0 %v7836_v25  ;;  %7799 = vmatpush3.bf16.msra.mxu1 %v7836_v25 }
 0x7f3   :  { %7764 = vmatprep.subr.bf16.mxu0 %v7837_v31  ;;  %7792 = vmatprep.subr.bf16.mxu1 %v7837_v31 }
 0x7f6   :  { %7765 = vmatpush3.bf16.msra.mxu0 %v7838_v3  ;;  %7800 = vmatpush3.bf16.msra.mxu1 %v7838_v3 }
 0x7f7   :  { %7766 = vmatprep.subr.bf16.mxu0 %v7839_v5  ;;  %7793 = vmatprep.subr.bf16.mxu1 %v7839_v5 }
 0x7fa   :  { %7767 = vmatpush3.bf16.msra.mxu0 %v7840_v60  ;;  %7801 = vmatpush3.bf16.msra.mxu1 %v7840_v60  ;;  %v12160_v60 = vld [vmem:[#allocation158_spill] sm:$0xff] }
 0x7fd   :  { %6903 = vmatmul.mubr.bf16.vlgmr.msra.gmra.mxu0 %v12151_v34  ;;  %6911 = vmatmul.mubr.bf16.vlgmr.msra.gmra.mxu1 %v10812_v15 }
 0x85d   :  { %v6417_v28 = vpop.f32.mrf.mxu0  ;;  %v6460_v39 = vpop.f32.mrf.mxu1 }
 0x85e   :  { %v6555_v4 = vadd.f32 %v6417_v28, %v4948_v22  ;;  %v6557_v7 = vadd.f32 %v6460_v39, %v5011_v43  ;;  %v12161_v28 = vld [vmem:[#allocation23_spill] sm:$0xff] }
 0x85f   :  { %v6419_v38 = vpop.f32.mrf.mxu0  ;;  %v6462_v61 = vpop.f32.mrf.mxu1  ;;  %v12162_v22 = vld [vmem:[#allocation19_spill] sm:$0xff] }
 0x860   :  { %v6556_v58 = vadd.f32 %v6419_v38, %v4950_v52  ;;  %v6558_v44 = vadd.f32 %v6462_v61, %v5013_v1  ;;  %v7683_v24 = vmul.f32 -1.442695, %v6555_v4  ;;  %v7687_v29 = vmul.f32 -1.442695, %v6557_v7  ;;  %v12163_v43 = vld [vmem:[#allocation15_spill] sm:$0xff]  ;;  %v12165_v7 = vld [vmem:[#allocation46_spill] sm:$0xff] }
 0x861   :  { %v6421_v11 = vpop.f32.mrf.mxu0  ;;  %v6464_v15 = vpop.f32.mrf.mxu1 }
 0x862   :  { %v6563_v14 = vadd.f32 %v6421_v11, %v4952_v23  ;;  %v6565_v19 = vadd.f32 %v6464_v15, %v5015_v49  ;;  %v7684_v57 = vmul.f32 -1.442695, %v6556_v58  ;;  %v7688_v2 = vmul.f32 -1.442695, %v6558_v44  ;;  %v12167_v44 = vld [vmem:[#allocation48_spill] sm:$0xff] }
 0x863   :  { %v6423_v63 = vpop.f32.mrf.mxu0  ;;  %v6466_v27 = vpop.f32.mrf.mxu1  ;;  %8161 = vpow2.f32 %v7683_v24 }
 0x864   :  { %v6564_v21 = vadd.f32 %v6423_v63, %v4954_v10  ;;  %v7685_v6 = vmul.f32 -1.442695, %v6563_v14  ;;  %v6566_v56 = vadd.f32 %v6466_v27, %v5017_v55  ;;  %8163 = vpow2.f32 %v7687_v29 }
 0x865   :  { %v7689_v42 = vmul.f32 -1.442695, %v6565_v19  ;;  %8165 = vpow2.f32 %v7684_v57 }
 0x866   :  { %v7686_v62 = vmul.f32 -1.442695, %v6564_v21  ;;  %8167 = vpow2.f32 %v7688_v2  ;;  %v7690_v8 = vmul.f32 -1.442695, %v6566_v56 }
 0x867   :  { %8169 = vpow2.f32 %v7685_v6 }
 0x868   :  { %8171 = vpow2.f32 %v7689_v42 }
 0x869   :  { %8173 = vpow2.f32 %v7686_v62 }
 0x86a   :  { %8175 = vpow2.f32 %v7690_v8 }
 0x870   :  { %v8162_v13 = vpop.eup %8161 }
 0x871   :  { %v8164_v59 = vpop.eup %8163  ;;  %v6583_v54 = vadd.f32 1.0, %v8162_v13 }
 0x872   :  { %v8166_v50 = vpop.eup %8165  ;;  %v6607_v45 = vadd.f32 1.0, %v8164_v59 }
 0x873   :  { %v8168_v12 = vpop.eup %8167  ;;  %v6584_v18 = vadd.f32 1.0, %v8166_v50  ;;  %8177 = vrcp.f32 %v6583_v54 }
 0x874   :  { %v8170_v35 = vpop.eup %8169  ;;  %v6608_v20 = vadd.f32 1.0, %v8168_v12  ;;  %8179 = vrcp.f32 %v6607_v45 }
 0x875   :  { %v8172_v32 = vpop.eup %8171  ;;  %v6585_v48 = vadd.f32 1.0, %v8170_v35  ;;  %8181 = vrcp.f32 %v6584_v18 }
 0x876   :  { %v8174_v33 = vpop.eup %8173  ;;  %v6609_v17 = vadd.f32 1.0, %v8172_v32  ;;  %8183 = vrcp.f32 %v6608_v20 }
 0x877   :  { %v8176_v37 = vpop.eup %8175  ;;  %v6586_v25 = vadd.f32 1.0, %v8174_v33  ;;  %8185 = vrcp.f32 %v6585_v48 }
 0x878   :  { %v6610_v31 = vadd.f32 1.0, %v8176_v37  ;;  %8187 = vrcp.f32 %v6609_v17 }
 0x879   :  { %8189 = vrcp.f32 %v6586_v25 }
 0x880   :  { %v8178_v26 = vpop.eup %8177 }
 0x881   :  { %v8180_v24 = vpop.eup %8179 }
 0x882   :  { %v8182_v14 = vpop.eup %8181  ;;  %v6647_v21 = vmul.f32 %v8180_v24, %v10797_v16 }
 0x883   :  { %v8184_v29 = vpop.eup %8183 }
 0x884   :  { %v8186_v19 = vpop.eup %8185  ;;  %v6648_v13 = vmul.f32 %v8184_v29, %v10801_v30 }
 0x885   :  { %v8188_v27 = vpop.eup %8187 }
 0x886   :  { %v8190_v47 = vpop.eup %8189  ;;  %v6649_v16 = vmul.f32 %v8188_v27, %v10805_v40 }
 0x89d   :  { %v6503_v3 = vpop.f32.mrf.mxu0  ;;  %v6546_v5 = vpop.f32.mrf.mxu1 }
 0x89e   :  { %v6559_v34 = vadd.f32 %v6503_v3, %v12160_v60  ;;  %v6561_v39 = vadd.f32 %v6546_v5, %v12161_v28 }
 0x89f   :  { %v6505_v38 = vpop.f32.mrf.mxu0  ;;  %v6548_v61 = vpop.f32.mrf.mxu1 }
 0x8a0   :  { %8191 = vtanh.f32 %v6559_v34  ;;  %v7691_v51 = vmul.f32 -1.442695, %v6561_v39  ;;  %v6560_v0 = vadd.f32 %v6505_v38, %v12162_v22  ;;  %v6562_v11 = vadd.f32 %v6548_v61, %v12163_v43 }
 0x8a1   :  { %8193 = vrcp.f32 %v6610_v31  ;;  %v6507_v53 = vpop.f32.mrf.mxu0  ;;  %v6550_v52 = vpop.f32.mrf.mxu1 }
 0x8a2   :  { %8195 = vpow2.f32 %v7691_v51  ;;  %v7692_v4 = vmul.f32 -1.442695, %v6562_v11  ;;  %v6567_v1 = vadd.f32 %v6507_v53, %v12164_v41  ;;  %v6569_v15 = vadd.f32 %v6550_v52, %v12165_v7 }
 0x8a3   :  { %8197 = vtanh.f32 %v6560_v0  ;;  %v6509_v46 = vpop.f32.mrf.mxu0  ;;  %v6552_v23 = vpop.f32.mrf.mxu1 }
 0x8a4   :  { %8199 = vpow2.f32 %v7692_v4  ;;  %v7693_v58 = vmul.f32 -1.442695, %v6569_v15  ;;  %v6568_v49 = vadd.f32 %v6509_v46, %v12166_v36  ;;  %v6570_v63 = vadd.f32 %v6552_v23, %v12167_v44 }
 0x8a5   :  { %8201 = vtanh.f32 %v6567_v1 }
 0x8a6   :  { %8203 = vpow2.f32 %v7693_v58  ;;  %v7694_v10 = vmul.f32 -1.442695, %v6570_v63 }
 0x8a7   :  { %8205 = vtanh.f32 %v6568_v49 }
 0x8a8   :  { %8207 = vpow2.f32 %v7694_v10 }
 0x8ad   :  { %v8192_v55 = vpop.eup %8191 }
 0x8ae   :  { %v8194_v57 = vpop.eup %8193  ;;  %v6651_v2 = vmul.f32 %v8192_v55, %v8178_v26 }
 0x8af   :  { %v8196_v6 = vpop.eup %8195  ;;  %v6650_v20 = vmul.f32 %v8194_v57, %v10809_v9  ;;  %v7705_v9 = vld [vmem:[%s11021_s10] ss:$0 sm:$0xff] }
 0x8b0   :  { %v8198_v56 = vpop.eup %8197  ;;  %v6655_v42 = vadd.f32 %v6651_v2, %v6647_v21  ;;  %v6635_v62 = vadd.f32 1.0, %v8196_v6 }
 0x8b1   :  { %v8200_v8 = vpop.eup %8199  ;;  %v6652_v59 = vmul.f32 %v8198_v56, %v8182_v14 }
 0x8b2   :  { %v8202_v50 = vpop.eup %8201  ;;  %8209 = vtanh.f32 %v6655_v42  ;;  %7701 = vst [vmem:[%s11024_s13 + $0x20] sm:$0xff] %v6655_v42  ;;  %v6636_v12 = vadd.f32 1.0, %v8200_v8 }
 0x8b3   :  { %v8204_v54 = vpop.eup %8203  ;;  %8211 = vrcp.f32 %v6635_v62  ;;  %v6656_v35 = vadd.f32 %v6652_v59, %v6648_v13  ;;  %v6653_v45 = vmul.f32 %v8202_v50, %v8186_v19 }
 0x8b4   :  { %v8206_v32 = vpop.eup %8205  ;;  %8213 = vrcp.f32 %v6636_v12  ;;  %v6637_v18 = vadd.f32 1.0, %v8204_v54 }
 0x8b5   :  { %v8208_v33 = vpop.eup %8207  ;;  %8215 = vtanh.f32 %v6656_v35  ;;  %7702 = vst [vmem:[%s11024_s13 + $0x28] sm:$0xff] %v6656_v35  ;;  %v6657_v30 = vadd.f32 %v6653_v45, %v6649_v16  ;;  %v6654_v48 = vmul.f32 %v8206_v32, %v8190_v47 }
 0x8b6   :  { %8217 = vrcp.f32 %v6637_v18  ;;  %v6638_v37 = vadd.f32 1.0, %v8208_v33 }
 0x8b7   :  { %8219 = vtanh.f32 %v6657_v30  ;;  %7703 = vst [vmem:[%s11024_s13 + $0x30] sm:$0xff] %v6657_v30  ;;  %v6658_v40 = vadd.f32 %v6654_v48, %v6650_v20 }
 0x8b8   :  { %8221 = vrcp.f32 %v6638_v37 }
 0x8b9   :  { %8223 = vtanh.f32 %v6658_v40  ;;  %7704 = vst [vmem:[%s11024_s13 + $0x38] sm:$0xff] %v6658_v40 }
 0x8bd   :  { %v7768_v17 = vpop.f32.mrf.mxu0  ;;  %v7774_v25 = vpop.f32.mrf.mxu1 }
 0x8bf   :  { %v8210_v31 = vpop.eup %8209  ;;  %v7769_v3 = vpop.f32.mrf.mxu0 }
 0x8c0   :  { %v7775_v5 = vpop.f32.mrf.mxu1  ;;  %v8212_v60 = vpop.eup %8211  ;;  %v7770_v34 = vadd.f32 %v7769_v3, %v7768_v17 }
 0x8c1   :  { %v7776_v28 = vadd.f32 %v7775_v5, %v7774_v25  ;;  %v8214_v39 = vpop.eup %8213  ;;  %v7771_v38 = vpop.f32.mrf.mxu0  ;;  %v6663_v51 = vmul.f32 %v8212_v60, %v8210_v31 }
 0x8c2   :  { %v7777_v61 = vpop.f32.mrf.mxu1  ;;  %v8216_v22 = vpop.eup %8215  ;;  %v6905_v0 = vadd.f32 %v7770_v34, %v7705_v9 }
 0x8c3   :  { %v6913_v43 = vadd.f32 %v7776_v28, %v7705_v9  ;;  %v8218_v11 = vpop.eup %8217  ;;  %v7772_v53 = vpop.f32.mrf.mxu0  ;;  %v6664_v4 = vmul.f32 %v8216_v22, %v8214_v39  ;;  %7697 = vst [vmem:[%s11023_s12 + $0x20] sm:$0xff] %v6663_v51 }
 0x8c4   :  { %v7778_v52 = vpop.f32.mrf.mxu1  ;;  %v8220_v41 = vpop.eup %8219  ;;  %6927 = vst [vmem:[%s11022_s11] sm:$0xff] %v6905_v0  ;;  %v7773_v1 = vadd.f32 %v7772_v53, %v7771_v38 }
 0x8c5   :  { %6929 = vst [vmem:[%s11022_s11 + $0x10] sm:$0xff] %v6913_v43  ;;  %v7779_v7 = vadd.f32 %v7778_v52, %v7777_v61  ;;  %v8222_v15 = vpop.eup %8221  ;;  %7698 = vst [vmem:[%s11023_s12 + $0x28] sm:$0xff] %v6664_v4  ;;  %v6665_v46 = vmul.f32 %v8220_v41, %v8218_v11 }
 0x8c6   :  { %v8224_v23 = vpop.eup %8223  ;;  %v6908_v58 = vadd.f32 %v7773_v1, %v7705_v9 }
 0x8c7   :  { %v6916_v36 = vadd.f32 %v7779_v7, %v7705_v9  ;;  %v6666_v49 = vmul.f32 %v8224_v23, %v8222_v15  ;;  %7699 = vst [vmem:[%s11023_s12 + $0x30] sm:$0xff] %v6665_v46  ;;  %v7750_v44 = vpack.c.bf16 %v6665_v46, %v6663_v51 }
 0x8c8   :  { %6928 = vst [vmem:[%s11022_s11 + $0x8] sm:$0xff] %v6908_v58 }
 0x8c9   :  { %6930 = vst [vmem:[%s11022_s11 + $0x18] sm:$0xff] %v6916_v36  ;;  %7700 = vst [vmem:[%s11023_s12 + $0x38] sm:$0xff] %v6666_v49  ;;  %v7751_v63 = vpack.c.bf16 %v6666_v49, %v6664_v4 }
 0x8cb   :  { %6918 = vmatprep.mubr.bf16.mxu1 %v7751_v63 }
 0x8cc   :  { %6919 = vmatmul.mubr.bf16.gmra.mxu1 %v7750_v44 }
 0x98c   :  { %v7780_v26 = vpop.f32.mrf.mxu1 }
 0x98e   :  { %v7781_v10 = vpop.f32.mrf.mxu1 }
 0x98f   :  { %v7782_v24 = vadd.f32 %v7781_v10, %v7780_v26 }
 0x990   :  { %v7783_v14 = vpop.f32.mrf.mxu1 }
 0x991   :  { %v6921_v29 = vadd.f32 %v7782_v24, %v7705_v9 }
 0x992   :  { %v7784_v19 = vpop.f32.mrf.mxu1 }
 0x993   :  { %6931 = vst [vmem:[%s11022_s11 + $0x20] sm:$0xff] %v6921_v29  ;;  %v7785_v27 = vadd.f32 %v7784_v19, %v7783_v14 }
 0x995   :  { %v6924_v47 = vadd.f32 %v7785_v27, %v7705_v9 }
 0x997   :  { %6932 = vst [vmem:[%s11022_s11 + $0x28] sm:$0xff] %v6924_v47 }
 0x998   :  { %6945 = vsyncpa [#allocation5], 1 }
 0x999   :  { %6946 = vsyncpa [#allocation7], 1 }

</bundles_post_ra>
